<compile_context>
chip_gen: v5e
topology: v5e:2x2
jax: 0.10.0
libtpu: 0.0.40
codegen_flags: <defaults>
</compile_context>

<pallas_src>
import math
import functools

import jax
import jax.numpy as jnp
from jax import lax
from jax.experimental import pallas as pl
from jax.experimental.pallas import tpu as pltpu


def _pow2_divisor(n: int) -> int:
    """Largest power of two dividing n (n > 0, static Python int)."""
    return n & (-n)


def _attention_block_kernel(x_ref, gmap_ref, gmapt_ref, gamma_ref, beta_ref,
                            w_qkv_ref, b_qkv_ref, w_proj_ref, b_proj_ref,
                            o_ref, xn_scr, a_scr,
                            *, num_heads, head_ch, channels, q_tile, eps,
                            unroll_heads):
    C = channels
    ch3 = 3 * head_ch
    x = x_ref[0]                                   # [C, T] f32 (used for GroupNorm only)
    T = x.shape[1]

    # ---------------- GroupNorm(32, C), two-pass, stats via lane reductions ----------
    gmap = gmap_ref[...]                           # [G, C] one-hot group membership
    gmap_t = gmapt_ref[...]                        # [C, G]
    G = gmap.shape[0]
    denom = jnp.float32((C // G) * T)

    sx = jnp.sum(x, axis=1, keepdims=True)                                     # [C, 1]
    mean_g = jnp.dot(gmap, sx, preferred_element_type=jnp.float32) / denom     # [G, 1]
    mean_c = jnp.dot(gmap_t, mean_g, preferred_element_type=jnp.float32)       # [C, 1]
    xc = x - mean_c
    sxx = jnp.sum(xc * xc, axis=1, keepdims=True)                              # [C, 1]
    var_g = jnp.dot(gmap, sxx, preferred_element_type=jnp.float32) / denom     # [G, 1]
    var_c = jnp.dot(gmap_t, var_g, preferred_element_type=jnp.float32)         # [C, 1]
    xn = xc * lax.rsqrt(var_c + eps) * gamma_ref[...] + beta_ref[...]          # [C, T]
    # Only the normalized activations stay resident (bf16); qkv is recomputed per head.
    xn_scr[...] = xn.astype(jnp.bfloat16)

    # ---------------- QKVAttentionLegacy, per head, query-tiled ----------------------
    n_qt = T // q_tile
    w_row_align = _pow2_divisor(ch3)       # true static alignment of the per-head rows
    a_row_align = _pow2_divisor(head_ch)

    def head_body(h, carry):
        row3 = h * ch3
        row = h * head_ch
        # per-head qkv = Conv1d row-slice (legacy contiguous layout, Q rows pre-scaled
        # by scale^2 wrapper-side, so no per-head elementwise scaling here).
        w_h = w_qkv_ref[pl.ds(pl.multiple_of(row3, w_row_align), ch3), :]      # [3ch,C] bf16
        b_h = b_qkv_ref[pl.ds(pl.multiple_of(row3, w_row_align), ch3), :]      # [3ch,1] f32
        qkv_h = jnp.dot(w_h, xn_scr[...],
                        preferred_element_type=jnp.float32) + b_h              # [3ch,T] f32
        q = qkv_h[:head_ch].astype(jnp.bfloat16)                               # [ch, T]
        k = qkv_h[head_ch:2 * head_ch].astype(jnp.bfloat16)                    # [ch, T]
        v = qkv_h[2 * head_ch:].astype(jnp.bfloat16)                           # [ch, T]

        for jt in range(n_qt):                                                 # static tiles
            q_t = q[:, jt * q_tile:(jt + 1) * q_tile]                          # [ch, Tq]
            # transposed scores: sT[s, t] = sum_c k[c,s] * q_scaled[c,t]
            # (keeps the PV matmul in standard MXU form; no [T,T] transpose of p)
            sT = lax.dot_general(k, q_t, (((0,), (0,)), ((), ())),
                                 preferred_element_type=jnp.float32)           # [T, Tq] f32
            m = jnp.max(sT, axis=0, keepdims=True)                             # [1, Tq]
            # bf16 softmax numerator; denominator accumulated in f32 from the SAME
            # bf16 values the PV matmul consumes.
            p = jnp.exp((sT - m).astype(jnp.bfloat16))                         # [T, Tq] bf16
            l = jnp.sum(p, axis=0, keepdims=True, dtype=jnp.float32)           # [1, Tq] f32
            # unnormalized PV matmul, then deferred normalization via an EUP reciprocal
            a_un = jnp.dot(v, p, preferred_element_type=jnp.float32)           # [ch, Tq]
            a_t = a_un * pl.reciprocal(l, approx=True)
            a_scr[pl.ds(pl.multiple_of(row, a_row_align), head_ch),
                  jt * q_tile:(jt + 1) * q_tile] = a_t.astype(a_scr.dtype)
        return carry

    lax.fori_loop(0, num_heads, head_body, 0, unroll=unroll_heads)

    # ---------------- proj_out = Conv1d(C, C, 1) + residual --------------------------
    h_out = jnp.dot(w_proj_ref[...], a_scr[...].astype(jnp.bfloat16),
                    preferred_element_type=jnp.float32) + b_proj_ref[...]      # [C, T]
    # Re-read the residual from VMEM instead of keeping it live across the head loop.
    o_ref[0] = x_ref[0] + h_out


def _vmem_limit_bytes(C, T, head_ch, q_tile):
    """Chip/shape-aware VMEM ceiling: ~2x the static working set, clamped to 3/4 of
    physical VMEM (64 MiB/TC on v7x, 128 MiB on v5e/v6e), never below 32 MiB."""
    try:
        cap = int(pltpu.get_tpu_info().vmem_capacity_bytes)
    except Exception:
        cap = 64 * 1024 * 1024          # conservative fallback (v7x per-TC)
    est = (2 * (C * T * 4) * 2          # x-in + out blocks, f32, double-buffered
           + (3 * C * C + C * C) * 2    # qkv + proj weights (bf16)
           + 16 * C * 4                 # biases / gamma / beta / group maps (approx)
           + 2 * C * T * 4              # xn + a scratch (<= f32)
           + 3 * head_ch * T * 4        # per-head qkv temp (f32)
           + 4 * T * q_tile * 4)        # score/prob slabs + headroom (f32)
    return int(min(max(2 * est, 32 * 1024 * 1024), (cap * 3) // 4))


def attention_block(x, gamma, beta, w_qkv, b_qkv, w_proj, b_proj,
                    *, num_heads, groups=32, eps=1e-5):
    """x: [B, C, H, W] f32  ->  [B, C, H, W] f32 (matches AttentionBlock._forward)."""
    B, C, Hs, Ws = x.shape
    T = Hs * Ws
    assert C % num_heads == 0
    head_ch = C // num_heads
    assert head_ch % 8 == 0, "head channels must be a multiple of 8 for aligned slicing"
    assert C % groups == 0

    # Query tile: match the 256-wide MXU when possible, else 128, else whole T.
    if T % 256 == 0:
        q_tile = 256
    elif T % 128 == 0:
        q_tile = 128
    else:
        q_tile = T
    n_qt = T // q_tile
    # Bound the total static unroll (heads x q-tiles) to keep vreg pressure / compile
    # time in check; roll the head loop for larger configs.
    unroll_heads = (num_heads * n_qt) <= 8

    # bf16 attention-output scratch only if head rows stay (16,128)-tile aligned;
    # otherwise fall back to f32 (perf fallback, not correctness).
    a_dtype = jnp.bfloat16 if head_ch % 16 == 0 else jnp.float32

    x_bct = x.reshape(B, C, T).astype(jnp.float32)

    # Keep the legacy head-major [h][q,k,v][ch] row layout (contiguous per head) and
    # fold the attention scale once as scale^2 on the Q rows/bias (mathematically
    # identical to q*scale, k*scale).
    scale2 = jnp.float32(1.0 / math.sqrt(head_ch))
    w4 = w_qkv.astype(jnp.float32).reshape(num_heads, 3, head_ch, C)
    b4 = b_qkv.astype(jnp.float32).reshape(num_heads, 3, head_ch)
    w4 = w4.at[:, 0].multiply(scale2)
    b4 = b4.at[:, 0].multiply(scale2)
    w3 = w4.reshape(3 * C, C).astype(jnp.bfloat16)          # bf16 MXU operand
    b3 = b4.reshape(3 * C, 1).astype(jnp.float32)           # bias stays f32

    # one-hot group membership matrices (tiny [G,C]x[C,1] stat matmuls in-kernel)
    gmap = (jnp.arange(groups)[:, None] ==
            (jnp.arange(C) // (C // groups))[None, :]).astype(jnp.float32)     # [G, C]
    gmap_t = gmap.T                                                            # [C, G]

    kernel = functools.partial(_attention_block_kernel,
                               num_heads=num_heads, head_ch=head_ch,
                               channels=C, q_tile=q_tile, eps=eps,
                               unroll_heads=unroll_heads)

    out = pl.pallas_call(
        kernel,
        out_shape=jax.ShapeDtypeStruct((B, C, T), jnp.float32),
        grid_spec=pltpu.PrefetchScalarGridSpec(
            num_scalar_prefetch=0,
            grid=(B,),
            in_specs=[
                pl.BlockSpec((1, C, T), lambda b: (b, 0, 0)),    # x
                pl.BlockSpec((groups, C), lambda b: (0, 0)),     # group map
                pl.BlockSpec((C, groups), lambda b: (0, 0)),     # group map^T
                pl.BlockSpec((C, 1), lambda b: (0, 0)),          # gamma
                pl.BlockSpec((C, 1), lambda b: (0, 0)),          # beta
                pl.BlockSpec((3 * C, C), lambda b: (0, 0)),      # qkv weight (bf16)
                pl.BlockSpec((3 * C, 1), lambda b: (0, 0)),      # qkv bias (f32)
                pl.BlockSpec((C, C), lambda b: (0, 0)),          # proj weight (bf16)
                pl.BlockSpec((C, 1), lambda b: (0, 0)),          # proj bias (f32)
            ],
            out_specs=pl.BlockSpec((1, C, T), lambda b: (b, 0, 0)),
            scratch_shapes=[
                pltpu.VMEM((C, T), jnp.bfloat16),                # normalized activations
                pltpu.VMEM((C, T), a_dtype),                     # attention output
            ],
        ),
        compiler_params=pltpu.CompilerParams(
            dimension_semantics=("parallel",),                   # v7x: shard batch over 2 TCs
            vmem_limit_bytes=_vmem_limit_bytes(C, T, head_ch, q_tile)),
    )(x_bct, gmap, gmap_t,
      gamma.reshape(C, 1).astype(jnp.float32),
      beta.reshape(C, 1).astype(jnp.float32),
      w3, b3,
      w_proj.astype(jnp.bfloat16),
      b_proj.reshape(C, 1).astype(jnp.float32))
    return out.reshape(B, C, Hs, Ws)


def reference_attention_block(x, gamma, beta, w_qkv, b_qkv, w_proj, b_proj,
                              *, num_heads, groups=32, eps=1e-5):
    """Pure-JAX f32 reference matching the PyTorch module's _forward."""
    B, C, H, W = x.shape
    T = H * W
    xr = x.reshape(B, C, T).astype(jnp.float32)
    # GroupNorm
    xg = xr.reshape(B, groups, (C // groups) * T)
    mean = xg.mean(axis=-1, keepdims=True)
    var = xg.var(axis=-1, keepdims=True)            # biased
    xn = ((xg - mean) / jnp.sqrt(var + eps)).reshape(B, C, T)
    xn = xn * gamma[None, :, None] + beta[None, :, None]
    # qkv conv1d (kernel size 1)
    qkv = jnp.einsum('oc,bct->bot', w_qkv, xn) + b_qkv[None, :, None]
    # QKVAttentionLegacy
    ch = C // num_heads
    qkv_h = qkv.reshape(B * num_heads, 3 * ch, T)
    q, k, v = qkv_h[:, :ch], qkv_h[:, ch:2 * ch], qkv_h[:, 2 * ch:]
    scale = 1.0 / math.sqrt(math.sqrt(ch))
    w = jnp.einsum('bct,bcs->bts', q * scale, k * scale)
    w = jax.nn.softmax(w, axis=-1)
    a = jnp.einsum('bts,bcs->bct', w, v).reshape(B, C, T)
    # proj_out conv1d
    h = jnp.einsum('oc,bct->bot', w_proj, a) + b_proj[None, :, None]
    return (xr + h).reshape(B, C, H, W)


if __name__ == "__main__":
    B, C, H, W = 2, 64, 16, 16       # T = 256 (lane-dense), 4 heads of 16 channels
    NUM_HEADS = 4
    GROUPS = 32

    key = jax.random.PRNGKey(0)
    kx, kg, kb, kw1, kb1, kw2, kb2 = jax.random.split(key, 7)

    x = jax.random.normal(kx, (B, C, H, W), dtype=jnp.float32)

    # GroupNorm params (PyTorch default is ones/zeros; perturb deterministically)
    gamma = 1.0 + 0.1 * jax.random.normal(kg, (C,), dtype=jnp.float32)
    beta = 0.1 * jax.random.normal(kb, (C,), dtype=jnp.float32)

    # Conv1d(C, 3C, 1): weight [3C, C], bias [3C]
    w_qkv = jax.random.normal(kw1, (3 * C, C), dtype=jnp.float32) / math.sqrt(C)
    b_qkv = 0.05 * jax.random.normal(kb1, (3 * C,), dtype=jnp.float32)

    # Conv1d(C, C, 1): weight [C, C], bias [C].
    # NOTE: the reference wraps this in zero_module() (all-zero init); a deterministic
    # non-zero init is used so the attention path is actually exercised.
    w_proj = jax.random.normal(kw2, (C, C), dtype=jnp.float32) / math.sqrt(C)
    b_proj = 0.05 * jax.random.normal(kb2, (C,), dtype=jnp.float32)

    out = attention_block(x, gamma, beta, w_qkv, b_qkv, w_proj, b_proj,
                          num_heads=NUM_HEADS, groups=GROUPS)
    out = jax.block_until_ready(out)

    ref = reference_attention_block(x, gamma, beta, w_qkv, b_qkv, w_proj, b_proj,
                                    num_heads=NUM_HEADS, groups=GROUPS)

    assert out.shape == (B, C, H, W)
    # bf16 MXU operands + bf16 softmax numerator (f32 accumulation everywhere) vs. the
    # pure-f32 reference -> relaxed absolute tolerance on O(1)-magnitude outputs.
    err = float(jnp.max(jnp.abs(out - ref)))
    assert err < 6e-2, f"max abs err {err}"
    print("KERNEL_OK")
</pallas_src>

<mosaic_0001>
module attributes {stable_mosaic.version = 11 : i64} {
  func.func @_attention_block_kernel(%arg0: i32, %arg1: memref<1x64x256xf32, #tpu.memory_space<vmem>>, %arg2: memref<32x64xf32, #tpu.memory_space<vmem>>, %arg3: memref<64x32xf32, #tpu.memory_space<vmem>>, %arg4: memref<64x1xf32, #tpu.memory_space<vmem>>, %arg5: memref<64x1xf32, #tpu.memory_space<vmem>>, %arg6: memref<192x64xbf16, #tpu.memory_space<vmem>>, %arg7: memref<192x1xf32, #tpu.memory_space<vmem>>, %arg8: memref<64x64xbf16, #tpu.memory_space<vmem>>, %arg9: memref<64x1xf32, #tpu.memory_space<vmem>>, %arg10: memref<1x64x256xf32, #tpu.memory_space<vmem>>, %arg11: memref<64x256xbf16, #tpu.memory_space<vmem>>, %arg12: memref<64x256xbf16, #tpu.memory_space<vmem>>) attributes {dimension_semantics = [#tpu.dimension_semantics<parallel>], iteration_bounds = array<i64: 2>, scalar_prefetch = 0 : i64, scratch_operands = 2 : i64, tpu.core_type = #tpu.core_type<tc>, window_params = [{transform_indices = @transform_0, window_bounds = array<i64: 1, 64, 256>}, {pipeline_mode = #tpu.pipeline_mode<synchronous>, transform_indices = @transform_1, window_bounds = array<i64: 32, 64>}, {pipeline_mode = #tpu.pipeline_mode<synchronous>, transform_indices = @transform_2, window_bounds = array<i64: 64, 32>}, {pipeline_mode = #tpu.pipeline_mode<synchronous>, transform_indices = @transform_3, window_bounds = array<i64: 64, 1>}, {pipeline_mode = #tpu.pipeline_mode<synchronous>, transform_indices = @transform_4, window_bounds = array<i64: 64, 1>}, {pipeline_mode = #tpu.pipeline_mode<synchronous>, transform_indices = @transform_5, window_bounds = array<i64: 192, 64>}, {pipeline_mode = #tpu.pipeline_mode<synchronous>, transform_indices = @transform_6, window_bounds = array<i64: 192, 1>}, {pipeline_mode = #tpu.pipeline_mode<synchronous>, transform_indices = @transform_7, window_bounds = array<i64: 64, 64>}, {pipeline_mode = #tpu.pipeline_mode<synchronous>, transform_indices = @transform_8, window_bounds = array<i64: 64, 1>}, {transform_indices = @transform_9, window_bounds = array<i64: 1, 64, 256>}]} {
    %c0 = arith.constant 0 : index
    %c0_0 = arith.constant 0 : index
    %c0_1 = arith.constant 0 : index
    %0 = vector.load %arg1[%c0, %c0_0, %c0_1] : memref<1x64x256xf32, #tpu.memory_space<vmem>>, vector<1x64x256xf32>
    %1 = vector.shape_cast %0 : vector<1x64x256xf32> to vector<64x256xf32>
    %c0_2 = arith.constant 0 : index
    %c0_3 = arith.constant 0 : index
    %2 = vector.load %arg2[%c0_2, %c0_3] : memref<32x64xf32, #tpu.memory_space<vmem>>, vector<32x64xf32>
    %c0_4 = arith.constant 0 : index
    %c0_5 = arith.constant 0 : index
    %3 = vector.load %arg3[%c0_4, %c0_5] : memref<64x32xf32, #tpu.memory_space<vmem>>, vector<64x32xf32>
    %cst = arith.constant dense<0.000000e+00> : vector<64xf32>
    %4 = vector.multi_reduction <add>, %1, %cst [1] : vector<64x256xf32> to vector<64xf32>
    %5 = vector.shape_cast %4 : vector<64xf32> to vector<64x1xf32>
    %cst_6 = arith.constant dense<0.000000e+00> : vector<32x1xf32>
    %6 = tpu.matmul %2, %5, %cst_6 {dimension_numbers = #tpu.dot_dimension_numbers<[1], [0], [0], [1], [0, 0, 1, 1], [], []>} : vector<32x64xf32>, vector<64x1xf32>, vector<32x1xf32> -> vector<32x1xf32>
    %cst_7 = arith.constant 5.120000e+02 : f32
    %7 = vector.broadcast %cst_7 : f32 to vector<32x1xf32>
    %8 = arith.divf %6, %7 : vector<32x1xf32>
    %cst_8 = arith.constant dense<0.000000e+00> : vector<64x1xf32>
    %9 = tpu.matmul %3, %8, %cst_8 {dimension_numbers = #tpu.dot_dimension_numbers<[1], [0], [0], [1], [0, 0, 1, 1], [], []>} : vector<64x32xf32>, vector<32x1xf32>, vector<64x1xf32> -> vector<64x1xf32>
    %10 = vector.broadcast %9 : vector<64x1xf32> to vector<64x256xf32>
    %11 = arith.subf %1, %10 : vector<64x256xf32>
    %12 = arith.mulf %11, %11 : vector<64x256xf32>
    %cst_9 = arith.constant dense<0.000000e+00> : vector<64xf32>
    %13 = vector.multi_reduction <add>, %12, %cst_9 [1] : vector<64x256xf32> to vector<64xf32>
    %14 = vector.shape_cast %13 : vector<64xf32> to vector<64x1xf32>
    %cst_10 = arith.constant dense<0.000000e+00> : vector<32x1xf32>
    %15 = tpu.matmul %2, %14, %cst_10 {dimension_numbers = #tpu.dot_dimension_numbers<[1], [0], [0], [1], [0, 0, 1, 1], [], []>} : vector<32x64xf32>, vector<64x1xf32>, vector<32x1xf32> -> vector<32x1xf32>
    %cst_11 = arith.constant 5.120000e+02 : f32
    %16 = vector.broadcast %cst_11 : f32 to vector<32x1xf32>
    %17 = arith.divf %15, %16 : vector<32x1xf32>
    %cst_12 = arith.constant dense<0.000000e+00> : vector<64x1xf32>
    %18 = tpu.matmul %3, %17, %cst_12 {dimension_numbers = #tpu.dot_dimension_numbers<[1], [0], [0], [1], [0, 0, 1, 1], [], []>} : vector<64x32xf32>, vector<32x1xf32>, vector<64x1xf32> -> vector<64x1xf32>
    %cst_13 = arith.constant 9.99999974E-6 : f32
    %19 = vector.broadcast %cst_13 : f32 to vector<64x1xf32>
    %20 = arith.addf %18, %19 : vector<64x1xf32>
    %21 = math.rsqrt %20 : vector<64x1xf32>
    %22 = vector.broadcast %21 : vector<64x1xf32> to vector<64x256xf32>
    %23 = arith.mulf %11, %22 : vector<64x256xf32>
    %c0_14 = arith.constant 0 : index
    %c0_15 = arith.constant 0 : index
    %24 = vector.load %arg4[%c0_14, %c0_15] : memref<64x1xf32, #tpu.memory_space<vmem>>, vector<64x1xf32>
    %25 = vector.broadcast %24 : vector<64x1xf32> to vector<64x256xf32>
    %26 = arith.mulf %23, %25 : vector<64x256xf32>
    %c0_16 = arith.constant 0 : index
    %c0_17 = arith.constant 0 : index
    %27 = vector.load %arg5[%c0_16, %c0_17] : memref<64x1xf32, #tpu.memory_space<vmem>>, vector<64x1xf32>
    %28 = vector.broadcast %27 : vector<64x1xf32> to vector<64x256xf32>
    %29 = arith.addf %26, %28 : vector<64x256xf32>
    %30 = arith.truncf %29 : vector<64x256xf32> to vector<64x256xbf16>
    %c0_18 = arith.constant 0 : index
    %c0_19 = arith.constant 0 : index
    %31 = vector.load %arg11[%c0_18, %c0_19] : memref<64x256xbf16, #tpu.memory_space<vmem>>, vector<64x256xbf16>
    tpu.vector_store %arg11[%c0_18, %c0_19], %30 {strides = array<i32>} : memref<64x256xbf16, #tpu.memory_space<vmem>>, vector<64x256xbf16>,
    %c0_i32 = arith.constant 0 : i32
    %c48_i32 = arith.constant 48 : i32
    %32 = arith.muli %c0_i32, %c48_i32 : i32
    %c16_i32 = arith.constant 16 : i32
    %33 = arith.muli %c0_i32, %c16_i32 : i32
    %34 = tpu.assume_multiple %32, 16 : i32
    %35 = arith.index_cast %34 : i32 to index
    %c0_20 = arith.constant 0 : index
    %36 = vector.load %arg6[%35, %c0_20] : memref<192x64xbf16, #tpu.memory_space<vmem>>, vector<48x64xbf16>
    %37 = tpu.assume_multiple %32, 16 : i32
    %38 = arith.index_cast %37 : i32 to index
    %c0_21 = arith.constant 0 : index
    %39 = vector.load %arg7[%38, %c0_21] : memref<192x1xf32, #tpu.memory_space<vmem>>, vector<48x1xf32>
    %c0_22 = arith.constant 0 : index
    %c0_23 = arith.constant 0 : index
    %40 = vector.load %arg11[%c0_22, %c0_23] : memref<64x256xbf16, #tpu.memory_space<vmem>>, vector<64x256xbf16>
    %cst_24 = arith.constant dense<0.000000e+00> : vector<48x256xf32>
    %41 = tpu.matmul %36, %40, %cst_24 {dimension_numbers = #tpu.dot_dimension_numbers<[1], [0], [0], [1], [0, 0, 1, 1], [], []>} : vector<48x64xbf16>, vector<64x256xbf16>, vector<48x256xf32> -> vector<48x256xf32>
    %42 = vector.broadcast %39 : vector<48x1xf32> to vector<48x256xf32>
    %43 = arith.addf %41, %42 : vector<48x256xf32>
    %44 = vector.extract_strided_slice %43 {offsets = [0, 0], sizes = [16, 256], strides = [1, 1]} : vector<48x256xf32> to vector<16x256xf32>
    %45 = arith.truncf %44 : vector<16x256xf32> to vector<16x256xbf16>
    %46 = vector.extract_strided_slice %43 {offsets = [16, 0], sizes = [16, 256], strides = [1, 1]} : vector<48x256xf32> to vector<16x256xf32>
    %47 = arith.truncf %46 : vector<16x256xf32> to vector<16x256xbf16>
    %48 = vector.extract_strided_slice %43 {offsets = [32, 0], sizes = [16, 256], strides = [1, 1]} : vector<48x256xf32> to vector<16x256xf32>
    %49 = arith.truncf %48 : vector<16x256xf32> to vector<16x256xbf16>
    %cst_25 = arith.constant dense<0.000000e+00> : vector<256x256xf32>
    %50 = tpu.matmul %47, %45, %cst_25 {dimension_numbers = #tpu.dot_dimension_numbers<[0], [0], [1], [1], [0, 1, 1, 1], [], []>} : vector<16x256xbf16>, vector<16x256xbf16>, vector<256x256xf32> -> vector<256x256xf32>
    %cst_26 = arith.constant dense<0xFF800000> : vector<256xf32>
    %51 = vector.multi_reduction <maximumf>, %50, %cst_26 [0] : vector<256x256xf32> to vector<256xf32>
    %52 = vector.shape_cast %51 : vector<256xf32> to vector<1x256xf32>
    %53 = vector.broadcast %52 : vector<1x256xf32> to vector<256x256xf32>
    %54 = arith.subf %50, %53 : vector<256x256xf32>
    %55 = arith.truncf %54 : vector<256x256xf32> to vector<256x256xbf16>
    %56 = math.exp %55 : vector<256x256xbf16>
    %57 = arith.extf %56 : vector<256x256xbf16> to vector<256x256xf32>
    %cst_27 = arith.constant dense<0.000000e+00> : vector<256xf32>
    %58 = vector.multi_reduction <add>, %57, %cst_27 [0] : vector<256x256xf32> to vector<256xf32>
    %59 = vector.shape_cast %58 : vector<256xf32> to vector<1x256xf32>
    %cst_28 = arith.constant dense<0.000000e+00> : vector<16x256xf32>
    %60 = tpu.matmul %49, %56, %cst_28 {dimension_numbers = #tpu.dot_dimension_numbers<[1], [0], [0], [1], [0, 0, 1, 1], [], []>} : vector<16x256xbf16>, vector<256x256xbf16>, vector<16x256xf32> -> vector<16x256xf32>
    %61 = tpu.reciprocal %59 {approx = true} : vector<1x256xf32> -> vector<1x256xf32>
    %62 = vector.broadcast %61 : vector<1x256xf32> to vector<16x256xf32>
    %63 = arith.mulf %60, %62 : vector<16x256xf32>
    %64 = arith.truncf %63 : vector<16x256xf32> to vector<16x256xbf16>
    %65 = tpu.assume_multiple %33, 16 : i32
    %66 = arith.index_cast %65 : i32 to index
    %c0_29 = arith.constant 0 : index
    %67 = vector.load %arg12[%66, %c0_29] : memref<64x256xbf16, #tpu.memory_space<vmem>>, vector<16x256xbf16>
    tpu.vector_store %arg12[%66, %c0_29], %64 {strides = array<i32>} : memref<64x256xbf16, #tpu.memory_space<vmem>>, vector<16x256xbf16>,
    %c1_i32 = arith.constant 1 : i32
    %c48_i32_30 = arith.constant 48 : i32
    %68 = arith.muli %c1_i32, %c48_i32_30 : i32
    %c16_i32_31 = arith.constant 16 : i32
    %69 = arith.muli %c1_i32, %c16_i32_31 : i32
    %70 = tpu.assume_multiple %68, 16 : i32
    %71 = arith.index_cast %70 : i32 to index
    %c0_32 = arith.constant 0 : index
    %72 = vector.load %arg6[%71, %c0_32] : memref<192x64xbf16, #tpu.memory_space<vmem>>, vector<48x64xbf16>
    %73 = tpu.assume_multiple %68, 16 : i32
    %74 = arith.index_cast %73 : i32 to index
    %c0_33 = arith.constant 0 : index
    %75 = vector.load %arg7[%74, %c0_33] : memref<192x1xf32, #tpu.memory_space<vmem>>, vector<48x1xf32>
    %c0_34 = arith.constant 0 : index
    %c0_35 = arith.constant 0 : index
    %76 = vector.load %arg11[%c0_34, %c0_35] : memref<64x256xbf16, #tpu.memory_space<vmem>>, vector<64x256xbf16>
    %cst_36 = arith.constant dense<0.000000e+00> : vector<48x256xf32>
    %77 = tpu.matmul %72, %76, %cst_36 {dimension_numbers = #tpu.dot_dimension_numbers<[1], [0], [0], [1], [0, 0, 1, 1], [], []>} : vector<48x64xbf16>, vector<64x256xbf16>, vector<48x256xf32> -> vector<48x256xf32>
    %78 = vector.broadcast %75 : vector<48x1xf32> to vector<48x256xf32>
    %79 = arith.addf %77, %78 : vector<48x256xf32>
    %80 = vector.extract_strided_slice %79 {offsets = [0, 0], sizes = [16, 256], strides = [1, 1]} : vector<48x256xf32> to vector<16x256xf32>
    %81 = arith.truncf %80 : vector<16x256xf32> to vector<16x256xbf16>
    %82 = vector.extract_strided_slice %79 {offsets = [16, 0], sizes = [16, 256], strides = [1, 1]} : vector<48x256xf32> to vector<16x256xf32>
    %83 = arith.truncf %82 : vector<16x256xf32> to vector<16x256xbf16>
    %84 = vector.extract_strided_slice %79 {offsets = [32, 0], sizes = [16, 256], strides = [1, 1]} : vector<48x256xf32> to vector<16x256xf32>
    %85 = arith.truncf %84 : vector<16x256xf32> to vector<16x256xbf16>
    %cst_37 = arith.constant dense<0.000000e+00> : vector<256x256xf32>
    %86 = tpu.matmul %83, %81, %cst_37 {dimension_numbers = #tpu.dot_dimension_numbers<[0], [0], [1], [1], [0, 1, 1, 1], [], []>} : vector<16x256xbf16>, vector<16x256xbf16>, vector<256x256xf32> -> vector<256x256xf32>
    %cst_38 = arith.constant dense<0xFF800000> : vector<256xf32>
    %87 = vector.multi_reduction <maximumf>, %86, %cst_38 [0] : vector<256x256xf32> to vector<256xf32>
    %88 = vector.shape_cast %87 : vector<256xf32> to vector<1x256xf32>
    %89 = vector.broadcast %88 : vector<1x256xf32> to vector<256x256xf32>
    %90 = arith.subf %86, %89 : vector<256x256xf32>
    %91 = arith.truncf %90 : vector<256x256xf32> to vector<256x256xbf16>
    %92 = math.exp %91 : vector<256x256xbf16>
    %93 = arith.extf %92 : vector<256x256xbf16> to vector<256x256xf32>
    %cst_39 = arith.constant dense<0.000000e+00> : vector<256xf32>
    %94 = vector.multi_reduction <add>, %93, %cst_39 [0] : vector<256x256xf32> to vector<256xf32>
    %95 = vector.shape_cast %94 : vector<256xf32> to vector<1x256xf32>
    %cst_40 = arith.constant dense<0.000000e+00> : vector<16x256xf32>
    %96 = tpu.matmul %85, %92, %cst_40 {dimension_numbers = #tpu.dot_dimension_numbers<[1], [0], [0], [1], [0, 0, 1, 1], [], []>} : vector<16x256xbf16>, vector<256x256xbf16>, vector<16x256xf32> -> vector<16x256xf32>
    %97 = tpu.reciprocal %95 {approx = true} : vector<1x256xf32> -> vector<1x256xf32>
    %98 = vector.broadcast %97 : vector<1x256xf32> to vector<16x256xf32>
    %99 = arith.mulf %96, %98 : vector<16x256xf32>
    %100 = arith.truncf %99 : vector<16x256xf32> to vector<16x256xbf16>
    %101 = tpu.assume_multiple %69, 16 : i32
    %102 = arith.index_cast %101 : i32 to index
    %c0_41 = arith.constant 0 : index
    %103 = vector.load %arg12[%102, %c0_41] : memref<64x256xbf16, #tpu.memory_space<vmem>>, vector<16x256xbf16>
    tpu.vector_store %arg12[%102, %c0_41], %100 {strides = array<i32>} : memref<64x256xbf16, #tpu.memory_space<vmem>>, vector<16x256xbf16>,
    %c2_i32 = arith.constant 2 : i32
    %c48_i32_42 = arith.constant 48 : i32
    %104 = arith.muli %c2_i32, %c48_i32_42 : i32
    %c16_i32_43 = arith.constant 16 : i32
    %105 = arith.muli %c2_i32, %c16_i32_43 : i32
    %106 = tpu.assume_multiple %104, 16 : i32
    %107 = arith.index_cast %106 : i32 to index
    %c0_44 = arith.constant 0 : index
    %108 = vector.load %arg6[%107, %c0_44] : memref<192x64xbf16, #tpu.memory_space<vmem>>, vector<48x64xbf16>
    %109 = tpu.assume_multiple %104, 16 : i32
    %110 = arith.index_cast %109 : i32 to index
    %c0_45 = arith.constant 0 : index
    %111 = vector.load %arg7[%110, %c0_45] : memref<192x1xf32, #tpu.memory_space<vmem>>, vector<48x1xf32>
    %c0_46 = arith.constant 0 : index
    %c0_47 = arith.constant 0 : index
    %112 = vector.load %arg11[%c0_46, %c0_47] : memref<64x256xbf16, #tpu.memory_space<vmem>>, vector<64x256xbf16>
    %cst_48 = arith.constant dense<0.000000e+00> : vector<48x256xf32>
    %113 = tpu.matmul %108, %112, %cst_48 {dimension_numbers = #tpu.dot_dimension_numbers<[1], [0], [0], [1], [0, 0, 1, 1], [], []>} : vector<48x64xbf16>, vector<64x256xbf16>, vector<48x256xf32> -> vector<48x256xf32>
    %114 = vector.broadcast %111 : vector<48x1xf32> to vector<48x256xf32>
    %115 = arith.addf %113, %114 : vector<48x256xf32>
    %116 = vector.extract_strided_slice %115 {offsets = [0, 0], sizes = [16, 256], strides = [1, 1]} : vector<48x256xf32> to vector<16x256xf32>
    %117 = arith.truncf %116 : vector<16x256xf32> to vector<16x256xbf16>
    %118 = vector.extract_strided_slice %115 {offsets = [16, 0], sizes = [16, 256], strides = [1, 1]} : vector<48x256xf32> to vector<16x256xf32>
    %119 = arith.truncf %118 : vector<16x256xf32> to vector<16x256xbf16>
    %120 = vector.extract_strided_slice %115 {offsets = [32, 0], sizes = [16, 256], strides = [1, 1]} : vector<48x256xf32> to vector<16x256xf32>
    %121 = arith.truncf %120 : vector<16x256xf32> to vector<16x256xbf16>
    %cst_49 = arith.constant dense<0.000000e+00> : vector<256x256xf32>
    %122 = tpu.matmul %119, %117, %cst_49 {dimension_numbers = #tpu.dot_dimension_numbers<[0], [0], [1], [1], [0, 1, 1, 1], [], []>} : vector<16x256xbf16>, vector<16x256xbf16>, vector<256x256xf32> -> vector<256x256xf32>
    %cst_50 = arith.constant dense<0xFF800000> : vector<256xf32>
    %123 = vector.multi_reduction <maximumf>, %122, %cst_50 [0] : vector<256x256xf32> to vector<256xf32>
    %124 = vector.shape_cast %123 : vector<256xf32> to vector<1x256xf32>
    %125 = vector.broadcast %124 : vector<1x256xf32> to vector<256x256xf32>
    %126 = arith.subf %122, %125 : vector<256x256xf32>
    %127 = arith.truncf %126 : vector<256x256xf32> to vector<256x256xbf16>
    %128 = math.exp %127 : vector<256x256xbf16>
    %129 = arith.extf %128 : vector<256x256xbf16> to vector<256x256xf32>
    %cst_51 = arith.constant dense<0.000000e+00> : vector<256xf32>
    %130 = vector.multi_reduction <add>, %129, %cst_51 [0] : vector<256x256xf32> to vector<256xf32>
    %131 = vector.shape_cast %130 : vector<256xf32> to vector<1x256xf32>
    %cst_52 = arith.constant dense<0.000000e+00> : vector<16x256xf32>
    %132 = tpu.matmul %121, %128, %cst_52 {dimension_numbers = #tpu.dot_dimension_numbers<[1], [0], [0], [1], [0, 0, 1, 1], [], []>} : vector<16x256xbf16>, vector<256x256xbf16>, vector<16x256xf32> -> vector<16x256xf32>
    %133 = tpu.reciprocal %131 {approx = true} : vector<1x256xf32> -> vector<1x256xf32>
    %134 = vector.broadcast %133 : vector<1x256xf32> to vector<16x256xf32>
    %135 = arith.mulf %132, %134 : vector<16x256xf32>
    %136 = arith.truncf %135 : vector<16x256xf32> to vector<16x256xbf16>
    %137 = tpu.assume_multiple %105, 16 : i32
    %138 = arith.index_cast %137 : i32 to index
    %c0_53 = arith.constant 0 : index
    %139 = vector.load %arg12[%138, %c0_53] : memref<64x256xbf16, #tpu.memory_space<vmem>>, vector<16x256xbf16>
    tpu.vector_store %arg12[%138, %c0_53], %136 {strides = array<i32>} : memref<64x256xbf16, #tpu.memory_space<vmem>>, vector<16x256xbf16>,
    %c3_i32 = arith.constant 3 : i32
    %c48_i32_54 = arith.constant 48 : i32
    %140 = arith.muli %c3_i32, %c48_i32_54 : i32
    %c16_i32_55 = arith.constant 16 : i32
    %141 = arith.muli %c3_i32, %c16_i32_55 : i32
    %142 = tpu.assume_multiple %140, 16 : i32
    %143 = arith.index_cast %142 : i32 to index
    %c0_56 = arith.constant 0 : index
    %144 = vector.load %arg6[%143, %c0_56] : memref<192x64xbf16, #tpu.memory_space<vmem>>, vector<48x64xbf16>
    %145 = tpu.assume_multiple %140, 16 : i32
    %146 = arith.index_cast %145 : i32 to index
    %c0_57 = arith.constant 0 : index
    %147 = vector.load %arg7[%146, %c0_57] : memref<192x1xf32, #tpu.memory_space<vmem>>, vector<48x1xf32>
    %c0_58 = arith.constant 0 : index
    %c0_59 = arith.constant 0 : index
    %148 = vector.load %arg11[%c0_58, %c0_59] : memref<64x256xbf16, #tpu.memory_space<vmem>>, vector<64x256xbf16>
    %cst_60 = arith.constant dense<0.000000e+00> : vector<48x256xf32>
    %149 = tpu.matmul %144, %148, %cst_60 {dimension_numbers = #tpu.dot_dimension_numbers<[1], [0], [0], [1], [0, 0, 1, 1], [], []>} : vector<48x64xbf16>, vector<64x256xbf16>, vector<48x256xf32> -> vector<48x256xf32>
    %150 = vector.broadcast %147 : vector<48x1xf32> to vector<48x256xf32>
    %151 = arith.addf %149, %150 : vector<48x256xf32>
    %152 = vector.extract_strided_slice %151 {offsets = [0, 0], sizes = [16, 256], strides = [1, 1]} : vector<48x256xf32> to vector<16x256xf32>
    %153 = arith.truncf %152 : vector<16x256xf32> to vector<16x256xbf16>
    %154 = vector.extract_strided_slice %151 {offsets = [16, 0], sizes = [16, 256], strides = [1, 1]} : vector<48x256xf32> to vector<16x256xf32>
    %155 = arith.truncf %154 : vector<16x256xf32> to vector<16x256xbf16>
    %156 = vector.extract_strided_slice %151 {offsets = [32, 0], sizes = [16, 256], strides = [1, 1]} : vector<48x256xf32> to vector<16x256xf32>
    %157 = arith.truncf %156 : vector<16x256xf32> to vector<16x256xbf16>
    %cst_61 = arith.constant dense<0.000000e+00> : vector<256x256xf32>
    %158 = tpu.matmul %155, %153, %cst_61 {dimension_numbers = #tpu.dot_dimension_numbers<[0], [0], [1], [1], [0, 1, 1, 1], [], []>} : vector<16x256xbf16>, vector<16x256xbf16>, vector<256x256xf32> -> vector<256x256xf32>
    %cst_62 = arith.constant dense<0xFF800000> : vector<256xf32>
    %159 = vector.multi_reduction <maximumf>, %158, %cst_62 [0] : vector<256x256xf32> to vector<256xf32>
    %160 = vector.shape_cast %159 : vector<256xf32> to vector<1x256xf32>
    %161 = vector.broadcast %160 : vector<1x256xf32> to vector<256x256xf32>
    %162 = arith.subf %158, %161 : vector<256x256xf32>
    %163 = arith.truncf %162 : vector<256x256xf32> to vector<256x256xbf16>
    %164 = math.exp %163 : vector<256x256xbf16>
    %165 = arith.extf %164 : vector<256x256xbf16> to vector<256x256xf32>
    %cst_63 = arith.constant dense<0.000000e+00> : vector<256xf32>
    %166 = vector.multi_reduction <add>, %165, %cst_63 [0] : vector<256x256xf32> to vector<256xf32>
    %167 = vector.shape_cast %166 : vector<256xf32> to vector<1x256xf32>
    %cst_64 = arith.constant dense<0.000000e+00> : vector<16x256xf32>
    %168 = tpu.matmul %157, %164, %cst_64 {dimension_numbers = #tpu.dot_dimension_numbers<[1], [0], [0], [1], [0, 0, 1, 1], [], []>} : vector<16x256xbf16>, vector<256x256xbf16>, vector<16x256xf32> -> vector<16x256xf32>
    %169 = tpu.reciprocal %167 {approx = true} : vector<1x256xf32> -> vector<1x256xf32>
    %170 = vector.broadcast %169 : vector<1x256xf32> to vector<16x256xf32>
    %171 = arith.mulf %168, %170 : vector<16x256xf32>
    %172 = arith.truncf %171 : vector<16x256xf32> to vector<16x256xbf16>
    %173 = tpu.assume_multiple %141, 16 : i32
    %174 = arith.index_cast %173 : i32 to index
    %c0_65 = arith.constant 0 : index
    %175 = vector.load %arg12[%174, %c0_65] : memref<64x256xbf16, #tpu.memory_space<vmem>>, vector<16x256xbf16>
    tpu.vector_store %arg12[%174, %c0_65], %172 {strides = array<i32>} : memref<64x256xbf16, #tpu.memory_space<vmem>>, vector<16x256xbf16>,
    %c4_i32 = arith.constant 4 : i32
    %c0_66 = arith.constant 0 : index
    %c0_67 = arith.constant 0 : index
    %176 = vector.load %arg8[%c0_66, %c0_67] : memref<64x64xbf16, #tpu.memory_space<vmem>>, vector<64x64xbf16>
    %c0_68 = arith.constant 0 : index
    %c0_69 = arith.constant 0 : index
    %177 = vector.load %arg12[%c0_68, %c0_69] : memref<64x256xbf16, #tpu.memory_space<vmem>>, vector<64x256xbf16>
    %cst_70 = arith.constant dense<0.000000e+00> : vector<64x256xf32>
    %178 = tpu.matmul %176, %177, %cst_70 {dimension_numbers = #tpu.dot_dimension_numbers<[1], [0], [0], [1], [0, 0, 1, 1], [], []>} : vector<64x64xbf16>, vector<64x256xbf16>, vector<64x256xf32> -> vector<64x256xf32>
    %c0_71 = arith.constant 0 : index
    %c0_72 = arith.constant 0 : index
    %179 = vector.load %arg9[%c0_71, %c0_72] : memref<64x1xf32, #tpu.memory_space<vmem>>, vector<64x1xf32>
    %180 = vector.broadcast %179 : vector<64x1xf32> to vector<64x256xf32>
    %181 = arith.addf %178, %180 : vector<64x256xf32>
    %c0_73 = arith.constant 0 : index
    %c0_74 = arith.constant 0 : index
    %c0_75 = arith.constant 0 : index
    %182 = vector.load %arg1[%c0_73, %c0_74, %c0_75] : memref<1x64x256xf32, #tpu.memory_space<vmem>>, vector<1x64x256xf32>
    %183 = vector.shape_cast %182 : vector<1x64x256xf32> to vector<64x256xf32>
    %184 = arith.addf %183, %181 : vector<64x256xf32>
    %c0_76 = arith.constant 0 : index
    %c0_77 = arith.constant 0 : index
    %c0_78 = arith.constant 0 : index
    %185 = vector.load %arg10[%c0_76, %c0_77, %c0_78] : memref<1x64x256xf32, #tpu.memory_space<vmem>>, vector<1x64x256xf32>
    %186 = vector.shape_cast %185 : vector<1x64x256xf32> to vector<64x256xf32>
    %187 = vector.shape_cast %184 : vector<64x256xf32> to vector<1x64x256xf32>
    tpu.vector_store %arg10[%c0_76, %c0_77, %c0_78], %187 {strides = array<i32>} : memref<1x64x256xf32, #tpu.memory_space<vmem>>, vector<1x64x256xf32>,
    return
  }
  func.func @transform_0(%arg0: i32) -> (i32, i32, i32) {
    %c0_i32 = arith.constant 0 : i32
    %c0_i32_0 = arith.constant 0 : i32
    %c0_i32_1 = arith.constant 0 : i32
    return %arg0, %c0_i32, %c0_i32_0 : i32, i32, i32
  }
  func.func @transform_1(%arg0: i32) -> (i32, i32) {
    %c0_i32 = arith.constant 0 : i32
    %c0_i32_0 = arith.constant 0 : i32
    %c0_i32_1 = arith.constant 0 : i32
    return %c0_i32, %c0_i32_0 : i32, i32
  }
  func.func @transform_2(%arg0: i32) -> (i32, i32) {
    %c0_i32 = arith.constant 0 : i32
    %c0_i32_0 = arith.constant 0 : i32
    %c0_i32_1 = arith.constant 0 : i32
    return %c0_i32, %c0_i32_0 : i32, i32
  }
  func.func @transform_3(%arg0: i32) -> (i32, i32) {
    %c0_i32 = arith.constant 0 : i32
    %c0_i32_0 = arith.constant 0 : i32
    %c0_i32_1 = arith.constant 0 : i32
    return %c0_i32, %c0_i32_0 : i32, i32
  }
  func.func @transform_4(%arg0: i32) -> (i32, i32) {
    %c0_i32 = arith.constant 0 : i32
    %c0_i32_0 = arith.constant 0 : i32
    %c0_i32_1 = arith.constant 0 : i32
    return %c0_i32, %c0_i32_0 : i32, i32
  }
  func.func @transform_5(%arg0: i32) -> (i32, i32) {
    %c0_i32 = arith.constant 0 : i32
    %c0_i32_0 = arith.constant 0 : i32
    %c0_i32_1 = arith.constant 0 : i32
    return %c0_i32, %c0_i32_0 : i32, i32
  }
  func.func @transform_6(%arg0: i32) -> (i32, i32) {
    %c0_i32 = arith.constant 0 : i32
    %c0_i32_0 = arith.constant 0 : i32
    %c0_i32_1 = arith.constant 0 : i32
    return %c0_i32, %c0_i32_0 : i32, i32
  }
  func.func @transform_7(%arg0: i32) -> (i32, i32) {
    %c0_i32 = arith.constant 0 : i32
    %c0_i32_0 = arith.constant 0 : i32
    %c0_i32_1 = arith.constant 0 : i32
    return %c0_i32, %c0_i32_0 : i32, i32
  }
  func.func @transform_8(%arg0: i32) -> (i32, i32) {
    %c0_i32 = arith.constant 0 : i32
    %c0_i32_0 = arith.constant 0 : i32
    %c0_i32_1 = arith.constant 0 : i32
    return %c0_i32, %c0_i32_0 : i32, i32
  }
  func.func @transform_9(%arg0: i32) -> (i32, i32, i32) {
    %c0_i32 = arith.constant 0 : i32
    %c0_i32_0 = arith.constant 0 : i32
    %c0_i32_1 = arith.constant 0 : i32
    return %arg0, %c0_i32, %c0_i32_0 : i32, i32, i32
  }
}

</mosaic_0001>

<bundles_post_ra>
// kernel: tpu_custom_call.1
= control target key start
LH: loop header
LB: loop body
LE: loop exit
PB: predicated region body
PF: predicated region fallthrough
CT: control target
= control target key end

     0   :  { %14 = vsyncpa [#allocation5], 0  ;;  %s9965_s0 = inlined_call_operand.vmem [shape: f32[2,64,256], index: 0, kind: input, shape index: {}]   ;;  %s9966_s1 = inlined_call_operand.vmem [shape: f32[32,64], index: 1, kind: input, shape index: {}]   ;;  %s9967_s2 = inlined_call_operand.vmem [shape: f32[64,32], index: 2, kind: input, shape index: {}]   ;;  %s9968_s3 = inlined_call_operand.vmem [shape: f32[64,1], index: 3, kind: input, shape index: {}]   ;;  %s9969_s4 = inlined_call_operand.vmem [shape: f32[64,1], index: 4, kind: input, shape index: {}]   ;;  %s9970_s5 = inlined_call_operand.vmem [shape: bf16[192,64], index: 5, kind: input, shape index: {}]   ;;  %s9971_s6 = inlined_call_operand.vmem [shape: f32[192,1], index: 6, kind: input, shape index: {}]   ;;  %s9972_s7 = inlined_call_operand.vmem [shape: bf16[64,64], index: 7, kind: input, shape index: {}]   ;;  %s9973_s8 = inlined_call_operand.vmem [shape: f32[64,1], index: 8, kind: input, shape index: {}]   ;;  %s9974_s9 = inlined_call_operand.hbm [shape: f32[2,64,256], index: 9, kind: output, shape index: {}]  }
   0x1   :  { %16 = vsyncpa [#allocation5 + $0x1], 0  ;;  %s6583_s30 = smov 0   ;;  %s6585_s10 = smov 0  }
   0x2   :  { %s6587_s11 = smov 0   ;;  %s6589_s12 = smov 0  }
   0x3 LB: > { %s6604_s13 = sadd.s32 4294967295, %s6527_s12   ;;  %s5359_s14 = sadd.s32 4294967294, %s6527_s12   ;;  %s6527_s12 = sphi %s6589_s12, %s10273_s12   ;;  %s6523_s11 = sphi %s6587_s11, %s10272_s11   ;;  %s6519_s10 = sphi %s6585_s10, %s10271_s10   ;;  %s6515_s30 = sphi %s6583_s30, %s10270_s30  }
   0x4   : > { %s6608_s15 = sadd.s32 1, %s6527_s12   ;;  %s223_s16 = sadd.s32 1, %s6523_s11 }
   0x5   : > { %s220_s17 = ssub.s32 %s6527_s12, %s6608_s15  ;;  %p233_p0 = scmp.ne.s32.totalorder %s6523_s11, %s6519_s10 }
   0x6   : > { %p221_p1 = scmp.eq.s32.totalorder %s220_s17, 0  ;;  %p234_p2 = scmp.eq.s32.totalorder %s6604_s13, 1 }
   0x7   : > { %p239_p3 = scmp.ne.s32.totalorder %s6519_s10, %s6515_s30  ;;  %p240_p4 = scmp.eq.s32.totalorder %s5359_s14, 1 }
   0x8   : > { %s6619_s18 = scalar_select %p221_p1, %s6523_s11, %s223_s16  }
   0x9   : > { %p6621_p5 = por %p234_p2, %p233_p0  ;;  %p6625_p6 = por %p240_p4, %p239_p3 }
   0xa   : > { %p5362_p7 = scmp.ge.s32.totalorder %s6527_s12, 1  ;;  %p290_p8 = scmp.lt.s32.totalorder %s6527_s12, 3 }
   0xc   : > { %p291_p9 = pnand %p5362_p7, %p290_p8 }
   0xe   : > { %294 = sbr.rel (%p291_p9) target bundleno = 5106 (0x13f2), region = 56 }
  0x13   : > { %p326_p10 = scmp.lt.s32.totalorder %s6604_s13, 1  ;;  %v6705_v32 = vld [vmem:[%s9966_s1] sm:$0xff]  ;;  %vm384_vm0 = vcmask 523264   ;;  %v6712_v33 = vld [vmem:[%s9966_s1 + $0x8] sm:$0xff]  ;;  %v6719_v34 = vld [vmem:[%s9966_s1 + $0x10] sm:$0xff]  ;;  %v6529_v36 = vmov 512.0  }
  0x14   : > { %v6726_v35 = vld [vmem:[%s9966_s1 + $0x18] sm:$0xff]  ;;  %5919 = vrcp.f32 %v6529_v36  ;;  %v6739_v51 = vld [vmem:[%s9967_s2] sm:$0xff]  ;;  %vm437_vm2 = vcmask 261120   ;;  %v6746_v52 = vld [vmem:[%s9967_s2 + $0x8] sm:$0xff]  ;;  %v6530_v59 = vmov 0   ;;  %s323_s23 = sand.u32 1, %s6519_s10  }
  0x15   : > { %s327_s21 = scalar_select %p326_p10, %s6604_s13, 1  ;;  %v6753_v53 = vld [vmem:[%s9967_s2 + $0x10] sm:$0xff]  ;;  %v6760_v54 = vld [vmem:[%s9967_s2 + $0x18] sm:$0xff]  ;;  %v6767_v55 = vld [vmem:[%s9967_s2 + $0x20] sm:$0xff]  ;;  %5918 = vset.pattern.permute.xlu2 %v6530_v59  ;;  %5917 = vset.pattern.permute.xlu1 %v6530_v59 }
  0x16   : > { %v6774_v56 = vld [vmem:[%s9967_s2 + $0x28] sm:$0xff]  ;;  %v6781_v57 = vld [vmem:[%s9967_s2 + $0x30] sm:$0xff]  ;;  %v6788_v58 = vld [vmem:[%s9967_s2 + $0x38] sm:$0xff]  ;;  %5916 = vset.pattern.permute.xlu0 %v6530_v59  ;;  %s5363_s24 = sshll.u32 %s323_s23, 7  ;;  %s5872_s27 = sshll.u32 %s6604_s13, 7 }
  0x17   : > { %s5815_s22 = sshll.u32 %s327_s21, 7  ;;  %s9898_s26 = scalar_lea.vmem [#allocation4], %s5363_s24 }
  0x18   : > { %s6636_s25 = scalar_lea.vmem %s9965_s0, %s5815_s22  ;;  %s5290_s14 = scalar_lea.hbm %s9974_s9, %s5872_s27 }
  0x19   : > { %v6639_v0 = vld [vmem:[%s6636_s25 + $0x70] sm:$0xff]  ;;  %v6642_v1 = vld [vmem:[%s6636_s25 + $0x78] sm:$0xff]  ;;  %v6663_v9 = vld [vmem:[%s6636_s25 + $0x60] sm:$0xff]  ;;  %s5291_s16 = sshll.u32 %s9898_s26, 4  ;;  %s5293_s17 = sshll.u32 %s5290_s14, 4  ;;  %s5292_s16 = int_to_ptr.vmem [resolvable:$true] %s5291_s16  ;;  %s5294_s17 = int_to_ptr.hbm [resolvable:$true] %s5293_s17 }
  0x1a   : > { %v6645_v2 = vld [vmem:[%s6636_s25 + $0x50] sm:$0xff]  ;;  %v381_v3 = vadd.f32 %v6642_v1, %v6639_v0  ;;  %v6650_v4 = vld [vmem:[%s6636_s25 + $0x58] sm:$0xff]  ;;  %v6666_v10 = vld [vmem:[%s6636_s25 + $0x68] sm:$0xff]  ;;  %v5920_v38 = vpop.eup %5919  ;;  %s5279_s13 = scalar_lea.sflag [#allocation5], %s323_s23  ;;  %s6479_s21 = sshra.s32 %s5294_s17, 4  ;;  %s6480_s21 = int_to_ptr.hbm [resolvable:$true] %s6479_s21 }
  0x1b   : > { %v375_v5 = vadd.f32 %v6650_v4, %v6645_v2  ;;  %v6655_v6 = vld [vmem:[%s6636_s25 + $0x30] sm:$0xff]  ;;  %v6658_v7 = vld [vmem:[%s6636_s25 + $0x38] sm:$0xff]  ;;  %v6669_v11 = vld [vmem:[%s6636_s25 + $0x40] sm:$0xff]  ;;  %v378_v15 = vadd.f32 %v6666_v10, %v6663_v9  ;;  %v427_v39 = vmul.f32 512.0, %v5920_v38  ;;  %vm431_vm1 = vweird.f32 %v5920_v38  ;;  %s6481_s22 = scalar_lea.hbm %s6480_s21, 128  ;;  %s6485_s28 = scalar_lea.hbm %s9974_s9, 256 }
  0x1c   : > { %382 = vadd.xlane.f32.xlu0 %v381_v3  ;;  %v369_v8 = vadd.f32 %v6658_v7, %v6655_v6  ;;  %v6672_v12 = vld [vmem:[%s6636_s25 + $0x48] sm:$0xff]  ;;  %v6675_v13 = vld [vmem:[%s6636_s25 + $0x20] sm:$0xff]  ;;  %v6687_v18 = vld [vmem:[%s6636_s25 + $0x10] sm:$0xff]  ;;  %p6482_p11 = scmp.ne.s32.totalorder %s6480_s21, %s6481_s22  ;;  %p6486_p0 = scmp.lt.s32.totalorder %s6480_s21, %s9974_s9 }
  0x1d   : > { %376 = vadd.xlane.f32.xlu1 %v375_v5  ;;  %v6678_v14 = vld [vmem:[%s6636_s25 + $0x28] sm:$0xff]  ;;  %v372_v16 = vadd.f32 %v6672_v12, %v6669_v11  ;;  %v6690_v19 = vld [vmem:[%s6636_s25 + $0x18] sm:$0xff]  ;;  %v6693_v20 = vld [vmem:[%s6636_s25] sm:$0xff]  ;;  %v428_v41 = vsub.f32 1.0, %v427_v39  ;;  %p6487_p1 = scmp.lt.s32.totalorder %s6485_s28, %s6481_s22 }
  0x1e   : > { %370 = vadd.xlane.f32.xlu2 %v369_v8  ;;  %v366_v17 = vadd.f32 %v6678_v14, %v6675_v13  ;;  %v6696_v21 = vld [vmem:[%s6636_s25 + $0x8] sm:$0xff]  ;;  %v363_v22 = vadd.f32 %v6690_v19, %v6687_v18  ;;  %p6483_p12 = pnand %p6482_p11, %p6621_p5 }
  0x1f   : > { %v360_v23 = vadd.f32 %v6696_v21, %v6693_v20  ;;  %v429_v42 = vmul.f32 %v5920_v38, %v428_v41  ;;  %p6488_p2 = por %p6487_p1, %p6486_p0 }
  0x20   : > { %p6484_p13 = pneg %p6483_p12 }
  0x21   : > { %v430_v44 = vadd.f32 %v5920_v38, %v429_v42 }
  0x22   : > { %p6489_p3 = pnand %p6488_p2, %p6484_p13 }
  0x23   : > { %v6730_v45 = vsel %vm431_vm1, %v5920_v38, %v430_v44 }
  0x24   : > { %379 = vadd.xlane.f32.xlu0 %v378_v15 }
  0x25   : > { %373 = vadd.xlane.f32.xlu1 %v372_v16 }
  0x26   : > { %367 = vadd.xlane.f32.xlu2 %v366_v17 }
  0x2c   : > { %364 = vadd.xlane.f32.xlu0 %v363_v22 }
  0x2d   : > { %361 = vadd.xlane.f32.xlu1 %v360_v23 }
  0x8f   : > { %v383_v24 = vpop.xlane.xlu0 %382 }
  0x90   : > { %405 = vmatpush.msra.mxu0 %v383_v24  ;;  %v377_v25 = vpop.xlane.xlu1 %376 }
  0x91   : > { %v371_v26 = vpop.xlane.xlu2 %370 }
  0x97   : > { %v380_v27 = vpop.xlane.xlu0 %379 }
  0x98   : > { %406 = vmatpush.msra.mxu0 %v380_v27  ;;  %v374_v28 = vpop.xlane.xlu1 %373 }
  0x99   : > { %v368_v29 = vpop.xlane.xlu2 %367 }
  0x9a   : > { %407 = vmatpush.msra.mxu0 %v377_v25 }
  0x9c   : > { %408 = vmatpush.msra.mxu0 %v374_v28 }
  0x9e   : > { %409 = vmatpush.msra.mxu0 %v371_v26 }
  0x9f   : > { %v365_v30 = vpop.xlane.xlu0 %364 }
  0xa0   : > { %410 = vmatpush.msra.mxu0 %v368_v29  ;;  %v362_v31 = vpop.xlane.xlu1 %361 }
  0xa2   : > { %411 = vmatpush.msra.mxu0 %v365_v30 }
  0xa4   : > { %412 = vmatpush.msra.mxu0 %v362_v31 }
  0xa5   : > { %5366 = vmatmul.msk.f32.vlgmr.msra.gmra.mxu0 %vm384_vm0, %v6705_v32 }
  0xad   : > { %5367 = vmatmul.msk.f32.gmra.mxu0 %vm384_vm0, %v6712_v33 }
  0xb5   : > { %5368 = vmatmul.msk.f32.gmra.mxu0 %vm384_vm0, %v6719_v34 }
  0xbd   : > { %5369 = vmatmul.msk.f32.gmra.mxu0 %vm384_vm0, %v6726_v35 }
 0x122   : > { %v414_v37 = vpop.f32.mrf.mxu0 }
 0x123   : > { %v433_v50 = vmul.f32 %v6730_v45, %v414_v37 }
 0x12a   : > { %v417_v40 = vpop.f32.mrf.mxu0 }
 0x12b   : > { %v434_v49 = vmul.f32 %v6730_v45, %v417_v40 }
 0x132   : > { %v420_v43 = vpop.f32.mrf.mxu0 }
 0x133   : > { %v435_v48 = vmul.f32 %v6730_v45, %v420_v43 }
 0x13a   : > { %v423_v46 = vpop.f32.mrf.mxu0 }
 0x13b   : > { %v436_v47 = vmul.f32 %v6730_v45, %v423_v46 }
 0x13d   : > { %474 = vmatpush.msra.mxu1 %v436_v47 }
 0x13f   : > { %475 = vmatpush.msra.mxu1 %v435_v48 }
 0x141   : > { %476 = vmatpush.msra.mxu1 %v434_v49 }
 0x143   : > { %477 = vmatpush.msra.mxu1 %v433_v50 }
 0x144   : > { %5370 = vmatmul.msk.f32.vlgmr.msra.gmra.mxu1 %vm437_vm2, %v6739_v51 }
 0x14c   : > { %5371 = vmatmul.msk.f32.gmra.mxu1 %vm437_vm2, %v6746_v52 }
 0x154   : > { %5372 = vmatmul.msk.f32.gmra.mxu1 %vm437_vm2, %v6753_v53 }
 0x15c   : > { %5373 = vmatmul.msk.f32.gmra.mxu1 %vm437_vm2, %v6760_v54 }
 0x164   : > { %5374 = vmatmul.msk.f32.gmra.mxu1 %vm437_vm2, %v6767_v55 }
 0x16c   : > { %5375 = vmatmul.msk.f32.gmra.mxu1 %vm437_vm2, %v6774_v56 }
 0x174   : > { %5376 = vmatmul.msk.f32.gmra.mxu1 %vm437_vm2, %v6781_v57 }
 0x17c   : > { %5377 = vmatmul.msk.f32.gmra.mxu1 %vm437_vm2, %v6788_v58 }
 0x1c1   : > { %v479_v60 = vpop.f32.mrf.mxu1 }
 0x1c9   : > { %v482_v61 = vpop.f32.mrf.mxu1 }
 0x1d1   : > { %v485_v62 = vpop.f32.mrf.mxu1 }
 0x1d9   : > { %v488_v63 = vpop.f32.mrf.mxu1 }
 0x1e1   : > { %v491_v3 = vpop.f32.mrf.mxu1 }
 0x1e2   : > { %525 = vperm.xlu2 %5918, %v491_v3  }
 0x1e9   : > { %v494_v5 = vpop.f32.mrf.mxu1 }
 0x1ea   : > { %530 = vperm.xlu1 %5917, %v494_v5  }
 0x1f1   : > { %v497_v8 = vpop.f32.mrf.mxu1 }
 0x1f2   : > { %515 = vperm.xlu1 %5917, %v485_v62   ;;  %535 = vperm.xlu0 %5916, %v497_v8  }
 0x1f9   : > { %v500_v15 = vpop.f32.mrf.mxu1 }
 0x1fa   : > { %505 = vperm.xlu1 %5917, %v479_v60   ;;  %540 = vperm.xlu2 %5918, %v500_v15   ;;  %v879_v15 = vld [vmem:[%s9969_s4 + $0x30] sm:$0xff] }
 0x202   : > { %520 = vperm.xlu2 %5918, %v488_v63  }
 0x20a   : > { %510 = vperm.xlu2 %5918, %v482_v61  }
 0x23c   : > { %v526_v16 = vpop.permute.xlu2 %525 }
 0x254   : > { %v541_v17 = vpop.permute.xlu2 %540 }
 0x255   : > { %v6793_v22 = vsub.f32 %v6639_v0, %v541_v17  ;;  %v6796_v23 = vsub.f32 %v6642_v1, %v541_v17  ;;  %v813_v17 = vld [vmem:[%s9968_s3 + $0x20] sm:$0xff] }
 0x257   : > { %v573_v24 = vmul.f32 %v6793_v22, %v6793_v22  ;;  %v574_v25 = vmul.f32 %v6796_v23, %v6796_v23 }
 0x259   : > { %v596_v26 = vadd.f32 %v574_v25, %v573_v24  ;;  %v814_v24 = vld [vmem:[%s9968_s3 + $0x28] sm:$0xff] }
 0x25a   : > { %v878_v25 = vld [vmem:[%s9969_s4 + $0x28] sm:$0xff] }
 0x25b   : > { %597 = vadd.xlane.f32.xlu0 %v596_v26  ;;  %v811_v26 = vld [vmem:[%s9968_s3 + $0x10] sm:$0xff] }
 0x25c   : > { %v531_v27 = vpop.permute.xlu1 %530  ;;  %v521_v28 = vpop.permute.xlu2 %520 }
 0x25d   : > { %v6803_v29 = vsub.f32 %v6645_v2, %v531_v27  ;;  %v6806_v30 = vsub.f32 %v6650_v4, %v531_v27  ;;  %v6809_v0 = vsub.f32 %v6655_v6, %v521_v28  ;;  %v6812_v1 = vsub.f32 %v6658_v7, %v521_v28  ;;  %v877_v27 = vld [vmem:[%s9969_s4 + $0x20] sm:$0xff]  ;;  %v812_v28 = vld [vmem:[%s9968_s3 + $0x18] sm:$0xff] }
 0x25f   : > { %v569_v31 = vmul.f32 %v6803_v29, %v6803_v29  ;;  %v570_v36 = vmul.f32 %v6806_v30, %v6806_v30  ;;  %v565_v37 = vmul.f32 %v6809_v0, %v6809_v0  ;;  %v566_v2 = vmul.f32 %v6812_v1, %v6812_v1 }
 0x261   : > { %v590_v4 = vadd.f32 %v570_v36, %v569_v31  ;;  %v584_v38 = vadd.f32 %v566_v2, %v565_v37 }
 0x263   : > { %591 = vadd.xlane.f32.xlu1 %v590_v4  ;;  %585 = vadd.xlane.f32.xlu0 %v584_v38 }
 0x264   : > { %v516_v6 = vpop.permute.xlu1 %515  ;;  %v536_v39 = vpop.permute.xlu0 %535 }
 0x265   : > { %v6823_v7 = vsub.f32 %v6675_v13, %v516_v6  ;;  %v6826_v40 = vsub.f32 %v6678_v14, %v516_v6  ;;  %v6829_v41 = vsub.f32 %v6663_v9, %v536_v39  ;;  %v6832_v42 = vsub.f32 %v6666_v10, %v536_v39  ;;  %v511_v60 = vpop.permute.xlu2 %510 }
 0x266   : > { %v6843_v14 = vsub.f32 %v6669_v11, %v526_v16  ;;  %v6846_v9 = vsub.f32 %v6672_v12, %v526_v16  ;;  %v6863_v62 = vsub.f32 %v6687_v18, %v511_v60  ;;  %v816_v18 = vld [vmem:[%s9968_s3 + $0x38] sm:$0xff] }
 0x267   : > { %v563_v43 = vmul.f32 %v6823_v7, %v6823_v7  ;;  %v564_v44 = vmul.f32 %v6826_v40, %v6826_v40  ;;  %v571_v46 = vmul.f32 %v6829_v41, %v6829_v41  ;;  %v572_v13 = vmul.f32 %v6832_v42, %v6832_v42  ;;  %v880_v16 = vld [vmem:[%s9969_s4 + $0x38] sm:$0xff] }
 0x268   : > { %v567_v59 = vmul.f32 %v6843_v14, %v6843_v14  ;;  %v568_v11 = vmul.f32 %v6846_v9, %v6846_v9  ;;  %v561_v3 = vmul.f32 %v6863_v62, %v6863_v62 }
 0x269   : > { %v581_v10 = vadd.f32 %v564_v44, %v563_v43  ;;  %v593_v47 = vadd.f32 %v572_v13, %v571_v46 }
 0x26b   : > { %582 = vadd.xlane.f32.xlu1 %v581_v10  ;;  %594 = vadd.xlane.f32.xlu2 %v593_v47 }
 0x26c   : > { %v506_v48 = vpop.permute.xlu1 %505 }
 0x26d   : > { %v6849_v49 = vsub.f32 %v6693_v20, %v506_v48  ;;  %v6852_v50 = vsub.f32 %v6696_v21, %v506_v48  ;;  %v6866_v20 = vsub.f32 %v6690_v19, %v511_v60  ;;  %v587_v21 = vadd.f32 %v568_v11, %v567_v59  ;;  %v815_v19 = vld [vmem:[%s9968_s3 + $0x30] sm:$0xff] }
 0x26f   : > { %v559_v12 = vmul.f32 %v6849_v49, %v6849_v49  ;;  %v560_v61 = vmul.f32 %v6852_v50, %v6852_v50  ;;  %v562_v5 = vmul.f32 %v6866_v20, %v6866_v20 }
 0x271   : > { %v575_v63 = vadd.f32 %v560_v61, %v559_v12  ;;  %v578_v8 = vadd.f32 %v562_v5, %v561_v3 }
 0x273   : > { %588 = vadd.xlane.f32.xlu2 %v587_v21  ;;  %576 = vadd.xlane.f32.xlu0 %v575_v63 }
 0x27b   : > { %579 = vadd.xlane.f32.xlu2 %v578_v8 }
 0x284   : > { %854 = vperm.xlu1 %5917, %v816_v18  }
 0x287   : > { %849 = vperm.xlu0 %5916, %v815_v19  }
 0x28c   : > { %913 = vperm.xlu1 %5917, %v879_v15  }
 0x28f   : > { %918 = vperm.xlu0 %5916, %v880_v16  }
 0x293   : > { %839 = vperm.xlu2 %5918, %v813_v17  }
 0x294   : > { %844 = vperm.xlu1 %5917, %v814_v24  }
 0x297   : > { %908 = vperm.xlu0 %5916, %v878_v25  }
 0x29b   : > { %829 = vperm.xlu2 %5918, %v811_v26  }
 0x29c   : > { %903 = vperm.xlu1 %5917, %v877_v27  }
 0x2a4   : > { %834 = vperm.xlu1 %5917, %v812_v28  }
 0x2ce   : > { %v598_v31 = vpop.xlane.xlu0 %597 }
 0x2cf   : > { %607 = vmatpush.msra.mxu2 %v598_v31 }
 0x2d6   : > { %v592_v37 = vpop.xlane.xlu1 %591  ;;  %v586_v4 = vpop.xlane.xlu0 %585 }
 0x2de   : > { %v595_v36 = vpop.xlane.xlu2 %594  ;;  %v583_v38 = vpop.xlane.xlu1 %582 }
 0x2df   : > { %608 = vmatpush.msra.mxu2 %v595_v36 }
 0x2e1   : > { %609 = vmatpush.msra.mxu2 %v592_v37 }
 0x2e6   : > { %v589_v2 = vpop.xlane.xlu2 %588  ;;  %v577_v39 = vpop.xlane.xlu0 %576 }
 0x2e7   : > { %610 = vmatpush.msra.mxu2 %v589_v2 }
 0x2e9   : > { %611 = vmatpush.msra.mxu2 %v586_v4 }
 0x2eb   : > { %612 = vmatpush.msra.mxu2 %v583_v38 }
 0x2ee   : > { %v580_v6 = vpop.xlane.xlu2 %579 }
 0x2ef   : > { %613 = vmatpush.msra.mxu2 %v580_v6 }
 0x2f1   : > { %614 = vmatpush.msra.mxu2 %v577_v39 }
 0x2f2   : > { %5378 = vmatmul.msk.f32.vlgmr.msra.gmra.mxu2 %vm384_vm0, %v6705_v32 }
 0x2fa   : > { %5379 = vmatmul.msk.f32.gmra.mxu2 %vm384_vm0, %v6712_v33 }
 0x302   : > { %5380 = vmatmul.msk.f32.gmra.mxu2 %vm384_vm0, %v6719_v34 }
 0x30a   : > { %5381 = vmatmul.msk.f32.gmra.mxu2 %vm384_vm0, %v6726_v35 }
 0x375   : > { %v616_v43 = vpop.f32.mrf.mxu2 }
 0x376   : > { %v628_v33 = vmul.f32 %v616_v43, %v6730_v45 }
 0x37d   : > { %v619_v44 = vpop.f32.mrf.mxu2 }
 0x37e   : > { %v629_v32 = vmul.f32 %v619_v44, %v6730_v45 }
 0x385   : > { %v622_v46 = vpop.f32.mrf.mxu2 }
 0x386   : > { %v630_v47 = vmul.f32 %v622_v46, %v6730_v45 }
 0x38d   : > { %v625_v13 = vpop.f32.mrf.mxu2 }
 0x38e   : > { %v631_v10 = vmul.f32 %v625_v13, %v6730_v45 }
 0x390   : > { %644 = vmatpush.msra.mxu3 %v631_v10 }
 0x392   : > { %645 = vmatpush.msra.mxu3 %v630_v47 }
 0x394   : > { %646 = vmatpush.msra.mxu3 %v629_v32 }
 0x396   : > { %647 = vmatpush.msra.mxu3 %v628_v33 }
 0x397   : > { %5382 = vmatmul.msk.f32.vlgmr.msra.gmra.mxu3 %vm437_vm2, %v6739_v51 }
 0x39f   : > { %5383 = vmatmul.msk.f32.gmra.mxu3 %vm437_vm2, %v6746_v52 }
 0x3a7   : > { %5384 = vmatmul.msk.f32.gmra.mxu3 %vm437_vm2, %v6753_v53 }
 0x3af   : > { %5385 = vmatmul.msk.f32.gmra.mxu3 %vm437_vm2, %v6760_v54 }
 0x3b7   : > { %5386 = vmatmul.msk.f32.gmra.mxu3 %vm437_vm2, %v6767_v55 }
 0x3bf   : > { %5387 = vmatmul.msk.f32.gmra.mxu3 %vm437_vm2, %v6774_v56 }
 0x3c7   : > { %5388 = vmatmul.msk.f32.gmra.mxu3 %vm437_vm2, %v6781_v57 }
 0x3cf   : > { %5389 = vmatmul.msk.f32.gmra.mxu3 %vm437_vm2, %v6788_v58 }
 0x41a   : > { %v649_v34 = vpop.f32.mrf.mxu3 }
 0x41b   : > { %v650_v35 = vadd.f32 1e-05, %v649_v34 }
 0x41d   : > { %5921 = vrsqrt.f32 %v650_v35  ;;  %vm679_vm4 = vweird.f32 %v650_v35 }
 0x422   : > { %v652_v45 = vpop.f32.mrf.mxu3 }
 0x423   : > { %v5922_v51 = vpop.eup %5921  ;;  %v653_v52 = vadd.f32 1e-05, %v652_v45 }
 0x424   : > { %v674_v53 = vmul.f32 %v5922_v51, %v650_v35  ;;  %vm680_vm3 = vweird.f32 %v5922_v51 }
 0x425   : > { %5923 = vrsqrt.f32 %v653_v52  ;;  %vm681_vm5 = vmor %vm679_vm4, %vm680_vm3  ;;  %vm689_vm7 = vweird.f32 %v653_v52 }
 0x426   : > { %v675_v54 = vmul.f32 %v5922_v51, %v674_v53 }
 0x428   : > { %v676_v48 = vmul.f32 0.5, %v675_v54 }
 0x42a   : > { %v677_v55 = vsub.f32 1.5, %v676_v48  ;;  %v655_v59 = vpop.f32.mrf.mxu3 }
 0x42b   : > { %v5924_v56 = vpop.eup %5923  ;;  %v656_v11 = vadd.f32 1e-05, %v655_v59 }
 0x42c   : > { %v684_v60 = vmul.f32 %v5924_v56, %v653_v52  ;;  %v678_v57 = vmul.f32 %v5922_v51, %v677_v55  ;;  %vm690_vm6 = vweird.f32 %v5924_v56 }
 0x42d   : > { %5925 = vrsqrt.f32 %v656_v11  ;;  %vm691_vm8 = vmor %vm689_vm7, %vm690_vm6  ;;  %vm699_vm10 = vweird.f32 %v656_v11 }
 0x42e   : > { %v685_v58 = vmul.f32 %v5924_v56, %v684_v60  ;;  %v682_v12 = vsel %vm681_vm5, %v5922_v51, %v678_v57 }
 0x42f   : > { %755 = vperm.xlu0 %5916, %v682_v12  }
 0x430   : > { %v686_v61 = vmul.f32 0.5, %v685_v58 }
 0x432   : > { %v658_v21 = vpop.f32.mrf.mxu3  ;;  %v687_v63 = vsub.f32 1.5, %v686_v61 }
 0x433   : > { %v5926_v3 = vpop.eup %5925  ;;  %v659_v5 = vadd.f32 1e-05, %v658_v21 }
 0x434   : > { %v694_v8 = vmul.f32 %v5926_v3, %v656_v11  ;;  %v688_v18 = vmul.f32 %v5924_v56, %v687_v63  ;;  %vm700_vm9 = vweird.f32 %v5926_v3  ;;  %v876_v11 = vld [vmem:[%s9969_s4 + $0x18] sm:$0xff] }
 0x435   : > { %5927 = vrsqrt.f32 %v659_v5  ;;  %vm701_vm11 = vmor %vm699_vm10, %vm700_vm9  ;;  %vm709_vm13 = vweird.f32 %v659_v5 }
 0x436   : > { %v695_v19 = vmul.f32 %v5926_v3, %v694_v8  ;;  %v692_v15 = vsel %vm691_vm8, %v5924_v56, %v688_v18 }
 0x437   : > { %760 = vperm.xlu2 %5918, %v692_v15   ;;  %v875_v15 = vld [vmem:[%s9969_s4 + $0x10] sm:$0xff] }
 0x438   : > { %v696_v16 = vmul.f32 0.5, %v695_v19 }
 0x43a   : > { %v697_v17 = vsub.f32 1.5, %v696_v16  ;;  %v661_v24 = vpop.f32.mrf.mxu3 }
 0x43b   : > { %v5928_v25 = vpop.eup %5927  ;;  %v662_v26 = vadd.f32 1e-05, %v661_v24 }
 0x43c   : > { %v704_v27 = vmul.f32 %v5928_v25, %v659_v5  ;;  %v698_v28 = vmul.f32 %v5926_v3, %v697_v17  ;;  %vm710_vm12 = vweird.f32 %v5928_v25  ;;  %v962_v17 = vld [vmem:[%s9971_s6 + $0x18] sm:$0xff] }
 0x43d   : > { %5929 = vrsqrt.f32 %v662_v26  ;;  %vm711_vm14 = vmor %vm709_vm13, %vm710_vm12  ;;  %vm719_vm1 = vweird.f32 %v662_v26  ;;  %vm1145_vm12 = vcmask 130048  }
 0x43e   : > { %v705_v31 = vmul.f32 %v5928_v25, %v704_v27  ;;  %v702_v36 = vsel %vm701_vm11, %v5926_v3, %v698_v28  ;;  %v873_v3 = vld [vmem:[%s9969_s4] sm:$0xff]  ;;  %v961_v27 = vld [vmem:[%s9971_s6 + $0x10] sm:$0xff]  ;;  %v874_v28 = vld [vmem:[%s9969_s4 + $0x8] sm:$0xff] }
 0x43f   : > { %765 = vperm.xlu0 %5916, %v702_v36   ;;  %v959_v36 = vld [vmem:[%s9971_s6] sm:$0xff] }
 0x440   : > { %v706_v37 = vmul.f32 0.5, %v705_v31  ;;  %v960_v31 = vld [vmem:[%s9971_s6 + $0x8] sm:$0xff] }
 0x442   : > { %v664_v2 = vpop.f32.mrf.mxu3  ;;  %v707_v4 = vsub.f32 1.5, %v706_v37  ;;  %v964_v37 = vld [vmem:[%s9971_s6 + $0x28] sm:$0xff] }
 0x443   : > { %v5930_v38 = vpop.eup %5929  ;;  %v665_v6 = vadd.f32 1e-05, %v664_v2  ;;  %v963_v2 = vld [vmem:[%s9971_s6 + $0x20] sm:$0xff] }
 0x444   : > { %v714_v39 = vmul.f32 %v5930_v38, %v662_v26  ;;  %v708_v43 = vmul.f32 %v5928_v25, %v707_v4  ;;  %vm720_vm15 = vweird.f32 %v5930_v38  ;;  %v809_v26 = vld [vmem:[%s9968_s3] sm:$0xff]  ;;  %v5481_v4 = vld [vmem:[%s9971_s6 + $0x48] sm:$0xff] }
 0x445   : > { %5931 = vrsqrt.f32 %v665_v6  ;;  %vm721_vm2 = vmor %vm719_vm1, %vm720_vm15  ;;  %vm729_vm4 = vweird.f32 %v665_v6 }
 0x446   : > { %v715_v44 = vmul.f32 %v5930_v38, %v714_v39  ;;  %v712_v46 = vsel %vm711_vm14, %v5928_v25, %v708_v43  ;;  %v810_v25 = vld [vmem:[%s9968_s3 + $0x8] sm:$0xff]  ;;  %v5479_v39 = vld [vmem:[%s9971_s6 + $0x38] sm:$0xff]  ;;  %v5478_v43 = vld [vmem:[%s9971_s6 + $0x30] sm:$0xff] }
 0x447   : > { %770 = vperm.xlu2 %5918, %v712_v46  }
 0x448   : > { %v716_v13 = vmul.f32 0.5, %v715_v44  ;;  %v6978_v44 = vpop.permute.xlu0 %849 }
 0x44a   : > { %v717_v10 = vsub.f32 1.5, %v716_v13  ;;  %v667_v47 = vpop.f32.mrf.mxu3  ;;  %v5482_v13 = vld [vmem:[%s9971_s6 + $0x50] sm:$0xff] }
 0x44b   : > { %v5932_v32 = vpop.eup %5931  ;;  %v668_v33 = vadd.f32 1e-05, %v667_v47 }
 0x44c   : > { %v724_v34 = vmul.f32 %v5932_v32, %v665_v6  ;;  %v718_v35 = vmul.f32 %v5930_v38, %v717_v10  ;;  %vm730_vm3 = vweird.f32 %v5932_v32  ;;  %v840_v6 = vpop.permute.xlu2 %839  ;;  %v855_v10 = vpop.permute.xlu1 %854 }
 0x44d   : > { %5933 = vrsqrt.f32 %v668_v33  ;;  %vm731_vm5 = vmor %vm729_vm4, %vm730_vm3  ;;  %vm739_vm7 = vweird.f32 %v668_v33 }
 0x44e   : > { %v725_v45 = vmul.f32 %v5932_v32, %v724_v34  ;;  %v722_v51 = vsel %vm721_vm2, %v5930_v38, %v718_v35  ;;  %v5480_v38 = vld [vmem:[%s9971_s6 + $0x40] sm:$0xff] }
 0x44f   : > { %775 = vperm.xlu0 %5916, %v722_v51   ;;  %v5575_v51 = vld [vmem:[%s9971_s6 + $0x78] sm:$0xff] }
 0x450   : > { %v726_v52 = vmul.f32 0.5, %v725_v45  ;;  %v919_v47 = vpop.permute.xlu0 %918 }
 0x452   : > { %v670_v53 = vpop.f32.mrf.mxu3  ;;  %v727_v54 = vsub.f32 1.5, %v726_v52 }
 0x453   : > { %v5934_v48 = vpop.eup %5933  ;;  %v671_v55 = vadd.f32 1e-05, %v670_v53 }
 0x454   : > { %v734_v59 = vmul.f32 %v5934_v48, %v668_v33  ;;  %v728_v56 = vmul.f32 %v5932_v32, %v727_v54  ;;  %vm740_vm6 = vweird.f32 %v5934_v48  ;;  %v6980_v46 = vpop.permute.xlu2 %829  ;;  %v5574_v33 = vld [vmem:[%s9971_s6 + $0x70] sm:$0xff]  ;;  %v6990_v34 = vpop.permute.xlu1 %913 }
 0x455   : > { %5935 = vrsqrt.f32 %v671_v55  ;;  %vm741_vm8 = vmor %vm739_vm7, %vm740_vm6  ;;  %vm749_vm9 = vweird.f32 %v671_v55 }
 0x456   : > { %v735_v60 = vmul.f32 %v5934_v48, %v734_v59  ;;  %v732_v57 = vsel %vm731_vm5, %v5932_v32, %v728_v56 }
 0x457   : > { %780 = vperm.xlu2 %5918, %v732_v57   ;;  %898 = vperm.xlu0 %5916, %v876_v11   ;;  %v5572_v11 = vld [vmem:[%s9971_s6 + $0x60] sm:$0xff] }
 0x458   : > { %v736_v58 = vmul.f32 0.5, %v735_v60  ;;  %v909_v35 = vpop.permute.xlu0 %908 }
 0x45a   : > { %v737_v12 = vsub.f32 1.5, %v736_v58 }
 0x45b   : > { %v5936_v61 = vpop.eup %5935 }
 0x45c   : > { %v744_v21 = vmul.f32 %v5936_v61, %v671_v55  ;;  %v738_v63 = vmul.f32 %v5934_v48, %v737_v12  ;;  %vm750_vm10 = vweird.f32 %v5936_v61  ;;  %v845_v55 = vpop.permute.xlu1 %844 }
 0x45d   : > { %vm751_vm11 = vmor %vm749_vm9, %vm750_vm10 }
 0x45e   : > { %v745_v5 = vmul.f32 %v5936_v61, %v744_v21  ;;  %v742_v8 = vsel %vm741_vm8, %v5934_v48, %v738_v63 }
 0x45f   : > { %785 = vperm.xlu1 %5917, %v742_v8   ;;  %883 = vperm.xlu0 %5916, %v873_v3  }
 0x460   : > { %v746_v18 = vmul.f32 0.5, %v745_v5 }
 0x462   : > { %v747_v19 = vsub.f32 1.5, %v746_v18 }
 0x464   : > { %v748_v16 = vmul.f32 %v5936_v61, %v747_v19 }
 0x466   : > { %v752_v24 = vsel %vm751_vm11, %v5936_v61, %v748_v16  ;;  %v5573_v61 = vld [vmem:[%s9971_s6 + $0x68] sm:$0xff] }
 0x467   : > { %893 = vperm.xlu1 %5917, %v875_v15   ;;  %790 = vperm.xlu2 %5918, %v752_v24  }
 0x468   : > { %990 = vperm.xlu0 %5916, %v962_v17  }
 0x46f   : > { %824 = vperm.xlu1 %5917, %v810_v25   ;;  %819 = vperm.xlu2 %5918, %v809_v26   ;;  %v5576_v25 = vld [vmem:[%s9971_s6 + $0x80] sm:$0xff] }
 0x477   : > { %985 = vperm.xlu1 %5917, %v961_v27   ;;  %888 = vperm.xlu2 %5918, %v874_v28  }
 0x47f   : > { %980 = vperm.xlu1 %5917, %v960_v31   ;;  %975 = vperm.xlu2 %5918, %v959_v36  }
 0x487   : > { %1000 = vperm.xlu1 %5917, %v964_v37   ;;  %995 = vperm.xlu2 %5918, %v963_v2  }
 0x48f   : > { %2012 = vperm.xlu1 %5917, %v5481_v4   ;;  %2007 = vperm.xlu2 %5918, %v5480_v38   ;;  %v5577_v4 = vld [vmem:[%s9971_s6 + $0x88] sm:$0xff] }
 0x491   : > { %v6985_v32 = vpop.permute.xlu2 %760 }
 0x497   : > { %2002 = vperm.xlu1 %5917, %v5479_v39   ;;  %1997 = vperm.xlu2 %5918, %v5478_v43  }
 0x49f   : > { %2017 = vperm.xlu1 %5917, %v5482_v13  }
 0x4a1   : > { %v771_v45 = vpop.permute.xlu2 %770  ;;  %v756_v52 = vpop.permute.xlu0 %755 }
 0x4a2   : > { %v799_v18 = vmul.f32 %v771_v45, %v6809_v0  ;;  %v800_v19 = vmul.f32 %v771_v45, %v6812_v1  ;;  %v794_v39 = vmul.f32 %v756_v52, %v6852_v50 }
 0x4a7   : > { %3028 = vperm.xlu1 %5917, %v5574_v33  }
 0x4af   : > { %3033 = vperm.xlu1 %5917, %v5575_v51  }
 0x4b1   : > { %v781_v53 = vpop.permute.xlu2 %780  ;;  %v766_v12 = vpop.permute.xlu0 %765 }
 0x4b2   : > { %v803_v54 = vmul.f32 %v781_v53, %v6803_v29  ;;  %v804_v48 = vmul.f32 %v781_v53, %v6806_v30  ;;  %v904_v29 = vpop.permute.xlu1 %903  ;;  %v797_v53 = vmul.f32 %v766_v12, %v6823_v7 }
 0x4b4   : > { %v867_v59 = vmul.f32 %v845_v55, %v803_v54  ;;  %v868_v56 = vmul.f32 %v845_v55, %v804_v48  ;;  %v798_v54 = vmul.f32 %v766_v12, %v6826_v40  ;;  %v5668_v48 = vld [vmem:[%s9971_s6 + $0xa0] sm:$0xff]  ;;  %v861_v7 = vmul.f32 %v6980_v46, %v797_v53 }
 0x4b6   : > { %v931_v60 = vadd.f32 %v909_v35, %v867_v59  ;;  %v932_v57 = vadd.f32 %v909_v35, %v868_v56  ;;  %v862_v40 = vmul.f32 %v6980_v46, %v798_v54 }
 0x4b7   : > { %3018 = vperm.xlu1 %5917, %v5572_v11  }
 0x4b8   : > { %v942_v58 = vpack.c.bf16 %v932_v57, %v931_v60  ;;  %v5669_v60 = vld [vmem:[%s9971_s6 + $0xa8] sm:$0xff]  ;;  %v796_v57 = vmul.f32 %v6985_v32, %v6866_v20 }
 0x4ba   : > { %950 = vst [vmem:[#allocation2 + $0x28] sm:$0xff] %v942_v58  ;;  %v835_v28 = vpop.permute.xlu1 %834 }
 0x4bb   : > { %v863_v31 = vmul.f32 %v835_v28, %v799_v18  ;;  %v864_v0 = vmul.f32 %v835_v28, %v800_v19 }
 0x4bf   : > { %3023 = vperm.xlu1 %5917, %v5573_v61  }
 0x4c1   : > { %v776_v30 = vpop.permute.xlu0 %775  ;;  %v791_v21 = vpop.permute.xlu2 %790  ;;  %v5824_v20 = vld [vmem:[#allocation2 + $0x24] sm:$0xf0] }
 0x4c2   : > { %v801_v63 = vmul.f32 %v776_v30, %v6843_v14  ;;  %v802_v3 = vmul.f32 %v776_v30, %v6846_v9  ;;  %v807_v5 = vmul.f32 %v791_v21, %v6793_v22  ;;  %v808_v8 = vmul.f32 %v791_v21, %v6796_v23 }
 0x4c4   : > { %v865_v15 = vmul.f32 %v840_v6, %v801_v63  ;;  %v866_v16 = vmul.f32 %v840_v6, %v802_v3  ;;  %v871_v17 = vmul.f32 %v855_v10, %v807_v5  ;;  %v872_v24 = vmul.f32 %v855_v10, %v808_v8 }
 0x4c5   : > { %v793_v6 = vmul.f32 %v756_v52, %v6849_v49 }
 0x4c6   : > { %v929_v26 = vadd.f32 %v904_v29, %v865_v15  ;;  %v930_v14 = vadd.f32 %v904_v29, %v866_v16  ;;  %v935_v27 = vadd.f32 %v919_v47, %v871_v17  ;;  %v936_v9 = vadd.f32 %v919_v47, %v872_v24 }
 0x4c7   : > { %3038 = vperm.xlu1 %5917, %v5576_v25  }
 0x4c8   : > { %v941_v22 = vpack.c.bf16 %v930_v14, %v929_v26  ;;  %v944_v23 = vpack.c.bf16 %v936_v9, %v935_v27 }
 0x4c9   : > { %v899_v36 = vpop.permute.xlu0 %898  ;;  %v820_v38 = vpop.permute.xlu2 %819 }
 0x4ca   : > { %949 = vst [vmem:[#allocation2 + $0x20] sm:$0xff] %v941_v22  ;;  %v927_v1 = vadd.f32 %v899_v36, %v863_v31  ;;  %v928_v37 = vadd.f32 %v899_v36, %v864_v0  ;;  %v857_v43 = vmul.f32 %v820_v38, %v793_v6  ;;  %v858_v13 = vmul.f32 %v820_v38, %v794_v39  ;;  %v5667_v22 = vld [vmem:[%s9971_s6 + $0x98] sm:$0xff]  ;;  %v5818_v38 = vld [vmem:[%s9970_s5 + $0x10] sm:$0xff] }
 0x4cb   : > { %952 = vst [vmem:[#allocation2 + $0x38] sm:$0xff] %v944_v23 }
 0x4cc   : > { %v940_v2 = vpack.c.bf16 %v928_v37, %v927_v1 }
 0x4ce   : > { %948 = vst [vmem:[#allocation2 + $0x18] sm:$0xff] %v940_v2  ;;  %v5816_v2 = vld [vmem:[%s9970_s5] sm:$0xff] }
 0x4cf   : > { %3043 = vperm.xlu1 %5917, %v5577_v4   ;;  %v5817_v4 = vld [vmem:[%s9970_s5 + $0x8] sm:$0xff] }
 0x4d1   : > { %v786_v10 = vpop.permute.xlu1 %785  ;;  %v884_v47 = vpop.permute.xlu0 %883  ;;  %v5420_v8 = vld [vmem:[#allocation2 + $0x20] sm:$0xf]  ;;  %v5823_v18 = vld [vmem:[#allocation2 + $0x24] sm:$0xf] }
 0x4d2   : > { %v805_v33 = vmul.f32 %v786_v10, %v6829_v41  ;;  %v806_v35 = vmul.f32 %v786_v10, %v6832_v42  ;;  %v921_v45 = vadd.f32 %v884_v47, %v857_v43  ;;  %v922_v51 = vadd.f32 %v884_v47, %v858_v13  ;;  %v5826_v58 = vld [vmem:[#allocation2 + $0x34] sm:$0xf0]  ;;  %v5430_v29 = vld [vmem:[#allocation2 + $0x38] sm:$0xf0]  ;;  %v889_v5 = vpop.permute.xlu2 %888 }
 0x4d3   : > { %v5421_v17 = vor.u32 %v5824_v20, %v5420_v8  ;;  %v5055_v8 = vld [vmem:[%s9973_s8 + $0x18] sm:$0xff] }
 0x4d4   : > { %v869_v49 = vmul.f32 %v6978_v44, %v805_v33  ;;  %v870_v50 = vmul.f32 %v6978_v44, %v806_v35  ;;  %v937_v52 = vpack.c.bf16 %v922_v51, %v921_v45 }
 0x4d5   : > { %v5822_v14 = vld [vmem:[#allocation2 + $0x14] sm:$0xf0]  ;;  %v5414_v27 = vld [vmem:[#allocation2 + $0x18] sm:$0xf0] }
 0x4d6   : > { %v933_v55 = vadd.f32 %v6990_v34, %v869_v49  ;;  %v934_v41 = vadd.f32 %v6990_v34, %v870_v50  ;;  %945 = vst [vmem:[#allocation2] sm:$0xff] %v937_v52  ;;  %v795_v34 = vmul.f32 %v6985_v32, %v6863_v62  ;;  %v5666_v62 = vld [vmem:[%s9971_s6 + $0x90] sm:$0xff]  ;;  %v5422_v32 = vld [vmem:[#allocation2 + $0x28] sm:$0xf0] }
 0x4d7   : > { %4049 = vperm.xlu1 %5917, %v5668_v48   ;;  %v5425_v24 = vor.u32 %v5823_v18, %v5422_v32  ;;  %v5058_v32 = vld [vmem:[%s9973_s8 + $0x30] sm:$0xff] }
 0x4d8   : > { %v943_v42 = vpack.c.bf16 %v934_v41, %v933_v55 }
 0x4d9   : > { %v894_v59 = vpop.permute.xlu1 %893 }
 0x4da   : > { %951 = vst [vmem:[#allocation2 + $0x30] sm:$0xff] %v943_v42  ;;  %v925_v56 = vadd.f32 %v894_v59, %v861_v7  ;;  %v926_v44 = vadd.f32 %v894_v59, %v862_v40  ;;  %v976_v13 = vpop.permute.xlu2 %975  ;;  %v991_v55 = vpop.permute.xlu0 %990 }
 0x4dc   : > { %v939_v11 = vpack.c.bf16 %v926_v44, %v925_v56 }
 0x4dd   : > { %v5404_v23 = vld [vmem:[#allocation2] sm:$0xf]  ;;  %v5819_v0 = vld [vmem:[#allocation2 + $0x4] sm:$0xf] }
 0x4de   : > { %947 = vst [vmem:[#allocation2 + $0x10] sm:$0xff] %v939_v11 }
 0x4df   : > { %4054 = vperm.xlu1 %5917, %v5669_v60  }
 0x4e1   : > { %v825_v12 = vpop.permute.xlu1 %824  ;;  %v5428_v46 = vld [vmem:[#allocation2 + $0x30] sm:$0xf]  ;;  %v5825_v61 = vld [vmem:[#allocation2 + $0x34] sm:$0xf] }
 0x4e2   : > { %v859_v30 = vmul.f32 %v825_v12, %v795_v34  ;;  %v860_v21 = vmul.f32 %v825_v12, %v796_v57  ;;  %v5429_v63 = vor.u32 %v5826_v58, %v5428_v46  ;;  %v5433_v3 = vor.u32 %v5825_v61, %v5430_v29  ;;  %v5483_v46 = vld [vmem:[%s9971_s6 + $0x58] sm:$0xff]  ;;  %v5052_v29 = vld [vmem:[%s9973_s8] sm:$0xff] }
 0x4e4   : > { %v923_v19 = vadd.f32 %v889_v5, %v859_v30  ;;  %v924_v15 = vadd.f32 %v889_v5, %v860_v21  ;;  %1071 = vmatpush.bf16.msrb.mxu0 %v5429_v63  ;;  %1095 = vmatpush.bf16.msrb.mxu2 %v5433_v3  ;;  %v5053_v21 = vld [vmem:[%s9973_s8 + $0x8] sm:$0xff]  ;;  %v5054_v3 = vld [vmem:[%s9973_s8 + $0x10] sm:$0xff] }
 0x4e5   : > { %v5412_v25 = vld [vmem:[#allocation2 + $0x10] sm:$0xf]  ;;  %v5821_v26 = vld [vmem:[#allocation2 + $0x14] sm:$0xf] }
 0x4e6   : > { %v938_v16 = vpack.c.bf16 %v924_v15, %v923_v19  ;;  %v5413_v9 = vor.u32 %v5822_v14, %v5412_v25  ;;  %v5417_v28 = vor.u32 %v5821_v26, %v5414_v27  ;;  %v5056_v19 = vld [vmem:[%s9973_s8 + $0x20] sm:$0xff] }
 0x4e7   : > { %4039 = vperm.xlu1 %5917, %v5666_v62   ;;  %v5057_v62 = vld [vmem:[%s9973_s8 + $0x28] sm:$0xff] }
 0x4e8   : > { %946 = vst [vmem:[#allocation2 + $0x8] sm:$0xff] %v938_v16  ;;  %1072 = vmatpush.bf16.msrb.mxu0 %v5421_v17  ;;  %1096 = vmatpush.bf16.msrb.mxu2 %v5425_v24  ;;  %v5059_v17 = vld [vmem:[%s9973_s8 + $0x38] sm:$0xff] }
 0x4e9   : > { %v986_v6 = vpop.permute.xlu1 %985 }
 0x4ec   : > { %1073 = vmatpush.bf16.msrb.mxu0 %v5413_v9  ;;  %1097 = vmatpush.bf16.msrb.mxu2 %v5417_v28 }
 0x4ef   : > { %4044 = vperm.xlu1 %5917, %v5667_v22   ;;  %v5820_v31 = vld [vmem:[#allocation2 + $0x4] sm:$0xf0]  ;;  %v5406_v36 = vld [vmem:[#allocation2 + $0x8] sm:$0xf0] }
 0x4f0   : > { %v5405_v1 = vor.u32 %v5820_v31, %v5404_v23  ;;  %v5409_v37 = vor.u32 %v5819_v0, %v5406_v36 }
 0x4f1   : > { %v981_v10 = vpop.permute.xlu1 %980 }
 0x4f2   : > { %1074 = vmatpush.bf16.msrb.mxu0 %v5405_v1  ;;  %1098 = vmatpush.bf16.msrb.mxu2 %v5409_v37 }
 0x4f5   : > { %5434 = vmatmul.msk.bf16.vlgmr.msrb.gmra.mxu0 %vm384_vm0, %v5816_v2  ;;  %5437 = vmatmul.msk.bf16.vlgmr.msrb.gmra.mxu2 %vm384_vm0, %v5816_v2 }
 0x505   : > { %5435 = vmatmul.msk.bf16.gmra.mxu0 %vm384_vm0, %v5817_v4  ;;  %5438 = vmatmul.msk.bf16.gmra.mxu2 %vm384_vm0, %v5817_v4 }
 0x515   : > { %5436 = vmatmul.msk.bf16.gmra.mxu0 %vm384_vm0, %v5818_v38  ;;  %5439 = vmatmul.msk.bf16.gmra.mxu2 %vm384_vm0, %v5818_v38 }
 0x572   : > { %v1076_v39 = vpop.f32.mrf.mxu0 }
 0x573   : > { %v1077_v33 = vadd.f32 %v1076_v39, %v976_v13 }
 0x578   : > { %v1100_v43 = vpop.f32.mrf.mxu2 }
 0x579   : > { %v1101_v53 = vadd.f32 %v1100_v43, %v976_v13 }
 0x57a   : > { %v1078_v47 = vpop.f32.mrf.mxu0 }
 0x57b   : > { %v1079_v35 = vadd.f32 %v1078_v47, %v981_v10 }
 0x57d   : > { %v1115_v45 = vpack.c.bf16 %v1079_v35, %v1077_v33 }
 0x57f   : > { %1201 = vmatpush.bf16.msrb.mxu1 %v1115_v45 }
 0x580   : > { %v1102_v51 = vpop.f32.mrf.mxu2 }
 0x581   : > { %v1103_v54 = vadd.f32 %v1102_v51, %v981_v10 }
 0x582   : > { %v1081_v49 = vpop.f32.mrf.mxu0 }
 0x583   : > { %v1116_v50 = vpack.c.bf16 %v1103_v54, %v1101_v53  ;;  %v1082_v7 = vadd.f32 %v1081_v49, %v986_v6 }
 0x585   : > { %1290 = vmatpush.bf16.msrb.mxu3 %v1116_v50 }
 0x588   : > { %v1105_v52 = vpop.f32.mrf.mxu2 }
 0x589   : > { %v1106_v40 = vadd.f32 %v1105_v52, %v986_v6 }
 0x58a   : > { %v1083_v48 = vpop.f32.mrf.mxu0 }
 0x58b   : > { %v1084_v41 = vadd.f32 %v1083_v48, %v991_v55 }
 0x58d   : > { %v1117_v56 = vpack.c.bf16 %v1084_v41, %v1082_v7 }
 0x590   : > { %v1107_v42 = vpop.f32.mrf.mxu2 }
 0x591   : > { %v1108_v59 = vadd.f32 %v1107_v42, %v991_v55 }
 0x593   : > { %v1118_v44 = vpack.c.bf16 %v1108_v59, %v1106_v40 }
 0x595   : > { %1121 = vxpose.binary.xlu0.c.b16.start.end [1/2] (short) %v1118_v44, %v1117_v56, 128 }
 0x641   : > { %v1129_v11 = vpop.trf.xlu0 }
 0x642   : > { %5440 = vmatmul.msk.bf16.vlgmr.msrb.gmra.mxu1 %vm1145_vm12, %v1129_v11  ;;  %5456 = vmatmul.msk.bf16.vlgmr.msrb.gmra.mxu3 %vm1145_vm12, %v1129_v11 }
 0x649   : > { %v1130_v60 = vpop.trf.xlu0 }
 0x651   : > { %v1131_v34 = vpop.trf.xlu0 }
 0x652   : > { %5441 = vmatmul.msk.bf16.gmra.mxu1 %vm1145_vm12, %v1131_v34  ;;  %5457 = vmatmul.msk.bf16.gmra.mxu3 %vm1145_vm12, %v1131_v34 }
 0x659   : > { %v1132_v57 = vpop.trf.xlu0 }
 0x661   : > { %v1133_v58 = vpop.trf.xlu0 }
 0x662   : > { %5442 = vmatmul.msk.bf16.gmra.mxu1 %vm1145_vm12, %v1133_v58  ;;  %5458 = vmatmul.msk.bf16.gmra.mxu3 %vm1145_vm12, %v1133_v58 }
 0x669   : > { %v1134_v12 = vpop.trf.xlu0 }
 0x671   : > { %v1135_v61 = vpop.trf.xlu0 }
 0x672   : > { %5443 = vmatmul.msk.bf16.gmra.mxu1 %vm1145_vm12, %v1135_v61  ;;  %5459 = vmatmul.msk.bf16.gmra.mxu3 %vm1145_vm12, %v1135_v61 }
 0x673   : > { %2022 = vperm.xlu0 %5916, %v5483_v46  }
 0x679   : > { %v1136_v30 = vpop.trf.xlu0 }
 0x67b   : > { %5062 = vperm.xlu0 %5916, %v5052_v29  }
 0x681   : > { %v1137_v63 = vpop.trf.xlu0 }
 0x682   : > { %5444 = vmatmul.msk.bf16.gmra.mxu1 %vm1145_vm12, %v1137_v63  ;;  %5460 = vmatmul.msk.bf16.gmra.mxu3 %vm1145_vm12, %v1137_v63 }
 0x683   : > { %5067 = vperm.xlu0 %5916, %v5053_v21  }
 0x689   : > { %v1138_v5 = vpop.trf.xlu0 }
 0x68b   : > { %5072 = vperm.xlu0 %5916, %v5054_v3  }
 0x691   : > { %v1139_v18 = vpop.trf.xlu0 }
 0x692   : > { %5445 = vmatmul.msk.bf16.gmra.mxu1 %vm1145_vm12, %v1139_v18  ;;  %5461 = vmatmul.msk.bf16.gmra.mxu3 %vm1145_vm12, %v1139_v18 }
 0x693   : > { %5077 = vperm.xlu0 %5916, %v5055_v8  }
 0x699   : > { %v1140_v15 = vpop.trf.xlu0 }
 0x69b   : > { %5082 = vperm.xlu0 %5916, %v5056_v19  }
 0x6a1   : > { %v1141_v20 = vpop.trf.xlu0 }
 0x6a2   : > { %5446 = vmatmul.msk.bf16.gmra.mxu1 %vm1145_vm12, %v1141_v20  ;;  %5462 = vmatmul.msk.bf16.gmra.mxu3 %vm1145_vm12, %v1141_v20 }
 0x6a3   : > { %5087 = vperm.xlu0 %5916, %v5057_v62  }
 0x6a9   : > { %v1142_v16 = vpop.trf.xlu0 }
 0x6ab   : > { %5092 = vperm.xlu0 %5916, %v5058_v32  }
 0x6b1   : > { %v1143_v24 = vpop.trf.xlu0 }
 0x6b2   : > { %5447 = vmatmul.msk.bf16.gmra.mxu1 %vm1145_vm12, %v1143_v24  ;;  %5463 = vmatmul.msk.bf16.gmra.mxu3 %vm1145_vm12, %v1143_v24 }
 0x6b3   : > { %5097 = vperm.xlu0 %5916, %v5059_v17  }
 0x6b9   : > { %v1144_v50 = vpop.trf.xlu0 }
 0x6bf   : > { %v7101_v25 = vpop.f32.mrf.mxu1 }
 0x6c2   : > { %5448 = vmatmul.msk.bf16.gmra.mxu1 %vm1145_vm12, %v1130_v60  ;;  %5464 = vmatmul.msk.bf16.gmra.mxu3 %vm1145_vm12, %v1130_v60 }
 0x6c5   : > { %v7105_v26 = vpop.f32.mrf.mxu3 }
 0x6c7   : > { %v7107_v14 = vpop.f32.mrf.mxu1 }
 0x6cd   : > { %v7109_v27 = vpop.f32.mrf.mxu3 }
 0x6ce   : > { %10062 = vst [vmem:[#allocation7_spill] sm:$0xff] %v7109_v27 }
 0x6cf   : > { %v7111_v9 = vpop.f32.mrf.mxu1 }
 0x6d0   : > { %10063 = vst [vmem:[#allocation8_spill] sm:$0xff] %v7111_v9  ;;  %v1372_v20 = vmax.f32 %v7101_v25, %v7111_v9 }
 0x6d2   : > { %5449 = vmatmul.msk.bf16.gmra.mxu1 %vm1145_vm12, %v1132_v57  ;;  %5465 = vmatmul.msk.bf16.gmra.mxu3 %vm1145_vm12, %v1132_v57 }
 0x6d5   : > { %v7115_v28 = vpop.f32.mrf.mxu3 }
 0x6d6   : > { %10064 = vst [vmem:[#allocation9_spill] sm:$0xff] %v7115_v28 }
 0x6d7   : > { %v7117_v22 = vpop.f32.mrf.mxu1 }
 0x6d8   : > { %10065 = vst [vmem:[#allocation10_spill] sm:$0xff] %v7117_v22  ;;  %v1373_v62 = vmax.f32 %v7107_v14, %v7117_v22 }
 0x6dd   : > { %v7119_v23 = vpop.f32.mrf.mxu3 }
 0x6de   : > { %10066 = vst [vmem:[#allocation11_spill] sm:$0xff] %v7119_v23 }
 0x6df   : > { %v7121_v31 = vpop.f32.mrf.mxu1 }
 0x6e2   : > { %5450 = vmatmul.msk.bf16.gmra.mxu1 %vm1145_vm12, %v1134_v12  ;;  %5466 = vmatmul.msk.bf16.gmra.mxu3 %vm1145_vm12, %v1134_v12 }
 0x6e5   : > { %v7125_v0 = vpop.f32.mrf.mxu3 }
 0x6e7   : > { %v7127_v36 = vpop.f32.mrf.mxu1 }
 0x6e8   : > { %v1375_v32 = vmax.f32 %v1373_v62, %v7127_v36 }
 0x6ed   : > { %v7129_v1 = vpop.f32.mrf.mxu3 }
 0x6ef   : > { %v7131_v37 = vpop.f32.mrf.mxu1 }
 0x6f2   : > { %5451 = vmatmul.msk.bf16.gmra.mxu1 %vm1145_vm12, %v1136_v30  ;;  %5467 = vmatmul.msk.bf16.gmra.mxu3 %vm1145_vm12, %v1136_v30 }
 0x6f5   : > { %v7135_v2 = vpop.f32.mrf.mxu3 }
 0x6f7   : > { %v7137_v4 = vpop.f32.mrf.mxu1 }
 0x6f8   : > { %10067 = vst [vmem:[#allocation12_spill] sm:$0xff] %v7137_v4  ;;  %v1377_v17 = vmax.f32 %v1375_v32, %v7137_v4  ;;  %v1410_v4 = vmax.f32 %v7109_v27, %v7119_v23 }
 0x6fd   : > { %v7139_v38 = vpop.f32.mrf.mxu3 }
 0x6fe   : > { %10068 = vst [vmem:[#allocation13_spill] sm:$0xff] %v7139_v38 }
 0x6ff   : > { %v7141_v6 = vpop.f32.mrf.mxu1 }
 0x702   : > { %5452 = vmatmul.msk.bf16.gmra.mxu1 %vm1145_vm12, %v1138_v5  ;;  %5468 = vmatmul.msk.bf16.gmra.mxu3 %vm1145_vm12, %v1138_v5 }
 0x705   : > { %v7145_v39 = vpop.f32.mrf.mxu3 }
 0x707   : > { %v7147_v43 = vpop.f32.mrf.mxu1 }
 0x70d   : > { %v7149_v13 = vpop.f32.mrf.mxu3 }
 0x70e   : > { %10069 = vst [vmem:[#allocation14_spill] sm:$0xff] %v7149_v13 }
 0x70f   : > { %v7151_v10 = vpop.f32.mrf.mxu1 }
 0x712   : > { %5453 = vmatmul.msk.bf16.gmra.mxu1 %vm1145_vm12, %v1140_v15  ;;  %5469 = vmatmul.msk.bf16.gmra.mxu3 %vm1145_vm12, %v1140_v15 }
 0x715   : > { %v7155_v47 = vpop.f32.mrf.mxu3 }
 0x717   : > { %v7157_v33 = vpop.f32.mrf.mxu1 }
 0x71d   : > { %v7159_v35 = vpop.f32.mrf.mxu3 }
 0x71f   : > { %v7161_v45 = vpop.f32.mrf.mxu1 }
 0x722   : > { %5454 = vmatmul.msk.bf16.gmra.mxu1 %vm1145_vm12, %v1142_v16  ;;  %5470 = vmatmul.msk.bf16.gmra.mxu3 %vm1145_vm12, %v1142_v16  ;;  %v1374_v16 = vmax.f32 %v1372_v20, %v7121_v31 }
 0x725   : > { %v7165_v51 = vpop.f32.mrf.mxu3 }
 0x727   : > { %v7167_v53 = vpop.f32.mrf.mxu1 }
 0x72d   : > { %v7169_v54 = vpop.f32.mrf.mxu3 }
 0x72e   : > { %10070 = vst [vmem:[#allocation15_spill] sm:$0xff] %v7169_v54 }
 0x72f   : > { %v7171_v49 = vpop.f32.mrf.mxu1 }
 0x732   : > { %5455 = vmatmul.msk.bf16.gmra.mxu1 %vm1145_vm12, %v1144_v50  ;;  %5471 = vmatmul.msk.bf16.gmra.mxu3 %vm1145_vm12, %v1144_v50  ;;  %v1376_v50 = vmax.f32 %v1374_v16, %v7131_v37 }
 0x735   : > { %v7175_v52 = vpop.f32.mrf.mxu3 }
 0x737   : > { %v7177_v48 = vpop.f32.mrf.mxu1 }
 0x738   : > { %10071 = vst [vmem:[#allocation16_spill] sm:$0xff] %v7177_v48 }
 0x73d   : > { %v7179_v55 = vpop.f32.mrf.mxu3 }
 0x73e   : > { %10072 = vst [vmem:[#allocation17_spill] sm:$0xff] %v7179_v55 }
 0x73f   : > { %v7181_v41 = vpop.f32.mrf.mxu1 }
 0x745   : > { %v7183_v42 = vpop.f32.mrf.mxu3 }
 0x746   : > { %10073 = vst [vmem:[#allocation18_spill] sm:$0xff] %v7183_v42 }
 0x747   : > { %v7185_v7 = vpop.f32.mrf.mxu1 }
 0x74d   : > { %v7187_v40 = vpop.f32.mrf.mxu3 }
 0x74e   : > { %10074 = vst [vmem:[#allocation19_spill] sm:$0xff] %v7187_v40 }
 0x74f   : > { %v7189_v59 = vpop.f32.mrf.mxu1 }
 0x755   : > { %v7191_v56 = vpop.f32.mrf.mxu3 }
 0x757   : > { %v7193_v44 = vpop.f32.mrf.mxu1 }
 0x75d   : > { %v7195_v11 = vpop.f32.mrf.mxu3 }
 0x75e   : > { %10075 = vst [vmem:[#allocation20_spill] sm:$0xff] %v7195_v11 }
 0x75f   : > { %v7197_v60 = vpop.f32.mrf.mxu1 }
 0x765   : > { %v7199_v34 = vpop.f32.mrf.mxu3 }
 0x767   : > { %v7201_v57 = vpop.f32.mrf.mxu1 }
 0x76d   : > { %v7203_v58 = vpop.f32.mrf.mxu3 }
 0x76f   : > { %v7205_v12 = vpop.f32.mrf.mxu1 }
 0x775   : > { %v7207_v46 = vpop.f32.mrf.mxu3 }
 0x776   : > { %10076 = vst [vmem:[#allocation21_spill] sm:$0xff] %v7207_v46 }
 0x777   : > { %v7209_v61 = vpop.f32.mrf.mxu1 }
 0x77d   : > { %v7213_v30 = vpop.f32.mrf.mxu3 }
 0x77e   : > { %10077 = vst [vmem:[#allocation22_spill] sm:$0xff] %v7213_v30 }
 0x77f   : > { %v7211_v29 = vpop.f32.mrf.mxu1 }
 0x785   : > { %v7217_v63 = vpop.f32.mrf.mxu3 }
 0x786   : > { %10078 = vst [vmem:[#allocation23_spill] sm:$0xff] %v7217_v63 }
 0x787   : > { %v7215_v21 = vpop.f32.mrf.mxu1 }
 0x78d   : > { %v7221_v5 = vpop.f32.mrf.mxu3 }
 0x78e   : > { %10079 = vst [vmem:[#allocation24_spill] sm:$0xff] %v7221_v5 }
 0x78f   : > { %v7219_v3 = vpop.f32.mrf.mxu1 }
 0x795   : > { %v7225_v18 = vpop.f32.mrf.mxu3 }
 0x796   : > { %10080 = vst [vmem:[#allocation25_spill] sm:$0xff] %v7225_v18  ;;  %v1379_v18 = vmax.f32 %v1377_v17, %v7147_v43 }
 0x797   : > { %v7223_v8 = vpop.f32.mrf.mxu1 }
 0x798   : > { %v1381_v63 = vmax.f32 %v1379_v18, %v7157_v33  ;;  %v1409_v18 = vmax.f32 %v7105_v26, %v7115_v28 }
 0x79a   : > { %v1383_v62 = vmax.f32 %v1381_v63, %v7167_v53 }
 0x79c   : > { %v1385_v32 = vmax.f32 %v1383_v62, %v7177_v48  ;;  %v1411_v62 = vmax.f32 %v1409_v18, %v7125_v0 }
 0x79d   : > { %v7229_v15 = vpop.f32.mrf.mxu3 }
 0x79e   : > { %10081 = vst [vmem:[#allocation26_spill] sm:$0xff] %v7229_v15  ;;  %v1378_v15 = vmax.f32 %v1376_v50, %v7141_v6  ;;  %v1387_v17 = vmax.f32 %v1385_v32, %v7185_v7  ;;  %v1413_v27 = vmax.f32 %v1411_v62, %v7135_v2 }
 0x79f   : > { %v7227_v19 = vpop.f32.mrf.mxu1 }
 0x7a0   : > { %v1380_v9 = vmax.f32 %v1378_v15, %v7151_v10  ;;  %v1412_v15 = vmax.f32 %v1410_v4, %v7129_v1 }
 0x7a2   : > { %v1382_v20 = vmax.f32 %v1380_v9, %v7161_v45  ;;  %v1389_v9 = vmax.f32 %v1387_v17, %v7193_v44  ;;  %v1414_v48 = vmax.f32 %v1412_v15, %v7139_v38  ;;  %v1415_v17 = vmax.f32 %v1413_v27, %v7145_v39 }
 0x7a4   : > { %v1384_v16 = vmax.f32 %v1382_v20, %v7171_v49  ;;  %v1391_v20 = vmax.f32 %v1389_v9, %v7201_v57  ;;  %v1416_v28 = vmax.f32 %v1414_v48, %v7149_v13  ;;  %v1417_v9 = vmax.f32 %v1415_v17, %v7155_v47 }
 0x7a5   : > { %v7244_v22 = vpop.f32.mrf.mxu3 }
 0x7a6   : > { %v1386_v63 = vmax.f32 %v1384_v16, %v7181_v41  ;;  %v1393_v16 = vmax.f32 %v1391_v20, %v7209_v61  ;;  %v1418_v18 = vmax.f32 %v1416_v28, %v7159_v35 }
 0x7a7   : > { %v7238_v24 = vpop.f32.mrf.mxu1 }
 0x7a8   : > { %v1388_v23 = vmax.f32 %v1386_v63, %v7189_v59  ;;  %v1395_v63 = vmax.f32 %v1393_v16, %v7215_v21  ;;  %v1420_v38 = vmax.f32 %v1418_v18, %v7169_v54 }
 0x7aa   : > { %v1390_v4 = vmax.f32 %v1388_v23, %v7197_v60  ;;  %v1397_v48 = vmax.f32 %v1395_v63, %v7223_v8  ;;  %v1419_v23 = vmax.f32 %v1417_v9, %v7165_v51  ;;  %v1422_v20 = vmax.f32 %v1420_v38, %v7179_v55  ;;  %v10082_v55 = vld [vmem:[#allocation23_spill] sm:$0xff] }
 0x7ac   : > { %v1392_v15 = vmax.f32 %v1390_v4, %v7205_v12  ;;  %v1399_v28 = vmax.f32 %v1397_v48, %v7238_v24  ;;  %v1421_v4 = vmax.f32 %v1419_v23, %v7175_v52  ;;  %v1424_v16 = vmax.f32 %v1422_v20, %v7187_v40 }
 0x7ad   : > { %v7265_v32 = vpop.f32.mrf.mxu3 }
 0x7ae   : > { %v1394_v62 = vmax.f32 %v1392_v15, %v7211_v29  ;;  %v1423_v15 = vmax.f32 %v1421_v4, %v7183_v42  ;;  %v1426_v63 = vmax.f32 %v1424_v16, %v7195_v11  ;;  %v10083_v42 = vld [vmem:[#allocation26_spill] sm:$0xff] }
 0x7af   : > { %v7254_v50 = vpop.f32.mrf.mxu1 }
 0x7b0   : > { %v1396_v27 = vmax.f32 %v1394_v62, %v7219_v3  ;;  %v1425_v38 = vmax.f32 %v1423_v15, %v7191_v56  ;;  %v1428_v62 = vmax.f32 %v1426_v63, %v7203_v58 }
 0x7b2   : > { %v1398_v17 = vmax.f32 %v1396_v27, %v7227_v19  ;;  %v1427_v23 = vmax.f32 %v1425_v38, %v7199_v34  ;;  %v1430_v20 = vmax.f32 %v1428_v62, %v7213_v30 }
 0x7b4   : > { %v1400_v9 = vmax.f32 %v1398_v17, %v7254_v50  ;;  %v1429_v27 = vmax.f32 %v1427_v23, %v7207_v46  ;;  %v10084_v17 = vld [vmem:[#allocation25_spill] sm:$0xff] }
 0x7b5   : > { %v7286_v54 = vpop.f32.mrf.mxu3 }
 0x7b6   : > { %v1431_v4 = vmax.f32 %v1429_v27, %v10082_v55  ;;  %v1086_v27 = vpop.f32.mrf.mxu0 }
 0x7b7   : > { %v1280_v13 = vpop.f32.mrf.mxu1 }
 0x7b8   : > { %v1401_v18 = vmax.f32 %v1399_v28, %v1280_v13  ;;  %v1432_v28 = vmax.f32 %v1430_v20, %v7221_v5  ;;  %v1433_v15 = vmax.f32 %v1431_v4, %v10084_v17 }
 0x7ba   : > { %v1402_v48 = vmax.f32 %v1400_v9, %v1401_v18  ;;  %v1434_v16 = vmax.f32 %v1432_v28, %v10083_v42  ;;  %v1435_v9 = vmax.f32 %v1433_v15, %v7244_v22  ;;  %v7311_v15 = vpop.permute.xlu1 %1000 }
 0x7bc   : > { %v1403_v40 = vrot.slane %v1402_v48, 4  ;;  %v1436_v63 = vmax.f32 %v1434_v16, %v7265_v32  ;;  %v1437_v62 = vmax.f32 %v1435_v9, %v7286_v54 }
 0x7bd   : > { %v7299_v11 = vpop.f32.mrf.mxu3 }
 0x7be   : > { %v1404_v18 = vmax.f32 %v1402_v48, %v1403_v40  ;;  %v1438_v38 = vmax.f32 %v1436_v63, %v7299_v11  ;;  %v1088_v48 = vpop.f32.mrf.mxu0  ;;  %v1110_v63 = vpop.f32.mrf.mxu2 }
 0x7bf   : > { %v1089_v9 = vadd.f32 %v1088_v48, %v7311_v15 }
 0x7c0   : > { %v1405_v23 = vrot.slane %v1404_v18, 2  ;;  %v1439_v20 = vmax.f32 %v1437_v62, %v1438_v38  ;;  %v996_v38 = vpop.permute.xlu2 %995 }
 0x7c1   : > { %v1087_v62 = vadd.f32 %v1086_v27, %v996_v38 }
 0x7c2   : > { %v1406_v5 = vmax.f32 %v1404_v18, %v1405_v23  ;;  %v1440_v30 = vrot.slane %v1439_v20, 4 }
 0x7c4   : > { %v1407_v55 = vrot.slane %v1406_v5, 1  ;;  %v1441_v28 = vmax.f32 %v1439_v20, %v1440_v30  ;;  %v7314_v30 = vadd.f32 %v1110_v63, %v996_v38  ;;  %v10085_v20 = vld [vmem:[#allocation8_spill] sm:$0xff] }
 0x7c6   : > { %v7306_v42 = vmax.f32 %v1406_v5, %v1407_v55  ;;  %v1442_v46 = vrot.slane %v1441_v28, 2  ;;  %v7316_v55 = vpack.c.bf16 %v1089_v9, %v1087_v62 }
 0x7c8   : > { %v1506_v4 = vsub.f32 %v7254_v50, %v7306_v42  ;;  %v1508_v40 = vsub.f32 %v1280_v13, %v7306_v42  ;;  %v1443_v16 = vmax.f32 %v1441_v28, %v1442_v46  ;;  %v1446_v50 = vsub.f32 %v7101_v25, %v7306_v42  ;;  %v10087_v25 = vld [vmem:[#allocation12_spill] sm:$0xff] }
 0x7c9   : > { %v1448_v13 = vsub.f32 %v7107_v14, %v7306_v42  ;;  %v1450_v28 = vsub.f32 %v10085_v20, %v7306_v42  ;;  %v1454_v27 = vsub.f32 %v7121_v31, %v7306_v42  ;;  %v1456_v48 = vsub.f32 %v7127_v36, %v7306_v42  ;;  %v10088_v20 = vld [vmem:[#allocation16_spill] sm:$0xff] }
 0x7ca   : > { %v1540_v18 = vpack.c.bf16 %v1508_v40, %v1506_v4  ;;  %v1444_v23 = vrot.slane %v1443_v16, 1  ;;  %v10086_v4 = vld [vmem:[#allocation10_spill] sm:$0xff]  ;;  %v1458_v63 = vsub.f32 %v7131_v37, %v7306_v42  ;;  %v1460_v9 = vsub.f32 %v10087_v25, %v7306_v42 }
 0x7cb   : > { %v1452_v40 = vsub.f32 %v10086_v4, %v7306_v42  ;;  %v1464_v38 = vsub.f32 %v7147_v43, %v7306_v42  ;;  %v1466_v31 = vsub.f32 %v7151_v10, %v7306_v42  ;;  %v1468_v36 = vsub.f32 %v7157_v33, %v7306_v42 }
 0x7cc   : > { %v1602_v5 = vunpack.c.l.bf16 %v1540_v18  ;;  %v1604_v46 = vunpack.c.h.bf16 %v1540_v18  ;;  %v7334_v14 = vmax.f32 %v1443_v16, %v1444_v23  ;;  %v1462_v18 = vsub.f32 %v7141_v6, %v7306_v42 }
 0x7cd   : > { %v1470_v37 = vsub.f32 %v7161_v45, %v7306_v42  ;;  %v1472_v16 = vsub.f32 %v7167_v53, %v7306_v42  ;;  %v1474_v23 = vsub.f32 %v7171_v49, %v7306_v42  ;;  %v1476_v43 = vsub.f32 %v10088_v20, %v7306_v42 }
 0x7ce   : > { %v1726_v62 = vmul.f32 1.442695, %v1602_v5  ;;  %v1730_v6 = vmul.f32 1.442695, %v1604_v46  ;;  %v1478_v10 = vsub.f32 %v7181_v41, %v7306_v42  ;;  %v1480_v33 = vsub.f32 %v7185_v7, %v7306_v42 }
 0x7cf   : > { %v1482_v5 = vsub.f32 %v7189_v59, %v7306_v42  ;;  %v1484_v45 = vsub.f32 %v7193_v44, %v7306_v42  ;;  %v1507_v53 = vsub.f32 %v7286_v54, %v7334_v14  ;;  %v1509_v49 = vsub.f32 %v7299_v11, %v7334_v14 }
 0x7d0   : > { %v1486_v46 = vsub.f32 %v7197_v60, %v7306_v42  ;;  %v1488_v41 = vsub.f32 %v7201_v57, %v7306_v42  ;;  %v1490_v7 = vsub.f32 %v7205_v12, %v7306_v42  ;;  %v1492_v59 = vsub.f32 %v7209_v61, %v7306_v42 }
 0x7d1   : > { %5937 = vpow2.f32 %v1726_v62  ;;  %v1494_v44 = vsub.f32 %v7211_v29, %v7306_v42  ;;  %v1496_v54 = vsub.f32 %v7215_v21, %v7306_v42  ;;  %v1498_v11 = vsub.f32 %v7219_v3, %v7306_v42 }
 0x7d2   : > { %5939 = vpow2.f32 %v1730_v6  ;;  %v1500_v60 = vsub.f32 %v7223_v8, %v7306_v42  ;;  %v1502_v57 = vsub.f32 %v7227_v19, %v7306_v42  ;;  %v1504_v12 = vsub.f32 %v7238_v24, %v7306_v42 }
 0x7d3   : > { %v1541_v61 = vpack.c.bf16 %v1509_v49, %v1507_v53  ;;  %v7384_v4 = vpack.c.bf16 %v1448_v13, %v1446_v50  ;;  %v7386_v29 = vpack.c.bf16 %v1452_v40, %v1450_v28  ;;  %v7388_v25 = vpack.c.bf16 %v1456_v48, %v1454_v27 }
 0x7d4   : > { %v7390_v21 = vpack.c.bf16 %v1460_v9, %v1458_v63  ;;  %v7392_v3 = vpack.c.bf16 %v1464_v38, %v1462_v18  ;;  %v7394_v62 = vpack.c.bf16 %v1468_v36, %v1466_v31  ;;  %v7396_v8 = vpack.c.bf16 %v1472_v16, %v1470_v37  ;;  %v10089_v9 = vld [vmem:[#allocation7_spill] sm:$0xff]  ;;  %v10090_v37 = vld [vmem:[#allocation9_spill] sm:$0xff] }
 0x7d5   : > { %v7398_v6 = vpack.c.bf16 %v1476_v43, %v1474_v23  ;;  %v7400_v19 = vpack.c.bf16 %v1480_v33, %v1478_v10  ;;  %v7402_v42 = vpack.c.bf16 %v1484_v45, %v1482_v5  ;;  %v7404_v24 = vpack.c.bf16 %v1488_v41, %v1486_v46  ;;  %v10091_v43 = vld [vmem:[#allocation11_spill] sm:$0xff]  ;;  %v10092_v45 = vld [vmem:[#allocation13_spill] sm:$0xff]  ;;  %v10093_v46 = vld [vmem:[#allocation14_spill] sm:$0xff] }
 0x7d6   : > { %v7406_v50 = vpack.c.bf16 %v1492_v59, %v1490_v7  ;;  %v7408_v13 = vpack.c.bf16 %v1496_v54, %v1494_v44  ;;  %v7410_v28 = vpack.c.bf16 %v1500_v60, %v1498_v11  ;;  %v7412_v40 = vpack.c.bf16 %v1504_v12, %v1502_v57  ;;  %v10094_v54 = vld [vmem:[#allocation15_spill] sm:$0xff]  ;;  %v10095_v60 = vld [vmem:[#allocation17_spill] sm:$0xff] }
 0x7d7   : > { %v7414_v27 = vpop.eup %5937  ;;  %v1603_v48 = vunpack.c.l.bf16 %v1541_v61  ;;  %v1447_v63 = vsub.f32 %v7105_v26, %v7334_v14  ;;  %v1449_v18 = vsub.f32 %v10089_v9, %v7334_v14  ;;  %v1542_v38 = vunpack.c.l.bf16 %v7384_v4  ;;  %v10099_v9 = vld [vmem:[#allocation21_spill] sm:$0xff] }
 0x7d8   : > { %v7421_v31 = vpop.eup %5939  ;;  %v1605_v36 = vunpack.c.h.bf16 %v1541_v61  ;;  %v1451_v16 = vsub.f32 %v10090_v37, %v7334_v14  ;;  %v1544_v23 = vunpack.c.h.bf16 %v7384_v4  ;;  %v1546_v20 = vunpack.c.l.bf16 %v7386_v29  ;;  %v10097_v61 = vld [vmem:[#allocation19_spill] sm:$0xff]  ;;  %v10098_v4 = vld [vmem:[#allocation20_spill] sm:$0xff] }
 0x7d9   : > { %v1453_v10 = vsub.f32 %v10091_v43, %v7334_v14  ;;  %v1455_v26 = vsub.f32 %v7125_v0, %v7334_v14  ;;  %v1457_v33 = vsub.f32 %v7129_v1, %v7334_v14  ;;  %v1459_v5 = vsub.f32 %v7135_v2, %v7334_v14  ;;  %v10101_v43 = vld [vmem:[#allocation23_spill] sm:$0xff] }
 0x7da   : > { %v1461_v53 = vsub.f32 %v10092_v45, %v7334_v14  ;;  %v1463_v49 = vsub.f32 %v7145_v39, %v7334_v14  ;;  %v1465_v41 = vsub.f32 %v10093_v46, %v7334_v14  ;;  %v1467_v7 = vsub.f32 %v7155_v47, %v7334_v14  ;;  %v10096_v47 = vld [vmem:[#allocation18_spill] sm:$0xff] }
 0x7db   : > { %v1728_v59 = vmul.f32 1.442695, %v1603_v48  ;;  %v1469_v0 = vsub.f32 %v7159_v35, %v7334_v14  ;;  %v1471_v1 = vsub.f32 %v7165_v51, %v7334_v14  ;;  %v1511_v2 = vpack.c.bf16 %v1449_v18, %v1447_v63 }
 0x7dc   : > { %v1732_v44 = vmul.f32 1.442695, %v1605_v36  ;;  %v1473_v11 = vsub.f32 %v10094_v54, %v7334_v14  ;;  %v1475_v39 = vsub.f32 %v7175_v52, %v7334_v14  ;;  %v1477_v57 = vsub.f32 %v10095_v60, %v7334_v14  ;;  %v10100_v36 = vld [vmem:[#allocation22_spill] sm:$0xff]  ;;  %v10102_v54 = vld [vmem:[#allocation24_spill] sm:$0xff] }
 0x7dd   : > { %v1479_v12 = vsub.f32 %v10096_v47, %v7334_v14  ;;  %v1481_v35 = vsub.f32 %v10097_v61, %v7334_v14  ;;  %v1483_v51 = vsub.f32 %v7191_v56, %v7334_v14  ;;  %v1485_v48 = vsub.f32 %v10098_v4, %v7334_v14  ;;  %v10103_v60 = vld [vmem:[#allocation26_spill] sm:$0xff] }
 0x7de   : > { %v1487_v63 = vsub.f32 %v7199_v34, %v7334_v14  ;;  %v1489_v52 = vsub.f32 %v7203_v58, %v7334_v14  ;;  %v1491_v18 = vsub.f32 %v10099_v9, %v7334_v14  ;;  %v1493_v37 = vsub.f32 %v10100_v36, %v7334_v14 }
 0x7df   : > { %5941 = vpow2.f32 %v1728_v59  ;;  %v1495_v45 = vsub.f32 %v10101_v43, %v7334_v14  ;;  %v7471_v56 = vpack.c.bf16 %v1453_v10, %v1451_v16  ;;  %v1543_v46 = vunpack.c.l.bf16 %v1511_v2 }
 0x7e0   : > { %5943 = vpow2.f32 %v1732_v44  ;;  %v1497_v34 = vsub.f32 %v10102_v54, %v7334_v14  ;;  %v1499_v58 = vsub.f32 %v10084_v17, %v7334_v14  ;;  %v1501_v47 = vsub.f32 %v10103_v60, %v7334_v14 }
 0x7e1   : > { %v1503_v61 = vsub.f32 %v7244_v22, %v7334_v14  ;;  %v1505_v59 = vsub.f32 %v7265_v32, %v7334_v14  ;;  %v7483_v4 = vpack.c.bf16 %v1457_v33, %v1455_v26  ;;  %v1545_v16 = vunpack.c.h.bf16 %v1511_v2 }
 0x7e2   : > { %v7485_v10 = vpack.c.bf16 %v1461_v53, %v1459_v5  ;;  %v7487_v44 = vpack.c.bf16 %v1465_v41, %v1463_v49  ;;  %v7489_v9 = vpack.c.bf16 %v1469_v0, %v1467_v7  ;;  %v1606_v36 = vmul.f32 1.442695, %v1542_v38 }
 0x7e3   : > { %v7491_v17 = vpack.c.bf16 %v1473_v11, %v1471_v1  ;;  %v7493_v43 = vpack.c.bf16 %v1477_v57, %v1475_v39  ;;  %v1547_v54 = vunpack.c.l.bf16 %v7471_v56  ;;  %v1608_v22 = vmul.f32 1.442695, %v1543_v46 }
 0x7e4   : > { %v7496_v60 = vpack.c.bf16 %v1481_v35, %v1479_v12  ;;  %v7498_v32 = vpack.c.bf16 %v1485_v48, %v1483_v51  ;;  %v1570_v14 = vunpack.c.l.bf16 %v7398_v6  ;;  %v1610_v26 = vmul.f32 1.442695, %v1544_v23 }
 0x7e5   : > { %v7501_v33 = vpop.eup %5941  ;;  %v7503_v5 = vpack.c.bf16 %v1489_v52, %v1487_v63  ;;  %v7505_v53 = vpack.c.bf16 %v1493_v37, %v1491_v18  ;;  %v1548_v38 = vunpack.c.h.bf16 %v7386_v29  ;;  %v1612_v49 = vmul.f32 1.442695, %v1545_v16 }
 0x7e6   : > { %v7508_v41 = vpop.eup %5943  ;;  %v7510_v7 = vpack.c.bf16 %v1497_v34, %v1495_v45  ;;  %v1572_v0 = vunpack.c.h.bf16 %v7398_v6  ;;  %5945 = vpow2.f32 %v1606_v36  ;;  %v1614_v1 = vmul.f32 1.442695, %v1546_v20 }
 0x7e7   : > { %v7513_v2 = vpack.c.bf16 %v1501_v47, %v1499_v58  ;;  %v1566_v23 = vunpack.c.l.bf16 %v7396_v8  ;;  %5947 = vpow2.f32 %v1608_v22  ;;  %v1616_v11 = vmul.f32 1.442695, %v1547_v54 }
 0x7e8   : > { %v7516_v39 = vpack.c.bf16 %v1505_v59, %v1503_v61  ;;  %v1568_v57 = vunpack.c.h.bf16 %v7396_v8  ;;  %5949 = vpow2.f32 %v1610_v26  ;;  %v1662_v29 = vmul.f32 1.442695, %v1570_v14 }
 0x7e9   : > { %v1549_v12 = vunpack.c.h.bf16 %v7471_v56  ;;  %v1550_v35 = vunpack.c.l.bf16 %v7388_v25  ;;  %5951 = vpow2.f32 %v1612_v49  ;;  %v1618_v6 = vmul.f32 1.442695, %v1548_v38 }
 0x7ea   : > { %v1551_v20 = vunpack.c.l.bf16 %v7483_v4  ;;  %v1552_v51 = vunpack.c.h.bf16 %v7388_v25  ;;  %5953 = vpow2.f32 %v1614_v1  ;;  %v1666_v48 = vmul.f32 1.442695, %v1572_v0 }
 0x7eb   : > { %v1562_v63 = vunpack.c.l.bf16 %v7394_v62  ;;  %5955 = vpow2.f32 %v1616_v11  ;;  %v1654_v52 = vmul.f32 1.442695, %v1566_v23  ;;  %v7526_v8 = vpack.c.bf16 %v7421_v31, %v7414_v27 }
 0x7ec   : > { %v7528_v18 = vpop.eup %5945  ;;  %v1553_v37 = vunpack.c.h.bf16 %v7483_v4  ;;  %v1564_v45 = vunpack.c.h.bf16 %v7394_v62  ;;  %v1658_v56 = vmul.f32 1.442695, %v1568_v57  ;;  %5957 = vpow2.f32 %v1662_v29 }
 0x7ed   : > { %v7532_v46 = vpop.eup %5947  ;;  %v1554_v25 = vunpack.c.l.bf16 %v7390_v21  ;;  %v1555_v34 = vunpack.c.l.bf16 %v7485_v10  ;;  %5959 = vpow2.f32 %v1618_v6  ;;  %v1622_v58 = vmul.f32 1.442695, %v1550_v35  ;;  %1918 = vmatpush.bf16.msra.mxu2 %v7526_v8 }
 0x7ee   : > { %v5950_v27 = vpop.eup %5949  ;;  %v1556_v31 = vunpack.c.h.bf16 %v7390_v21  ;;  %v1557_v47 = vunpack.c.h.bf16 %v7485_v10  ;;  %v1626_v61 = vmul.f32 1.442695, %v1552_v51  ;;  %5961 = vpow2.f32 %v1666_v48 }
 0x7ef   : > { %v7539_v62 = vpop.eup %5951  ;;  %v1558_v59 = vunpack.c.l.bf16 %v7392_v3  ;;  %v1559_v4 = vunpack.c.l.bf16 %v7487_v44  ;;  %v1646_v16 = vmul.f32 1.442695, %v1562_v63  ;;  %5963 = vpow2.f32 %v1654_v52 }
 0x7f0   : > { %v5954_v36 = vpop.eup %5953  ;;  %v1560_v54 = vunpack.c.h.bf16 %v7392_v3  ;;  %v1561_v22 = vunpack.c.h.bf16 %v7487_v44  ;;  %v1650_v14 = vmul.f32 1.442695, %v1564_v45  ;;  %5965 = vpow2.f32 %v1658_v56 }
 0x7f1   : > { %v7545_v21 = vpop.eup %5955  ;;  %v1563_v10 = vunpack.c.l.bf16 %v7489_v9  ;;  %v1565_v26 = vunpack.c.h.bf16 %v7489_v9  ;;  %5967 = vpow2.f32 %v1622_v58  ;;  %v1630_v38 = vmul.f32 1.442695, %v1554_v25 }
 0x7f2   : > { %v5958_v49 = vpop.eup %5957  ;;  %v1567_v0 = vunpack.c.l.bf16 %v7491_v17  ;;  %v1569_v1 = vunpack.c.h.bf16 %v7491_v17  ;;  %5969 = vpow2.f32 %v1626_v61  ;;  %v1634_v23 = vmul.f32 1.442695, %v1556_v31 }
 0x7f3   : > { %v5960_v3 = vpop.eup %5959  ;;  %v1571_v44 = vunpack.c.l.bf16 %v7493_v43  ;;  %v1573_v11 = vunpack.c.h.bf16 %v7493_v43  ;;  %v1638_v57 = vmul.f32 1.442695, %v1558_v59  ;;  %5971 = vpow2.f32 %v1646_v16 }
 0x7f4   : > { %v5962_v29 = vpop.eup %5961  ;;  %v1574_v35 = vunpack.c.l.bf16 %v7400_v19  ;;  %v1642_v6 = vmul.f32 1.442695, %v1560_v54  ;;  %5973 = vpow2.f32 %v1650_v14  ;;  %v1576_v48 = vunpack.c.h.bf16 %v7400_v19 }
 0x7f5   : > { %v5964_v51 = vpop.eup %5963  ;;  %v1620_v63 = vmul.f32 1.442695, %v1549_v12  ;;  %5975 = vpow2.f32 %v1630_v38  ;;  %v7556_v52 = vpack.c.bf16 %v5962_v29, %v5958_v49  ;;  %v1578_v25 = vunpack.c.l.bf16 %v7402_v42 }
 0x7f6   : > { %v5966_v45 = vpop.eup %5965  ;;  %v1624_v58 = vmul.f32 1.442695, %v1551_v20  ;;  %5977 = vpow2.f32 %v1634_v23  ;;  %v1580_v59 = vunpack.c.h.bf16 %v7402_v42  ;;  %v1628_v16 = vmul.f32 1.442695, %v1553_v37 }
 0x7f7   : > { %v5968_v31 = vpop.eup %5967  ;;  %5979 = vpow2.f32 %v1638_v57  ;;  %1904 = vmatpush.bf16.msra.mxu0 %v7556_v52  ;;  %v1632_v54 = vmul.f32 1.442695, %v1555_v34  ;;  %v7563_v14 = vpack.c.bf16 %v5960_v3, %v5954_v36  ;;  %v7566_v38 = vpack.c.bf16 %v5950_v27, %v7528_v18 }
 0x7f8   : > { %v5970_v12 = vpop.eup %5969  ;;  %5981 = vpow2.f32 %v1642_v6  ;;  %v1636_v23 = vmul.f32 1.442695, %v1557_v47  ;;  %v7569_v29 = vpack.c.bf16 %v5966_v45, %v5964_v51  ;;  %v1640_v37 = vmul.f32 1.442695, %v1559_v4 }
 0x7f9   : > { %v5972_v49 = vpop.eup %5971  ;;  %5983 = vpow2.f32 %v1620_v63  ;;  %v1766_v57 = vunpack.c.l.bf16 %v7566_v38  ;;  %v1768_v34 = vunpack.c.h.bf16 %v7566_v38  ;;  %v1582_v36 = vunpack.c.l.bf16 %v7404_v24 }
 0x7fa   : > { %v5974_v61 = vpop.eup %5973  ;;  %5985 = vpow2.f32 %v1624_v58  ;;  %v1644_v18 = vmul.f32 1.442695, %v1561_v22  ;;  %v1648_v27 = vmul.f32 1.442695, %v1563_v10  ;;  %v7575_v47 = vpack.c.bf16 %v5970_v12, %v5968_v31 }
 0x7fb   : > { %v5976_v6 = vpop.eup %5975  ;;  %5987 = vpow2.f32 %v1628_v16  ;;  %1905 = vmatpush.bf16.msra.mxu0 %v7569_v29  ;;  %v1770_v51 = vunpack.c.l.bf16 %v7563_v14  ;;  %v1830_v63 = vadd.f32 %v1768_v34, %v1766_v57  ;;  %v1583_v45 = vunpack.c.l.bf16 %v7503_v5 }
 0x7fc   : > { %v5978_v3 = vpop.eup %5977  ;;  %5989 = vpow2.f32 %v1632_v54  ;;  %v1652_v58 = vmul.f32 1.442695, %v1565_v26  ;;  %v7579_v20 = vpack.c.bf16 %v5974_v61, %v5972_v49  ;;  %v1656_v22 = vmul.f32 1.442695, %v1567_v0 }
 0x7fd   : > { %v5980_v4 = vpop.eup %5979  ;;  %5991 = vpow2.f32 %v1636_v23  ;;  %v1772_v10 = vunpack.c.h.bf16 %v7563_v14  ;;  %v1831_v16 = vadd.f32 %v1830_v63, %v1770_v51  ;;  %v1598_v31 = vunpack.c.l.bf16 %v7412_v40 }
 0x7fe   : > { %v5982_v56 = vpop.eup %5981  ;;  %5993 = vpow2.f32 %v1640_v37  ;;  %v1660_v12 = vmul.f32 1.442695, %v1569_v1  ;;  %v1664_v54 = vmul.f32 1.442695, %v1571_v44  ;;  %v1740_v0 = vpack.c.bf16 %v5978_v3, %v5976_v6 }
 0x7ff   : > { %v7582_v9 = vpop.eup %5983  ;;  %5995 = vpow2.f32 %v1644_v18  ;;  %1906 = vmatpush.bf16.msra.mxu0 %v7579_v20  ;;  %v1774_v61 = vunpack.c.l.bf16 %v7575_v47  ;;  %v1832_v49 = vadd.f32 %v1831_v16, %v1772_v10  ;;  %v1600_v37 = vunpack.c.h.bf16 %v7412_v40 }
 0x800   : > { %v7590_v26 = vpop.eup %5985  ;;  %5997 = vpow2.f32 %v1648_v27  ;;  %v1668_v17 = vmul.f32 1.442695, %v1573_v11  ;;  %v1742_v1 = vpack.c.bf16 %v5982_v56, %v5980_v4  ;;  %v1670_v44 = vmul.f32 1.442695, %v1574_v35 }
 0x801   : > { %v7593_v23 = vpop.eup %5987  ;;  %5999 = vpow2.f32 %v1652_v58  ;;  %v1776_v34 = vunpack.c.h.bf16 %v7575_v47  ;;  %v1833_v6 = vadd.f32 %v1832_v49, %v1774_v61  ;;  %v1594_v27 = vunpack.c.l.bf16 %v7410_v28 }
 0x802   : > { %v7598_v57 = vpop.eup %5989  ;;  %6001 = vpow2.f32 %v1656_v22  ;;  %v1596_v40 = vunpack.c.h.bf16 %v7410_v28  ;;  %v1674_v43 = vmul.f32 1.442695, %v1576_v48  ;;  %v1718_v56 = vmul.f32 1.442695, %v1598_v31 }
 0x803   : > { %v7603_v18 = vpop.eup %5991  ;;  %6003 = vpow2.f32 %v1660_v12  ;;  %1907 = vmatpush.bf16.msra.mxu0 %v1742_v1  ;;  %v1778_v3 = vunpack.c.l.bf16 %v1740_v0  ;;  %v1834_v35 = vadd.f32 %v1833_v6, %v1776_v34  ;;  %v1584_v63 = vunpack.c.h.bf16 %v7404_v24 }
 0x804   : > { %v7609_v11 = vpop.eup %5993  ;;  %6005 = vpow2.f32 %v1664_v54  ;;  %v1585_v4 = vunpack.c.h.bf16 %v7503_v5  ;;  %v1678_v28 = vmul.f32 1.442695, %v1578_v25  ;;  %v1722_v19 = vmul.f32 1.442695, %v1600_v37 }
 0x805   : > { %v7611_v51 = vpop.eup %5995  ;;  %6007 = vpow2.f32 %v1668_v17  ;;  %v1780_v48 = vunpack.c.h.bf16 %v1740_v0  ;;  %v1835_v22 = vadd.f32 %v1834_v35, %v1778_v3  ;;  %v1590_v16 = vunpack.c.l.bf16 %v7408_v13 }
 0x806   : > { %v7617_v58 = vpop.eup %5997  ;;  %6009 = vpow2.f32 %v1670_v44  ;;  %v1592_v31 = vunpack.c.h.bf16 %v7408_v13  ;;  %v1710_v12 = vmul.f32 1.442695, %v1594_v27  ;;  %v1714_v61 = vmul.f32 1.442695, %v1596_v40 }
 0x807   : > { %v7619_v10 = vpop.eup %5999  ;;  %6011 = vpow2.f32 %v1674_v43  ;;  %1908 = vmatpush.bf16.msra.mxu0 %v1740_v0  ;;  %v1782_v25 = vunpack.c.l.bf16 %v1742_v1  ;;  %v1836_v49 = vadd.f32 %v1835_v22, %v1780_v48  ;;  %v1586_v37 = vunpack.c.l.bf16 %v7406_v50 }
 0x808   : > { %v7623_v54 = vpop.eup %6001  ;;  %6013 = vpow2.f32 %v1718_v56  ;;  %v1588_v44 = vunpack.c.h.bf16 %v7406_v50  ;;  %v1682_v34 = vmul.f32 1.442695, %v1580_v59  ;;  %v1686_v0 = vmul.f32 1.442695, %v1582_v36 }
 0x809   : > { %v7625_v17 = vpop.eup %6003  ;;  %6015 = vpow2.f32 %v1678_v28  ;;  %v1784_v6 = vunpack.c.h.bf16 %v1742_v1  ;;  %v1837_v27 = vadd.f32 %v1836_v49, %v1782_v25  ;;  %v1702_v43 = vmul.f32 1.442695, %v1590_v16 }
 0x80a   : > { %v6006_v13 = vpop.eup %6005  ;;  %6017 = vpow2.f32 %v1722_v19  ;;  %v1706_v56 = vmul.f32 1.442695, %v1592_v31  ;;  %v1786_v3 = vunpack.c.l.bf16 %v7579_v20  ;;  %v7637_v42 = vpack.c.bf16 %v7582_v9, %v7545_v21 }
 0x80b   : > { %v6008_v40 = vpop.eup %6007  ;;  %6019 = vpow2.f32 %v1710_v12  ;;  %1909 = vmatpush.bf16.msra.mxu0 %v7575_v47  ;;  %v1838_v35 = vadd.f32 %v1837_v27, %v1784_v6  ;;  %v7641_v24 = vpack.c.bf16 %v7539_v62, %v7532_v46  ;;  %v1690_v36 = vmul.f32 1.442695, %v1584_v63 }
 0x80c   : > { %v6010_v50 = vpop.eup %6009  ;;  %6021 = vpow2.f32 %v1714_v61  ;;  %v1694_v1 = vmul.f32 1.442695, %v1586_v37  ;;  %v1788_v28 = vunpack.c.h.bf16 %v7579_v20  ;;  %v1698_v21 = vmul.f32 1.442695, %v1588_v44 }
 0x80d   : > { %v6012_v59 = vpop.eup %6011  ;;  %6023 = vpow2.f32 %v1682_v34  ;;  %v1839_v47 = vadd.f32 %v1838_v35, %v1786_v3  ;;  %v1767_v48 = vunpack.c.l.bf16 %v7641_v24  ;;  %v1769_v22 = vunpack.c.h.bf16 %v7641_v24 }
 0x80e   : > { %v6014_v19 = vpop.eup %6013  ;;  %6025 = vpow2.f32 %v1686_v0  ;;  %v1790_v9 = vunpack.c.l.bf16 %v7569_v29  ;;  %v7650_v46 = vpack.c.bf16 %v7593_v23, %v7590_v26  ;;  %v1771_v63 = vunpack.c.l.bf16 %v7637_v42 }
 0x80f   : > { %v6016_v16 = vpop.eup %6015  ;;  %6027 = vpow2.f32 %v1702_v43  ;;  %1910 = vmatpush.bf16.msra.mxu0 %v7563_v14  ;;  %v1840_v20 = vadd.f32 %v1839_v47, %v1788_v28  ;;  %v1867_v31 = vadd.f32 %v1769_v22, %v1767_v48  ;;  %v1792_v61 = vunpack.c.h.bf16 %v7569_v29 }
 0x810   : > { %v6018_v62 = vpop.eup %6017  ;;  %6029 = vpow2.f32 %v1706_v56  ;;  %v7656_v49 = vpack.c.bf16 %v6008_v40, %v6006_v13  ;;  %v1773_v26 = vunpack.c.h.bf16 %v7637_v42  ;;  %v10104_v34 = vunpack.c.l.bf16 %v7496_v60 }
 0x811   : > { %v6020_v12 = vpop.eup %6019  ;;  %6031 = vpow2.f32 %v1690_v36  ;;  %v7654_v25 = vpack.c.bf16 %v6018_v62, %v6014_v19  ;;  %v1841_v14 = vadd.f32 %v1840_v20, %v1790_v9  ;;  %v1868_v23 = vadd.f32 %v1867_v31, %v1771_v63 }
 0x812   : > { %v6022_v37 = vpop.eup %6021  ;;  %6033 = vpow2.f32 %v1694_v1  ;;  %v1672_v0 = vmul.f32 1.442695, %v10104_v34  ;;  %v1794_v6 = vunpack.c.l.bf16 %v7556_v52  ;;  %v7664_v29 = vpack.c.bf16 %v6012_v59, %v6010_v50 }
 0x813   : > { %v6024_v44 = vpop.eup %6023  ;;  %6035 = vpow2.f32 %v1698_v21  ;;  %1919 = vmatpush.bf16.msra.mxu2 %v7654_v25  ;;  %1911 = vmatpush.bf16.msra.mxu0 %v7566_v38  ;;  %v1842_v27 = vadd.f32 %v1841_v14, %v1792_v61  ;;  %v7669_v40 = vpack.c.bf16 %v7603_v18, %v7598_v57  ;;  %v1775_v43 = vunpack.c.l.bf16 %v7650_v46 }
 0x814   : > { %v6026_v13 = vpop.eup %6025  ;;  %v1869_v56 = vadd.f32 %v1868_v23, %v1773_v26  ;;  %v1587_v35 = vunpack.c.l.bf16 %v7505_v53  ;;  %v10105_v36 = vunpack.c.h.bf16 %v7496_v60  ;;  %v1796_v38 = vunpack.c.h.bf16 %v7556_v52 }
 0x815   : > { %v6028_v3 = vpop.eup %6027  ;;  %v7676_v50 = vpack.c.bf16 %v6022_v37, %v6020_v12  ;;  %v1843_v28 = vadd.f32 %v1842_v27, %v1794_v6  ;;  %v7681_v57 = vpack.c.bf16 %v7625_v17, %v7623_v54  ;;  %v1777_v18 = vunpack.c.h.bf16 %v7650_v46 }
 0x816   : > { %v1676_v1 = vmul.f32 1.442695, %v10105_v36  ;;  %v6030_v59 = vpop.eup %6029  ;;  %1912 = vmatmul.bf16.vlgmr.msra.gmra.mxu0 %v7316_v55  ;;  %v1870_v19 = vadd.f32 %v1869_v56, %v1775_v43  ;;  %6037 = vpow2.f32 %v1672_v0  ;;  %v10106_v60 = vunpack.c.l.bf16 %v7498_v32 }
 0x817   : > { %1932 = vmatpush.bf16.msrb.mxu0 %v7656_v49  ;;  %v6032_v47 = vpop.eup %6031  ;;  %1920 = vmatpush.bf16.msra.mxu2 %v7676_v50  ;;  %v7687_v52 = vpack.c.bf16 %v6024_v44, %v6016_v16  ;;  %v1798_v22 = vunpack.c.l.bf16 %v7664_v29  ;;  %v1844_v9 = vadd.f32 %v1843_v28, %v1796_v38  ;;  %v1743_v54 = vpack.c.bf16 %v7611_v51, %v7609_v11 }
 0x818   : > { %v1680_v48 = vmul.f32 1.442695, %v10106_v60  ;;  %v6034_v21 = vpop.eup %6033  ;;  %v1779_v17 = vunpack.c.l.bf16 %v7669_v40  ;;  %v1871_v62 = vadd.f32 %v1870_v19, %v1777_v18  ;;  %6039 = vpow2.f32 %v1676_v1 }
 0x819   : > { %v6036_v20 = vpop.eup %6035  ;;  %v10107_v63 = vunpack.c.h.bf16 %v7498_v32  ;;  %v7696_v12 = vpack.c.bf16 %v6030_v59, %v6028_v3  ;;  %v1745_v16 = vpack.c.bf16 %v7619_v10, %v7617_v58  ;;  %v1800_v61 = vunpack.c.h.bf16 %v7664_v29 }
 0x81a   : > { %v1845_v37 = vadd.f32 %v1844_v9, %v1798_v22  ;;  %v1781_v14 = vunpack.c.h.bf16 %v7669_v40  ;;  %v1872_v26 = vadd.f32 %v1871_v62, %v1779_v17  ;;  %v1599_v11 = vunpack.c.l.bf16 %v7516_v39  ;;  %v1112_v62 = vpop.f32.mrf.mxu2 }
 0x81b   : > { %1933 = vmatpush.bf16.msrb.mxu0 %v7681_v57  ;;  %v1684_v31 = vmul.f32 1.442695, %v10107_v63  ;;  %6041 = vpow2.f32 %v1680_v48  ;;  %v1688_v51 = vmul.f32 1.442695, %v1583_v45  ;;  %1921 = vmatpush.bf16.msra.mxu2 %v7696_v12  ;;  %v1802_v32 = vunpack.c.l.bf16 %v7687_v52 }
 0x81c   : > { %v1754_v23 = vpack.c.bf16 %v6032_v47, %v6026_v13  ;;  %v1846_v44 = vadd.f32 %v1845_v37, %v1800_v61  ;;  %v1783_v58 = vunpack.c.l.bf16 %v1743_v54  ;;  %v1873_v10 = vadd.f32 %v1872_v26, %v1781_v14  ;;  %v6038_v34 = vpop.eup %6037 }
 0x81d   : > { %v1601_v0 = vunpack.c.h.bf16 %v7516_v39  ;;  %6043 = vpow2.f32 %v1684_v31  ;;  %v1692_v6 = vmul.f32 1.442695, %v1585_v4  ;;  %v1756_v27 = vpack.c.bf16 %v6036_v20, %v6034_v21 }
 0x81e   : > { %v1804_v43 = vunpack.c.h.bf16 %v7687_v52  ;;  %v1847_v45 = vadd.f32 %v1846_v44, %v1802_v32  ;;  %v1785_v56 = vunpack.c.h.bf16 %v1743_v54  ;;  %v1874_v3 = vadd.f32 %v1873_v10, %v1783_v58  ;;  %v6040_v36 = vpop.eup %6039 }
 0x81f   : > { %1934 = vmatpush.bf16.msrb.mxu0 %v1745_v16  ;;  %v1595_v13 = vunpack.c.l.bf16 %v7513_v2  ;;  %6045 = vpow2.f32 %v1688_v51  ;;  %v1696_v1 = vmul.f32 1.442695, %v1587_v35  ;;  %v1720_v38 = vmul.f32 1.442695, %v1599_v11  ;;  %1922 = vmatpush.bf16.msra.mxu2 %v1756_v27 }
 0x820   : > { %v1806_v59 = vunpack.c.l.bf16 %v1754_v23  ;;  %v1848_v28 = vadd.f32 %v1847_v45, %v1804_v43  ;;  %v1787_v39 = vunpack.c.l.bf16 %v1745_v16  ;;  %v1875_v18 = vadd.f32 %v1874_v3, %v1785_v56 }
 0x821   : > { %v6042_v5 = vpop.eup %6041  ;;  %v1589_v4 = vunpack.c.h.bf16 %v7505_v53  ;;  %v1597_v19 = vunpack.c.h.bf16 %v7513_v2  ;;  %6047 = vpow2.f32 %v1692_v6  ;;  %v1724_v47 = vmul.f32 1.442695, %v1601_v0 }
 0x822   : > { %v1808_v60 = vunpack.c.h.bf16 %v1754_v23  ;;  %v1849_v48 = vadd.f32 %v1848_v28, %v1806_v59  ;;  %v1789_v22 = vunpack.c.h.bf16 %v1745_v16  ;;  %v1876_v21 = vadd.f32 %v1875_v18, %v1787_v39 }
 0x823   : > { %1935 = vmatpush.bf16.msrb.mxu0 %v1743_v54  ;;  %v6044_v9 = vpop.eup %6043  ;;  %v1591_v35 = vunpack.c.l.bf16 %v7510_v7  ;;  %6049 = vpow2.f32 %v1696_v1  ;;  %v1712_v17 = vmul.f32 1.442695, %v1595_v13  ;;  %1923 = vmatpush.bf16.msra.mxu2 %v1754_v23  ;;  %v1791_v54 = vunpack.c.l.bf16 %v7681_v57 }
 0x824   : > { %6051 = vpow2.f32 %v1720_v38  ;;  %v1810_v20 = vunpack.c.l.bf16 %v1756_v27  ;;  %v1850_v53 = vadd.f32 %v1849_v48, %v1808_v60  ;;  %v1877_v2 = vadd.f32 %v1876_v21, %v1789_v22  ;;  %v5837_v38 = vld [vmem:[#allocation2 + $0x34] sm:$0xf0] }
 0x825   : > { %v6046_v63 = vpop.eup %6045  ;;  %v1593_v31 = vunpack.c.h.bf16 %v7510_v7  ;;  %v1700_v16 = vmul.f32 1.442695, %v1589_v4  ;;  %v1716_v61 = vmul.f32 1.442695, %v1597_v19  ;;  %6053 = vpow2.f32 %v1724_v47  ;;  %v5514_v19 = vld [vmem:[#allocation2 + $0x20] sm:$0xf] }
 0x826   : > { %v1812_v37 = vunpack.c.h.bf16 %v1756_v27  ;;  %v1851_v14 = vadd.f32 %v1850_v53, %v1810_v20  ;;  %v1793_v26 = vunpack.c.h.bf16 %v7681_v57  ;;  %v1878_v11 = vadd.f32 %v1877_v2, %v1791_v54 }
 0x827   : > { %1936 = vmatpush.bf16.msrb.mxu0 %v7669_v40  ;;  %v6048_v51 = vpop.eup %6047  ;;  %v1113_v32 = vadd.f32 %v1112_v62, %v7311_v15  ;;  %v1704_v23 = vmul.f32 1.442695, %v1591_v35  ;;  %6055 = vpow2.f32 %v1712_v17  ;;  %1924 = vmatpush.bf16.msra.mxu2 %v7687_v52  ;;  %v1795_v40 = vunpack.c.l.bf16 %v7656_v49  ;;  %v5835_v35 = vld [vmem:[#allocation2 + $0x24] sm:$0xf0] }
 0x828   : > { %v1814_v44 = vunpack.c.l.bf16 %v7696_v12  ;;  %v1852_v7 = vadd.f32 %v1851_v14, %v1812_v37  ;;  %v7724_v58 = vpack.c.bf16 %v6040_v36, %v6038_v34  ;;  %v1879_v10 = vadd.f32 %v1878_v11, %v1793_v26  ;;  %v5833_v14 = vld [vmem:[#allocation2 + $0x14] sm:$0xf0] }
 0x829   : > { %v6050_v0 = vpop.eup %6049  ;;  %v1708_v57 = vmul.f32 1.442695, %v1593_v31  ;;  %6057 = vpow2.f32 %v1716_v61  ;;  %v1797_v6 = vunpack.c.h.bf16 %v7656_v49  ;;  %v7729_v15 = vpack.c.bf16 %v7508_v41, %v7501_v33 }
 0x82a   : > { %v6052_v52 = vpop.eup %6051  ;;  %6059 = vpow2.f32 %v1700_v16  ;;  %v1816_v27 = vunpack.c.h.bf16 %v7696_v12  ;;  %v1853_v43 = vadd.f32 %v1852_v7, %v1814_v44  ;;  %v1880_v45 = vadd.f32 %v1879_v10, %v1795_v40  ;;  %v5522_v12 = vld [vmem:[#allocation2 + $0x30] sm:$0xf]  ;;  %v5498_v7 = vld [vmem:[#allocation2] sm:$0xf] }
 0x82b   : > { %1937 = vmatpush.bf16.msrb.mxu0 %v7650_v46  ;;  %v6054_v56 = vpop.eup %6053  ;;  %v7733_v46 = vpack.c.bf16 %v1113_v32, %v7314_v30  ;;  %6061 = vpow2.f32 %v1704_v23  ;;  %1925 = vmatpush.bf16.msra.mxu2 %v7664_v29  ;;  %v7736_v34 = vpack.c.bf16 %v6044_v9, %v6042_v5  ;;  %v1818_v49 = vunpack.c.l.bf16 %v7676_v50 }
 0x82c   : > { %v1854_v3 = vadd.f32 %v1853_v43, %v1816_v27  ;;  %v1799_v33 = vunpack.c.l.bf16 %v7724_v58  ;;  %v1881_v41 = vadd.f32 %v1880_v45, %v1797_v6  ;;  %6063 = vpow2.f32 %v1708_v57 }
 0x82d   : > { %v6056_v36 = vpop.eup %6055  ;;  %v1820_v30 = vunpack.c.h.bf16 %v7676_v50  ;;  %v7744_v29 = vpack.c.bf16 %v6054_v56, %v6052_v52  ;;  %v1801_v13 = vunpack.c.h.bf16 %v7724_v58  ;;  %v1755_v39 = vpack.c.bf16 %v6048_v51, %v6046_v63  ;;  %v5506_v63 = vld [vmem:[#allocation2 + $0x10] sm:$0xf]  ;;  %v5827_v52 = vld [vmem:[%s9970_s5 + $0x18] sm:$0xff] }
 0x82e   : > { %1926 = vmatmul.bf16.vlgmr.msra.gmra.mxu2 %v7733_v46  ;;  %v1882_v1 = vadd.f32 %v1881_v41, %v1799_v33  ;;  %v1855_v59 = vadd.f32 %v1854_v3, %v1818_v49  ;;  %v1822_v5 = vunpack.c.l.bf16 %v7654_v25  ;;  %v1803_v4 = vunpack.c.l.bf16 %v7736_v34  ;;  %v5836_v3 = vld [vmem:[#allocation2 + $0x34] sm:$0xf] }
 0x82f   : > { %1946 = vmatpush.bf16.msrb.mxu2 %v7729_v15  ;;  %1938 = vmatpush.bf16.msrb.mxu0 %v7637_v42  ;;  %v6058_v28 = vpop.eup %6057  ;;  %v5523_v42 = vor.u32 %v5837_v38, %v5522_v12  ;;  %v1805_v48 = vunpack.c.h.bf16 %v7736_v34  ;;  %v1824_v22 = vunpack.c.h.bf16 %v7654_v25  ;;  %v1826_v62 = vunpack.c.l.bf16 %v7526_v8  ;;  %v5524_v12 = vld [vmem:[#allocation2 + $0x38] sm:$0xf0] }
 0x830   : > { %v6060_v18 = vpop.eup %6059  ;;  %v1883_v50 = vadd.f32 %v1882_v1, %v1801_v13  ;;  %v1856_v47 = vadd.f32 %v1855_v59, %v1820_v30  ;;  %v1761_v21 = vpack.c.bf16 %v6058_v28, %v6056_v36  ;;  %v5515_v20 = vor.u32 %v5835_v35, %v5514_v19  ;;  %v5834_v1 = vld [vmem:[#allocation2 + $0x24] sm:$0xf]  ;;  %v5516_v28 = vld [vmem:[#allocation2 + $0x28] sm:$0xf0] }
 0x831   : > { %v6062_v60 = vpop.eup %6061  ;;  %v1807_v53 = vunpack.c.l.bf16 %v1755_v39  ;;  %v1828_v16 = vunpack.c.h.bf16 %v7526_v8  ;;  %v1809_v61 = vunpack.c.h.bf16 %v1755_v39  ;;  %v5507_v11 = vor.u32 %v5833_v14, %v5506_v63 }
 0x832   : > { %v1884_v9 = vadd.f32 %v1883_v50, %v1803_v4  ;;  %v1857_v17 = vadd.f32 %v1856_v47, %v1822_v5  ;;  %v6064_v54 = vpop.eup %6063  ;;  %v1819_v27 = vunpack.c.l.bf16 %v1761_v21  ;;  %v1821_v45 = vunpack.c.h.bf16 %v1761_v21  ;;  %v5828_v4 = vld [vmem:[%s9970_s5 + $0x20] sm:$0xff] }
 0x833   : > { %1947 = vmatpush.bf16.msrb.mxu2 %v7744_v29  ;;  %1939 = vmatpush.bf16.msrb.mxu0 %v7641_v24  ;;  %v1757_v24 = vpack.c.bf16 %v6060_v18, %v6050_v0  ;;  %v1759_v25 = vpack.c.bf16 %v6064_v54, %v6062_v60  ;;  %v1823_v49 = vunpack.c.l.bf16 %v7744_v29  ;;  %v1825_v41 = vunpack.c.h.bf16 %v7744_v29  ;;  %v5508_v29 = vld [vmem:[#allocation2 + $0x18] sm:$0xf0]  ;;  %v5830_v50 = vld [vmem:[#allocation2 + $0x4] sm:$0xf] }
 0x834   : > { %v1885_v2 = vadd.f32 %v1884_v9, %v1805_v48  ;;  %v1858_v31 = vadd.f32 %v1857_v17, %v1824_v22  ;;  %v5527_v30 = vor.u32 %v5836_v3, %v5524_v12  ;;  %v1827_v13 = vunpack.c.l.bf16 %v7729_v15 }
 0x835   : > { %v1811_v51 = vunpack.c.l.bf16 %v1757_v24  ;;  %v1813_v40 = vunpack.c.h.bf16 %v1757_v24  ;;  %v1815_v0 = vunpack.c.l.bf16 %v1759_v25  ;;  %v1817_v57 = vunpack.c.h.bf16 %v1759_v25 }
 0x836   : > { %1940 = vmatmul.bf16.vlgmr.msrb.gmra.mxu0 %v7316_v55  ;;  %v1886_v37 = vadd.f32 %v1885_v2, %v1807_v53  ;;  %v1859_v26 = vadd.f32 %v1858_v31, %v1826_v62  ;;  %v5831_v55 = vld [vmem:[#allocation2 + $0x4] sm:$0xf0]  ;;  %v1829_v59 = vunpack.c.h.bf16 %v7729_v15  ;;  %v2013_v53 = vpop.permute.xlu1 %2012 }
 0x837   : > { %2093 = vmatpush.bf16.msra.mxu0 %v5523_v42  ;;  %1948 = vmatpush.bf16.msrb.mxu2 %v1761_v21  ;;  %v5499_v10 = vor.u32 %v5831_v55, %v5498_v7  ;;  %v5832_v42 = vld [vmem:[#allocation2 + $0x14] sm:$0xf]  ;;  %v5829_v15 = vld [vmem:[%s9970_s5 + $0x28] sm:$0xff] }
 0x838   : > { %v1887_v32 = vadd.f32 %v1886_v37, %v1809_v61  ;;  %v1860_v23 = vadd.f32 %v1859_v26, %v1828_v16  ;;  %v5511_v5 = vor.u32 %v5832_v42, %v5508_v29 }
 0x83a   : > { %v1888_v44 = vadd.f32 %v1887_v32, %v1811_v51  ;;  %v1861_v48 = vrot.slane %v1860_v23, 4 }
 0x83b   : > { %2094 = vmatpush.bf16.msra.mxu0 %v5515_v20  ;;  %1949 = vmatpush.bf16.msrb.mxu2 %v1759_v25  ;;  %v2008_v20 = vpop.permute.xlu2 %2007 }
 0x83c   : > { %v1889_v8 = vadd.f32 %v1888_v44, %v1813_v40  ;;  %v1862_v21 = vadd.f32 %v1861_v48, %v1860_v23 }
 0x83e   : > { %v1890_v6 = vadd.f32 %v1889_v8, %v1815_v0  ;;  %v1863_v17 = vrot.slane %v1862_v21, 2  ;;  %v2003_v26 = vpop.permute.xlu1 %2002 }
 0x83f   : > { %2095 = vmatpush.bf16.msra.mxu0 %v5507_v11  ;;  %1950 = vmatpush.bf16.msrb.mxu2 %v1757_v24 }
 0x840   : > { %v1891_v43 = vadd.f32 %v1890_v6, %v1817_v57  ;;  %v1864_v24 = vadd.f32 %v1863_v17, %v1862_v21 }
 0x842   : > { %v1892_v56 = vadd.f32 %v1891_v43, %v1819_v27  ;;  %v1865_v31 = vrot.slane %v1864_v24, 1 }
 0x843   : > { %2096 = vmatpush.bf16.msra.mxu0 %v5499_v10  ;;  %1951 = vmatpush.bf16.msrb.mxu2 %v1755_v39  ;;  %v1998_v14 = vpop.permute.xlu2 %1997 }
 0x844   : > { %v1893_v33 = vadd.f32 %v1892_v56, %v1821_v45  ;;  %v1866_v25 = vadd.f32 %v1865_v31, %v1864_v24 }
 0x846   : > { %5528 = vmatmul.msk.bf16.vlgmr.msra.gmra.mxu0 %vm384_vm0, %v5827_v52  ;;  %v1894_v36 = vadd.f32 %v1893_v33, %v1823_v49  ;;  %6065 = vrcp.f32 %v1866_v25 }
 0x847   : > { %1952 = vmatpush.bf16.msrb.mxu2 %v7736_v34  ;;  %v5519_v34 = vor.u32 %v5834_v1, %v5516_v28 }
 0x848   : > { %v1895_v38 = vadd.f32 %v1894_v36, %v1825_v41 }
 0x84a   : > { %v1896_v39 = vadd.f32 %v1895_v38, %v1827_v13 }
 0x84b   : > { %1953 = vmatpush.bf16.msrb.mxu2 %v7724_v58  ;;  %v5500_v58 = vld [vmem:[#allocation2 + $0x8] sm:$0xf0] }
 0x84c   : > { %v1897_v18 = vadd.f32 %v1896_v39, %v1829_v59  ;;  %v5503_v19 = vor.u32 %v5830_v50, %v5500_v58  ;;  %v6066_v44 = vpop.eup %6065 }
 0x84e   : > { %1954 = vmatmul.bf16.vlgmr.msrb.gmra.mxu2 %v7733_v46  ;;  %v1898_v22 = vrot.slane %v1897_v18, 4 }
 0x84f   : > { %2117 = vmatpush.bf16.msra.mxu2 %v5527_v30 }
 0x850   : > { %v1899_v9 = vadd.f32 %v1898_v22, %v1897_v18 }
 0x852   : > { %v1900_v54 = vrot.slane %v1899_v9, 2 }
 0x853   : > { %2118 = vmatpush.bf16.msra.mxu2 %v5519_v34 }
 0x854   : > { %v1901_v2 = vadd.f32 %v1900_v54, %v1899_v9 }
 0x856   : > { %5529 = vmatmul.msk.bf16.gmra.mxu0 %vm384_vm0, %v5828_v4  ;;  %v1902_v16 = vrot.slane %v1901_v2, 1 }
 0x857   : > { %2119 = vmatpush.bf16.msra.mxu2 %v5511_v5 }
 0x858   : > { %v1903_v37 = vadd.f32 %v1902_v16, %v1901_v2 }
 0x85a   : > { %6067 = vrcp.f32 %v1903_v37 }
 0x85b   : > { %2120 = vmatpush.bf16.msra.mxu2 %v5503_v19 }
 0x85e   : > { %5531 = vmatmul.msk.bf16.vlgmr.msra.gmra.mxu2 %vm384_vm0, %v5827_v52 }
 0x860   : > { %v6068_v10 = vpop.eup %6067 }
 0x866   : > { %5530 = vmatmul.msk.bf16.gmra.mxu0 %vm384_vm0, %v5829_v15 }
 0x86e   : > { %5532 = vmatmul.msk.bf16.gmra.mxu2 %vm384_vm0, %v5828_v4 }
 0x87e   : > { %5533 = vmatmul.msk.bf16.gmra.mxu2 %vm384_vm0, %v5829_v15 }
 0x893   : > { %v1913_v46 = vpop.f32.mrf.mxu0 }
 0x89b   : > { %v1915_v47 = vpop.f32.mrf.mxu0 }
 0x8b1   : > { %v1927_v62 = vpop.f32.mrf.mxu2 }
 0x8b2   : > { %v1928_v23 = vadd.f32 %v1927_v62, %v1913_v46 }
 0x8b3   : > { %v1941_v60 = vpop.f32.mrf.mxu0 }
 0x8b4   : > { %v1962_v0 = vmul.f32 %v6066_v44, %v1928_v23 }
 0x8b9   : > { %v1929_v61 = vpop.f32.mrf.mxu2 }
 0x8ba   : > { %v1930_v6 = vadd.f32 %v1929_v61, %v1915_v47 }
 0x8bb   : > { %v1943_v35 = vpop.f32.mrf.mxu0 }
 0x8bc   : > { %v1964_v43 = vmul.f32 %v6066_v44, %v1930_v6 }
 0x8c3   : > { %v2098_v63 = vpop.f32.mrf.mxu0 }
 0x8c4   : > { %v2099_v51 = vadd.f32 %v2098_v63, %v1998_v14 }
 0x8cb   : > { %v2100_v11 = vpop.f32.mrf.mxu0 }
 0x8cc   : > { %v2101_v32 = vadd.f32 %v2100_v11, %v2003_v26 }
 0x8ce   : > { %v2137_v55 = vpack.c.bf16 %v2101_v32, %v2099_v51 }
 0x8d0   : > { %2222 = vmatpush.bf16.msrb.mxu0 %v2137_v55 }
 0x8d1   : > { %v1955_v40 = vpop.f32.mrf.mxu2 }
 0x8d2   : > { %v1956_v7 = vadd.f32 %v1955_v40, %v1941_v60 }
 0x8d3   : > { %v2103_v12 = vpop.f32.mrf.mxu0 }
 0x8d4   : > { %v1963_v8 = vmul.f32 %v6068_v10, %v1956_v7  ;;  %v2104_v59 = vadd.f32 %v2103_v12, %v2008_v20 }
 0x8d6   : > { %v1966_v57 = vpack.c.bf16 %v1963_v8, %v1962_v0 }
 0x8d8   : > { %1971 = vst [vmem:[#allocation3] sm:$0xff] %v1966_v57 }
 0x8d9   : > { %v1957_v52 = vpop.f32.mrf.mxu2 }
 0x8da   : > { %v1958_v27 = vadd.f32 %v1957_v52, %v1943_v35 }
 0x8db   : > { %v2105_v13 = vpop.f32.mrf.mxu0 }
 0x8dc   : > { %v1965_v45 = vmul.f32 %v6068_v10, %v1958_v27  ;;  %v2106_v1 = vadd.f32 %v2105_v13, %v2013_v53 }
 0x8de   : > { %v1967_v56 = vpack.c.bf16 %v1965_v45, %v1964_v43  ;;  %v2139_v34 = vpack.c.bf16 %v2106_v1, %v2104_v59 }
 0x8e0   : > { %1972 = vst [vmem:[#allocation3 + $0x8] sm:$0xff] %v1967_v56 }
 0x8e1   : > { %v2122_v49 = vpop.f32.mrf.mxu2 }
 0x8e2   : > { %v2123_v33 = vadd.f32 %v2122_v49, %v1998_v14 }
 0x8e3   : > { %v7792_v9 = vpop.f32.mrf.mxu0 }
 0x8e4   : > { %10108 = vst [vmem:[#allocation25_spill] sm:$0xff] %v7792_v9 }
 0x8e9   : > { %v2124_v3 = vpop.f32.mrf.mxu2 }
 0x8ea   : > { %v2125_v41 = vadd.f32 %v2124_v3, %v2003_v26 }
 0x8eb   : > { %v7798_v54 = vpop.f32.mrf.mxu0 }
 0x8ec   : > { %v2138_v36 = vpack.c.bf16 %v2125_v41, %v2123_v33  ;;  %10110 = vst [vmem:[#allocation10_spill] sm:$0xff] %v7798_v54 }
 0x8ee   : > { %2311 = vmatpush.bf16.msrb.mxu2 %v2138_v36 }
 0x8f1   : > { %v2127_v30 = vpop.f32.mrf.mxu2 }
 0x8f2   : > { %v2128_v28 = vadd.f32 %v2127_v30, %v2008_v20 }
 0x8f9   : > { %v2129_v38 = vpop.f32.mrf.mxu2 }
 0x8fa   : > { %v2130_v39 = vadd.f32 %v2129_v38, %v2013_v53 }
 0x8fc   : > { %v2140_v42 = vpack.c.bf16 %v2130_v39, %v2128_v28 }
 0x8fe   : > { %2143 = vxpose.binary.xlu2.c.b16.start.end [1/2] (short) %v2140_v42, %v2139_v34, 128 }
 0x901   : > { %v7796_v17 = vpop.f32.mrf.mxu2 }
 0x902   : > { %10109 = vst [vmem:[#allocation8_spill] sm:$0xff] %v7796_v17 }
 0x909   : > { %v7800_v62 = vpop.f32.mrf.mxu2 }
 0x90a   : > { %10111 = vst [vmem:[#allocation12_spill] sm:$0xff] %v7800_v62 }
 0x99f   : > { %v2151_v18 = vpop.trf.xlu2 }
 0x9a0   : > { %5534 = vmatmul.msk.bf16.vlgmr.msrb.gmra.mxu0 %vm1145_vm12, %v2151_v18  ;;  %5550 = vmatmul.msk.bf16.vlgmr.msrb.gmra.mxu2 %vm1145_vm12, %v2151_v18 }
 0x9a7   : > { %v2152_v29 = vpop.trf.xlu2 }
 0x9af   : > { %v2153_v5 = vpop.trf.xlu2 }
 0x9b0   : > { %5535 = vmatmul.msk.bf16.gmra.mxu0 %vm1145_vm12, %v2153_v5  ;;  %5551 = vmatmul.msk.bf16.gmra.mxu2 %vm1145_vm12, %v2153_v5 }
 0x9b7   : > { %v2154_v4 = vpop.trf.xlu2 }
 0x9bf   : > { %v2155_v58 = vpop.trf.xlu2 }
 0x9c0   : > { %5536 = vmatmul.msk.bf16.gmra.mxu0 %vm1145_vm12, %v2155_v58  ;;  %5552 = vmatmul.msk.bf16.gmra.mxu2 %vm1145_vm12, %v2155_v58 }
 0x9c7   : > { %v2156_v50 = vpop.trf.xlu2 }
 0x9cf   : > { %v2157_v19 = vpop.trf.xlu2 }
 0x9d0   : > { %5537 = vmatmul.msk.bf16.gmra.mxu0 %vm1145_vm12, %v2157_v19  ;;  %5553 = vmatmul.msk.bf16.gmra.mxu2 %vm1145_vm12, %v2157_v19 }
 0x9d7   : > { %v2158_v15 = vpop.trf.xlu2 }
 0x9df   : > { %v2159_v46 = vpop.trf.xlu2 }
 0x9e0   : > { %5538 = vmatmul.msk.bf16.gmra.mxu0 %vm1145_vm12, %v2159_v46  ;;  %5554 = vmatmul.msk.bf16.gmra.mxu2 %vm1145_vm12, %v2159_v46 }
 0x9e7   : > { %v2160_v47 = vpop.trf.xlu2 }
 0x9ef   : > { %v2161_v60 = vpop.trf.xlu2 }
 0x9f0   : > { %5539 = vmatmul.msk.bf16.gmra.mxu0 %vm1145_vm12, %v2161_v60  ;;  %5555 = vmatmul.msk.bf16.gmra.mxu2 %vm1145_vm12, %v2161_v60 }
 0x9f7   : > { %v2162_v48 = vpop.trf.xlu2 }
 0x9ff   : > { %v2163_v22 = vpop.trf.xlu2 }
 0xa00   : > { %5540 = vmatmul.msk.bf16.gmra.mxu0 %vm1145_vm12, %v2163_v22  ;;  %5556 = vmatmul.msk.bf16.gmra.mxu2 %vm1145_vm12, %v2163_v22 }
 0xa07   : > { %v2164_v21 = vpop.trf.xlu2 }
 0xa0f   : > { %v2165_v35 = vpop.trf.xlu2 }
 0xa10   : > { %5541 = vmatmul.msk.bf16.gmra.mxu0 %vm1145_vm12, %v2165_v35  ;;  %5557 = vmatmul.msk.bf16.gmra.mxu2 %vm1145_vm12, %v2165_v35 }
 0xa17   : > { %v2166_v56 = vpop.trf.xlu2 }
 0xa1d   : > { %v7802_v20 = vpop.f32.mrf.mxu0 }
 0xa20   : > { %5542 = vmatmul.msk.bf16.gmra.mxu0 %vm1145_vm12, %v2152_v29  ;;  %5558 = vmatmul.msk.bf16.gmra.mxu2 %vm1145_vm12, %v2152_v29 }
 0xa23   : > { %v7806_v24 = vpop.f32.mrf.mxu2 }
 0xa25   : > { %v7808_v53 = vpop.f32.mrf.mxu0 }
 0xa2b   : > { %v7810_v2 = vpop.f32.mrf.mxu2 }
 0xa2c   : > { %10112 = vst [vmem:[#allocation16_spill] sm:$0xff] %v7810_v2 }
 0xa2d   : > { %v7812_v63 = vpop.f32.mrf.mxu0 }
 0xa2e   : > { %10113 = vst [vmem:[#allocation7_spill] sm:$0xff] %v7812_v63  ;;  %v2393_v35 = vmax.f32 %v7802_v20, %v7812_v63 }
 0xa30   : > { %5543 = vmatmul.msk.bf16.gmra.mxu0 %vm1145_vm12, %v2154_v4  ;;  %5559 = vmatmul.msk.bf16.gmra.mxu2 %vm1145_vm12, %v2154_v4 }
 0xa33   : > { %v7816_v31 = vpop.f32.mrf.mxu2 }
 0xa34   : > { %10114 = vst [vmem:[#allocation9_spill] sm:$0xff] %v7816_v31 }
 0xa35   : > { %v7818_v16 = vpop.f32.mrf.mxu0 }
 0xa36   : > { %10115 = vst [vmem:[#allocation11_spill] sm:$0xff] %v7818_v16 }
 0xa3b   : > { %v7820_v25 = vpop.f32.mrf.mxu2 }
 0xa3c   : > { %10116 = vst [vmem:[#allocation13_spill] sm:$0xff] %v7820_v25 }
 0xa3d   : > { %v7822_v61 = vpop.f32.mrf.mxu0 }
 0xa3e   : > { %v2395_v62 = vmax.f32 %v2393_v35, %v7822_v61 }
 0xa40   : > { %5544 = vmatmul.msk.bf16.gmra.mxu0 %vm1145_vm12, %v2156_v50  ;;  %5560 = vmatmul.msk.bf16.gmra.mxu2 %vm1145_vm12, %v2156_v50 }
 0xa43   : > { %v7826_v37 = vpop.f32.mrf.mxu2 }
 0xa45   : > { %v7828_v14 = vpop.f32.mrf.mxu0 }
 0xa4b   : > { %v7830_v26 = vpop.f32.mrf.mxu2 }
 0xa4d   : > { %v7832_v11 = vpop.f32.mrf.mxu0 }
 0xa4e   : > { %v2397_v54 = vmax.f32 %v2395_v62, %v7832_v11 }
 0xa50   : > { %5545 = vmatmul.msk.bf16.gmra.mxu0 %vm1145_vm12, %v2158_v15  ;;  %5561 = vmatmul.msk.bf16.gmra.mxu2 %vm1145_vm12, %v2158_v15 }
 0xa53   : > { %v7836_v51 = vpop.f32.mrf.mxu2 }
 0xa55   : > { %v7838_v32 = vpop.f32.mrf.mxu0 }
 0xa56   : > { %10117 = vst [vmem:[#allocation14_spill] sm:$0xff] %v7838_v32 }
 0xa5b   : > { %v7840_v55 = vpop.f32.mrf.mxu2 }
 0xa5c   : > { %10118 = vst [vmem:[#allocation15_spill] sm:$0xff] %v7840_v55 }
 0xa5d   : > { %v7842_v23 = vpop.f32.mrf.mxu0 }
 0xa60   : > { %5546 = vmatmul.msk.bf16.gmra.mxu0 %vm1145_vm12, %v2160_v47  ;;  %5562 = vmatmul.msk.bf16.gmra.mxu2 %vm1145_vm12, %v2160_v47 }
 0xa63   : > { %v7846_v40 = vpop.f32.mrf.mxu2 }
 0xa65   : > { %v7848_v44 = vpop.f32.mrf.mxu0 }
 0xa6b   : > { %v7850_v7 = vpop.f32.mrf.mxu2 }
 0xa6c   : > { %10119 = vst [vmem:[#allocation17_spill] sm:$0xff] %v7850_v7 }
 0xa6d   : > { %v7852_v10 = vpop.f32.mrf.mxu0 }
 0xa70   : > { %5547 = vmatmul.msk.bf16.gmra.mxu0 %vm1145_vm12, %v2162_v48  ;;  %5563 = vmatmul.msk.bf16.gmra.mxu2 %vm1145_vm12, %v2162_v48 }
 0xa73   : > { %v7856_v0 = vpop.f32.mrf.mxu2 }
 0xa75   : > { %v7858_v8 = vpop.f32.mrf.mxu0 }
 0xa7b   : > { %v7860_v57 = vpop.f32.mrf.mxu2 }
 0xa7d   : > { %v7862_v6 = vpop.f32.mrf.mxu0 }
 0xa80   : > { %5548 = vmatmul.msk.bf16.gmra.mxu0 %vm1145_vm12, %v2164_v21  ;;  %5564 = vmatmul.msk.bf16.gmra.mxu2 %vm1145_vm12, %v2164_v21  ;;  %v2394_v21 = vmax.f32 %v7808_v53, %v7818_v16 }
 0xa83   : > { %v7866_v52 = vpop.f32.mrf.mxu2 }
 0xa85   : > { %v7868_v27 = vpop.f32.mrf.mxu0 }
 0xa8b   : > { %v7870_v43 = vpop.f32.mrf.mxu2 }
 0xa8c   : > { %10120 = vst [vmem:[#allocation18_spill] sm:$0xff] %v7870_v43 }
 0xa8d   : > { %v7872_v45 = vpop.f32.mrf.mxu0 }
 0xa90   : > { %5549 = vmatmul.msk.bf16.gmra.mxu0 %vm1145_vm12, %v2166_v56  ;;  %5565 = vmatmul.msk.bf16.gmra.mxu2 %vm1145_vm12, %v2166_v56  ;;  %v2396_v56 = vmax.f32 %v2394_v21, %v7828_v14 }
 0xa92   : > { %v2398_v17 = vmax.f32 %v2396_v56, %v7838_v32  ;;  %v2431_v32 = vmax.f32 %v7810_v2, %v7820_v25 }
 0xa93   : > { %v7876_v49 = vpop.f32.mrf.mxu2 }
 0xa95   : > { %v7878_v3 = vpop.f32.mrf.mxu0 }
 0xa96   : > { %10121 = vst [vmem:[#allocation19_spill] sm:$0xff] %v7878_v3 }
 0xa9b   : > { %v7880_v33 = vpop.f32.mrf.mxu2 }
 0xa9c   : > { %10122 = vst [vmem:[#allocation20_spill] sm:$0xff] %v7880_v33 }
 0xa9d   : > { %v7882_v41 = vpop.f32.mrf.mxu0 }
 0xaa3   : > { %v7884_v12 = vpop.f32.mrf.mxu2 }
 0xaa4   : > { %10123 = vst [vmem:[#allocation21_spill] sm:$0xff] %v7884_v12 }
 0xaa5   : > { %v7886_v36 = vpop.f32.mrf.mxu0 }
 0xaab   : > { %v7888_v30 = vpop.f32.mrf.mxu2 }
 0xaac   : > { %10124 = vst [vmem:[#allocation22_spill] sm:$0xff] %v7888_v30 }
 0xaad   : > { %v7890_v13 = vpop.f32.mrf.mxu0 }
 0xab3   : > { %v7892_v1 = vpop.f32.mrf.mxu2 }
 0xab5   : > { %v7894_v38 = vpop.f32.mrf.mxu0 }
 0xabb   : > { %v7896_v59 = vpop.f32.mrf.mxu2 }
 0xabc   : > { %10125 = vst [vmem:[#allocation23_spill] sm:$0xff] %v7896_v59 }
 0xabd   : > { %v7898_v28 = vpop.f32.mrf.mxu0 }
 0xac3   : > { %v7900_v39 = vpop.f32.mrf.mxu2 }
 0xac5   : > { %v7902_v34 = vpop.f32.mrf.mxu0 }
 0xacb   : > { %v7904_v42 = vpop.f32.mrf.mxu2 }
 0xacd   : > { %v7906_v18 = vpop.f32.mrf.mxu0 }
 0xad3   : > { %v7908_v29 = vpop.f32.mrf.mxu2 }
 0xad5   : > { %v7910_v5 = vpop.f32.mrf.mxu0 }
 0xadb   : > { %v7914_v58 = vpop.f32.mrf.mxu2 }
 0xadc   : > { %10126 = vst [vmem:[#allocation24_spill] sm:$0xff] %v7914_v58 }
 0xadd   : > { %v7912_v4 = vpop.f32.mrf.mxu0 }
 0xae3   : > { %v7918_v19 = vpop.f32.mrf.mxu2 }
 0xae4   : > { %10127 = vst [vmem:[#allocation26_spill] sm:$0xff] %v7918_v19 }
 0xae5   : > { %v7916_v50 = vpop.f32.mrf.mxu0 }
 0xaeb   : > { %v7922_v46 = vpop.f32.mrf.mxu2 }
 0xaec   : > { %10128 = vst [vmem:[#allocation27_spill] sm:$0xff] %v7922_v46 }
 0xaed   : > { %v7920_v15 = vpop.f32.mrf.mxu0 }
 0xaf3   : > { %v7926_v60 = vpop.f32.mrf.mxu2 }
 0xaf4   : > { %10129 = vst [vmem:[#allocation28_spill] sm:$0xff] %v7926_v60  ;;  %v2400_v60 = vmax.f32 %v2398_v17, %v7848_v44 }
 0xaf5   : > { %v7924_v47 = vpop.f32.mrf.mxu0 }
 0xaf6   : > { %v2402_v19 = vmax.f32 %v2400_v60, %v7858_v8  ;;  %v2430_v60 = vmax.f32 %v7806_v24, %v7816_v31 }
 0xaf8   : > { %v2404_v21 = vmax.f32 %v2402_v19, %v7868_v27 }
 0xafa   : > { %v2406_v56 = vmax.f32 %v2404_v21, %v7878_v3  ;;  %v2432_v21 = vmax.f32 %v2430_v60, %v7826_v37 }
 0xafb   : > { %v7930_v22 = vpop.f32.mrf.mxu2 }
 0xafc   : > { %10130 = vst [vmem:[#allocation29_spill] sm:$0xff] %v7930_v22  ;;  %v2399_v22 = vmax.f32 %v2397_v54, %v7842_v23  ;;  %v2408_v17 = vmax.f32 %v2406_v56, %v7886_v36  ;;  %v2434_v2 = vmax.f32 %v2432_v21, %v7836_v51 }
 0xafd   : > { %v7928_v48 = vpop.f32.mrf.mxu0 }
 0xafe   : > { %v2401_v63 = vmax.f32 %v2399_v22, %v7852_v10  ;;  %v2433_v22 = vmax.f32 %v2431_v32, %v7830_v26 }
 0xb00   : > { %v2403_v35 = vmax.f32 %v2401_v63, %v7862_v6  ;;  %v2410_v63 = vmax.f32 %v2408_v17, %v7894_v38  ;;  %v2435_v3 = vmax.f32 %v2433_v22, %v7840_v55  ;;  %v2436_v17 = vmax.f32 %v2434_v2, %v7846_v40 }
 0xb02   : > { %v2405_v62 = vmax.f32 %v2403_v35, %v7872_v45  ;;  %v2412_v35 = vmax.f32 %v2410_v63, %v7902_v34  ;;  %v2437_v31 = vmax.f32 %v2435_v3, %v7850_v7  ;;  %v2438_v63 = vmax.f32 %v2436_v17, %v7856_v0 }
 0xb03   : > { %v7945_v16 = vpop.f32.mrf.mxu2 }
 0xb04   : > { %v2407_v19 = vmax.f32 %v2405_v62, %v7882_v41  ;;  %v2414_v62 = vmax.f32 %v2412_v35, %v7910_v5  ;;  %v2439_v60 = vmax.f32 %v2437_v31, %v7860_v57 }
 0xb05   : > { %v7939_v9 = vpop.f32.mrf.mxu0 }
 0xb06   : > { %v2409_v25 = vmax.f32 %v2407_v19, %v7890_v13  ;;  %v2416_v19 = vmax.f32 %v2414_v62, %v7916_v50  ;;  %v2441_v55 = vmax.f32 %v2439_v60, %v7870_v43 }
 0xb08   : > { %v2411_v32 = vmax.f32 %v2409_v25, %v7898_v28  ;;  %v2418_v3 = vmax.f32 %v2416_v19, %v7924_v47  ;;  %v2440_v25 = vmax.f32 %v2438_v63, %v7866_v52  ;;  %v2443_v35 = vmax.f32 %v2441_v55, %v7880_v33  ;;  %v10131_v33 = vld [vmem:[#allocation26_spill] sm:$0xff] }
 0xb0a   : > { %v2413_v22 = vmax.f32 %v2411_v32, %v7906_v18  ;;  %v2420_v31 = vmax.f32 %v2418_v3, %v7939_v9  ;;  %v2442_v32 = vmax.f32 %v2440_v25, %v7876_v49  ;;  %v2445_v62 = vmax.f32 %v2443_v35, %v7888_v30 }
 0xb0b   : > { %v7966_v56 = vpop.f32.mrf.mxu2 }
 0xb0c   : > { %v2415_v21 = vmax.f32 %v2413_v22, %v7912_v4  ;;  %v2444_v22 = vmax.f32 %v2442_v32, %v7884_v12  ;;  %v2447_v19 = vmax.f32 %v2445_v62, %v7896_v59  ;;  %v10132_v12 = vld [vmem:[#allocation29_spill] sm:$0xff] }
 0xb0d   : > { %v7955_v54 = vpop.f32.mrf.mxu0 }
 0xb0e   : > { %v2417_v2 = vmax.f32 %v2415_v21, %v7920_v15  ;;  %v2446_v55 = vmax.f32 %v2444_v22, %v7892_v1  ;;  %v2449_v21 = vmax.f32 %v2447_v19, %v7904_v42 }
 0xb10   : > { %v2419_v17 = vmax.f32 %v2417_v2, %v7928_v48  ;;  %v2448_v25 = vmax.f32 %v2446_v55, %v7900_v39  ;;  %v2451_v35 = vmax.f32 %v2449_v21, %v7914_v58 }
 0xb12   : > { %v2421_v63 = vmax.f32 %v2419_v17, %v7955_v54  ;;  %v2450_v2 = vmax.f32 %v2448_v25, %v7908_v29  ;;  %v10133_v17 = vld [vmem:[#allocation28_spill] sm:$0xff] }
 0xb13   : > { %v7987_v43 = vpop.f32.mrf.mxu2 }
 0xb14   : > { %v2452_v32 = vmax.f32 %v2450_v2, %v10131_v33 }
 0xb15   : > { %v2301_v7 = vpop.f32.mrf.mxu0 }
 0xb16   : > { %v2422_v60 = vmax.f32 %v2420_v31, %v2301_v7  ;;  %v2453_v31 = vmax.f32 %v2451_v35, %v7922_v46  ;;  %v2454_v22 = vmax.f32 %v2452_v32, %v10133_v17 }
 0xb18   : > { %v2423_v3 = vmax.f32 %v2421_v63, %v2422_v60  ;;  %v2455_v62 = vmax.f32 %v2453_v31, %v10132_v12  ;;  %v2456_v63 = vmax.f32 %v2454_v22, %v7945_v16  ;;  %v10134_v22 = vld [vmem:[#allocation10_spill] sm:$0xff] }
 0xb1a   : > { %v2424_v30 = vrot.slane %v2423_v3, 4  ;;  %v2457_v19 = vmax.f32 %v2455_v62, %v7966_v56  ;;  %v2458_v21 = vmax.f32 %v2456_v63, %v7987_v43  ;;  %v2018_v63 = vpop.permute.xlu1 %2017 }
 0xb1b   : > { %v8000_v59 = vpop.f32.mrf.mxu2 }
 0xb1c   : > { %v2425_v60 = vmax.f32 %v2423_v3, %v2424_v30  ;;  %v2459_v55 = vmax.f32 %v2457_v19, %v8000_v59  ;;  %v8012_v3 = vpop.permute.xlu0 %2022 }
 0xb1d   : > { %v2111_v19 = vadd.f32 %v10134_v22, %v8012_v3 }
 0xb1e   : > { %v2426_v25 = vrot.slane %v2425_v60, 2  ;;  %v2460_v35 = vmax.f32 %v2458_v21, %v2459_v55 }
 0xb20   : > { %v2427_v46 = vmax.f32 %v2425_v60, %v2426_v25  ;;  %v2461_v58 = vrot.slane %v2460_v35, 4  ;;  %v10135_v60 = vld [vmem:[#allocation25_spill] sm:$0xff] }
 0xb21   : > { %v2109_v21 = vadd.f32 %v10135_v60, %v2018_v63 }
 0xb22   : > { %v2428_v2 = vrot.slane %v2427_v46, 1  ;;  %v2462_v33 = vmax.f32 %v2460_v35, %v2461_v58 }
 0xb23   : > { %v8017_v58 = vpack.c.bf16 %v2111_v19, %v2109_v21 }
 0xb24   : > { %v8007_v31 = vmax.f32 %v2427_v46, %v2428_v2  ;;  %v2463_v12 = vrot.slane %v2462_v33, 2  ;;  %v10136_v46 = vld [vmem:[#allocation8_spill] sm:$0xff] }
 0xb25   : > { %v8020_v35 = vadd.f32 %v10136_v46, %v2018_v63 }
 0xb26   : > { %v2527_v32 = vsub.f32 %v7955_v54, %v8007_v31  ;;  %v2529_v30 = vsub.f32 %v2301_v7, %v8007_v31  ;;  %v2464_v62 = vmax.f32 %v2462_v33, %v2463_v12  ;;  %v2467_v7 = vsub.f32 %v7802_v20, %v8007_v31  ;;  %v10137_v54 = vld [vmem:[#allocation7_spill] sm:$0xff]  ;;  %v10139_v20 = vld [vmem:[#allocation14_spill] sm:$0xff] }
 0xb27   : > { %v2469_v33 = vsub.f32 %v7808_v53, %v8007_v31  ;;  %v2471_v22 = vsub.f32 %v10137_v54, %v8007_v31  ;;  %v2475_v19 = vsub.f32 %v7822_v61, %v8007_v31  ;;  %v2477_v63 = vsub.f32 %v7828_v14, %v8007_v31 }
 0xb28   : > { %v2561_v55 = vpack.c.bf16 %v2529_v30, %v2527_v32  ;;  %v2465_v25 = vrot.slane %v2464_v62, 1  ;;  %v10138_v32 = vld [vmem:[#allocation11_spill] sm:$0xff]  ;;  %v2479_v60 = vsub.f32 %v7832_v11, %v8007_v31  ;;  %v2481_v21 = vsub.f32 %v10139_v20, %v8007_v31 }
 0xb29   : > { %v2473_v30 = vsub.f32 %v10138_v32, %v8007_v31  ;;  %v2485_v46 = vsub.f32 %v7848_v44, %v8007_v31  ;;  %v2487_v61 = vsub.f32 %v7852_v10, %v8007_v31  ;;  %v2489_v14 = vsub.f32 %v7858_v8, %v8007_v31  ;;  %v10140_v32 = vld [vmem:[#allocation19_spill] sm:$0xff] }
 0xb2a   : > { %v2623_v2 = vunpack.c.l.bf16 %v2561_v55  ;;  %v2625_v12 = vunpack.c.h.bf16 %v2561_v55  ;;  %v8038_v53 = vmax.f32 %v2464_v62, %v2465_v25  ;;  %v2483_v55 = vsub.f32 %v7842_v23, %v8007_v31 }
 0xb2b   : > { %v2491_v11 = vsub.f32 %v7862_v6, %v8007_v31  ;;  %v2493_v62 = vsub.f32 %v7868_v27, %v8007_v31  ;;  %v2495_v25 = vsub.f32 %v7872_v45, %v8007_v31  ;;  %v2497_v44 = vsub.f32 %v10140_v32, %v8007_v31 }
 0xb2c   : > { %v2747_v54 = vmul.f32 1.442695, %v2623_v2  ;;  %v2751_v23 = vmul.f32 1.442695, %v2625_v12  ;;  %v2499_v10 = vsub.f32 %v7882_v41, %v8007_v31  ;;  %v2501_v8 = vsub.f32 %v7886_v36, %v8007_v31 }
 0xb2d   : > { %v2503_v2 = vsub.f32 %v7890_v13, %v8007_v31  ;;  %v2505_v6 = vsub.f32 %v7894_v38, %v8007_v31  ;;  %v2528_v27 = vsub.f32 %v7987_v43, %v8038_v53  ;;  %v2530_v45 = vsub.f32 %v8000_v59, %v8038_v53 }
 0xb2e   : > { %v2507_v12 = vsub.f32 %v7898_v28, %v8007_v31  ;;  %v2509_v41 = vsub.f32 %v7902_v34, %v8007_v31  ;;  %v2511_v36 = vsub.f32 %v7906_v18, %v8007_v31  ;;  %v2513_v13 = vsub.f32 %v7910_v5, %v8007_v31 }
 0xb2f   : > { %6069 = vpow2.f32 %v2747_v54  ;;  %v2515_v38 = vsub.f32 %v7912_v4, %v8007_v31  ;;  %v2517_v43 = vsub.f32 %v7916_v50, %v8007_v31  ;;  %v2519_v59 = vsub.f32 %v7920_v15, %v8007_v31 }
 0xb30   : > { %6071 = vpow2.f32 %v2751_v23  ;;  %v2521_v28 = vsub.f32 %v7924_v47, %v8007_v31  ;;  %v2523_v34 = vsub.f32 %v7928_v48, %v8007_v31  ;;  %v2525_v18 = vsub.f32 %v7939_v9, %v8007_v31 }
 0xb31   : > { %v2562_v5 = vpack.c.bf16 %v2530_v45, %v2528_v27  ;;  %v8088_v20 = vpack.c.bf16 %v2469_v33, %v2467_v7  ;;  %v8090_v4 = vpack.c.bf16 %v2473_v30, %v2471_v22  ;;  %v8092_v54 = vpack.c.bf16 %v2477_v63, %v2475_v19  ;;  %v10144_v27 = vld [vmem:[#allocation15_spill] sm:$0xff] }
 0xb32   : > { %v8094_v50 = vpack.c.bf16 %v2481_v21, %v2479_v60  ;;  %v8096_v15 = vpack.c.bf16 %v2485_v46, %v2483_v55  ;;  %v8098_v23 = vpack.c.bf16 %v2489_v14, %v2487_v61  ;;  %v8100_v47 = vpack.c.bf16 %v2493_v62, %v2491_v11  ;;  %v10141_v21 = vld [vmem:[#allocation16_spill] sm:$0xff]  ;;  %v10142_v11 = vld [vmem:[#allocation9_spill] sm:$0xff] }
 0xb33   : > { %v8102_v32 = vpack.c.bf16 %v2497_v44, %v2495_v25  ;;  %v8104_v48 = vpack.c.bf16 %v2501_v8, %v2499_v10  ;;  %v8106_v9 = vpack.c.bf16 %v2505_v6, %v2503_v2  ;;  %v8108_v31 = vpack.c.bf16 %v2509_v41, %v2507_v12  ;;  %v10143_v10 = vld [vmem:[#allocation13_spill] sm:$0xff] }
 0xb34   : > { %v8110_v7 = vpack.c.bf16 %v2513_v13, %v2511_v36  ;;  %v8112_v33 = vpack.c.bf16 %v2517_v43, %v2515_v38  ;;  %v8114_v22 = vpack.c.bf16 %v2521_v28, %v2519_v59  ;;  %v8116_v30 = vpack.c.bf16 %v2525_v18, %v2523_v34  ;;  %v10145_v41 = vld [vmem:[#allocation17_spill] sm:$0xff]  ;;  %v10146_v59 = vld [vmem:[#allocation18_spill] sm:$0xff]  ;;  %v10147_v34 = vld [vmem:[#allocation20_spill] sm:$0xff] }
 0xb35   : > { %v8118_v19 = vpop.eup %6069  ;;  %v2624_v63 = vunpack.c.l.bf16 %v2562_v5  ;;  %v2468_v60 = vsub.f32 %v7806_v24, %v8038_v53  ;;  %v2470_v55 = vsub.f32 %v10141_v21, %v8038_v53  ;;  %v2563_v46 = vunpack.c.l.bf16 %v8088_v20 }
 0xb36   : > { %v8125_v61 = vpop.eup %6071  ;;  %v2626_v14 = vunpack.c.h.bf16 %v2562_v5  ;;  %v2472_v62 = vsub.f32 %v10142_v11, %v8038_v53  ;;  %v2565_v25 = vunpack.c.h.bf16 %v8088_v20  ;;  %v2567_v44 = vunpack.c.l.bf16 %v8090_v4  ;;  %v10149_v20 = vld [vmem:[#allocation22_spill] sm:$0xff] }
 0xb37   : > { %v2474_v8 = vsub.f32 %v10143_v10, %v8038_v53  ;;  %v2476_v24 = vsub.f32 %v7826_v37, %v8038_v53  ;;  %v2478_v2 = vsub.f32 %v7830_v26, %v8038_v53  ;;  %v2480_v6 = vsub.f32 %v7836_v51, %v8038_v53  ;;  %v10152_v10 = vld [vmem:[#allocation26_spill] sm:$0xff] }
 0xb38   : > { %v2482_v45 = vsub.f32 %v10144_v27, %v8038_v53  ;;  %v2484_v12 = vsub.f32 %v7846_v40, %v8038_v53  ;;  %v2486_v36 = vsub.f32 %v10145_v41, %v8038_v53  ;;  %v2488_v13 = vsub.f32 %v7856_v0, %v8038_v53  ;;  %v10148_v0 = vld [vmem:[#allocation21_spill] sm:$0xff] }
 0xb39   : > { %v2749_v38 = vmul.f32 1.442695, %v2624_v63  ;;  %v2490_v37 = vsub.f32 %v7860_v57, %v8038_v53  ;;  %v2492_v26 = vsub.f32 %v7866_v52, %v8038_v53  ;;  %v2532_v51 = vpack.c.bf16 %v2470_v55, %v2468_v60  ;;  %v10150_v63 = vld [vmem:[#allocation23_spill] sm:$0xff] }
 0xb3a   : > { %v2753_v43 = vmul.f32 1.442695, %v2626_v14  ;;  %v2494_v28 = vsub.f32 %v10146_v59, %v8038_v53  ;;  %v2496_v40 = vsub.f32 %v7876_v49, %v8038_v53  ;;  %v2498_v18 = vsub.f32 %v10147_v34, %v8038_v53  ;;  %v10151_v14 = vld [vmem:[#allocation24_spill] sm:$0xff]  ;;  %v10153_v59 = vld [vmem:[#allocation27_spill] sm:$0xff]  ;;  %v10154_v34 = vld [vmem:[#allocation29_spill] sm:$0xff] }
 0xb3b   : > { %v2500_v5 = vsub.f32 %v10148_v0, %v8038_v53  ;;  %v2502_v57 = vsub.f32 %v10149_v20, %v8038_v53  ;;  %v2504_v52 = vsub.f32 %v7892_v1, %v8038_v53  ;;  %v2506_v60 = vsub.f32 %v10150_v63, %v8038_v53 }
 0xb3c   : > { %v2508_v21 = vsub.f32 %v7900_v39, %v8038_v53  ;;  %v2510_v49 = vsub.f32 %v7904_v42, %v8038_v53  ;;  %v2512_v55 = vsub.f32 %v7908_v29, %v8038_v53  ;;  %v2514_v11 = vsub.f32 %v10151_v14, %v8038_v53 }
 0xb3d   : > { %6073 = vpow2.f32 %v2749_v38  ;;  %v2516_v27 = vsub.f32 %v10152_v10, %v8038_v53  ;;  %v8175_v1 = vpack.c.bf16 %v2474_v8, %v2472_v62  ;;  %v2564_v41 = vunpack.c.l.bf16 %v2532_v51 }
 0xb3e   : > { %6075 = vpow2.f32 %v2753_v43  ;;  %v2518_v39 = vsub.f32 %v10153_v59, %v8038_v53  ;;  %v2520_v42 = vsub.f32 %v10133_v17, %v8038_v53  ;;  %v2522_v29 = vsub.f32 %v10154_v34, %v8038_v53 }
 0xb3f   : > { %v2524_v0 = vsub.f32 %v7945_v16, %v8038_v53  ;;  %v2526_v38 = vsub.f32 %v7966_v56, %v8038_v53  ;;  %v8187_v20 = vpack.c.bf16 %v2478_v2, %v2476_v24  ;;  %v2566_v62 = vunpack.c.h.bf16 %v2532_v51 }
 0xb40   : > { %v8189_v8 = vpack.c.bf16 %v2482_v45, %v2480_v6  ;;  %v8191_v43 = vpack.c.bf16 %v2486_v36, %v2484_v12  ;;  %v8193_v63 = vpack.c.bf16 %v2490_v37, %v2488_v13  ;;  %v2627_v14 = vmul.f32 1.442695, %v2563_v46 }
 0xb41   : > { %v8195_v17 = vpack.c.bf16 %v2494_v28, %v2492_v26  ;;  %v8197_v10 = vpack.c.bf16 %v2498_v18, %v2496_v40  ;;  %v2568_v59 = vunpack.c.l.bf16 %v8175_v1  ;;  %v2629_v16 = vmul.f32 1.442695, %v2564_v41 }
 0xb42   : > { %v8200_v34 = vpack.c.bf16 %v2502_v57, %v2500_v5  ;;  %v8202_v56 = vpack.c.bf16 %v2506_v60, %v2504_v52  ;;  %v2591_v53 = vunpack.c.l.bf16 %v8102_v32  ;;  %v2631_v24 = vmul.f32 1.442695, %v2565_v25 }
 0xb43   : > { %v8205_v2 = vpop.eup %6073  ;;  %v8207_v6 = vpack.c.bf16 %v2510_v49, %v2508_v21  ;;  %v8209_v45 = vpack.c.bf16 %v2514_v11, %v2512_v55  ;;  %v2569_v46 = vunpack.c.h.bf16 %v8090_v4  ;;  %v2633_v12 = vmul.f32 1.442695, %v2566_v62 }
 0xb44   : > { %v8212_v36 = vpop.eup %6075  ;;  %v8214_v13 = vpack.c.bf16 %v2518_v39, %v2516_v27  ;;  %v2593_v37 = vunpack.c.h.bf16 %v8102_v32  ;;  %6077 = vpow2.f32 %v2627_v14  ;;  %v2635_v26 = vmul.f32 1.442695, %v2567_v44 }
 0xb45   : > { %v8217_v51 = vpack.c.bf16 %v2522_v29, %v2520_v42  ;;  %v2587_v25 = vunpack.c.l.bf16 %v8100_v47  ;;  %6079 = vpow2.f32 %v2629_v16  ;;  %v2637_v28 = vmul.f32 1.442695, %v2568_v59 }
 0xb46   : > { %v8220_v40 = vpack.c.bf16 %v2526_v38, %v2524_v0  ;;  %v2589_v18 = vunpack.c.h.bf16 %v8100_v47  ;;  %6081 = vpow2.f32 %v2631_v24  ;;  %v2683_v4 = vmul.f32 1.442695, %v2591_v53 }
 0xb47   : > { %v2570_v5 = vunpack.c.h.bf16 %v8175_v1  ;;  %v2571_v57 = vunpack.c.l.bf16 %v8092_v54  ;;  %6083 = vpow2.f32 %v2633_v12  ;;  %v2639_v32 = vmul.f32 1.442695, %v2569_v46 }
 0xb48   : > { %v2572_v44 = vunpack.c.l.bf16 %v8187_v20  ;;  %v2573_v52 = vunpack.c.h.bf16 %v8092_v54  ;;  %6085 = vpow2.f32 %v2635_v26  ;;  %v2687_v60 = vmul.f32 1.442695, %v2593_v37 }
 0xb49   : > { %v2583_v21 = vunpack.c.l.bf16 %v8098_v23  ;;  %6087 = vpow2.f32 %v2637_v28  ;;  %v2675_v49 = vmul.f32 1.442695, %v2587_v25  ;;  %v8230_v47 = vpack.c.bf16 %v8125_v61, %v8118_v19 }
 0xb4a   : > { %v8232_v55 = vpop.eup %6077  ;;  %v2574_v11 = vunpack.c.h.bf16 %v8187_v20  ;;  %v2585_v27 = vunpack.c.h.bf16 %v8098_v23  ;;  %v2679_v1 = vmul.f32 1.442695, %v2589_v18  ;;  %6089 = vpow2.f32 %v2683_v4 }
 0xb4b   : > { %v8236_v41 = vpop.eup %6079  ;;  %v2575_v54 = vunpack.c.l.bf16 %v8094_v50  ;;  %v2576_v39 = vunpack.c.l.bf16 %v8189_v8  ;;  %6091 = vpow2.f32 %v2639_v32  ;;  %v2643_v42 = vmul.f32 1.442695, %v2571_v57  ;;  %2939 = vmatpush.bf16.msra.mxu3 %v8230_v47 }
 0xb4c   : > { %v6082_v19 = vpop.eup %6081  ;;  %v2577_v61 = vunpack.c.h.bf16 %v8094_v50  ;;  %v2578_v29 = vunpack.c.h.bf16 %v8189_v8  ;;  %v2647_v0 = vmul.f32 1.442695, %v2573_v52  ;;  %6093 = vpow2.f32 %v2687_v60 }
 0xb4d   : > { %v8243_v23 = vpop.eup %6083  ;;  %v2579_v38 = vunpack.c.l.bf16 %v8096_v15  ;;  %v2580_v20 = vunpack.c.l.bf16 %v8191_v43  ;;  %v2667_v62 = vmul.f32 1.442695, %v2583_v21  ;;  %6095 = vpow2.f32 %v2675_v49 }
 0xb4e   : > { %v6086_v14 = vpop.eup %6085  ;;  %v2581_v59 = vunpack.c.h.bf16 %v8096_v15  ;;  %v2582_v16 = vunpack.c.h.bf16 %v8191_v43  ;;  %v2671_v53 = vmul.f32 1.442695, %v2585_v27  ;;  %6097 = vpow2.f32 %v2679_v1 }
 0xb4f   : > { %v8249_v50 = vpop.eup %6087  ;;  %v2584_v8 = vunpack.c.l.bf16 %v8193_v63  ;;  %v2586_v24 = vunpack.c.h.bf16 %v8193_v63  ;;  %6099 = vpow2.f32 %v2643_v42  ;;  %v2651_v46 = vmul.f32 1.442695, %v2575_v54 }
 0xb50   : > { %v6090_v12 = vpop.eup %6089  ;;  %v2588_v37 = vunpack.c.l.bf16 %v8195_v17  ;;  %v2590_v26 = vunpack.c.h.bf16 %v8195_v17  ;;  %6101 = vpow2.f32 %v2647_v0  ;;  %v2655_v25 = vmul.f32 1.442695, %v2577_v61 }
 0xb51   : > { %v6092_v15 = vpop.eup %6091  ;;  %v2592_v43 = vunpack.c.l.bf16 %v8197_v10  ;;  %v2594_v28 = vunpack.c.h.bf16 %v8197_v10  ;;  %v2659_v18 = vmul.f32 1.442695, %v2579_v38  ;;  %6103 = vpow2.f32 %v2667_v62 }
 0xb52   : > { %v6094_v4 = vpop.eup %6093  ;;  %v2595_v57 = vunpack.c.l.bf16 %v8104_v48  ;;  %v2663_v32 = vmul.f32 1.442695, %v2581_v59  ;;  %6105 = vpow2.f32 %v2671_v53  ;;  %v2597_v60 = vunpack.c.h.bf16 %v8104_v48 }
 0xb53   : > { %v6096_v52 = vpop.eup %6095  ;;  %v2641_v21 = vmul.f32 1.442695, %v2570_v5  ;;  %6107 = vpow2.f32 %v2651_v46  ;;  %v8260_v49 = vpack.c.bf16 %v6094_v4, %v6090_v12  ;;  %v2599_v54 = vunpack.c.l.bf16 %v8106_v9 }
 0xb54   : > { %v6098_v27 = vpop.eup %6097  ;;  %v2645_v42 = vmul.f32 1.442695, %v2572_v44  ;;  %6109 = vpow2.f32 %v2655_v25  ;;  %v2601_v38 = vunpack.c.h.bf16 %v8106_v9  ;;  %v2649_v62 = vmul.f32 1.442695, %v2574_v11 }
 0xb55   : > { %v6100_v61 = vpop.eup %6099  ;;  %6111 = vpow2.f32 %v2659_v18  ;;  %2925 = vmatpush.bf16.msra.mxu1 %v8260_v49  ;;  %v2653_v59 = vmul.f32 1.442695, %v2576_v39  ;;  %v8267_v53 = vpack.c.bf16 %v6092_v15, %v6086_v14  ;;  %v8270_v46 = vpack.c.bf16 %v6082_v19, %v8232_v55 }
 0xb56   : > { %v6102_v5 = vpop.eup %6101  ;;  %6113 = vpow2.f32 %v2663_v32  ;;  %v2657_v25 = vmul.f32 1.442695, %v2578_v29  ;;  %v8273_v4 = vpack.c.bf16 %v6098_v27, %v6096_v52  ;;  %v2661_v11 = vmul.f32 1.442695, %v2580_v20 }
 0xb57   : > { %v6104_v12 = vpop.eup %6103  ;;  %6115 = vpow2.f32 %v2641_v21  ;;  %v2787_v18 = vunpack.c.l.bf16 %v8270_v46  ;;  %v2789_v39 = vunpack.c.h.bf16 %v8270_v46  ;;  %v2603_v14 = vunpack.c.l.bf16 %v8108_v31 }
 0xb58   : > { %v6106_v0 = vpop.eup %6105  ;;  %6117 = vpow2.f32 %v2645_v42  ;;  %v2665_v55 = vmul.f32 1.442695, %v2582_v16  ;;  %v2669_v19 = vmul.f32 1.442695, %v2584_v8  ;;  %v8279_v29 = vpack.c.bf16 %v6102_v5, %v6100_v61 }
 0xb59   : > { %v6108_v32 = vpop.eup %6107  ;;  %6119 = vpow2.f32 %v2649_v62  ;;  %2926 = vmatpush.bf16.msra.mxu1 %v8273_v4  ;;  %v2791_v52 = vunpack.c.l.bf16 %v8267_v53  ;;  %v2851_v21 = vadd.f32 %v2789_v39, %v2787_v18  ;;  %v2604_v27 = vunpack.c.l.bf16 %v8207_v6 }
 0xb5a   : > { %v6110_v15 = vpop.eup %6109  ;;  %6121 = vpow2.f32 %v2653_v59  ;;  %v2673_v42 = vmul.f32 1.442695, %v2586_v24  ;;  %v8283_v44 = vpack.c.bf16 %v6106_v0, %v6104_v12  ;;  %v2677_v16 = vmul.f32 1.442695, %v2588_v37 }
 0xb5b   : > { %v6112_v20 = vpop.eup %6111  ;;  %6123 = vpow2.f32 %v2657_v25  ;;  %v2793_v8 = vunpack.c.h.bf16 %v8267_v53  ;;  %v2852_v62 = vadd.f32 %v2851_v21, %v2791_v52  ;;  %v2619_v61 = vunpack.c.l.bf16 %v8116_v30 }
 0xb5c   : > { %v6114_v1 = vpop.eup %6113  ;;  %6125 = vpow2.f32 %v2661_v11  ;;  %v2681_v5 = vmul.f32 1.442695, %v2590_v26  ;;  %v2685_v59 = vmul.f32 1.442695, %v2592_v43  ;;  %v2761_v37 = vpack.c.bf16 %v6110_v15, %v6108_v32 }
 0xb5d   : > { %v8286_v63 = vpop.eup %6115  ;;  %6127 = vpow2.f32 %v2665_v55  ;;  %2927 = vmatpush.bf16.msra.mxu1 %v8283_v44  ;;  %v2795_v0 = vunpack.c.l.bf16 %v8279_v29  ;;  %v2853_v12 = vadd.f32 %v2852_v62, %v2793_v8  ;;  %v2621_v11 = vunpack.c.h.bf16 %v8116_v30 }
 0xb5e   : > { %v8294_v24 = vpop.eup %6117  ;;  %6129 = vpow2.f32 %v2669_v19  ;;  %v2689_v17 = vmul.f32 1.442695, %v2594_v28  ;;  %v2763_v26 = vpack.c.bf16 %v6114_v1, %v6112_v20  ;;  %v2691_v43 = vmul.f32 1.442695, %v2595_v57 }
 0xb5f   : > { %v8297_v25 = vpop.eup %6119  ;;  %6131 = vpow2.f32 %v2673_v42  ;;  %v2797_v39 = vunpack.c.h.bf16 %v8279_v29  ;;  %v2854_v32 = vadd.f32 %v2853_v12, %v2795_v0  ;;  %v2615_v19 = vunpack.c.l.bf16 %v8114_v22 }
 0xb60   : > { %v8302_v18 = vpop.eup %6121  ;;  %6133 = vpow2.f32 %v2677_v16  ;;  %v2617_v30 = vunpack.c.h.bf16 %v8114_v22  ;;  %v2695_v10 = vmul.f32 1.442695, %v2597_v60  ;;  %v2739_v1 = vmul.f32 1.442695, %v2619_v61 }
 0xb61   : > { %v8307_v55 = vpop.eup %6123  ;;  %6135 = vpow2.f32 %v2681_v5  ;;  %2928 = vmatpush.bf16.msra.mxu1 %v2763_v26  ;;  %v2799_v15 = vunpack.c.l.bf16 %v2761_v37  ;;  %v2855_v57 = vadd.f32 %v2854_v32, %v2797_v39  ;;  %v2605_v21 = vunpack.c.h.bf16 %v8108_v31 }
 0xb62   : > { %v8313_v28 = vpop.eup %6125  ;;  %6137 = vpow2.f32 %v2685_v59  ;;  %v2606_v20 = vunpack.c.h.bf16 %v8207_v6  ;;  %v2699_v22 = vmul.f32 1.442695, %v2599_v54  ;;  %v2743_v48 = vmul.f32 1.442695, %v2621_v11 }
 0xb63   : > { %v8315_v52 = vpop.eup %6127  ;;  %6139 = vpow2.f32 %v2689_v17  ;;  %v2801_v60 = vunpack.c.h.bf16 %v2761_v37  ;;  %v2856_v16 = vadd.f32 %v2855_v57, %v2799_v15  ;;  %v2611_v62 = vunpack.c.l.bf16 %v8112_v33 }
 0xb64   : > { %v8321_v42 = vpop.eup %6129  ;;  %6141 = vpow2.f32 %v2691_v43  ;;  %v2613_v61 = vunpack.c.h.bf16 %v8112_v33  ;;  %v2731_v5 = vmul.f32 1.442695, %v2615_v19  ;;  %v2735_v0 = vmul.f32 1.442695, %v2617_v30 }
 0xb65   : > { %v8323_v8 = vpop.eup %6131  ;;  %6143 = vpow2.f32 %v2695_v10  ;;  %2929 = vmatpush.bf16.msra.mxu1 %v2761_v37  ;;  %v2803_v54 = vunpack.c.l.bf16 %v2763_v26  ;;  %v2857_v12 = vadd.f32 %v2856_v16, %v2801_v60  ;;  %v2607_v11 = vunpack.c.l.bf16 %v8110_v7 }
 0xb66   : > { %v8327_v59 = vpop.eup %6133  ;;  %6145 = vpow2.f32 %v2739_v1  ;;  %v2609_v43 = vunpack.c.h.bf16 %v8110_v7  ;;  %v2703_v39 = vmul.f32 1.442695, %v2601_v38  ;;  %v2707_v37 = vmul.f32 1.442695, %v2603_v14 }
 0xb67   : > { %v8329_v17 = vpop.eup %6135  ;;  %6147 = vpow2.f32 %v2699_v22  ;;  %v2805_v32 = vunpack.c.h.bf16 %v2763_v26  ;;  %v2858_v19 = vadd.f32 %v2857_v12, %v2803_v54  ;;  %v2723_v10 = vmul.f32 1.442695, %v2611_v62 }
 0xb68   : > { %v6138_v33 = vpop.eup %6137  ;;  %6149 = vpow2.f32 %v2743_v48  ;;  %v2727_v1 = vmul.f32 1.442695, %v2613_v61  ;;  %v2807_v15 = vunpack.c.l.bf16 %v8283_v44  ;;  %v8341_v9 = vpack.c.bf16 %v8286_v63, %v8249_v50 }
 0xb69   : > { %v6140_v30 = vpop.eup %6139  ;;  %6151 = vpow2.f32 %v2731_v5  ;;  %2930 = vmatpush.bf16.msra.mxu1 %v8279_v29  ;;  %v2859_v57 = vadd.f32 %v2858_v19, %v2805_v32  ;;  %v8345_v31 = vpack.c.bf16 %v8243_v23, %v8236_v41  ;;  %v2711_v14 = vmul.f32 1.442695, %v2605_v21 }
 0xb6a   : > { %v6142_v7 = vpop.eup %6141  ;;  %6153 = vpow2.f32 %v2735_v0  ;;  %v2715_v26 = vmul.f32 1.442695, %v2607_v11  ;;  %v2809_v22 = vunpack.c.h.bf16 %v8283_v44  ;;  %v2719_v50 = vmul.f32 1.442695, %v2609_v43 }
 0xb6b   : > { %v6144_v38 = vpop.eup %6143  ;;  %6155 = vpow2.f32 %v2703_v39  ;;  %v2860_v29 = vadd.f32 %v2859_v57, %v2807_v15  ;;  %v2788_v60 = vunpack.c.l.bf16 %v8345_v31  ;;  %v2790_v16 = vunpack.c.h.bf16 %v8345_v31 }
 0xb6c   : > { %v6146_v48 = vpop.eup %6145  ;;  %6157 = vpow2.f32 %v2707_v37  ;;  %v2811_v63 = vunpack.c.l.bf16 %v8273_v4  ;;  %v8354_v41 = vpack.c.bf16 %v8297_v25, %v8294_v24  ;;  %v2792_v21 = vunpack.c.l.bf16 %v8341_v9 }
 0xb6d   : > { %v6148_v62 = vpop.eup %6147  ;;  %6159 = vpow2.f32 %v2723_v10  ;;  %2931 = vmatpush.bf16.msra.mxu1 %v8267_v53  ;;  %v2861_v44 = vadd.f32 %v2860_v29, %v2809_v22  ;;  %v2888_v61 = vadd.f32 %v2790_v16, %v2788_v60  ;;  %v2813_v0 = vunpack.c.h.bf16 %v8273_v4 }
 0xb6e   : > { %v6150_v23 = vpop.eup %6149  ;;  %6161 = vpow2.f32 %v2727_v1  ;;  %v8360_v12 = vpack.c.bf16 %v6140_v30, %v6138_v33  ;;  %v2794_v24 = vunpack.c.h.bf16 %v8341_v9  ;;  %v10155_v39 = vunpack.c.l.bf16 %v8200_v34 }
 0xb6f   : > { %v6152_v5 = vpop.eup %6151  ;;  %6163 = vpow2.f32 %v2711_v14  ;;  %v8358_v54 = vpack.c.bf16 %v6150_v23, %v6146_v48  ;;  %v2862_v53 = vadd.f32 %v2861_v44, %v2811_v63  ;;  %v2889_v25 = vadd.f32 %v2888_v61, %v2792_v21 }
 0xb70   : > { %v6154_v11 = vpop.eup %6153  ;;  %6165 = vpow2.f32 %v2715_v26  ;;  %v2693_v37 = vmul.f32 1.442695, %v10155_v39  ;;  %v2815_v32 = vunpack.c.l.bf16 %v8260_v49  ;;  %v8368_v4 = vpack.c.bf16 %v6144_v38, %v6142_v7 }
 0xb71   : > { %v6156_v43 = vpop.eup %6155  ;;  %6167 = vpow2.f32 %v2719_v50  ;;  %2940 = vmatpush.bf16.msra.mxu3 %v8358_v54  ;;  %2932 = vmatpush.bf16.msra.mxu1 %v8270_v46  ;;  %v2863_v19 = vadd.f32 %v2862_v53, %v2813_v0  ;;  %v8373_v30 = vpack.c.bf16 %v8307_v55, %v8302_v18  ;;  %v2796_v10 = vunpack.c.l.bf16 %v8354_v41 }
 0xb72   : > { %v6158_v33 = vpop.eup %6157  ;;  %v2890_v1 = vadd.f32 %v2889_v25, %v2794_v24  ;;  %v2608_v57 = vunpack.c.l.bf16 %v8209_v45  ;;  %v10156_v14 = vunpack.c.h.bf16 %v8200_v34  ;;  %v2817_v46 = vunpack.c.h.bf16 %v8260_v49 }
 0xb73   : > { %v6160_v15 = vpop.eup %6159  ;;  %v8380_v7 = vpack.c.bf16 %v6154_v11, %v6152_v5  ;;  %v2864_v22 = vadd.f32 %v2863_v19, %v2815_v32  ;;  %v8385_v18 = vpack.c.bf16 %v8329_v17, %v8327_v59  ;;  %v2798_v55 = vunpack.c.h.bf16 %v8354_v41 }
 0xb74   : > { %v2697_v26 = vmul.f32 1.442695, %v10156_v14  ;;  %v6162_v38 = vpop.eup %6161  ;;  %2933 = vmatmul.bf16.vlgmr.msra.gmra.mxu1 %v8017_v58  ;;  %v2891_v48 = vadd.f32 %v2890_v1, %v2796_v10  ;;  %6169 = vpow2.f32 %v2693_v37  ;;  %v10157_v34 = vunpack.c.l.bf16 %v8202_v56 }
 0xb75   : > { %2953 = vmatpush.bf16.msrb.mxu1 %v8360_v12  ;;  %v6164_v29 = vpop.eup %6163  ;;  %2941 = vmatpush.bf16.msra.mxu3 %v8380_v7  ;;  %v8391_v49 = vpack.c.bf16 %v6156_v43, %v6148_v62  ;;  %v2819_v16 = vunpack.c.l.bf16 %v8368_v4  ;;  %v2865_v63 = vadd.f32 %v2864_v22, %v2817_v46  ;;  %v2764_v59 = vpack.c.bf16 %v8315_v52, %v8313_v28 }
 0xb76   : > { %v2701_v60 = vmul.f32 1.442695, %v10157_v34  ;;  %v6166_v50 = vpop.eup %6165  ;;  %v2800_v17 = vunpack.c.l.bf16 %v8373_v30  ;;  %v2892_v23 = vadd.f32 %v2891_v48, %v2798_v55  ;;  %6171 = vpow2.f32 %v2697_v26 }
 0xb77   : > { %v6168_v44 = vpop.eup %6167  ;;  %v10158_v21 = vunpack.c.h.bf16 %v8202_v56  ;;  %v8400_v5 = vpack.c.bf16 %v6162_v38, %v6160_v15  ;;  %v2766_v62 = vpack.c.bf16 %v8323_v8, %v8321_v42  ;;  %v2821_v0 = vunpack.c.h.bf16 %v8368_v4 }
 0xb78   : > { %v2866_v11 = vadd.f32 %v2865_v63, %v2819_v16  ;;  %v2802_v53 = vunpack.c.h.bf16 %v8373_v30  ;;  %v2893_v24 = vadd.f32 %v2892_v23, %v2800_v17  ;;  %v2620_v28 = vunpack.c.l.bf16 %v8220_v40 }
 0xb79   : > { %2954 = vmatpush.bf16.msrb.mxu1 %v8385_v18  ;;  %v2705_v61 = vmul.f32 1.442695, %v10158_v21  ;;  %6173 = vpow2.f32 %v2701_v60  ;;  %v2709_v52 = vmul.f32 1.442695, %v2604_v27  ;;  %2942 = vmatpush.bf16.msra.mxu3 %v8400_v5  ;;  %v2823_v56 = vunpack.c.l.bf16 %v8391_v49 }
 0xb7a   : > { %v2775_v25 = vpack.c.bf16 %v6164_v29, %v6158_v33  ;;  %v2867_v43 = vadd.f32 %v2866_v11, %v2821_v0  ;;  %v2804_v42 = vunpack.c.l.bf16 %v2764_v59  ;;  %v2894_v8 = vadd.f32 %v2893_v24, %v2802_v53  ;;  %v6170_v39 = vpop.eup %6169 }
 0xb7b   : > { %v2622_v37 = vunpack.c.h.bf16 %v8220_v40  ;;  %6175 = vpow2.f32 %v2705_v61  ;;  %v2713_v32 = vmul.f32 1.442695, %v2606_v20  ;;  %v2777_v19 = vpack.c.bf16 %v6168_v44, %v6166_v50 }
 0xb7c   : > { %v2825_v10 = vunpack.c.h.bf16 %v8391_v49  ;;  %v2868_v27 = vadd.f32 %v2867_v43, %v2823_v56  ;;  %v2806_v1 = vunpack.c.h.bf16 %v2764_v59  ;;  %v2895_v15 = vadd.f32 %v2894_v8, %v2804_v42  ;;  %v6172_v14 = vpop.eup %6171 }
 0xb7d   : > { %2955 = vmatpush.bf16.msrb.mxu1 %v2766_v62  ;;  %v2616_v33 = vunpack.c.l.bf16 %v8217_v51  ;;  %6177 = vpow2.f32 %v2709_v52  ;;  %v2717_v26 = vmul.f32 1.442695, %v2608_v57  ;;  %v2741_v46 = vmul.f32 1.442695, %v2620_v28  ;;  %2943 = vmatpush.bf16.msra.mxu3 %v2777_v19  ;;  %v10159_v52 = vld [vmem:[#allocation12_spill] sm:$0xff] }
 0xb7e   : > { %v2827_v38 = vunpack.c.l.bf16 %v2775_v25  ;;  %v2869_v22 = vadd.f32 %v2868_v27, %v2825_v10  ;;  %v2808_v40 = vunpack.c.l.bf16 %v2766_v62  ;;  %v2896_v55 = vadd.f32 %v2895_v15, %v2806_v1 }
 0xb7f   : > { %v6174_v6 = vpop.eup %6173  ;;  %v2610_v20 = vunpack.c.h.bf16 %v8209_v45  ;;  %v2618_v48 = vunpack.c.h.bf16 %v8217_v51  ;;  %6179 = vpow2.f32 %v2713_v32  ;;  %v2745_v29 = vmul.f32 1.442695, %v2622_v37 }
 0xb80   : > { %v2829_v34 = vunpack.c.h.bf16 %v2775_v25  ;;  %v2870_v60 = vadd.f32 %v2869_v22, %v2827_v38  ;;  %v2810_v16 = vunpack.c.h.bf16 %v2766_v62  ;;  %v2897_v50 = vadd.f32 %v2896_v55, %v2808_v40 }
 0xb81   : > { %2956 = vmatpush.bf16.msrb.mxu1 %v2764_v59  ;;  %v6176_v63 = vpop.eup %6175  ;;  %v2612_v57 = vunpack.c.l.bf16 %v8214_v13  ;;  %6181 = vpow2.f32 %v2717_v26  ;;  %v2733_v17 = vmul.f32 1.442695, %v2616_v33  ;;  %2944 = vmatpush.bf16.msra.mxu3 %v2775_v25  ;;  %v2812_v59 = vunpack.c.l.bf16 %v8385_v18 }
 0xb82   : > { %6183 = vpow2.f32 %v2741_v46  ;;  %v2831_v23 = vunpack.c.l.bf16 %v2777_v19  ;;  %v2871_v44 = vadd.f32 %v2870_v60, %v2829_v34  ;;  %v2898_v45 = vadd.f32 %v2897_v50, %v2810_v16  ;;  %v5848_v46 = vld [vmem:[#allocation2 + $0x34] sm:$0xf0] }
 0xb83   : > { %v6178_v51 = vpop.eup %6177  ;;  %v2614_v21 = vunpack.c.h.bf16 %v8214_v13  ;;  %v2721_v61 = vmul.f32 1.442695, %v2610_v20  ;;  %v2737_v62 = vmul.f32 1.442695, %v2618_v48  ;;  %6185 = vpow2.f32 %v2745_v29  ;;  %v5608_v48 = vld [vmem:[#allocation2 + $0x20] sm:$0xf] }
 0xb84   : > { %v2833_v0 = vunpack.c.h.bf16 %v2777_v19  ;;  %v2872_v11 = vadd.f32 %v2871_v44, %v2831_v23  ;;  %v2814_v53 = vunpack.c.h.bf16 %v8385_v18  ;;  %v2899_v24 = vadd.f32 %v2898_v45, %v2812_v59 }
 0xb85   : > { %2957 = vmatpush.bf16.msrb.mxu1 %v8373_v30  ;;  %v6180_v28 = vpop.eup %6179  ;;  %v2135_v56 = vadd.f32 %v10159_v52, %v8012_v3  ;;  %v2725_v25 = vmul.f32 1.442695, %v2612_v57  ;;  %6187 = vpow2.f32 %v2733_v17  ;;  %2945 = vmatpush.bf16.msra.mxu3 %v8391_v49  ;;  %v2816_v30 = vunpack.c.l.bf16 %v8360_v12  ;;  %v5846_v57 = vld [vmem:[#allocation2 + $0x24] sm:$0xf0] }
 0xb86   : > { %v2835_v13 = vunpack.c.l.bf16 %v8400_v5  ;;  %v2873_v43 = vadd.f32 %v2872_v11, %v2833_v0  ;;  %v8429_v42 = vpack.c.bf16 %v6172_v14, %v6170_v39  ;;  %v2900_v8 = vadd.f32 %v2899_v24, %v2814_v53  ;;  %v5844_v53 = vld [vmem:[#allocation2 + $0x14] sm:$0xf0] }
 0xb87   : > { %v6182_v18 = vpop.eup %6181  ;;  %v2729_v37 = vmul.f32 1.442695, %v2614_v21  ;;  %6189 = vpow2.f32 %v2737_v62  ;;  %v2818_v32 = vunpack.c.h.bf16 %v8360_v12  ;;  %v8434_v3 = vpack.c.bf16 %v8212_v36, %v8205_v2  ;;  %v5600_v21 = vld [vmem:[#allocation2 + $0x10] sm:$0xf] }
 0xb88   : > { %v6184_v49 = vpop.eup %6183  ;;  %6191 = vpow2.f32 %v2721_v61  ;;  %v2837_v19 = vunpack.c.h.bf16 %v8400_v5  ;;  %v2874_v10 = vadd.f32 %v2873_v43, %v2835_v13  ;;  %v2901_v27 = vadd.f32 %v2900_v8, %v2816_v30  ;;  %v5616_v5 = vld [vmem:[#allocation2 + $0x30] sm:$0xf]  ;;  %v5592_v43 = vld [vmem:[#allocation2] sm:$0xf] }
 0xb89   : > { %2958 = vmatpush.bf16.msrb.mxu1 %v8354_v41  ;;  %v6186_v1 = vpop.eup %6185  ;;  %v8438_v41 = vpack.c.bf16 %v2135_v56, %v8020_v35  ;;  %6193 = vpow2.f32 %v2725_v25  ;;  %2946 = vmatpush.bf16.msra.mxu3 %v8368_v4  ;;  %v8441_v39 = vpack.c.bf16 %v6176_v63, %v6174_v6  ;;  %v2839_v12 = vunpack.c.l.bf16 %v8380_v7 }
 0xb8a   : > { %v2875_v15 = vadd.f32 %v2874_v10, %v2837_v19  ;;  %v2820_v2 = vunpack.c.l.bf16 %v8429_v42  ;;  %v2902_v36 = vadd.f32 %v2901_v27, %v2818_v32  ;;  %6195 = vpow2.f32 %v2729_v37 }
 0xb8b   : > { %v6188_v14 = vpop.eup %6187  ;;  %v2841_v35 = vunpack.c.h.bf16 %v8380_v7  ;;  %v8449_v4 = vpack.c.bf16 %v6186_v1, %v6184_v49  ;;  %v2822_v33 = vunpack.c.h.bf16 %v8429_v42  ;;  %v2776_v40 = vpack.c.bf16 %v6180_v28, %v6178_v51  ;;  %v5838_v49 = vld [vmem:[%s9970_s5 + $0x30] sm:$0xff] }
 0xb8c   : > { %2947 = vmatmul.bf16.vlgmr.msra.gmra.mxu3 %v8438_v41  ;;  %v2903_v26 = vadd.f32 %v2902_v36, %v2820_v2  ;;  %v2876_v38 = vadd.f32 %v2875_v15, %v2839_v12  ;;  %v2843_v6 = vunpack.c.l.bf16 %v8358_v54  ;;  %v2824_v20 = vunpack.c.l.bf16 %v8441_v39  ;;  %v5847_v15 = vld [vmem:[#allocation2 + $0x34] sm:$0xf] }
 0xb8d   : > { %2967 = vmatpush.bf16.msrb.mxu3 %v8434_v3  ;;  %2959 = vmatpush.bf16.msrb.mxu1 %v8341_v9  ;;  %v6190_v22 = vpop.eup %6189  ;;  %v5617_v9 = vor.u32 %v5848_v46, %v5616_v5  ;;  %v2826_v60 = vunpack.c.h.bf16 %v8441_v39  ;;  %v2845_v16 = vunpack.c.h.bf16 %v8358_v54  ;;  %v2847_v23 = vunpack.c.l.bf16 %v8230_v47  ;;  %v5618_v5 = vld [vmem:[#allocation2 + $0x38] sm:$0xf0] }
 0xb8e   : > { %v6192_v55 = vpop.eup %6191  ;;  %v2904_v7 = vadd.f32 %v2903_v26, %v2822_v33  ;;  %v2877_v29 = vadd.f32 %v2876_v38, %v2841_v35  ;;  %v2782_v50 = vpack.c.bf16 %v6190_v22, %v6188_v14  ;;  %v5609_v44 = vor.u32 %v5846_v57, %v5608_v48  ;;  %v5845_v26 = vld [vmem:[#allocation2 + $0x24] sm:$0xf]  ;;  %v5610_v22 = vld [vmem:[#allocation2 + $0x28] sm:$0xf0] }
 0xb8f   : > { %v6194_v34 = vpop.eup %6193  ;;  %v2828_v45 = vunpack.c.l.bf16 %v2776_v40  ;;  %v2849_v62 = vunpack.c.h.bf16 %v8230_v47  ;;  %v2830_v0 = vunpack.c.h.bf16 %v2776_v40  ;;  %v5601_v28 = vor.u32 %v5844_v53, %v5600_v21 }
 0xb90   : > { %v2905_v63 = vadd.f32 %v2904_v7, %v2824_v20  ;;  %v2878_v17 = vadd.f32 %v2877_v29, %v2843_v6  ;;  %v6196_v59 = vpop.eup %6195  ;;  %v2840_v19 = vunpack.c.l.bf16 %v2782_v50  ;;  %v2842_v27 = vunpack.c.h.bf16 %v2782_v50  ;;  %v5839_v20 = vld [vmem:[%s9970_s5 + $0x38] sm:$0xff]  ;;  %v5841_v7 = vld [vmem:[#allocation2 + $0x4] sm:$0xf] }
 0xb91   : > { %2968 = vmatpush.bf16.msrb.mxu3 %v8449_v4  ;;  %2960 = vmatpush.bf16.msrb.mxu1 %v8345_v31  ;;  %v2778_v31 = vpack.c.bf16 %v6192_v55, %v6182_v18  ;;  %v2780_v54 = vpack.c.bf16 %v6196_v59, %v6194_v34  ;;  %v2844_v12 = vunpack.c.l.bf16 %v8449_v4  ;;  %v2846_v36 = vunpack.c.h.bf16 %v8449_v4  ;;  %v5602_v4 = vld [vmem:[#allocation2 + $0x18] sm:$0xf0]  ;;  %v3029_v34 = vpop.permute.xlu1 %3028 }
 0xb92   : > { %v2906_v51 = vadd.f32 %v2905_v63, %v2826_v60  ;;  %v2879_v61 = vadd.f32 %v2878_v17, %v2845_v16  ;;  %v5621_v35 = vor.u32 %v5847_v15, %v5618_v5  ;;  %v2848_v33 = vunpack.c.l.bf16 %v8434_v3 }
 0xb93   : > { %v2832_v52 = vunpack.c.l.bf16 %v2778_v31  ;;  %v2834_v30 = vunpack.c.h.bf16 %v2778_v31  ;;  %v2836_v18 = vunpack.c.l.bf16 %v2780_v54  ;;  %v2838_v37 = vunpack.c.h.bf16 %v2780_v54 }
 0xb94   : > { %2961 = vmatmul.bf16.vlgmr.msrb.gmra.mxu1 %v8017_v58  ;;  %v2907_v11 = vadd.f32 %v2906_v51, %v2828_v45  ;;  %v2880_v24 = vadd.f32 %v2879_v61, %v2847_v23  ;;  %v5842_v58 = vld [vmem:[#allocation2 + $0x4] sm:$0xf0]  ;;  %v2850_v38 = vunpack.c.h.bf16 %v8434_v3  ;;  %v5840_v3 = vld [vmem:[%s9970_s5 + $0x40] sm:$0xff] }
 0xb95   : > { %3114 = vmatpush.bf16.msra.mxu1 %v5617_v9  ;;  %2969 = vmatpush.bf16.msrb.mxu3 %v2782_v50  ;;  %v5593_v8 = vor.u32 %v5842_v58, %v5592_v43  ;;  %v5843_v9 = vld [vmem:[#allocation2 + $0x14] sm:$0xf] }
 0xb96   : > { %v2908_v56 = vadd.f32 %v2907_v11, %v2830_v0  ;;  %v2881_v25 = vadd.f32 %v2880_v24, %v2849_v62  ;;  %v5605_v6 = vor.u32 %v5843_v9, %v5602_v4 }
 0xb98   : > { %v2909_v13 = vadd.f32 %v2908_v56, %v2832_v52  ;;  %v2882_v16 = vrot.slane %v2881_v25, 4 }
 0xb99   : > { %3115 = vmatpush.bf16.msra.mxu1 %v5609_v44  ;;  %2970 = vmatpush.bf16.msrb.mxu3 %v2780_v54  ;;  %v3034_v63 = vpop.permute.xlu1 %3033 }
 0xb9a   : > { %v2910_v47 = vadd.f32 %v2909_v13, %v2834_v30  ;;  %v2883_v57 = vadd.f32 %v2882_v16, %v2881_v25 }
 0xb9c   : > { %v2911_v32 = vadd.f32 %v2910_v47, %v2836_v18  ;;  %v2884_v23 = vrot.slane %v2883_v57, 2 }
 0xb9d   : > { %3116 = vmatpush.bf16.msra.mxu1 %v5601_v28  ;;  %2971 = vmatpush.bf16.msrb.mxu3 %v2778_v31 }
 0xb9e   : > { %v2912_v10 = vadd.f32 %v2911_v32, %v2838_v37  ;;  %v2885_v45 = vadd.f32 %v2884_v23, %v2883_v57 }
 0xba0   : > { %v2913_v1 = vadd.f32 %v2912_v10, %v2840_v19  ;;  %v2886_v62 = vrot.slane %v2885_v45, 1 }
 0xba1   : > { %3117 = vmatpush.bf16.msra.mxu1 %v5593_v8  ;;  %2972 = vmatpush.bf16.msrb.mxu3 %v2776_v40  ;;  %v3019_v51 = vpop.permute.xlu1 %3018 }
 0xba2   : > { %v2914_v2 = vadd.f32 %v2913_v1, %v2842_v27  ;;  %v2887_v0 = vadd.f32 %v2886_v62, %v2885_v45 }
 0xba4   : > { %5622 = vmatmul.msk.bf16.vlgmr.msra.gmra.mxu1 %vm384_vm0, %v5838_v49  ;;  %v2915_v14 = vadd.f32 %v2914_v2, %v2844_v12  ;;  %6197 = vrcp.f32 %v2887_v0 }
 0xba5   : > { %2973 = vmatpush.bf16.msrb.mxu3 %v8441_v39  ;;  %v5613_v39 = vor.u32 %v5845_v26, %v5610_v22 }
 0xba6   : > { %v2916_v46 = vadd.f32 %v2915_v14, %v2846_v36 }
 0xba8   : > { %v2917_v40 = vadd.f32 %v2916_v46, %v2848_v33 }
 0xba9   : > { %2974 = vmatpush.bf16.msrb.mxu3 %v8429_v42  ;;  %v5594_v42 = vld [vmem:[#allocation2 + $0x8] sm:$0xf0]  ;;  %v3024_v24 = vpop.permute.xlu1 %3023 }
 0xbaa   : > { %v2918_v55 = vadd.f32 %v2917_v40, %v2850_v38  ;;  %v5597_v48 = vor.u32 %v5841_v7, %v5594_v42  ;;  %v6198_v13 = vpop.eup %6197 }
 0xbac   : > { %2975 = vmatmul.bf16.vlgmr.msrb.gmra.mxu3 %v8438_v41  ;;  %v2919_v50 = vrot.slane %v2918_v55, 4 }
 0xbad   : > { %3138 = vmatpush.bf16.msra.mxu3 %v5621_v35 }
 0xbae   : > { %v2920_v17 = vadd.f32 %v2919_v50, %v2918_v55 }
 0xbb0   : > { %v2921_v44 = vrot.slane %v2920_v17, 2 }
 0xbb1   : > { %3139 = vmatpush.bf16.msra.mxu3 %v5613_v39 }
 0xbb2   : > { %v2922_v21 = vadd.f32 %v2921_v44, %v2920_v17 }
 0xbb4   : > { %5623 = vmatmul.msk.bf16.gmra.mxu1 %vm384_vm0, %v5839_v20  ;;  %v2923_v54 = vrot.slane %v2922_v21, 1 }
 0xbb5   : > { %3140 = vmatpush.bf16.msra.mxu3 %v5605_v6 }
 0xbb6   : > { %v2924_v53 = vadd.f32 %v2923_v54, %v2922_v21 }
 0xbb8   : > { %6199 = vrcp.f32 %v2924_v53 }
 0xbb9   : > { %3141 = vmatpush.bf16.msra.mxu3 %v5597_v48 }
 0xbbc   : > { %5625 = vmatmul.msk.bf16.vlgmr.msra.gmra.mxu3 %vm384_vm0, %v5838_v49 }
 0xbbe   : > { %v6200_v8 = vpop.eup %6199 }
 0xbc4   : > { %5624 = vmatmul.msk.bf16.gmra.mxu1 %vm384_vm0, %v5840_v3 }
 0xbcc   : > { %5626 = vmatmul.msk.bf16.gmra.mxu3 %vm384_vm0, %v5839_v20 }
 0xbdc   : > { %5627 = vmatmul.msk.bf16.gmra.mxu3 %vm384_vm0, %v5840_v3  ;;  %v5671_v3 = vld [vmem:[%s9971_s6 + $0xb8] sm:$0xff] }
 0xbf1   : > { %v2934_v41 = vpop.f32.mrf.mxu1 }
 0xbf9   : > { %v2936_v29 = vpop.f32.mrf.mxu1 }
 0xc0f   : > { %v2948_v31 = vpop.f32.mrf.mxu3 }
 0xc10   : > { %v2949_v25 = vadd.f32 %v2948_v31, %v2934_v41 }
 0xc11   : > { %v2962_v60 = vpop.f32.mrf.mxu1 }
 0xc12   : > { %v2983_v18 = vmul.f32 %v6198_v13, %v2949_v25 }
 0xc17   : > { %v2950_v11 = vpop.f32.mrf.mxu3 }
 0xc18   : > { %v2951_v32 = vadd.f32 %v2950_v11, %v2936_v29 }
 0xc19   : > { %v2964_v59 = vpop.f32.mrf.mxu1 }
 0xc1a   : > { %v2985_v10 = vmul.f32 %v6198_v13, %v2951_v32 }
 0xc21   : > { %v3119_v61 = vpop.f32.mrf.mxu1 }
 0xc22   : > { %v3120_v52 = vadd.f32 %v3119_v61, %v3019_v51 }
 0xc29   : > { %v3121_v28 = vpop.f32.mrf.mxu1 }
 0xc2a   : > { %v3122_v56 = vadd.f32 %v3121_v28, %v3024_v24 }
 0xc2c   : > { %v3158_v58 = vpack.c.bf16 %v3122_v56, %v3120_v52 }
 0xc2e   : > { %3243 = vmatpush.bf16.msrb.mxu1 %v3158_v58 }
 0xc2f   : > { %v2976_v30 = vpop.f32.mrf.mxu3 }
 0xc30   : > { %v2977_v43 = vadd.f32 %v2976_v30, %v2962_v60 }
 0xc31   : > { %v3124_v5 = vpop.f32.mrf.mxu1 }
 0xc32   : > { %v2984_v47 = vmul.f32 %v6200_v8, %v2977_v43  ;;  %v3125_v38 = vadd.f32 %v3124_v5, %v3029_v34 }
 0xc34   : > { %v2987_v37 = vpack.c.bf16 %v2984_v47, %v2983_v18 }
 0xc36   : > { %2992 = vst [vmem:[#allocation3 + $0x10] sm:$0xff] %v2987_v37 }
 0xc37   : > { %v2978_v49 = vpop.f32.mrf.mxu3 }
 0xc38   : > { %v2979_v19 = vadd.f32 %v2978_v49, %v2964_v59 }
 0xc39   : > { %v3126_v33 = vpop.f32.mrf.mxu1 }
 0xc3a   : > { %v2986_v27 = vmul.f32 %v6200_v8, %v2979_v19  ;;  %v3127_v26 = vadd.f32 %v3126_v33, %v3034_v63 }
 0xc3c   : > { %v2988_v1 = vpack.c.bf16 %v2986_v27, %v2985_v10  ;;  %v3160_v39 = vpack.c.bf16 %v3127_v26, %v3125_v38 }
 0xc3e   : > { %2993 = vst [vmem:[#allocation3 + $0x18] sm:$0xff] %v2988_v1 }
 0xc3f   : > { %v3143_v12 = vpop.f32.mrf.mxu3 }
 0xc40   : > { %v3144_v2 = vadd.f32 %v3143_v12, %v3019_v51 }
 0xc41   : > { %v8500_v57 = vpop.f32.mrf.mxu1 }
 0xc42   : > { %10160 = vst [vmem:[#allocation28_spill] sm:$0xff] %v8500_v57 }
 0xc47   : > { %v3145_v15 = vpop.f32.mrf.mxu3 }
 0xc48   : > { %v3146_v36 = vadd.f32 %v3145_v15, %v3024_v24 }
 0xc49   : > { %v8506_v23 = vpop.f32.mrf.mxu1 }
 0xc4a   : > { %v3159_v14 = vpack.c.bf16 %v3146_v36, %v3144_v2  ;;  %10162 = vst [vmem:[#allocation25_spill] sm:$0xff] %v8506_v23 }
 0xc4c   : > { %3332 = vmatpush.bf16.msrb.mxu3 %v3159_v14 }
 0xc4f   : > { %v3148_v35 = vpop.f32.mrf.mxu3 }
 0xc50   : > { %v3149_v22 = vadd.f32 %v3148_v35, %v3029_v34 }
 0xc57   : > { %v3150_v46 = vpop.f32.mrf.mxu3 }
 0xc58   : > { %v3151_v40 = vadd.f32 %v3150_v46, %v3034_v63 }
 0xc5a   : > { %v3161_v9 = vpack.c.bf16 %v3151_v40, %v3149_v22 }
 0xc5c   : > { %3164 = vxpose.binary.xlu2.c.b16.start.end [1/2] (short) %v3161_v9, %v3160_v39, 128 }
 0xc5f   : > { %v8504_v59 = vpop.f32.mrf.mxu3 }
 0xc60   : > { %10161 = vst [vmem:[#allocation10_spill] sm:$0xff] %v8504_v59 }
 0xc67   : > { %v8508_v44 = vpop.f32.mrf.mxu3 }
 0xc68   : > { %10163 = vst [vmem:[#allocation8_spill] sm:$0xff] %v8508_v44 }
 0xcfd   : > { %v3172_v55 = vpop.trf.xlu2 }
 0xcfe   : > { %5628 = vmatmul.msk.bf16.vlgmr.msrb.gmra.mxu1 %vm1145_vm12, %v3172_v55  ;;  %5644 = vmatmul.msk.bf16.vlgmr.msrb.gmra.mxu3 %vm1145_vm12, %v3172_v55 }
 0xd05   : > { %v3173_v4 = vpop.trf.xlu2 }
 0xd0d   : > { %v3174_v6 = vpop.trf.xlu2 }
 0xd0e   : > { %5629 = vmatmul.msk.bf16.gmra.mxu1 %vm1145_vm12, %v3174_v6  ;;  %5645 = vmatmul.msk.bf16.gmra.mxu3 %vm1145_vm12, %v3174_v6 }
 0xd15   : > { %v3175_v20 = vpop.trf.xlu2 }
 0xd1d   : > { %v3176_v42 = vpop.trf.xlu2 }
 0xd1e   : > { %5630 = vmatmul.msk.bf16.gmra.mxu1 %vm1145_vm12, %v3176_v42  ;;  %5646 = vmatmul.msk.bf16.gmra.mxu3 %vm1145_vm12, %v3176_v42 }
 0xd25   : > { %v3177_v7 = vpop.trf.xlu2 }
 0xd2d   : > { %v3178_v48 = vpop.trf.xlu2 }
 0xd2e   : > { %5631 = vmatmul.msk.bf16.gmra.mxu1 %vm1145_vm12, %v3178_v48  ;;  %5647 = vmatmul.msk.bf16.gmra.mxu3 %vm1145_vm12, %v3178_v48 }
 0xd35   : > { %4064 = vperm.xlu2 %5918, %v5671_v3   ;;  %v3179_v41 = vpop.trf.xlu2 }
 0xd3d   : > { %v3180_v29 = vpop.trf.xlu2 }
 0xd3e   : > { %5632 = vmatmul.msk.bf16.gmra.mxu1 %vm1145_vm12, %v3180_v29  ;;  %5648 = vmatmul.msk.bf16.gmra.mxu3 %vm1145_vm12, %v3180_v29 }
 0xd45   : > { %v3181_v34 = vpop.trf.xlu2 }
 0xd4d   : > { %v3182_v60 = vpop.trf.xlu2 }
 0xd4e   : > { %5633 = vmatmul.msk.bf16.gmra.mxu1 %vm1145_vm12, %v3182_v60  ;;  %5649 = vmatmul.msk.bf16.gmra.mxu3 %vm1145_vm12, %v3182_v60 }
 0xd55   : > { %v3183_v16 = vpop.trf.xlu2 }
 0xd5d   : > { %v3184_v50 = vpop.trf.xlu2 }
 0xd5e   : > { %5634 = vmatmul.msk.bf16.gmra.mxu1 %vm1145_vm12, %v3184_v50  ;;  %5650 = vmatmul.msk.bf16.gmra.mxu3 %vm1145_vm12, %v3184_v50 }
 0xd65   : > { %v3185_v63 = vpop.trf.xlu2 }
 0xd6d   : > { %v3186_v17 = vpop.trf.xlu2 }
 0xd6e   : > { %5635 = vmatmul.msk.bf16.gmra.mxu1 %vm1145_vm12, %v3186_v17  ;;  %5651 = vmatmul.msk.bf16.gmra.mxu3 %vm1145_vm12, %v3186_v17 }
 0xd75   : > { %v3187_v12 = vpop.trf.xlu2 }
 0xd7b   : > { %v8510_v31 = vpop.f32.mrf.mxu1 }
 0xd7e   : > { %5636 = vmatmul.msk.bf16.gmra.mxu1 %vm1145_vm12, %v3173_v4  ;;  %5652 = vmatmul.msk.bf16.gmra.mxu3 %vm1145_vm12, %v3173_v4 }
 0xd81   : > { %v8514_v45 = vpop.f32.mrf.mxu3 }
 0xd83   : > { %v8516_v51 = vpop.f32.mrf.mxu1 }
 0xd89   : > { %v8518_v21 = vpop.f32.mrf.mxu3 }
 0xd8a   : > { %10164 = vst [vmem:[#allocation7_spill] sm:$0xff] %v8518_v21 }
 0xd8b   : > { %v8520_v61 = vpop.f32.mrf.mxu1 }
 0xd8c   : > { %10165 = vst [vmem:[#allocation11_spill] sm:$0xff] %v8520_v61  ;;  %v3414_v60 = vmax.f32 %v8510_v31, %v8520_v61 }
 0xd8e   : > { %5637 = vmatmul.msk.bf16.gmra.mxu1 %vm1145_vm12, %v3175_v20  ;;  %5653 = vmatmul.msk.bf16.gmra.mxu3 %vm1145_vm12, %v3175_v20 }
 0xd91   : > { %v8524_v62 = vpop.f32.mrf.mxu3 }
 0xd92   : > { %10166 = vst [vmem:[#allocation14_spill] sm:$0xff] %v8524_v62 }
 0xd93   : > { %v8526_v54 = vpop.f32.mrf.mxu1 }
 0xd94   : > { %10167 = vst [vmem:[#allocation19_spill] sm:$0xff] %v8526_v54 }
 0xd99   : > { %v8528_v0 = vpop.f32.mrf.mxu3 }
 0xd9a   : > { %10168 = vst [vmem:[#allocation16_spill] sm:$0xff] %v8528_v0 }
 0xd9b   : > { %v8530_v11 = vpop.f32.mrf.mxu1 }
 0xd9c   : > { %10169 = vst [vmem:[#allocation9_spill] sm:$0xff] %v8530_v11  ;;  %v3416_v50 = vmax.f32 %v3414_v60, %v8530_v11 }
 0xd9e   : > { %5638 = vmatmul.msk.bf16.gmra.mxu1 %vm1145_vm12, %v3177_v7  ;;  %5654 = vmatmul.msk.bf16.gmra.mxu3 %vm1145_vm12, %v3177_v7 }
 0xda1   : > { %v8534_v53 = vpop.f32.mrf.mxu3 }
 0xda3   : > { %v8536_v24 = vpop.f32.mrf.mxu1 }
 0xda4   : > { %10170 = vst [vmem:[#allocation13_spill] sm:$0xff] %v8536_v24 }
 0xda9   : > { %v8538_v28 = vpop.f32.mrf.mxu3 }
 0xdab   : > { %v8540_v52 = vpop.f32.mrf.mxu1 }
 0xdac   : > { %10171 = vst [vmem:[#allocation15_spill] sm:$0xff] %v8540_v52  ;;  %v3418_v44 = vmax.f32 %v3416_v50, %v8540_v52 }
 0xdae   : > { %5639 = vmatmul.msk.bf16.gmra.mxu1 %vm1145_vm12, %v3179_v41  ;;  %5655 = vmatmul.msk.bf16.gmra.mxu3 %vm1145_vm12, %v3179_v41 }
 0xdb1   : > { %v8544_v56 = vpop.f32.mrf.mxu3 }
 0xdb3   : > { %v8546_v58 = vpop.f32.mrf.mxu1 }
 0xdb9   : > { %v8548_v25 = vpop.f32.mrf.mxu3 }
 0xdba   : > { %10172 = vst [vmem:[#allocation17_spill] sm:$0xff] %v8548_v25 }
 0xdbb   : > { %v8550_v30 = vpop.f32.mrf.mxu1 }
 0xdbc   : > { %v3420_v57 = vmax.f32 %v3418_v44, %v8550_v30 }
 0xdbe   : > { %5640 = vmatmul.msk.bf16.gmra.mxu1 %vm1145_vm12, %v3181_v34  ;;  %5656 = vmatmul.msk.bf16.gmra.mxu3 %vm1145_vm12, %v3181_v34 }
 0xdc1   : > { %v8554_v13 = vpop.f32.mrf.mxu3 }
 0xdc3   : > { %v8556_v43 = vpop.f32.mrf.mxu1 }
 0xdc9   : > { %v8558_v8 = vpop.f32.mrf.mxu3 }
 0xdcb   : > { %v8560_v18 = vpop.f32.mrf.mxu1 }
 0xdcc   : > { %v3422_v61 = vmax.f32 %v3420_v57, %v8560_v18 }
 0xdce   : > { %5641 = vmatmul.msk.bf16.gmra.mxu1 %vm1145_vm12, %v3183_v16  ;;  %5657 = vmatmul.msk.bf16.gmra.mxu3 %vm1145_vm12, %v3183_v16  ;;  %v3415_v16 = vmax.f32 %v8516_v51, %v8526_v54 }
 0xdd1   : > { %v8564_v47 = vpop.f32.mrf.mxu3 }
 0xdd3   : > { %v8566_v37 = vpop.f32.mrf.mxu1 }
 0xdd9   : > { %v8568_v32 = vpop.f32.mrf.mxu3 }
 0xddb   : > { %v8570_v49 = vpop.f32.mrf.mxu1 }
 0xddc   : > { %v3424_v60 = vmax.f32 %v3422_v61, %v8570_v49 }
 0xdde   : > { %5642 = vmatmul.msk.bf16.gmra.mxu1 %vm1145_vm12, %v3185_v63  ;;  %5658 = vmatmul.msk.bf16.gmra.mxu3 %vm1145_vm12, %v3185_v63  ;;  %v3417_v63 = vmax.f32 %v3415_v16, %v8536_v24 }
 0xde0   : > { %v3419_v59 = vmax.f32 %v3417_v63, %v8546_v58 }
 0xde1   : > { %v8574_v19 = vpop.f32.mrf.mxu3 }
 0xde2   : > { %v3421_v23 = vmax.f32 %v3419_v59, %v8556_v43 }
 0xde3   : > { %v8576_v10 = vpop.f32.mrf.mxu1 }
 0xde4   : > { %v3423_v54 = vmax.f32 %v3421_v23, %v8566_v37 }
 0xde6   : > { %v3425_v16 = vmax.f32 %v3423_v54, %v8576_v10 }
 0xde9   : > { %v8578_v27 = vpop.f32.mrf.mxu3 }
 0xdeb   : > { %v8580_v1 = vpop.f32.mrf.mxu1 }
 0xdec   : > { %v3426_v11 = vmax.f32 %v3424_v60, %v8580_v1 }
 0xdee   : > { %5643 = vmatmul.msk.bf16.gmra.mxu1 %vm1145_vm12, %v3187_v12  ;;  %5659 = vmatmul.msk.bf16.gmra.mxu3 %vm1145_vm12, %v3187_v12 }
 0xdf1   : > { %v8584_v15 = vpop.f32.mrf.mxu3 }
 0xdf3   : > { %v8586_v2 = vpop.f32.mrf.mxu1 }
 0xdf4   : > { %10173 = vst [vmem:[#allocation18_spill] sm:$0xff] %v8586_v2  ;;  %v3427_v50 = vmax.f32 %v3425_v16, %v8586_v2 }
 0xdf9   : > { %v8588_v36 = vpop.f32.mrf.mxu3 }
 0xdfb   : > { %v8590_v5 = vpop.f32.mrf.mxu1 }
 0xdfc   : > { %10174 = vst [vmem:[#allocation20_spill] sm:$0xff] %v8590_v5  ;;  %v3428_v44 = vmax.f32 %v3426_v11, %v8590_v5 }
 0xe01   : > { %v8592_v14 = vpop.f32.mrf.mxu3 }
 0xe03   : > { %v8594_v35 = vpop.f32.mrf.mxu1 }
 0xe04   : > { %v3429_v59 = vmax.f32 %v3427_v50, %v8594_v35 }
 0xe09   : > { %v8596_v33 = vpop.f32.mrf.mxu3 }
 0xe0b   : > { %v8598_v26 = vpop.f32.mrf.mxu1 }
 0xe0c   : > { %v3430_v57 = vmax.f32 %v3428_v44, %v8598_v26 }
 0xe11   : > { %v8600_v46 = vpop.f32.mrf.mxu3 }
 0xe13   : > { %v8602_v38 = vpop.f32.mrf.mxu1 }
 0xe14   : > { %v3431_v23 = vmax.f32 %v3429_v59, %v8602_v38 }
 0xe19   : > { %v8604_v22 = vpop.f32.mrf.mxu3 }
 0xe1b   : > { %v8606_v40 = vpop.f32.mrf.mxu1 }
 0xe1c   : > { %v3432_v61 = vmax.f32 %v3430_v57, %v8606_v40 }
 0xe21   : > { %v8608_v39 = vpop.f32.mrf.mxu3 }
 0xe23   : > { %v8610_v9 = vpop.f32.mrf.mxu1 }
 0xe24   : > { %v3433_v54 = vmax.f32 %v3431_v23, %v8610_v9  ;;  %v3452_v23 = vmax.f32 %v8518_v21, %v8528_v0 }
 0xe29   : > { %v8612_v55 = vpop.f32.mrf.mxu3 }
 0xe2b   : > { %v8614_v4 = vpop.f32.mrf.mxu1 }
 0xe2c   : > { %v3434_v60 = vmax.f32 %v3432_v61, %v8614_v4 }
 0xe31   : > { %v8616_v6 = vpop.f32.mrf.mxu3 }
 0xe33   : > { %v8618_v20 = vpop.f32.mrf.mxu1 }
 0xe34   : > { %10175 = vst [vmem:[#allocation21_spill] sm:$0xff] %v8618_v20  ;;  %v3435_v16 = vmax.f32 %v3433_v54, %v8618_v20 }
 0xe39   : > { %v8622_v7 = vpop.f32.mrf.mxu3 }
 0xe3b   : > { %v8620_v42 = vpop.f32.mrf.mxu1 }
 0xe3c   : > { %10176 = vst [vmem:[#allocation22_spill] sm:$0xff] %v8620_v42  ;;  %v3436_v2 = vmax.f32 %v3434_v60, %v8620_v42  ;;  %v3451_v60 = vmax.f32 %v8514_v45, %v8524_v62 }
 0xe41   : > { %v8626_v3 = vpop.f32.mrf.mxu3 }
 0xe43   : > { %v8624_v48 = vpop.f32.mrf.mxu1 }
 0xe44   : > { %10177 = vst [vmem:[#allocation23_spill] sm:$0xff] %v8624_v48  ;;  %v3437_v11 = vmax.f32 %v3435_v16, %v8624_v48  ;;  %v3454_v16 = vmax.f32 %v3452_v23, %v8538_v28 }
 0xe49   : > { %v8630_v29 = vpop.f32.mrf.mxu3 }
 0xe4a   : > { %10178 = vst [vmem:[#allocation24_spill] sm:$0xff] %v8630_v29 }
 0xe4b   : > { %v8628_v41 = vpop.f32.mrf.mxu1 }
 0xe4c   : > { %v3438_v50 = vmax.f32 %v3436_v2, %v8628_v41  ;;  %v3453_v2 = vmax.f32 %v3451_v60, %v8534_v53 }
 0xe4e   : > { %v3455_v42 = vmax.f32 %v3453_v2, %v8544_v56 }
 0xe51   : > { %v8640_v17 = vpop.f32.mrf.mxu3 }
 0xe52   : > { %10179 = vst [vmem:[#allocation26_spill] sm:$0xff] %v8640_v17 }
 0xe53   : > { %v8632_v34 = vpop.f32.mrf.mxu1 }
 0xe54   : > { %v3439_v44 = vmax.f32 %v3437_v11, %v8632_v34  ;;  %v3456_v11 = vmax.f32 %v3454_v16, %v8548_v25 }
 0xe56   : > { %v3458_v0 = vmax.f32 %v3456_v11, %v8558_v8 }
 0xe59   : > { %v8656_v52 = vpop.f32.mrf.mxu3 }
 0xe5a   : > { %10180 = vst [vmem:[#allocation27_spill] sm:$0xff] %v8656_v52 }
 0xe5b   : > { %v8642_v12 = vpop.f32.mrf.mxu1 }
 0xe5c   : > { %v3440_v59 = vmax.f32 %v3438_v50, %v8642_v12 }
 0xe61   : > { %v8670_v5 = vpop.f32.mrf.mxu3 }
 0xe62   : > { %10181 = vst [vmem:[#allocation29_spill] sm:$0xff] %v8670_v5 }
 0xe63   : > { %v8652_v24 = vpop.f32.mrf.mxu1 }
 0xe64   : > { %v3441_v57 = vmax.f32 %v3439_v44, %v8652_v24 }
 0xe69   : > { %v8684_v50 = vpop.f32.mrf.mxu3 }
 0xe6a   : > { %10182 = vst [vmem:[#allocation12_spill] sm:$0xff] %v8684_v50 }
 0xe6b   : > { %v8664_v63 = vpop.f32.mrf.mxu1 }
 0xe6c   : > { %v3442_v54 = vmax.f32 %v3440_v59, %v8664_v63  ;;  %v3457_v59 = vmax.f32 %v3455_v42, %v8554_v13 }
 0xe6e   : > { %v3459_v62 = vmax.f32 %v3457_v59, %v8564_v47 }
 0xe71   : > { %v8696_v11 = vpop.f32.mrf.mxu3 }
 0xe73   : > { %v3322_v61 = vpop.f32.mrf.mxu1 }
 0xe74   : > { %v3443_v20 = vmax.f32 %v3441_v57, %v3322_v61  ;;  %v3460_v57 = vmax.f32 %v3458_v0, %v8568_v32 }
 0xe76   : > { %v3444_v48 = vmax.f32 %v3442_v54, %v3443_v20  ;;  %v3462_v20 = vmax.f32 %v3460_v57, %v8578_v27  ;;  %v3461_v54 = vmax.f32 %v3459_v62, %v8574_v19 }
 0xe78   : > { %v3445_v44 = vrot.slane %v3444_v48, 4  ;;  %v3464_v60 = vmax.f32 %v3462_v20, %v8588_v36  ;;  %v3463_v16 = vmax.f32 %v3461_v54, %v8584_v15 }
 0xe7a   : > { %v3446_v21 = vmax.f32 %v3444_v48, %v3445_v44  ;;  %v3466_v2 = vmax.f32 %v3464_v60, %v8596_v33  ;;  %v3465_v42 = vmax.f32 %v3463_v16, %v8592_v14  ;;  %v8710_v16 = vpop.f32.mrf.mxu3 }
 0xe7c   : > { %v3447_v23 = vrot.slane %v3446_v21, 2  ;;  %v3468_v0 = vmax.f32 %v3466_v2, %v8604_v22  ;;  %v3467_v48 = vmax.f32 %v3465_v42, %v8600_v46 }
 0xe7e   : > { %v3448_v25 = vmax.f32 %v3446_v21, %v3447_v23  ;;  %v3470_v44 = vmax.f32 %v3468_v0, %v8612_v55  ;;  %v3469_v62 = vmax.f32 %v3467_v48, %v8608_v39 }
 0xe80   : > { %v3449_v59 = vrot.slane %v3448_v25, 1  ;;  %v3472_v57 = vmax.f32 %v3470_v44, %v8622_v7  ;;  %v3471_v20 = vmax.f32 %v3469_v62, %v8616_v6 }
 0xe82   : > { %v3474_v54 = vmax.f32 %v3472_v57, %v8630_v29  ;;  %v8706_v21 = vmax.f32 %v3448_v25, %v3449_v59  ;;  %v3473_v23 = vmax.f32 %v3471_v20, %v8626_v3 }
 0xe84   : > { %v3476_v60 = vmax.f32 %v3474_v54, %v8656_v52  ;;  %v3475_v2 = vmax.f32 %v3473_v23, %v8640_v17  ;;  %v3540_v0 = vsub.f32 %v8628_v41, %v8706_v21  ;;  %v3542_v48 = vsub.f32 %v8632_v34, %v8706_v21 }
 0xe85   : > { %v3544_v25 = vsub.f32 %v8642_v12, %v8706_v21  ;;  %v3546_v44 = vsub.f32 %v8652_v24, %v8706_v21  ;;  %v3548_v12 = vsub.f32 %v8664_v63, %v8706_v21  ;;  %v3550_v24 = vsub.f32 %v3322_v61, %v8706_v21  ;;  %v10189_v61 = vld [vmem:[#allocation11_spill] sm:$0xff] }
 0xe86   : > { %v3478_v42 = vmax.f32 %v3476_v60, %v8684_v50  ;;  %v3477_v59 = vmax.f32 %v3475_v2, %v8670_v5  ;;  %v8725_v20 = vpack.c.bf16 %v3542_v48, %v3540_v0  ;;  %v3039_v60 = vpop.permute.xlu1 %3038  ;;  %v3490_v63 = vsub.f32 %v8516_v51, %v8706_v21 }
 0xe87   : > { %v8727_v54 = vpack.c.bf16 %v3546_v44, %v3544_v25  ;;  %v3582_v0 = vpack.c.bf16 %v3550_v24, %v3548_v12  ;;  %v10187_v25 = vld [vmem:[#allocation28_spill] sm:$0xff]  ;;  %v10190_v12 = vld [vmem:[#allocation19_spill] sm:$0xff]  ;;  %v3502_v51 = vsub.f32 %v8546_v58, %v8706_v21 }
 0xe88   : > { %v3480_v62 = vmax.f32 %v3478_v42, %v8710_v16  ;;  %v3479_v57 = vmax.f32 %v3477_v59, %v8696_v11  ;;  %10183 = vst [vmem:[#allocation30_spill] sm:$0xff] %v8725_v20  ;;  %v10186_v42 = vld [vmem:[#allocation25_spill] sm:$0xff]  ;;  %v3130_v44 = vadd.f32 %v10187_v25, %v3039_v60  ;;  %v3494_v24 = vsub.f32 %v10190_v12, %v8706_v21 }
 0xe89   : > { %10184 = vst [vmem:[#allocation31_spill] sm:$0xff] %v8727_v54  ;;  %v10192_v25 = vld [vmem:[#allocation13_spill] sm:$0xff] }
 0xe8a   : > { %v3481_v41 = vmax.f32 %v3479_v57, %v3480_v62  ;;  %v3644_v57 = vunpack.c.l.bf16 %v3582_v0 }
 0xe8c   : > { %v3482_v23 = vrot.slane %v3481_v41, 4  ;;  %v3768_v12 = vmul.f32 1.442695, %v3644_v57  ;;  %v10194_v57 = vld [vmem:[#allocation18_spill] sm:$0xff] }
 0xe8e   : > { %v3483_v34 = vmax.f32 %v3481_v41, %v3482_v23  ;;  %v8732_v2 = vpop.permute.xlu1 %3043  ;;  %v3488_v41 = vsub.f32 %v8510_v31, %v8706_v21  ;;  %v3646_v23 = vunpack.c.h.bf16 %v3582_v0  ;;  %v10193_v31 = vld [vmem:[#allocation15_spill] sm:$0xff]  ;;  %6201 = vpow2.f32 %v3768_v12 }
 0xe8f   : > { %10185 = vst [vmem:[#allocation32_spill] sm:$0xff] %v8732_v2  ;;  %v3132_v59 = vadd.f32 %v10186_v42, %v8732_v2  ;;  %v10191_v42 = vld [vmem:[#allocation9_spill] sm:$0xff]  ;;  %v3500_v0 = vsub.f32 %v10193_v31, %v8706_v21  ;;  %v3514_v31 = vsub.f32 %v8576_v10, %v8706_v21  ;;  %v3518_v2 = vsub.f32 %v10194_v57, %v8706_v21 }
 0xe90   : > { %v3484_v50 = vrot.slane %v3483_v34, 2  ;;  %v3772_v58 = vmul.f32 1.442695, %v3646_v23  ;;  %v3524_v10 = vsub.f32 %v8598_v26, %v8706_v21  ;;  %v3532_v23 = vsub.f32 %v8614_v4, %v8706_v21  ;;  %v10196_v57 = vld [vmem:[#allocation21_spill] sm:$0xff]  ;;  %v10198_v26 = vld [vmem:[#allocation23_spill] sm:$0xff] }
 0xe91   : > { %v8737_v62 = vpack.c.bf16 %v3132_v59, %v3130_v44  ;;  %v3496_v59 = vsub.f32 %v10191_v42, %v8706_v21  ;;  %v3498_v44 = vsub.f32 %v10192_v25, %v8706_v21  ;;  %v3510_v42 = vsub.f32 %v8566_v37, %v8706_v21  ;;  %v10195_v37 = vld [vmem:[#allocation20_spill] sm:$0xff] }
 0xe92   : > { %v3485_v52 = vmax.f32 %v3483_v34, %v3484_v50  ;;  %v3492_v50 = vsub.f32 %v10189_v61, %v8706_v21  ;;  %v3504_v61 = vsub.f32 %v8550_v30, %v8706_v21  ;;  %v3512_v25 = vsub.f32 %v8570_v49, %v8706_v21 }
 0xe93   : > { %10188 = vst [vmem:[#allocation25_spill] sm:$0xff] %v8737_v62  ;;  %v3516_v30 = vsub.f32 %v8580_v1, %v8706_v21  ;;  %v3520_v62 = vsub.f32 %v10195_v37, %v8706_v21  ;;  %v3522_v49 = vsub.f32 %v8594_v35, %v8706_v21  ;;  %v3526_v1 = vsub.f32 %v8602_v38, %v8706_v21  ;;  %v10197_v35 = vld [vmem:[#allocation22_spill] sm:$0xff] }
 0xe94   : > { %v3486_v48 = vrot.slane %v3485_v52, 1  ;;  %v3534_v37 = vsub.f32 %v10196_v57, %v8706_v21  ;;  %v3536_v20 = vsub.f32 %v10197_v35, %v8706_v21  ;;  %v3538_v54 = vsub.f32 %v10198_v26, %v8706_v21  ;;  %v10199_v38 = vld [vmem:[#allocation10_spill] sm:$0xff] }
 0xe95   : > { %v8798_v5 = vadd.f32 %v10199_v38, %v3039_v60  ;;  %6203 = vpow2.f32 %v3772_v58  ;;  %v8800_v17 = vpack.c.bf16 %v3490_v63, %v3488_v41  ;;  %v8804_v4 = vpack.c.bf16 %v3498_v44, %v3496_v59  ;;  %v10200_v44 = vld [vmem:[#allocation7_spill] sm:$0xff]  ;;  %v10205_v26 = vld [vmem:[#allocation26_spill] sm:$0xff] }
 0xe96   : > { %v8745_v34 = vmax.f32 %v3485_v52, %v3486_v48  ;;  %v3506_v52 = vsub.f32 %v8556_v43, %v8706_v21  ;;  %v3508_v48 = vsub.f32 %v8560_v18, %v8706_v21  ;;  %v8806_v12 = vpack.c.bf16 %v3502_v51, %v3500_v0  ;;  %v8831_v51 = vpop.eup %6201  ;;  %v10206_v38 = vld [vmem:[#allocation27_spill] sm:$0xff] }
 0xe97   : > { %v8812_v35 = vpack.c.bf16 %v3514_v31, %v3512_v25  ;;  %v8816_v60 = vpack.c.bf16 %v3522_v49, %v3520_v62  ;;  %v8818_v58 = vpack.c.bf16 %v3526_v1, %v3524_v10  ;;  %v8822_v63 = vpack.c.bf16 %v3534_v37, %v3532_v23 }
 0xe98   : > { %v3549_v43 = vsub.f32 %v8696_v11, %v8745_v34  ;;  %v3551_v18 = vsub.f32 %v8710_v16, %v8745_v34  ;;  %v3528_v11 = vsub.f32 %v8606_v40, %v8706_v21  ;;  %v3530_v16 = vsub.f32 %v8610_v9, %v8706_v21 }
 0xe99   : > { %v8802_v9 = vpack.c.bf16 %v3494_v24, %v3492_v50  ;;  %v8808_v57 = vpack.c.bf16 %v3506_v52, %v3504_v61  ;;  %v8810_v29 = vpack.c.bf16 %v3510_v42, %v3508_v48  ;;  %v8814_v21 = vpack.c.bf16 %v3518_v2, %v3516_v30  ;;  %v10201_v61 = vld [vmem:[#allocation14_spill] sm:$0xff]  ;;  %v10202_v42 = vld [vmem:[#allocation16_spill] sm:$0xff] }
 0xe9a   : > { %v3583_v40 = vpack.c.bf16 %v3551_v18, %v3549_v43  ;;  %v8820_v41 = vpack.c.bf16 %v3530_v16, %v3528_v11  ;;  %v8824_v50 = vpack.c.bf16 %v3538_v54, %v3536_v20  ;;  %v3489_v59 = vsub.f32 %v8514_v45, %v8745_v34  ;;  %v10203_v43 = vld [vmem:[#allocation17_spill] sm:$0xff] }
 0xe9b   : > { %v3491_v0 = vsub.f32 %v10200_v44, %v8745_v34  ;;  %v3584_v2 = vunpack.c.l.bf16 %v8800_v17  ;;  %v3493_v52 = vsub.f32 %v10201_v61, %v8745_v34  ;;  %v3586_v48 = vunpack.c.h.bf16 %v8800_v17  ;;  %v8837_v54 = vpop.eup %6203 }
 0xe9c   : > { %v3645_v24 = vunpack.c.l.bf16 %v3583_v40  ;;  %v3647_v62 = vunpack.c.h.bf16 %v3583_v40  ;;  %v3588_v20 = vunpack.c.l.bf16 %v8802_v9  ;;  %v3495_v45 = vsub.f32 %v10202_v42, %v8745_v34  ;;  %v10207_v40 = vld [vmem:[#allocation29_spill] sm:$0xff] }
 0xe9d   : > { %v3497_v25 = vsub.f32 %v8534_v53, %v8745_v34  ;;  %v3499_v31 = vsub.f32 %v8538_v28, %v8745_v34  ;;  %v3501_v30 = vsub.f32 %v8544_v56, %v8745_v34  ;;  %v3503_v18 = vsub.f32 %v10203_v43, %v8745_v34 }
 0xe9e   : > { %v3505_v17 = vsub.f32 %v8554_v13, %v8745_v34  ;;  %v3507_v49 = vsub.f32 %v8558_v8, %v8745_v34  ;;  %v3509_v10 = vsub.f32 %v8564_v47, %v8745_v34  ;;  %v3770_v1 = vmul.f32 1.442695, %v3645_v24  ;;  %v10208_v24 = vld [vmem:[#allocation12_spill] sm:$0xff] }
 0xe9f   : > { %v3511_v53 = vsub.f32 %v8568_v32, %v8745_v34  ;;  %v3513_v28 = vsub.f32 %v8574_v19, %v8745_v34  ;;  %v3553_v56 = vpack.c.bf16 %v3491_v0, %v3489_v59  ;;  %v3774_v11 = vmul.f32 1.442695, %v3647_v62 }
 0xea0   : > { %v3515_v16 = vsub.f32 %v8578_v27, %v8745_v34  ;;  %v3517_v13 = vsub.f32 %v8584_v15, %v8745_v34  ;;  %v3519_v8 = vsub.f32 %v8588_v36, %v8745_v34  ;;  %v3521_v47 = vsub.f32 %v8592_v14, %v8745_v34 }
 0xea1   : > { %v3523_v32 = vsub.f32 %v8596_v33, %v8745_v34  ;;  %v3525_v19 = vsub.f32 %v8600_v46, %v8745_v34  ;;  %v3527_v23 = vsub.f32 %v8604_v22, %v8745_v34  ;;  %v3529_v27 = vsub.f32 %v8608_v39, %v8745_v34  ;;  %v10204_v22 = vld [vmem:[#allocation24_spill] sm:$0xff] }
 0xea2   : > { %v3531_v15 = vsub.f32 %v8612_v55, %v8745_v34  ;;  %v3533_v36 = vsub.f32 %v8616_v6, %v8745_v34  ;;  %v3535_v14 = vsub.f32 %v8622_v7, %v8745_v34  ;;  %6205 = vpow2.f32 %v3770_v1 }
 0xea3   : > { %v3537_v33 = vsub.f32 %v8626_v3, %v8745_v34  ;;  %v8883_v46 = vpack.c.bf16 %v3495_v45, %v3493_v52  ;;  %v3585_v37 = vunpack.c.l.bf16 %v3553_v56  ;;  %6207 = vpow2.f32 %v3774_v11 }
 0xea4   : > { %v3539_v39 = vsub.f32 %v10204_v22, %v8745_v34  ;;  %v3541_v55 = vsub.f32 %v10205_v26, %v8745_v34  ;;  %v3543_v6 = vsub.f32 %v10206_v38, %v8745_v34  ;;  %v3545_v7 = vsub.f32 %v10207_v40, %v8745_v34 }
 0xea5   : > { %v3547_v59 = vsub.f32 %v10208_v24, %v8745_v34  ;;  %v8895_v3 = vpack.c.bf16 %v3499_v31, %v3497_v25  ;;  %v3587_v44 = vunpack.c.h.bf16 %v3553_v56  ;;  %v8897_v0 = vpack.c.bf16 %v3503_v18, %v3501_v30 }
 0xea6   : > { %v8899_v62 = vpack.c.bf16 %v3507_v49, %v3505_v17  ;;  %v8901_v61 = vpack.c.bf16 %v3511_v53, %v3509_v10  ;;  %v3648_v52 = vmul.f32 1.442695, %v3584_v2  ;;  %v8903_v42 = vpack.c.bf16 %v3515_v16, %v3513_v28 }
 0xea7   : > { %v8905_v45 = vpack.c.bf16 %v3519_v8, %v3517_v13  ;;  %v3589_v43 = vunpack.c.l.bf16 %v8883_v46  ;;  %v3650_v1 = vmul.f32 1.442695, %v3585_v37  ;;  %v8908_v11 = vpack.c.bf16 %v3523_v32, %v3521_v47 }
 0xea8   : > { %v8910_v34 = vpack.c.bf16 %v3527_v23, %v3525_v19  ;;  %v3612_v25 = vunpack.c.l.bf16 %v8814_v21  ;;  %v3652_v31 = vmul.f32 1.442695, %v3586_v48  ;;  %v8913_v30 = vpop.eup %6205  ;;  %v8915_v18 = vpack.c.bf16 %v3531_v15, %v3529_v27 }
 0xea9   : > { %v8917_v17 = vpack.c.bf16 %v3535_v14, %v3533_v36  ;;  %v3590_v2 = vunpack.c.h.bf16 %v8802_v9  ;;  %v3654_v49 = vmul.f32 1.442695, %v3587_v44  ;;  %v8920_v10 = vpop.eup %6207  ;;  %v8922_v53 = vpack.c.bf16 %v3539_v39, %v3537_v33 }
 0xeaa   : > { %v3614_v28 = vunpack.c.h.bf16 %v8814_v21  ;;  %6209 = vpow2.f32 %v3648_v52  ;;  %v3656_v56 = vmul.f32 1.442695, %v3588_v20  ;;  %v8925_v16 = vpack.c.bf16 %v3543_v6, %v3541_v55 }
 0xeab   : > { %v3608_v48 = vunpack.c.l.bf16 %v8812_v35  ;;  %6211 = vpow2.f32 %v3650_v1  ;;  %v3658_v13 = vmul.f32 1.442695, %v3589_v43  ;;  %v8928_v8 = vpack.c.bf16 %v3547_v59, %v3545_v7 }
 0xeac   : > { %v3610_v47 = vunpack.c.h.bf16 %v8812_v35  ;;  %6213 = vpow2.f32 %v3652_v31  ;;  %v3704_v9 = vmul.f32 1.442695, %v3612_v25  ;;  %v3591_v32 = vunpack.c.h.bf16 %v8883_v46 }
 0xead   : > { %v3592_v19 = vunpack.c.l.bf16 %v8804_v4  ;;  %6215 = vpow2.f32 %v3654_v49  ;;  %v3660_v21 = vmul.f32 1.442695, %v3590_v2  ;;  %v3593_v20 = vunpack.c.l.bf16 %v8895_v3 }
 0xeae   : > { %v3594_v23 = vunpack.c.h.bf16 %v8804_v4  ;;  %6217 = vpow2.f32 %v3656_v56  ;;  %v3708_v27 = vmul.f32 1.442695, %v3614_v28  ;;  %v3604_v15 = vunpack.c.l.bf16 %v8810_v29 }
 0xeaf   : > { %6219 = vpow2.f32 %v3658_v13  ;;  %v3696_v36 = vmul.f32 1.442695, %v3608_v48  ;;  %v8938_v35 = vpack.c.bf16 %v8837_v54, %v8831_v51  ;;  %v3595_v33 = vunpack.c.h.bf16 %v8895_v3 }
 0xeb0   : > { %v8940_v14 = vpop.eup %6209  ;;  %v3606_v46 = vunpack.c.h.bf16 %v8810_v29  ;;  %v3700_v37 = vmul.f32 1.442695, %v3610_v47  ;;  %6221 = vpow2.f32 %v3704_v9  ;;  %v3596_v4 = vunpack.c.l.bf16 %v8806_v12 }
 0xeb1   : > { %v8944_v22 = vpop.eup %6211  ;;  %v3597_v39 = vunpack.c.l.bf16 %v8897_v0  ;;  %6223 = vpow2.f32 %v3660_v21  ;;  %v3664_v26 = vmul.f32 1.442695, %v3592_v19  ;;  %3960 = vmatpush.bf16.msra.mxu2 %v8938_v35  ;;  %v3598_v54 = vunpack.c.h.bf16 %v8806_v12 }
 0xeb2   : > { %v6214_v51 = vpop.eup %6213  ;;  %v3599_v55 = vunpack.c.h.bf16 %v8897_v0  ;;  %v3668_v38 = vmul.f32 1.442695, %v3594_v23  ;;  %6225 = vpow2.f32 %v3708_v27  ;;  %v3600_v6 = vunpack.c.l.bf16 %v8808_v57 }
 0xeb3   : > { %v8951_v29 = vpop.eup %6215  ;;  %v3601_v40 = vunpack.c.l.bf16 %v8899_v62  ;;  %v3688_v7 = vmul.f32 1.442695, %v3604_v15  ;;  %6227 = vpow2.f32 %v3696_v36  ;;  %v3602_v59 = vunpack.c.h.bf16 %v8808_v57 }
 0xeb4   : > { %v6218_v24 = vpop.eup %6217  ;;  %v3603_v3 = vunpack.c.h.bf16 %v8899_v62  ;;  %v3692_v44 = vmul.f32 1.442695, %v3606_v46  ;;  %6229 = vpow2.f32 %v3700_v37  ;;  %v3605_v0 = vunpack.c.l.bf16 %v8901_v61 }
 0xeb5   : > { %v8957_v12 = vpop.eup %6219  ;;  %v3607_v52 = vunpack.c.h.bf16 %v8901_v61  ;;  %6231 = vpow2.f32 %v3664_v26  ;;  %v3672_v43 = vmul.f32 1.442695, %v3596_v4  ;;  %v3609_v25 = vunpack.c.l.bf16 %v8903_v42 }
 0xeb6   : > { %v6222_v1 = vpop.eup %6221  ;;  %v3611_v31 = vunpack.c.h.bf16 %v8903_v42  ;;  %6233 = vpow2.f32 %v3668_v38  ;;  %v3676_v2 = vmul.f32 1.442695, %v3598_v54  ;;  %v3613_v62 = vunpack.c.l.bf16 %v8905_v45 }
 0xeb7   : > { %v6224_v57 = vpop.eup %6223  ;;  %v3615_v49 = vunpack.c.h.bf16 %v8905_v45  ;;  %v3680_v28 = vmul.f32 1.442695, %v3600_v6  ;;  %6235 = vpow2.f32 %v3688_v7  ;;  %v3616_v48 = vunpack.c.l.bf16 %v8816_v60 }
 0xeb8   : > { %v6226_v56 = vpop.eup %6225  ;;  %v3617_v61 = vunpack.c.l.bf16 %v8908_v11  ;;  %v3684_v13 = vmul.f32 1.442695, %v3602_v59  ;;  %6237 = vpow2.f32 %v3692_v44  ;;  %v3618_v9 = vunpack.c.h.bf16 %v8816_v60 }
 0xeb9   : > { %v6228_v47 = vpop.eup %6227  ;;  %v3662_v19 = vmul.f32 1.442695, %v3591_v32  ;;  %6239 = vpow2.f32 %v3672_v43  ;;  %v8968_v21 = vpack.c.bf16 %v6226_v56, %v6222_v1  ;;  %v3619_v27 = vunpack.c.h.bf16 %v8908_v11 }
 0xeba   : > { %v6230_v23 = vpop.eup %6229  ;;  %v3620_v15 = vunpack.c.l.bf16 %v8818_v58  ;;  %v3666_v36 = vmul.f32 1.442695, %v3593_v20  ;;  %6241 = vpow2.f32 %v3676_v2  ;;  %v3621_v37 = vunpack.c.l.bf16 %v8910_v34 }
 0xebb   : > { %v6232_v46 = vpop.eup %6231  ;;  %v3622_v4 = vunpack.c.h.bf16 %v8818_v58  ;;  %v3670_v26 = vmul.f32 1.442695, %v3595_v33  ;;  %6243 = vpow2.f32 %v3680_v28  ;;  %3946 = vmatpush.bf16.msra.mxu0 %v8968_v21  ;;  %v3674_v54 = vmul.f32 1.442695, %v3597_v39 }
 0xebc   : > { %v6234_v32 = vpop.eup %6233  ;;  %6245 = vpow2.f32 %v3684_v13  ;;  %v8975_v38 = vpack.c.bf16 %v6224_v57, %v6218_v24  ;;  %v8978_v6 = vpack.c.bf16 %v6214_v51, %v8940_v14  ;;  %v3623_v20 = vunpack.c.h.bf16 %v8910_v34 }
 0xebd   : > { %v6236_v7 = vpop.eup %6235  ;;  %6247 = vpow2.f32 %v3662_v19  ;;  %v3678_v59 = vmul.f32 1.442695, %v3599_v55  ;;  %v8981_v44 = vpack.c.bf16 %v6230_v23, %v6228_v47  ;;  %v3682_v33 = vmul.f32 1.442695, %v3601_v40 }
 0xebe   : > { %v6238_v43 = vpop.eup %6237  ;;  %6249 = vpow2.f32 %v3666_v36  ;;  %v3808_v1 = vunpack.c.l.bf16 %v8978_v6  ;;  %v3810_v39 = vunpack.c.h.bf16 %v8978_v6  ;;  %v3624_v24 = vunpack.c.l.bf16 %v8820_v41 }
 0xebf   : > { %v6240_v2 = vpop.eup %6239  ;;  %6251 = vpow2.f32 %v3670_v26  ;;  %v3686_v14 = vmul.f32 1.442695, %v3603_v3  ;;  %v3690_v51 = vmul.f32 1.442695, %v3605_v0  ;;  %3947 = vmatpush.bf16.msra.mxu0 %v8981_v44  ;;  %v8987_v55 = vpack.c.bf16 %v6234_v32, %v6232_v46  ;;  %v10209_v46 = vld [vmem:[#allocation31_spill] sm:$0xff] }
 0xec0   : > { %v6242_v57 = vpop.eup %6241  ;;  %6253 = vpow2.f32 %v3674_v54  ;;  %v3812_v28 = vunpack.c.l.bf16 %v8975_v38  ;;  %v3872_v56 = vadd.f32 %v3810_v39, %v3808_v1  ;;  %v3625_v13 = vunpack.c.l.bf16 %v8915_v18 }
 0xec1   : > { %v6244_v40 = vpop.eup %6243  ;;  %6255 = vpow2.f32 %v3678_v59  ;;  %v3694_v47 = vmul.f32 1.442695, %v3607_v52  ;;  %v8991_v19 = vpack.c.bf16 %v6238_v43, %v6236_v7  ;;  %v3698_v3 = vmul.f32 1.442695, %v3609_v25 }
 0xec2   : > { %v6246_v23 = vpop.eup %6245  ;;  %6257 = vpow2.f32 %v3682_v33  ;;  %v3814_v0 = vunpack.c.h.bf16 %v8975_v38  ;;  %v3873_v36 = vadd.f32 %v3872_v56, %v3812_v28  ;;  %v3640_v32 = vunpack.c.l.bf16 %v10209_v46 }
 0xec3   : > { %v8994_v26 = vpop.eup %6247  ;;  %6259 = vpow2.f32 %v3686_v14  ;;  %v3702_v54 = vmul.f32 1.442695, %v3611_v31  ;;  %v3706_v59 = vmul.f32 1.442695, %v3613_v62  ;;  %3948 = vmatpush.bf16.msra.mxu0 %v8991_v19  ;;  %v3782_v25 = vpack.c.bf16 %v6242_v57, %v6240_v2  ;;  %v10210_v57 = vld [vmem:[#allocation30_spill] sm:$0xff] }
 0xec4   : > { %v9002_v52 = vpop.eup %6249  ;;  %6261 = vpow2.f32 %v3690_v51  ;;  %v3816_v7 = vunpack.c.l.bf16 %v8987_v55  ;;  %v3874_v43 = vadd.f32 %v3873_v36, %v3814_v0  ;;  %v3642_v1 = vunpack.c.h.bf16 %v10209_v46 }
 0xec5   : > { %v9005_v33 = vpop.eup %6251  ;;  %6263 = vpow2.f32 %v3694_v47  ;;  %v3710_v42 = vmul.f32 1.442695, %v3615_v49  ;;  %v3784_v31 = vpack.c.bf16 %v6246_v23, %v6244_v40  ;;  %v3712_v62 = vmul.f32 1.442695, %v3616_v48 }
 0xec6   : > { %v9010_v39 = vpop.eup %6253  ;;  %6265 = vpow2.f32 %v3698_v3  ;;  %v3818_v2 = vunpack.c.h.bf16 %v8987_v55  ;;  %v3875_v14 = vadd.f32 %v3874_v43, %v3816_v7  ;;  %v3636_v28 = vunpack.c.l.bf16 %v10210_v57 }
 0xec7   : > { %v9015_v51 = vpop.eup %6255  ;;  %v3638_v56 = vunpack.c.h.bf16 %v10210_v57  ;;  %6267 = vpow2.f32 %v3702_v54  ;;  %v3716_v45 = vmul.f32 1.442695, %v3618_v9  ;;  %3949 = vmatpush.bf16.msra.mxu0 %v3784_v31  ;;  %v3760_v40 = vmul.f32 1.442695, %v3640_v32 }
 0xec8   : > { %v9021_v49 = vpop.eup %6257  ;;  %6269 = vpow2.f32 %v3706_v59  ;;  %v3820_v47 = vunpack.c.l.bf16 %v3782_v25  ;;  %v3876_v48 = vadd.f32 %v3875_v14, %v3818_v2  ;;  %v3626_v3 = vunpack.c.h.bf16 %v8820_v41 }
 0xec9   : > { %v9023_v23 = vpop.eup %6259  ;;  %v3627_v0 = vunpack.c.h.bf16 %v8915_v18  ;;  %6271 = vpow2.f32 %v3710_v42  ;;  %v3720_v36 = vmul.f32 1.442695, %v3620_v15  ;;  %v3764_v60 = vmul.f32 1.442695, %v3642_v1 }
 0xeca   : > { %v9029_v46 = vpop.eup %6261  ;;  %6273 = vpow2.f32 %v3712_v62  ;;  %v3822_v9 = vunpack.c.h.bf16 %v3782_v25  ;;  %v3877_v54 = vadd.f32 %v3876_v48, %v3820_v47  ;;  %v3632_v32 = vunpack.c.l.bf16 %v8824_v50 }
 0xecb   : > { %v9031_v59 = vpop.eup %6263  ;;  %v3634_v7 = vunpack.c.h.bf16 %v8824_v50  ;;  %6275 = vpow2.f32 %v3716_v45  ;;  %v3752_v43 = vmul.f32 1.442695, %v3636_v28  ;;  %3950 = vmatpush.bf16.msra.mxu0 %v3782_v25  ;;  %v3756_v42 = vmul.f32 1.442695, %v3638_v56 }
 0xecc   : > { %v9035_v2 = vpop.eup %6265  ;;  %6277 = vpow2.f32 %v3760_v40  ;;  %v3824_v15 = vunpack.c.l.bf16 %v3784_v31  ;;  %v3878_v14 = vadd.f32 %v3877_v54, %v3822_v9  ;;  %v3628_v1 = vunpack.c.l.bf16 %v8822_v63 }
 0xecd   : > { %v9037_v57 = vpop.eup %6267  ;;  %v3630_v62 = vunpack.c.h.bf16 %v8822_v63  ;;  %6279 = vpow2.f32 %v3720_v36  ;;  %v3724_v47 = vmul.f32 1.442695, %v3622_v4  ;;  %v3728_v25 = vmul.f32 1.442695, %v3624_v24 }
 0xece   : > { %v6270_v50 = vpop.eup %6269  ;;  %6281 = vpow2.f32 %v3764_v60  ;;  %v3826_v28 = vunpack.c.h.bf16 %v3784_v31  ;;  %v3879_v56 = vadd.f32 %v3878_v14, %v3824_v15  ;;  %v3744_v40 = vmul.f32 1.442695, %v3632_v32 }
 0xecf   : > { %v6272_v45 = vpop.eup %6271  ;;  %v3748_v48 = vmul.f32 1.442695, %v3634_v7  ;;  %6283 = vpow2.f32 %v3752_v43  ;;  %v3828_v9 = vunpack.c.l.bf16 %v8991_v19  ;;  %3951 = vmatpush.bf16.msra.mxu0 %v8987_v55  ;;  %v9049_v58 = vpack.c.bf16 %v8994_v26, %v8957_v12 }
 0xed0   : > { %v6274_v63 = vpop.eup %6273  ;;  %6285 = vpow2.f32 %v3756_v42  ;;  %v3880_v36 = vadd.f32 %v3879_v56, %v3826_v28  ;;  %v9053_v41 = vpack.c.bf16 %v8951_v29, %v8944_v22  ;;  %v3732_v24 = vmul.f32 1.442695, %v3626_v3 }
 0xed1   : > { %v6276_v4 = vpop.eup %6275  ;;  %6287 = vpow2.f32 %v3724_v47  ;;  %v3736_v31 = vmul.f32 1.442695, %v3628_v1  ;;  %v3830_v60 = vunpack.c.h.bf16 %v8991_v19  ;;  %v3740_v12 = vmul.f32 1.442695, %v3630_v62 }
 0xed2   : > { %v6278_v54 = vpop.eup %6277  ;;  %6289 = vpow2.f32 %v3728_v25  ;;  %v3881_v55 = vadd.f32 %v3880_v36, %v3828_v9  ;;  %v3809_v32 = vunpack.c.l.bf16 %v9053_v41  ;;  %v3811_v7 = vunpack.c.h.bf16 %v9053_v41 }
 0xed3   : > { %v6280_v43 = vpop.eup %6279  ;;  %6291 = vpow2.f32 %v3744_v40  ;;  %v3832_v26 = vunpack.c.l.bf16 %v8981_v44  ;;  %3952 = vmatpush.bf16.msra.mxu0 %v8975_v38  ;;  %v9062_v22 = vpack.c.bf16 %v9005_v33, %v9002_v52  ;;  %v3813_v3 = vunpack.c.l.bf16 %v9049_v58 }
 0xed4   : > { %v6282_v29 = vpop.eup %6281  ;;  %6293 = vpow2.f32 %v3748_v48  ;;  %v3882_v19 = vadd.f32 %v3881_v55, %v3830_v60  ;;  %v3909_v42 = vadd.f32 %v3811_v7, %v3809_v32  ;;  %v3834_v14 = vunpack.c.h.bf16 %v8981_v44  ;;  %v10211_v60 = vld [vmem:[#allocation25_spill] sm:$0xff] }
 0xed5   : > { %v6284_v15 = vpop.eup %6283  ;;  %6295 = vpow2.f32 %v3732_v24  ;;  %v9066_v1 = vpack.c.bf16 %v6282_v29, %v6278_v54  ;;  %v9068_v62 = vpack.c.bf16 %v6272_v45, %v6270_v50  ;;  %v3815_v52 = vunpack.c.h.bf16 %v9049_v58 }
 0xed6   : > { %v6286_v47 = vpop.eup %6285  ;;  %6297 = vpow2.f32 %v3736_v31  ;;  %v3883_v38 = vadd.f32 %v3882_v19, %v3832_v26  ;;  %v3910_v33 = vadd.f32 %v3909_v42, %v3813_v3  ;;  %v3714_v28 = vmul.f32 1.442695, %v3617_v61 }
 0xed7   : > { %v6288_v25 = vpop.eup %6287  ;;  %6299 = vpow2.f32 %v3740_v12  ;;  %v3836_v56 = vunpack.c.l.bf16 %v8968_v21  ;;  %3961 = vmatpush.bf16.msra.mxu2 %v9066_v1  ;;  %3953 = vmatpush.bf16.msra.mxu0 %v8978_v6  ;;  %v9076_v44 = vpack.c.bf16 %v6276_v4, %v6274_v63  ;;  %v9081_v40 = vpack.c.bf16 %v9015_v51, %v9010_v39 }
 0xed8   : > { %v6290_v50 = vpop.eup %6289  ;;  %v3884_v45 = vadd.f32 %v3883_v38, %v3834_v14  ;;  %v3817_v48 = vunpack.c.l.bf16 %v9062_v22  ;;  %v3911_v61 = vadd.f32 %v3910_v33, %v3815_v52  ;;  %v3629_v36 = vunpack.c.l.bf16 %v8917_v17 }
 0xed9   : > { %v6292_v9 = vpop.eup %6291  ;;  %v3718_v24 = vmul.f32 1.442695, %v3619_v27  ;;  %v3838_v6 = vunpack.c.h.bf16 %v8968_v21  ;;  %v9088_v63 = vpack.c.bf16 %v6286_v47, %v6284_v15  ;;  %v9093_v39 = vpack.c.bf16 %v9037_v57, %v9035_v2 }
 0xeda   : > { %v6294_v4 = vpop.eup %6293  ;;  %v3885_v31 = vadd.f32 %v3884_v45, %v3836_v56  ;;  %3954 = vmatmul.bf16.vlgmr.msra.gmra.mxu0 %v10211_v60  ;;  %v3819_v51 = vunpack.c.h.bf16 %v9062_v22  ;;  %v3912_v54 = vadd.f32 %v3911_v61, %v3817_v48  ;;  %6301 = vpow2.f32 %v3714_v28 }
 0xedb   : > { %3974 = vmatpush.bf16.msrb.mxu0 %v9068_v62  ;;  %v6296_v55 = vpop.eup %6295  ;;  %v3722_v11 = vmul.f32 1.442695, %v3621_v37  ;;  %3962 = vmatpush.bf16.msra.mxu2 %v9088_v63  ;;  %v9099_v21 = vpack.c.bf16 %v6288_v25, %v6280_v43  ;;  %v3840_v27 = vunpack.c.l.bf16 %v9076_v44  ;;  %v3785_v2 = vpack.c.bf16 %v9023_v23, %v9021_v49 }
 0xedc   : > { %v6298_v32 = vpop.eup %6297  ;;  %v3886_v7 = vadd.f32 %v3885_v31, %v3838_v6  ;;  %v3821_v57 = vunpack.c.l.bf16 %v9081_v40  ;;  %v3913_v12 = vadd.f32 %v3912_v54, %v3819_v51  ;;  %6303 = vpow2.f32 %v3718_v24 }
 0xedd   : > { %v6300_v26 = vpop.eup %6299  ;;  %v3726_v37 = vmul.f32 1.442695, %v3623_v20  ;;  %v9108_v29 = vpack.c.bf16 %v6294_v4, %v6292_v9  ;;  %v3787_v43 = vpack.c.bf16 %v9031_v59, %v9029_v46  ;;  %v3842_v19 = vunpack.c.h.bf16 %v9076_v44 }
 0xede   : > { %v3887_v3 = vadd.f32 %v3886_v7, %v3840_v27  ;;  %v3823_v42 = vunpack.c.h.bf16 %v9081_v40  ;;  %v3914_v15 = vadd.f32 %v3913_v12, %v3821_v57  ;;  %v3641_v49 = vunpack.c.l.bf16 %v8928_v8 }
 0xedf   : > { %3975 = vmatpush.bf16.msrb.mxu0 %v9093_v39  ;;  %6305 = vpow2.f32 %v3722_v11  ;;  %v3730_v23 = vmul.f32 1.442695, %v3625_v13  ;;  %3963 = vmatpush.bf16.msra.mxu2 %v9108_v29  ;;  %v3844_v34 = vunpack.c.l.bf16 %v9099_v21  ;;  %v3796_v20 = vpack.c.bf16 %v6296_v55, %v6290_v50 }
 0xee0   : > { %v3888_v14 = vadd.f32 %v3887_v3, %v3842_v19  ;;  %v3825_v46 = vunpack.c.l.bf16 %v3785_v2  ;;  %v3915_v59 = vadd.f32 %v3914_v15, %v3823_v42  ;;  %v6302_v47 = vpop.eup %6301  ;;  %v3643_v38 = vunpack.c.h.bf16 %v8928_v8 }
 0xee1   : > { %6307 = vpow2.f32 %v3726_v37  ;;  %v3734_v52 = vmul.f32 1.442695, %v3627_v0  ;;  %v3798_v33 = vpack.c.bf16 %v6300_v26, %v6298_v32  ;;  %v3846_v25 = vunpack.c.h.bf16 %v9099_v21 }
 0xee2   : > { %v3889_v13 = vadd.f32 %v3888_v14, %v3844_v34  ;;  %v3827_v28 = vunpack.c.h.bf16 %v3785_v2  ;;  %v3916_v56 = vadd.f32 %v3915_v59, %v3825_v46  ;;  %v6304_v45 = vpop.eup %6303  ;;  %v3637_v50 = vunpack.c.l.bf16 %v8925_v16 }
 0xee3   : > { %3976 = vmatpush.bf16.msrb.mxu0 %v3787_v43  ;;  %6309 = vpow2.f32 %v3730_v23  ;;  %v3738_v48 = vmul.f32 1.442695, %v3629_v36  ;;  %v3762_v61 = vmul.f32 1.442695, %v3641_v49  ;;  %3964 = vmatpush.bf16.msra.mxu2 %v3798_v33  ;;  %v3848_v9 = vunpack.c.l.bf16 %v3796_v20  ;;  %v10212_v49 = vld [vmem:[#allocation32_spill] sm:$0xff] }
 0xee4   : > { %v3890_v24 = vadd.f32 %v3889_v13, %v3846_v25  ;;  %v3829_v8 = vunpack.c.l.bf16 %v3787_v43  ;;  %v3917_v6 = vadd.f32 %v3916_v56, %v3827_v28  ;;  %v3631_v0 = vunpack.c.h.bf16 %v8917_v17  ;;  %v10213_v23 = vld [vmem:[#allocation8_spill] sm:$0xff] }
 0xee5   : > { %v6306_v18 = vpop.eup %6305  ;;  %v3639_v4 = vunpack.c.h.bf16 %v8925_v16  ;;  %6311 = vpow2.f32 %v3734_v52  ;;  %v3766_v31 = vmul.f32 1.442695, %v3643_v38  ;;  %v3850_v51 = vunpack.c.h.bf16 %v3796_v20 }
 0xee6   : > { %v3891_v54 = vadd.f32 %v3890_v24, %v3848_v9  ;;  %v3831_v55 = vunpack.c.h.bf16 %v3787_v43  ;;  %v3918_v11 = vadd.f32 %v3917_v6, %v3829_v8  ;;  %v3633_v36 = vunpack.c.l.bf16 %v8922_v53  ;;  %v5859_v9 = vld [vmem:[#allocation2 + $0x34] sm:$0xf0] }
 0xee7   : > { %3977 = vmatpush.bf16.msrb.mxu0 %v3785_v2  ;;  %v6308_v27 = vpop.eup %6307  ;;  %6313 = vpow2.f32 %v3738_v48  ;;  %v3754_v32 = vmul.f32 1.442695, %v3637_v50  ;;  %3965 = vmatpush.bf16.msra.mxu2 %v3796_v20  ;;  %v3833_v7 = vunpack.c.l.bf16 %v9093_v39  ;;  %v3852_v2 = vunpack.c.l.bf16 %v3798_v33 }
 0xee8   : > { %6315 = vpow2.f32 %v3762_v61  ;;  %v3892_v57 = vadd.f32 %v3891_v54, %v3850_v51  ;;  %v3919_v17 = vadd.f32 %v3918_v11, %v3831_v55  ;;  %v3635_v12 = vunpack.c.h.bf16 %v8922_v53 }
 0xee9   : > { %v6310_v16 = vpop.eup %6309  ;;  %v3742_v26 = vmul.f32 1.442695, %v3631_v0  ;;  %v3758_v37 = vmul.f32 1.442695, %v3639_v4  ;;  %6317 = vpow2.f32 %v3766_v31  ;;  %v3854_v43 = vunpack.c.h.bf16 %v3798_v33  ;;  %v5702_v31 = vld [vmem:[#allocation2 + $0x20] sm:$0xf] }
 0xeea   : > { %v3893_v19 = vadd.f32 %v3892_v57, %v3852_v2  ;;  %v3835_v3 = vunpack.c.h.bf16 %v9093_v39  ;;  %v3920_v42 = vadd.f32 %v3919_v17, %v3833_v7  ;;  %v3156_v34 = vadd.f32 %v10213_v23, %v10212_v49 }
 0xeeb   : > { %3978 = vmatpush.bf16.msrb.mxu0 %v9081_v40  ;;  %v6312_v15 = vpop.eup %6311  ;;  %v3746_v20 = vmul.f32 1.442695, %v3633_v36  ;;  %6319 = vpow2.f32 %v3754_v32  ;;  %3966 = vmatpush.bf16.msra.mxu2 %v9099_v21  ;;  %v3837_v40 = vunpack.c.l.bf16 %v9068_v62  ;;  %v3856_v53 = vunpack.c.l.bf16 %v9108_v29  ;;  %v5857_v32 = vld [vmem:[#allocation2 + $0x24] sm:$0xf0] }
 0xeec   : > { %v3894_v14 = vadd.f32 %v3893_v19, %v3854_v43  ;;  %v9137_v46 = vpack.c.bf16 %v6304_v45, %v6302_v47  ;;  %v3921_v59 = vadd.f32 %v3920_v42, %v3835_v3  ;;  %v3750_v38 = vmul.f32 1.442695, %v3635_v12  ;;  %v5855_v42 = vld [vmem:[#allocation2 + $0x14] sm:$0xf0] }
 0xeed   : > { %v6314_v39 = vpop.eup %6313  ;;  %6321 = vpow2.f32 %v3758_v37  ;;  %v3839_v52 = vunpack.c.h.bf16 %v9068_v62  ;;  %v9142_v33 = vpack.c.bf16 %v8920_v10, %v8913_v30  ;;  %v3858_v25 = vunpack.c.h.bf16 %v9108_v29  ;;  %v5710_v29 = vld [vmem:[#allocation2 + $0x30] sm:$0xf] }
 0xeee   : > { %v6316_v21 = vpop.eup %6315  ;;  %6323 = vpow2.f32 %v3742_v26  ;;  %v3895_v13 = vadd.f32 %v3894_v14, %v3856_v53  ;;  %v3922_v28 = vadd.f32 %v3921_v59, %v3837_v40  ;;  %v9149_v47 = vpack.c.bf16 %v6308_v27, %v6306_v18  ;;  %v5694_v26 = vld [vmem:[#allocation2 + $0x10] sm:$0xf]  ;;  %v5686_v14 = vld [vmem:[#allocation2] sm:$0xf] }
 0xeef   : > { %3979 = vmatpush.bf16.msrb.mxu0 %v9062_v22  ;;  %v6318_v56 = vpop.eup %6317  ;;  %v9146_v22 = vpack.c.bf16 %v3156_v34, %v8798_v5  ;;  %6325 = vpow2.f32 %v3746_v20  ;;  %3967 = vmatpush.bf16.msra.mxu2 %v9076_v44  ;;  %v3860_v62 = vunpack.c.l.bf16 %v9088_v63  ;;  %v3841_v30 = vunpack.c.l.bf16 %v9137_v46 }
 0xef0   : > { %v3896_v45 = vadd.f32 %v3895_v13, %v3858_v25  ;;  %v3923_v10 = vadd.f32 %v3922_v28, %v3839_v52  ;;  %6327 = vpow2.f32 %v3750_v38  ;;  %v3862_v5 = vunpack.c.h.bf16 %v9088_v63 }
 0xef1   : > { %v6320_v50 = vpop.eup %6319  ;;  %v9157_v44 = vpack.c.bf16 %v6318_v56, %v6316_v21  ;;  %v3843_v48 = vunpack.c.h.bf16 %v9137_v46  ;;  %v3797_v6 = vpack.c.bf16 %v6312_v15, %v6310_v16  ;;  %v3864_v0 = vunpack.c.l.bf16 %v9066_v1  ;;  %v5849_v21 = vld [vmem:[%s9970_s5 + $0x48] sm:$0xff] }
 0xef2   : > { %3968 = vmatmul.bf16.vlgmr.msra.gmra.mxu2 %v9146_v22  ;;  %v3924_v61 = vadd.f32 %v3923_v10, %v3841_v30  ;;  %v3897_v24 = vadd.f32 %v3896_v45, %v3860_v62  ;;  %v3845_v4 = vunpack.c.l.bf16 %v9149_v47  ;;  %v3847_v55 = vunpack.c.h.bf16 %v9149_v47  ;;  %v5858_v45 = vld [vmem:[#allocation2 + $0x34] sm:$0xf] }
 0xef3   : > { %3988 = vmatpush.bf16.msrb.mxu2 %v9142_v33  ;;  %3980 = vmatpush.bf16.msrb.mxu0 %v9049_v58  ;;  %v6322_v8 = vpop.eup %6321  ;;  %v5711_v58 = vor.u32 %v5859_v9, %v5710_v29  ;;  %v3866_v11 = vunpack.c.h.bf16 %v9066_v1  ;;  %v3868_v57 = vunpack.c.l.bf16 %v8938_v35  ;;  %v5703_v17 = vor.u32 %v5857_v32, %v5702_v31  ;;  %v5712_v29 = vld [vmem:[#allocation2 + $0x38] sm:$0xf0] }
 0xef4   : > { %v6324_v18 = vpop.eup %6323  ;;  %v3925_v63 = vadd.f32 %v3924_v61, %v3843_v48  ;;  %v3898_v51 = vadd.f32 %v3897_v24, %v3862_v5  ;;  %v3803_v27 = vpack.c.bf16 %v6322_v8, %v6320_v50  ;;  %v3849_v16 = vunpack.c.l.bf16 %v3797_v6  ;;  %v5856_v61 = vld [vmem:[#allocation2 + $0x24] sm:$0xf]  ;;  %v5704_v8 = vld [vmem:[#allocation2 + $0x28] sm:$0xf0] }
 0xef5   : > { %v6326_v54 = vpop.eup %6325  ;;  %v3870_v43 = vunpack.c.h.bf16 %v8938_v35  ;;  %v3851_v19 = vunpack.c.h.bf16 %v3797_v6  ;;  %v5695_v49 = vor.u32 %v5855_v42, %v5694_v26  ;;  %v3865_v62 = vunpack.c.l.bf16 %v9157_v44 }
 0xef6   : > { %v3926_v36 = vadd.f32 %v3925_v63, %v3845_v4  ;;  %v3899_v7 = vadd.f32 %v3898_v51, %v3864_v0  ;;  %v6328_v2 = vpop.eup %6327  ;;  %v3861_v25 = vunpack.c.l.bf16 %v3803_v27  ;;  %v3863_v28 = vunpack.c.h.bf16 %v3803_v27  ;;  %v5850_v4 = vld [vmem:[%s9970_s5 + $0x50] sm:$0xff]  ;;  %v5852_v63 = vld [vmem:[#allocation2 + $0x4] sm:$0xf] }
 0xef7   : > { %3989 = vmatpush.bf16.msrb.mxu2 %v9157_v44  ;;  %3981 = vmatpush.bf16.msrb.mxu0 %v9053_v41  ;;  %v3799_v41 = vpack.c.bf16 %v6324_v18, %v6314_v39  ;;  %v3801_v1 = vpack.c.bf16 %v6328_v2, %v6326_v54  ;;  %v3867_v10 = vunpack.c.h.bf16 %v9157_v44  ;;  %v5715_v5 = vor.u32 %v5858_v45, %v5712_v29  ;;  %v5696_v44 = vld [vmem:[#allocation2 + $0x18] sm:$0xf0]  ;;  %v4050_v54 = vpop.permute.xlu1 %4049 }
 0xef8   : > { %v3927_v12 = vadd.f32 %v3926_v36, %v3847_v55  ;;  %v3900_v37 = vadd.f32 %v3899_v7, %v3866_v11  ;;  %v3869_v48 = vunpack.c.l.bf16 %v9142_v33  ;;  %v3871_v24 = vunpack.c.h.bf16 %v9142_v33  ;;  %v5851_v33 = vld [vmem:[%s9970_s5 + $0x58] sm:$0xff] }
 0xef9   : > { %v3853_v23 = vunpack.c.l.bf16 %v3799_v41  ;;  %v3855_v40 = vunpack.c.h.bf16 %v3799_v41  ;;  %v3857_v39 = vunpack.c.l.bf16 %v3801_v1  ;;  %v3859_v38 = vunpack.c.h.bf16 %v3801_v1 }
 0xefa   : > { %3982 = vmatmul.bf16.vlgmr.msrb.gmra.mxu0 %v10211_v60  ;;  %v3928_v3 = vadd.f32 %v3927_v12, %v3849_v16  ;;  %v3901_v15 = vadd.f32 %v3900_v37, %v3868_v57  ;;  %v5853_v60 = vld [vmem:[#allocation2 + $0x4] sm:$0xf0] }
 0xefb   : > { %4135 = vmatpush.bf16.msra.mxu0 %v5711_v58  ;;  %3990 = vmatpush.bf16.msrb.mxu2 %v3803_v27  ;;  %v5687_v59 = vor.u32 %v5853_v60, %v5686_v14  ;;  %v5854_v58 = vld [vmem:[#allocation2 + $0x14] sm:$0xf] }
 0xefc   : > { %v3929_v34 = vadd.f32 %v3928_v3, %v3851_v19  ;;  %v3902_v20 = vadd.f32 %v3901_v15, %v3870_v43  ;;  %v5699_v0 = vor.u32 %v5854_v58, %v5696_v44 }
 0xefe   : > { %v3930_v53 = vadd.f32 %v3929_v34, %v3853_v23  ;;  %v3903_v11 = vrot.slane %v3902_v20, 4 }
 0xeff   : > { %4136 = vmatpush.bf16.msra.mxu0 %v5703_v17  ;;  %3991 = vmatpush.bf16.msrb.mxu2 %v3801_v1  ;;  %v4055_v36 = vpop.permute.xlu1 %4054 }
 0xf00   : > { %v3931_v35 = vadd.f32 %v3930_v53, %v3855_v40  ;;  %v3904_v32 = vadd.f32 %v3903_v11, %v3902_v20 }
 0xf02   : > { %v3932_v52 = vadd.f32 %v3931_v35, %v3857_v39  ;;  %v3905_v57 = vrot.slane %v3904_v32, 2 }
 0xf03   : > { %4137 = vmatpush.bf16.msra.mxu0 %v5695_v49  ;;  %3992 = vmatpush.bf16.msrb.mxu2 %v3799_v41 }
 0xf04   : > { %v3933_v13 = vadd.f32 %v3932_v52, %v3859_v38  ;;  %v3906_v16 = vadd.f32 %v3905_v57, %v3904_v32 }
 0xf06   : > { %v3934_v56 = vadd.f32 %v3933_v13, %v3861_v25  ;;  %v3907_v43 = vrot.slane %v3906_v16, 1 }
 0xf07   : > { %4138 = vmatpush.bf16.msra.mxu0 %v5687_v59  ;;  %3993 = vmatpush.bf16.msrb.mxu2 %v3797_v6  ;;  %v4040_v12 = vpop.permute.xlu1 %4039 }
 0xf08   : > { %v3935_v30 = vadd.f32 %v3934_v56, %v3863_v28  ;;  %v3908_v19 = vadd.f32 %v3907_v43, %v3906_v16 }
 0xf0a   : > { %5716 = vmatmul.msk.bf16.vlgmr.msra.gmra.mxu0 %vm384_vm0, %v5849_v21  ;;  %v3936_v50 = vadd.f32 %v3935_v30, %v3865_v62  ;;  %6329 = vrcp.f32 %v3908_v19 }
 0xf0b   : > { %3994 = vmatpush.bf16.msrb.mxu2 %v9149_v47  ;;  %v5707_v47 = vor.u32 %v5856_v61, %v5704_v8 }
 0xf0c   : > { %v3937_v9 = vadd.f32 %v3936_v50, %v3867_v10 }
 0xf0e   : > { %v3938_v6 = vadd.f32 %v3937_v9, %v3869_v48 }
 0xf0f   : > { %3995 = vmatpush.bf16.msrb.mxu2 %v9137_v46  ;;  %v5688_v46 = vld [vmem:[#allocation2 + $0x8] sm:$0xf0]  ;;  %v4045_v15 = vpop.permute.xlu1 %4044 }
 0xf10   : > { %v3939_v18 = vadd.f32 %v3938_v6, %v3871_v24  ;;  %v5691_v31 = vor.u32 %v5852_v63, %v5688_v46  ;;  %v6330_v53 = vpop.eup %6329  ;;  %v5670_v46 = vld [vmem:[%s9971_s6 + $0xb0] sm:$0xff] }
 0xf12   : > { %3996 = vmatmul.bf16.vlgmr.msrb.gmra.mxu2 %v9146_v22  ;;  %v3940_v27 = vrot.slane %v3939_v18, 4 }
 0xf13   : > { %4159 = vmatpush.bf16.msra.mxu2 %v5715_v5 }
 0xf14   : > { %v3941_v7 = vadd.f32 %v3940_v27, %v3939_v18 }
 0xf16   : > { %v3942_v17 = vrot.slane %v3941_v7, 2 }
 0xf17   : > { %4160 = vmatpush.bf16.msra.mxu2 %v5707_v47 }
 0xf18   : > { %v3943_v26 = vadd.f32 %v3942_v17, %v3941_v7 }
 0xf1a   : > { %5717 = vmatmul.msk.bf16.gmra.mxu0 %vm384_vm0, %v5850_v4  ;;  %v3944_v1 = vrot.slane %v3943_v26, 1 }
 0xf1b   : > { %4161 = vmatpush.bf16.msra.mxu2 %v5699_v0 }
 0xf1c   : > { %v3945_v42 = vadd.f32 %v3944_v1, %v3943_v26 }
 0xf1e   : > { %6331 = vrcp.f32 %v3945_v42 }
 0xf1f   : > { %4162 = vmatpush.bf16.msra.mxu2 %v5691_v31 }
 0xf22   : > { %5719 = vmatmul.msk.bf16.vlgmr.msra.gmra.mxu2 %vm384_vm0, %v5849_v21 }
 0xf24   : > { %v6332_v59 = vpop.eup %6331 }
 0xf2a   : > { %5718 = vmatmul.msk.bf16.gmra.mxu0 %vm384_vm0, %v5851_v33 }
 0xf32   : > { %5720 = vmatmul.msk.bf16.gmra.mxu2 %vm384_vm0, %v5850_v4 }
 0xf42   : > { %5721 = vmatmul.msk.bf16.gmra.mxu2 %vm384_vm0, %v5851_v33 }
 0xf57   : > { %v3955_v22 = vpop.f32.mrf.mxu0 }
 0xf5f   : > { %v3957_v51 = vpop.f32.mrf.mxu0 }
 0xf75   : > { %v3969_v41 = vpop.f32.mrf.mxu2 }
 0xf76   : > { %v3970_v20 = vadd.f32 %v3969_v41, %v3955_v22 }
 0xf77   : > { %v3983_v55 = vpop.f32.mrf.mxu0 }
 0xf78   : > { %v4004_v39 = vmul.f32 %v6330_v53, %v3970_v20 }
 0xf7d   : > { %v3971_v3 = vpop.f32.mrf.mxu2 }
 0xf7e   : > { %v3972_v52 = vadd.f32 %v3971_v3, %v3957_v51 }
 0xf7f   : > { %v3985_v2 = vpop.f32.mrf.mxu0 }
 0xf80   : > { %v4006_v13 = vmul.f32 %v6330_v53, %v3972_v52 }
 0xf87   : > { %v4140_v37 = vpop.f32.mrf.mxu0 }
 0xf88   : > { %v4141_v23 = vadd.f32 %v4140_v37, %v4040_v12 }
 0xf8f   : > { %v4142_v49 = vpop.f32.mrf.mxu0 }
 0xf90   : > { %v4143_v34 = vadd.f32 %v4142_v49, %v4045_v15 }
 0xf92   : > { %v4179_v60 = vpack.c.bf16 %v4143_v34, %v4141_v23 }
 0xf94   : > { %4264 = vmatpush.bf16.msrb.mxu0 %v4179_v60 }
 0xf95   : > { %v3997_v40 = vpop.f32.mrf.mxu2 }
 0xf96   : > { %v3998_v14 = vadd.f32 %v3997_v40, %v3983_v55 }
 0xf97   : > { %v4145_v29 = vpop.f32.mrf.mxu0 }
 0xf98   : > { %v4005_v35 = vmul.f32 %v6332_v59, %v3998_v14  ;;  %v4146_v24 = vadd.f32 %v4145_v29, %v4050_v54 }
 0xf9a   : > { %v4008_v38 = vpack.c.bf16 %v4005_v35, %v4004_v39 }
 0xf9c   : > { %4013 = vst [vmem:[#allocation3 + $0x20] sm:$0xff] %v4008_v38 }
 0xf9d   : > { %v3999_v21 = vpop.f32.mrf.mxu2 }
 0xf9e   : > { %v4000_v25 = vadd.f32 %v3999_v21, %v3985_v2 }
 0xf9f   : > { %v4147_v48 = vpop.f32.mrf.mxu0 }
 0xfa0   : > { %v4007_v28 = vmul.f32 %v6332_v59, %v4000_v25  ;;  %v4148_v61 = vadd.f32 %v4147_v48, %v4055_v36 }
 0xfa2   : > { %v4009_v56 = vpack.c.bf16 %v4007_v28, %v4006_v13  ;;  %v4181_v47 = vpack.c.bf16 %v4148_v61, %v4146_v24 }
 0xfa4   : > { %4014 = vst [vmem:[#allocation3 + $0x28] sm:$0xff] %v4009_v56 }
 0xfa5   : > { %v4164_v62 = vpop.f32.mrf.mxu2 }
 0xfa6   : > { %v4165_v30 = vadd.f32 %v4164_v62, %v4040_v12 }
 0xfa7   : > { %v9208_v32 = vpop.f32.mrf.mxu0 }
 0xfa8   : > { %10214 = vst [vmem:[#allocation28_spill] sm:$0xff] %v9208_v32 }
 0xfad   : > { %v4166_v45 = vpop.f32.mrf.mxu2 }
 0xfae   : > { %v4167_v10 = vadd.f32 %v4166_v45, %v4045_v15 }
 0xfaf   : > { %v9214_v57 = vpop.f32.mrf.mxu0 }
 0xfb0   : > { %v4180_v50 = vpack.c.bf16 %v4167_v10, %v4165_v30  ;;  %10216 = vst [vmem:[#allocation19_spill] sm:$0xff] %v9214_v57 }
 0xfb2   : > { %4353 = vmatpush.bf16.msrb.mxu2 %v4180_v50 }
 0xfb5   : > { %v4169_v5 = vpop.f32.mrf.mxu2 }
 0xfb6   : > { %v4170_v8 = vadd.f32 %v4169_v5, %v4050_v54 }
 0xfbd   : > { %v4171_v9 = vpop.f32.mrf.mxu2 }
 0xfbe   : > { %v4172_v6 = vadd.f32 %v4171_v9, %v4055_v36 }
 0xfc0   : > { %v4182_v58 = vpack.c.bf16 %v4172_v6, %v4170_v8 }
 0xfc2   : > { %4185 = vxpose.binary.xlu1.c.b16.start.end [1/2] (short) %v4182_v58, %v4181_v47, 128 }
 0xfc5   : > { %v9212_v2 = vpop.f32.mrf.mxu2 }
 0xfc6   : > { %10215 = vst [vmem:[#allocation11_spill] sm:$0xff] %v9212_v2 }
 0xfcd   : > { %v9216_v17 = vpop.f32.mrf.mxu2 }
 0xfce   : > { %10217 = vst [vmem:[#allocation9_spill] sm:$0xff] %v9216_v17 }
0x106e   : > { %v4193_v18 = vpop.trf.xlu1 }
0x106f   : > { %5722 = vmatmul.msk.bf16.vlgmr.msrb.gmra.mxu0 %vm1145_vm12, %v4193_v18  ;;  %5738 = vmatmul.msk.bf16.vlgmr.msrb.gmra.mxu2 %vm1145_vm12, %v4193_v18 }
0x1076   : > { %v4194_v44 = vpop.trf.xlu1 }
0x107e   : > { %v4195_v0 = vpop.trf.xlu1 }
0x107f   : > { %5723 = vmatmul.msk.bf16.gmra.mxu0 %vm1145_vm12, %v4195_v0  ;;  %5739 = vmatmul.msk.bf16.gmra.mxu2 %vm1145_vm12, %v4195_v0 }
0x1086   : > { %v4196_v4 = vpop.trf.xlu1 }
0x108c   : > { %4059 = vperm.xlu1 %5917, %v5670_v46  }
0x108e   : > { %v4197_v63 = vpop.trf.xlu1 }
0x108f   : > { %5724 = vmatmul.msk.bf16.gmra.mxu0 %vm1145_vm12, %v4197_v63  ;;  %5740 = vmatmul.msk.bf16.gmra.mxu2 %vm1145_vm12, %v4197_v63 }
0x1096   : > { %v4198_v31 = vpop.trf.xlu1 }
0x109e   : > { %v4199_v33 = vpop.trf.xlu1 }
0x109f   : > { %5725 = vmatmul.msk.bf16.gmra.mxu0 %vm1145_vm12, %v4199_v33  ;;  %5741 = vmatmul.msk.bf16.gmra.mxu2 %vm1145_vm12, %v4199_v33 }
0x10a6   : > { %v4200_v22 = vpop.trf.xlu1 }
0x10ae   : > { %v4201_v51 = vpop.trf.xlu1 }
0x10af   : > { %5726 = vmatmul.msk.bf16.gmra.mxu0 %vm1145_vm12, %v4201_v51  ;;  %5742 = vmatmul.msk.bf16.gmra.mxu2 %vm1145_vm12, %v4201_v51 }
0x10b6   : > { %v4202_v54 = vpop.trf.xlu1 }
0x10be   : > { %v4203_v55 = vpop.trf.xlu1 }
0x10bf   : > { %5727 = vmatmul.msk.bf16.gmra.mxu0 %vm1145_vm12, %v4203_v55  ;;  %5743 = vmatmul.msk.bf16.gmra.mxu2 %vm1145_vm12, %v4203_v55 }
0x10c6   : > { %v4204_v11 = vpop.trf.xlu1 }
0x10ce   : > { %v4205_v27 = vpop.trf.xlu1 }
0x10cf   : > { %5728 = vmatmul.msk.bf16.gmra.mxu0 %vm1145_vm12, %v4205_v27  ;;  %5744 = vmatmul.msk.bf16.gmra.mxu2 %vm1145_vm12, %v4205_v27 }
0x10d6   : > { %v4206_v36 = vpop.trf.xlu1 }
0x10de   : > { %v4207_v7 = vpop.trf.xlu1 }
0x10df   : > { %5729 = vmatmul.msk.bf16.gmra.mxu0 %vm1145_vm12, %v4207_v7  ;;  %5745 = vmatmul.msk.bf16.gmra.mxu2 %vm1145_vm12, %v4207_v7 }
0x10e6   : > { %v4208_v62 = vpop.trf.xlu1 }
0x10ec   : > { %v9218_v41 = vpop.f32.mrf.mxu0 }
0x10ef   : > { %5730 = vmatmul.msk.bf16.gmra.mxu0 %vm1145_vm12, %v4194_v44  ;;  %5746 = vmatmul.msk.bf16.gmra.mxu2 %vm1145_vm12, %v4194_v44 }
0x10f2   : > { %v9222_v16 = vpop.f32.mrf.mxu2 }
0x10f4   : > { %v9224_v12 = vpop.f32.mrf.mxu0 }
0x10fa   : > { %v9226_v26 = vpop.f32.mrf.mxu2 }
0x10fb   : > { %10218 = vst [vmem:[#allocation13_spill] sm:$0xff] %v9226_v26 }
0x10fc   : > { %v9228_v37 = vpop.f32.mrf.mxu0 }
0x10fd   : > { %10219 = vst [vmem:[#allocation15_spill] sm:$0xff] %v9228_v37  ;;  %v4435_v55 = vmax.f32 %v9218_v41, %v9228_v37 }
0x10ff   : > { %5731 = vmatmul.msk.bf16.gmra.mxu0 %vm1145_vm12, %v4196_v4  ;;  %5747 = vmatmul.msk.bf16.gmra.mxu2 %vm1145_vm12, %v4196_v4 }
0x1102   : > { %v9232_v43 = vpop.f32.mrf.mxu2 }
0x1103   : > { %10220 = vst [vmem:[#allocation18_spill] sm:$0xff] %v9232_v43 }
0x1104   : > { %v9234_v1 = vpop.f32.mrf.mxu0 }
0x1105   : > { %10221 = vst [vmem:[#allocation20_spill] sm:$0xff] %v9234_v1 }
0x110a   : > { %v9236_v19 = vpop.f32.mrf.mxu2 }
0x110b   : > { %10222 = vst [vmem:[#allocation21_spill] sm:$0xff] %v9236_v19 }
0x110c   : > { %v9238_v3 = vpop.f32.mrf.mxu0 }
0x110d   : > { %10223 = vst [vmem:[#allocation22_spill] sm:$0xff] %v9238_v3  ;;  %v4437_v27 = vmax.f32 %v4435_v55, %v9238_v3 }
0x110f   : > { %5732 = vmatmul.msk.bf16.gmra.mxu0 %vm1145_vm12, %v4198_v31  ;;  %5748 = vmatmul.msk.bf16.gmra.mxu2 %vm1145_vm12, %v4198_v31 }
0x1112   : > { %v9242_v42 = vpop.f32.mrf.mxu2 }
0x1114   : > { %v9244_v15 = vpop.f32.mrf.mxu0 }
0x1115   : > { %10224 = vst [vmem:[#allocation23_spill] sm:$0xff] %v9244_v15 }
0x111a   : > { %v9246_v49 = vpop.f32.mrf.mxu2 }
0x111c   : > { %v9248_v23 = vpop.f32.mrf.mxu0 }
0x111d   : > { %10225 = vst [vmem:[#allocation10_spill] sm:$0xff] %v9248_v23  ;;  %v4439_v2 = vmax.f32 %v4437_v27, %v9248_v23 }
0x111f   : > { %5733 = vmatmul.msk.bf16.gmra.mxu0 %vm1145_vm12, %v4200_v22  ;;  %5749 = vmatmul.msk.bf16.gmra.mxu2 %vm1145_vm12, %v4200_v22 }
0x1122   : > { %v9252_v34 = vpop.f32.mrf.mxu2 }
0x1124   : > { %v9254_v60 = vpop.f32.mrf.mxu0 }
0x112a   : > { %v9256_v20 = vpop.f32.mrf.mxu2 }
0x112b   : > { %10226 = vst [vmem:[#allocation7_spill] sm:$0xff] %v9256_v20 }
0x112c   : > { %v9258_v40 = vpop.f32.mrf.mxu0 }
0x112d   : > { %v4441_v17 = vmax.f32 %v4439_v2, %v9258_v40 }
0x112f   : > { %5734 = vmatmul.msk.bf16.gmra.mxu0 %vm1145_vm12, %v4202_v54  ;;  %5750 = vmatmul.msk.bf16.gmra.mxu2 %vm1145_vm12, %v4202_v54 }
0x1132   : > { %v9262_v53 = vpop.f32.mrf.mxu2 }
0x1134   : > { %v9264_v14 = vpop.f32.mrf.mxu0 }
0x113a   : > { %v9266_v59 = vpop.f32.mrf.mxu2 }
0x113c   : > { %v9268_v39 = vpop.f32.mrf.mxu0 }
0x113d   : > { %v4443_v37 = vmax.f32 %v4441_v17, %v9268_v39 }
0x113f   : > { %5735 = vmatmul.msk.bf16.gmra.mxu0 %vm1145_vm12, %v4204_v11  ;;  %5751 = vmatmul.msk.bf16.gmra.mxu2 %vm1145_vm12, %v4204_v11  ;;  %v4436_v11 = vmax.f32 %v9224_v12, %v9234_v1 }
0x1142   : > { %v9272_v35 = vpop.f32.mrf.mxu2 }
0x1144   : > { %v9274_v38 = vpop.f32.mrf.mxu0 }
0x114a   : > { %v9276_v52 = vpop.f32.mrf.mxu2 }
0x114c   : > { %v9278_v21 = vpop.f32.mrf.mxu0 }
0x114d   : > { %v4445_v55 = vmax.f32 %v4443_v37, %v9278_v21 }
0x114f   : > { %5736 = vmatmul.msk.bf16.gmra.mxu0 %vm1145_vm12, %v4206_v36  ;;  %5752 = vmatmul.msk.bf16.gmra.mxu2 %vm1145_vm12, %v4206_v36  ;;  %v4438_v36 = vmax.f32 %v4436_v11, %v9244_v15 }
0x1151   : > { %v4440_v32 = vmax.f32 %v4438_v36, %v9254_v60 }
0x1152   : > { %v9282_v25 = vpop.f32.mrf.mxu2 }
0x1153   : > { %v4442_v57 = vmax.f32 %v4440_v32, %v9264_v14 }
0x1154   : > { %v9284_v13 = vpop.f32.mrf.mxu0 }
0x1155   : > { %v4444_v1 = vmax.f32 %v4442_v57, %v9274_v38 }
0x1157   : > { %v4446_v11 = vmax.f32 %v4444_v1, %v9284_v13 }
0x115a   : > { %v9286_v28 = vpop.f32.mrf.mxu2 }
0x115c   : > { %v9288_v56 = vpop.f32.mrf.mxu0 }
0x115d   : > { %v4447_v3 = vmax.f32 %v4445_v55, %v9288_v56 }
0x115f   : > { %5737 = vmatmul.msk.bf16.gmra.mxu0 %vm1145_vm12, %v4208_v62  ;;  %5753 = vmatmul.msk.bf16.gmra.mxu2 %vm1145_vm12, %v4208_v62 }
0x1162   : > { %v9292_v45 = vpop.f32.mrf.mxu2 }
0x1164   : > { %v9294_v30 = vpop.f32.mrf.mxu0 }
0x1165   : > { %10227 = vst [vmem:[#allocation14_spill] sm:$0xff] %v9294_v30  ;;  %v4448_v27 = vmax.f32 %v4446_v11, %v9294_v30 }
0x116a   : > { %v9296_v10 = vpop.f32.mrf.mxu2 }
0x116c   : > { %v9298_v29 = vpop.f32.mrf.mxu0 }
0x116d   : > { %10228 = vst [vmem:[#allocation16_spill] sm:$0xff] %v9298_v29  ;;  %v4449_v2 = vmax.f32 %v4447_v3, %v9298_v29 }
0x1172   : > { %v9300_v50 = vpop.f32.mrf.mxu2 }
0x1174   : > { %v9302_v5 = vpop.f32.mrf.mxu0 }
0x1175   : > { %v4450_v32 = vmax.f32 %v4448_v27, %v9302_v5 }
0x117a   : > { %v9304_v48 = vpop.f32.mrf.mxu2 }
0x117c   : > { %v9306_v61 = vpop.f32.mrf.mxu0 }
0x117d   : > { %v4451_v17 = vmax.f32 %v4449_v2, %v9306_v61 }
0x1182   : > { %v9308_v9 = vpop.f32.mrf.mxu2 }
0x1184   : > { %v9310_v24 = vpop.f32.mrf.mxu0 }
0x1185   : > { %v4452_v57 = vmax.f32 %v4450_v32, %v9310_v24 }
0x118a   : > { %v9312_v8 = vpop.f32.mrf.mxu2 }
0x118c   : > { %v9314_v6 = vpop.f32.mrf.mxu0 }
0x118d   : > { %v4453_v37 = vmax.f32 %v4451_v17, %v9314_v6 }
0x1192   : > { %v9316_v47 = vpop.f32.mrf.mxu2 }
0x1194   : > { %v9318_v58 = vpop.f32.mrf.mxu0 }
0x1195   : > { %v4454_v1 = vmax.f32 %v4452_v57, %v9318_v58  ;;  %v4473_v57 = vmax.f32 %v9226_v26, %v9236_v19 }
0x119a   : > { %v9320_v18 = vpop.f32.mrf.mxu2 }
0x119c   : > { %v9322_v44 = vpop.f32.mrf.mxu0 }
0x119d   : > { %v4455_v55 = vmax.f32 %v4453_v37, %v9322_v44 }
0x11a2   : > { %v9324_v0 = vpop.f32.mrf.mxu2 }
0x11a4   : > { %v9326_v4 = vpop.f32.mrf.mxu0 }
0x11a5   : > { %10229 = vst [vmem:[#allocation17_spill] sm:$0xff] %v9326_v4  ;;  %v4456_v11 = vmax.f32 %v4454_v1, %v9326_v4 }
0x11aa   : > { %v9330_v63 = vpop.f32.mrf.mxu2 }
0x11ac   : > { %v9328_v46 = vpop.f32.mrf.mxu0 }
0x11ad   : > { %10230 = vst [vmem:[#allocation24_spill] sm:$0xff] %v9328_v46  ;;  %v4457_v30 = vmax.f32 %v4455_v55, %v9328_v46  ;;  %v4472_v55 = vmax.f32 %v9222_v16, %v9232_v43 }
0x11b2   : > { %v9334_v33 = vpop.f32.mrf.mxu2 }
0x11b3   : > { %10232 = vst [vmem:[#allocation27_spill] sm:$0xff] %v9334_v33 }
0x11b4   : > { %v9332_v31 = vpop.f32.mrf.mxu0 }
0x11b5   : > { %10231 = vst [vmem:[#allocation26_spill] sm:$0xff] %v9332_v31  ;;  %v4458_v3 = vmax.f32 %v4456_v11, %v9332_v31  ;;  %v4475_v11 = vmax.f32 %v4473_v57, %v9246_v49 }
0x11ba   : > { %v9338_v51 = vpop.f32.mrf.mxu2 }
0x11bb   : > { %10233 = vst [vmem:[#allocation29_spill] sm:$0xff] %v9338_v51 }
0x11bc   : > { %v9336_v22 = vpop.f32.mrf.mxu0 }
0x11bd   : > { %v4459_v27 = vmax.f32 %v4457_v30, %v9336_v22  ;;  %v4474_v30 = vmax.f32 %v4472_v55, %v9242_v42 }
0x11bf   : > { %v4476_v46 = vmax.f32 %v4474_v30, %v9252_v34 }
0x11c2   : > { %v9348_v7 = vpop.f32.mrf.mxu2 }
0x11c3   : > { %10234 = vst [vmem:[#allocation12_spill] sm:$0xff] %v9348_v7 }
0x11c4   : > { %v9340_v54 = vpop.f32.mrf.mxu0 }
0x11c5   : > { %v4460_v2 = vmax.f32 %v4458_v3, %v9340_v54  ;;  %v4477_v3 = vmax.f32 %v4475_v11, %v9256_v20 }
0x11c7   : > { %v4479_v19 = vmax.f32 %v4477_v3, %v9266_v59 }
0x11ca   : > { %v9364_v23 = vpop.f32.mrf.mxu2 }
0x11cb   : > { %10235 = vst [vmem:[#allocation31_spill] sm:$0xff] %v9364_v23 }
0x11cc   : > { %v9350_v62 = vpop.f32.mrf.mxu0 }
0x11cd   : > { %v4461_v32 = vmax.f32 %v4459_v27, %v9350_v62 }
0x11d2   : > { %v9378_v29 = vpop.f32.mrf.mxu2 }
0x11d3   : > { %10236 = vst [vmem:[#allocation30_spill] sm:$0xff] %v9378_v29 }
0x11d4   : > { %v9360_v15 = vpop.f32.mrf.mxu0 }
0x11d5   : > { %v4462_v17 = vmax.f32 %v4460_v2, %v9360_v15 }
0x11da   : > { %v9392_v27 = vpop.f32.mrf.mxu2 }
0x11db   : > { %10237 = vst [vmem:[#allocation25_spill] sm:$0xff] %v9392_v27 }
0x11dc   : > { %v9372_v36 = vpop.f32.mrf.mxu0 }
0x11dd   : > { %v4463_v1 = vmax.f32 %v4461_v32, %v9372_v36  ;;  %v4478_v32 = vmax.f32 %v4476_v46, %v9262_v53 }
0x11df   : > { %v4480_v43 = vmax.f32 %v4478_v32, %v9272_v35 }
0x11e2   : > { %v9404_v3 = vpop.f32.mrf.mxu2 }
0x11e4   : > { %v4343_v37 = vpop.f32.mrf.mxu0 }
0x11e5   : > { %v4464_v4 = vmax.f32 %v4462_v17, %v4343_v37  ;;  %v4481_v17 = vmax.f32 %v4479_v19, %v9276_v52 }
0x11e7   : > { %v4465_v31 = vmax.f32 %v4463_v1, %v4464_v4  ;;  %v4483_v4 = vmax.f32 %v4481_v17, %v9286_v28  ;;  %v4482_v1 = vmax.f32 %v4480_v43, %v9282_v25 }
0x11e9   : > { %v4466_v2 = vrot.slane %v4465_v31, 4  ;;  %v4485_v55 = vmax.f32 %v4483_v4, %v9296_v10  ;;  %v4484_v11 = vmax.f32 %v4482_v1, %v9292_v45 }
0x11eb   : > { %v4467_v26 = vmax.f32 %v4465_v31, %v4466_v2  ;;  %v4487_v30 = vmax.f32 %v4485_v55, %v9304_v48  ;;  %v4486_v46 = vmax.f32 %v4484_v11, %v9300_v50  ;;  %v9418_v11 = vpop.f32.mrf.mxu2 }
0x11ed   : > { %v4468_v57 = vrot.slane %v4467_v26, 2  ;;  %v4489_v19 = vmax.f32 %v4487_v30, %v9312_v8  ;;  %v4488_v31 = vmax.f32 %v4486_v46, %v9308_v9 }
0x11ef   : > { %v4469_v20 = vmax.f32 %v4467_v26, %v4468_v57  ;;  %v4491_v2 = vmax.f32 %v4489_v19, %v9320_v18  ;;  %v4490_v43 = vmax.f32 %v4488_v31, %v9316_v47 }
0x11f1   : > { %v4470_v32 = vrot.slane %v4469_v20, 1  ;;  %v4493_v17 = vmax.f32 %v4491_v2, %v9330_v63  ;;  %v4492_v4 = vmax.f32 %v4490_v43, %v9324_v0 }
0x11f3   : > { %v4495_v1 = vmax.f32 %v4493_v17, %v9338_v51  ;;  %v9414_v26 = vmax.f32 %v4469_v20, %v4470_v32  ;;  %v4494_v57 = vmax.f32 %v4492_v4, %v9334_v33 }
0x11f5   : > { %v4497_v55 = vmax.f32 %v4495_v1, %v9364_v23  ;;  %v4496_v30 = vmax.f32 %v4494_v57, %v9348_v7  ;;  %v4561_v19 = vsub.f32 %v9336_v22, %v9414_v26  ;;  %v4563_v31 = vsub.f32 %v9340_v54, %v9414_v26 }
0x11f6   : > { %v4565_v20 = vsub.f32 %v9350_v62, %v9414_v26  ;;  %v4567_v2 = vsub.f32 %v9360_v15, %v9414_v26  ;;  %v4569_v62 = vsub.f32 %v9372_v36, %v9414_v26  ;;  %v4509_v36 = vsub.f32 %v9218_v41, %v9414_v26  ;;  %v10249_v41 = vld [vmem:[#allocation10_spill] sm:$0xff] }
0x11f7   : > { %v4499_v46 = vmax.f32 %v4497_v55, %v9392_v27  ;;  %v4498_v32 = vmax.f32 %v4496_v30, %v9378_v29  ;;  %v9433_v4 = vpack.c.bf16 %v4563_v31, %v4561_v19  ;;  %v4571_v27 = vsub.f32 %v4343_v37, %v9414_v26  ;;  %v9440_v30 = vpop.permute.xlu1 %4059  ;;  %v4065_v29 = vpop.permute.xlu2 %4064  ;;  %v10242_v31 = vld [vmem:[#allocation9_spill] sm:$0xff] }
0x11f8   : > { %v9435_v1 = vpack.c.bf16 %v4567_v2, %v4565_v20  ;;  %10240 = vst [vmem:[#allocation33_spill] sm:$0xff] %v9440_v30  ;;  %v9444_v20 = vadd.f32 %v10242_v31, %v4065_v29  ;;  %v10244_v2 = vld [vmem:[#allocation28_spill] sm:$0xff]  ;;  %v4511_v37 = vsub.f32 %v9224_v12, %v9414_v26  ;;  %v10248_v31 = vld [vmem:[#allocation23_spill] sm:$0xff]  ;;  %v4523_v12 = vsub.f32 %v9254_v60, %v9414_v26 }
0x11f9   : > { %v4501_v43 = vmax.f32 %v4499_v46, %v9418_v11  ;;  %v4500_v17 = vmax.f32 %v4498_v32, %v9404_v3  ;;  %10238 = vst [vmem:[#allocation32_spill] sm:$0xff] %v9433_v4  ;;  %v4603_v23 = vpack.c.bf16 %v4571_v27, %v4569_v62  ;;  %v10241_v32 = vld [vmem:[#allocation19_spill] sm:$0xff]  ;;  %v10247_v62 = vld [vmem:[#allocation22_spill] sm:$0xff] }
0x11fa   : > { %10239 = vst [vmem:[#allocation8_spill] sm:$0xff] %v9435_v1  ;;  %v4153_v19 = vadd.f32 %v10241_v32, %v4065_v29  ;;  %v10245_v27 = vld [vmem:[#allocation15_spill] sm:$0xff]  ;;  %v4517_v32 = vsub.f32 %v10247_v62, %v9414_v26  ;;  %v4531_v62 = vsub.f32 %v9274_v38, %v9414_v26  ;;  %v10251_v38 = vld [vmem:[#allocation16_spill] sm:$0xff]  ;;  %v9508_v7 = vpack.c.bf16 %v4511_v37, %v4509_v36 }
0x11fb   : > { %v4502_v22 = vmax.f32 %v4500_v17, %v4501_v43  ;;  %10243 = vst [vmem:[#allocation19_spill] sm:$0xff] %v9444_v20  ;;  %v4151_v43 = vadd.f32 %v10244_v2, %v9440_v30  ;;  %v4665_v17 = vunpack.c.l.bf16 %v4603_v23  ;;  %v4519_v2 = vsub.f32 %v10248_v31, %v9414_v26 }
0x11fc   : > { %v4533_v31 = vsub.f32 %v9278_v21, %v9414_v26  ;;  %v4541_v30 = vsub.f32 %v10251_v38, %v9414_v26  ;;  %v4543_v21 = vsub.f32 %v9302_v5, %v9414_v26  ;;  %v10253_v5 = vld [vmem:[#allocation24_spill] sm:$0xff] }
0x11fd   : > { %v4503_v57 = vrot.slane %v4502_v22, 4  ;;  %v4557_v4 = vsub.f32 %v10253_v5, %v9414_v26  ;;  %v9512_v51 = vpack.c.bf16 %v4519_v2, %v4517_v32  ;;  %v10255_v32 = vld [vmem:[#allocation13_spill] sm:$0xff] }
0x11ff   : > { %v4504_v55 = vmax.f32 %v4502_v22, %v4503_v57  ;;  %v4667_v22 = vunpack.c.h.bf16 %v4603_v23  ;;  %v4513_v57 = vsub.f32 %v10245_v27, %v9414_v26  ;;  %v4521_v23 = vsub.f32 %v10249_v41, %v9414_v26 }
0x1200   : > { %v4525_v27 = vsub.f32 %v9258_v40, %v9414_v26  ;;  %v4535_v41 = vsub.f32 %v9284_v13, %v9414_v26  ;;  %v4537_v40 = vsub.f32 %v9288_v56, %v9414_v26  ;;  %v4545_v13 = vsub.f32 %v9306_v61, %v9414_v26  ;;  %v10254_v61 = vld [vmem:[#allocation26_spill] sm:$0xff] }
0x1201   : > { %v4505_v54 = vrot.slane %v4504_v55, 2  ;;  %v4793_v60 = vmul.f32 1.442695, %v4667_v22  ;;  %v4547_v56 = vsub.f32 %v9310_v24, %v9414_v26  ;;  %v4553_v22 = vsub.f32 %v9322_v44, %v9414_v26 }
0x1202   : > { %v4559_v1 = vsub.f32 %v10254_v61, %v9414_v26  ;;  %v9506_v24 = vpack.c.bf16 %v4153_v19, %v4151_v43  ;;  %v9514_v44 = vpack.c.bf16 %v4523_v12, %v4521_v23  ;;  %v9520_v5 = vpack.c.bf16 %v4535_v41, %v4533_v31  ;;  %v10256_v12 = vld [vmem:[#allocation18_spill] sm:$0xff]  ;;  %v10262_v61 = vld [vmem:[#allocation31_spill] sm:$0xff] }
0x1203   : > { %v4506_v15 = vmax.f32 %v4504_v55, %v4505_v54  ;;  %v10246_v54 = vld [vmem:[#allocation20_spill] sm:$0xff]  ;;  %v9526_v19 = vpack.c.bf16 %v4547_v56, %v4545_v13 }
0x1204   : > { %v4515_v29 = vsub.f32 %v10246_v54, %v9414_v26  ;;  %v4789_v54 = vmul.f32 1.442695, %v4665_v17  ;;  %v10250_v17 = vld [vmem:[#allocation14_spill] sm:$0xff]  ;;  %v9532_v37 = vpack.c.bf16 %v4559_v1, %v4557_v4 }
0x1205   : > { %v4507_v46 = vrot.slane %v4506_v15, 1  ;;  %v4539_v20 = vsub.f32 %v10250_v17, %v9414_v26  ;;  %v10252_v17 = vld [vmem:[#allocation17_spill] sm:$0xff] }
0x1206   : > { %6333 = vpow2.f32 %v4789_v54  ;;  %v4555_v38 = vsub.f32 %v10252_v17, %v9414_v26 }
0x1207   : > { %v9454_v55 = vmax.f32 %v4506_v15, %v4507_v46  ;;  %v4527_v15 = vsub.f32 %v9264_v14, %v9414_v26  ;;  %v4529_v46 = vsub.f32 %v9268_v39, %v9414_v26  ;;  %6335 = vpow2.f32 %v4793_v60  ;;  %v10258_v60 = vld [vmem:[#allocation7_spill] sm:$0xff] }
0x1208   : > { %v9522_v33 = vpack.c.bf16 %v4539_v20, %v4537_v40  ;;  %v9530_v36 = vpack.c.bf16 %v4555_v38, %v4553_v22  ;;  %v4605_v20 = vunpack.c.l.bf16 %v9508_v7  ;;  %v10261_v38 = vld [vmem:[#allocation12_spill] sm:$0xff] }
0x1209   : > { %v4570_v14 = vsub.f32 %v9404_v3, %v9454_v55  ;;  %v4572_v39 = vsub.f32 %v9418_v11, %v9454_v55  ;;  %v4549_v3 = vsub.f32 %v9314_v6, %v9414_v26  ;;  %v4551_v11 = vsub.f32 %v9318_v58, %v9414_v26 }
0x120a   : > { %v9510_v58 = vpack.c.bf16 %v4515_v29, %v4513_v57  ;;  %v9516_v54 = vpack.c.bf16 %v4527_v15, %v4525_v27  ;;  %v9518_v17 = vpack.c.bf16 %v4531_v62, %v4529_v46  ;;  %v9524_v26 = vpack.c.bf16 %v4543_v21, %v4541_v30  ;;  %v10257_v46 = vld [vmem:[#allocation21_spill] sm:$0xff] }
0x120b   : > { %v4604_v6 = vpack.c.bf16 %v4572_v39, %v4570_v14  ;;  %v9528_v43 = vpack.c.bf16 %v4551_v11, %v4549_v3  ;;  %v4510_v29 = vsub.f32 %v9222_v16, %v9454_v55  ;;  %v4512_v2 = vsub.f32 %v10255_v32, %v9454_v55 }
0x120c   : > { %v9539_v23 = vpop.eup %6333  ;;  %v4514_v27 = vsub.f32 %v10256_v12, %v9454_v55  ;;  %v4607_v15 = vunpack.c.h.bf16 %v9508_v7  ;;  %v4609_v4 = vunpack.c.l.bf16 %v9510_v58  ;;  %v4516_v16 = vsub.f32 %v10257_v46, %v9454_v55 }
0x120d   : > { %v4666_v57 = vunpack.c.l.bf16 %v4604_v6  ;;  %v4668_v30 = vunpack.c.h.bf16 %v4604_v6  ;;  %v9545_v1 = vpop.eup %6335  ;;  %v4518_v62 = vsub.f32 %v9242_v42, %v9454_v55  ;;  %v4520_v31 = vsub.f32 %v9246_v49, %v9454_v55  ;;  %v10263_v6 = vld [vmem:[#allocation30_spill] sm:$0xff] }
0x120e   : > { %v4522_v41 = vsub.f32 %v9252_v34, %v9454_v55  ;;  %v4524_v40 = vsub.f32 %v10258_v60, %v9454_v55  ;;  %v4526_v7 = vsub.f32 %v9262_v53, %v9454_v55  ;;  %v4528_v14 = vsub.f32 %v9266_v59, %v9454_v55 }
0x120f   : > { %v4530_v39 = vsub.f32 %v9272_v35, %v9454_v55  ;;  %v4791_v21 = vmul.f32 1.442695, %v4666_v57  ;;  %v4532_v42 = vsub.f32 %v9276_v52, %v9454_v55  ;;  %v4534_v49 = vsub.f32 %v9282_v25, %v9454_v55  ;;  %v10264_v57 = vld [vmem:[#allocation25_spill] sm:$0xff] }
0x1210   : > { %v4574_v34 = vpack.c.bf16 %v4512_v2, %v4510_v29  ;;  %v4795_v13 = vmul.f32 1.442695, %v4668_v30  ;;  %v4536_v56 = vsub.f32 %v9286_v28, %v9454_v55  ;;  %v4538_v53 = vsub.f32 %v9292_v45, %v9454_v55 }
0x1211   : > { %v4540_v59 = vsub.f32 %v9296_v10, %v9454_v55  ;;  %v4542_v35 = vsub.f32 %v9300_v50, %v9454_v55  ;;  %v4544_v52 = vsub.f32 %v9304_v48, %v9454_v55  ;;  %v4546_v25 = vsub.f32 %v9308_v9, %v9454_v55  ;;  %v10259_v48 = vld [vmem:[#allocation27_spill] sm:$0xff] }
0x1212   : > { %v4548_v3 = vsub.f32 %v9312_v8, %v9454_v55  ;;  %v4550_v28 = vsub.f32 %v9316_v47, %v9454_v55  ;;  %v4552_v45 = vsub.f32 %v9320_v18, %v9454_v55  ;;  %v4554_v10 = vsub.f32 %v9324_v0, %v9454_v55  ;;  %v10260_v8 = vld [vmem:[#allocation29_spill] sm:$0xff] }
0x1213   : > { %v4556_v50 = vsub.f32 %v9330_v63, %v9454_v55  ;;  %6337 = vpow2.f32 %v4791_v21  ;;  %v4558_v11 = vsub.f32 %v10259_v48, %v9454_v55  ;;  %v9591_v9 = vpack.c.bf16 %v4516_v16, %v4514_v27 }
0x1214   : > { %v4606_v22 = vunpack.c.l.bf16 %v4574_v34  ;;  %6339 = vpow2.f32 %v4795_v13  ;;  %v4560_v47 = vsub.f32 %v10260_v8, %v9454_v55  ;;  %v4562_v18 = vsub.f32 %v10261_v38, %v9454_v55 }
0x1215   : > { %v4564_v0 = vsub.f32 %v10262_v61, %v9454_v55  ;;  %v4566_v63 = vsub.f32 %v10263_v6, %v9454_v55  ;;  %v4568_v29 = vsub.f32 %v10264_v57, %v9454_v55  ;;  %v9603_v32 = vpack.c.bf16 %v4520_v31, %v4518_v62 }
0x1216   : > { %v4608_v2 = vunpack.c.h.bf16 %v4574_v34  ;;  %v9605_v30 = vpack.c.bf16 %v4524_v40, %v4522_v41  ;;  %v9607_v12 = vpack.c.bf16 %v4528_v14, %v4526_v7  ;;  %v9609_v27 = vpack.c.bf16 %v4532_v42, %v4530_v39 }
0x1217   : > { %v4669_v46 = vmul.f32 1.442695, %v4605_v20  ;;  %v9611_v16 = vpack.c.bf16 %v4536_v56, %v4534_v49  ;;  %v9613_v60 = vpack.c.bf16 %v4540_v59, %v4538_v53  ;;  %v4610_v21 = vunpack.c.l.bf16 %v9591_v9 }
0x1218   : > { %v4671_v13 = vmul.f32 1.442695, %v4606_v22  ;;  %v9616_v48 = vpack.c.bf16 %v4544_v52, %v4542_v35  ;;  %v9618_v55 = vpack.c.bf16 %v4548_v3, %v4546_v25  ;;  %v4633_v62 = vunpack.c.l.bf16 %v9522_v33 }
0x1219   : > { %v4673_v31 = vmul.f32 1.442695, %v4607_v15  ;;  %v9621_v41 = vpop.eup %6337  ;;  %v9623_v40 = vpack.c.bf16 %v4552_v45, %v4550_v28  ;;  %v9625_v7 = vpack.c.bf16 %v4556_v50, %v4554_v10  ;;  %v4611_v20 = vunpack.c.h.bf16 %v9510_v58 }
0x121a   : > { %v4675_v14 = vmul.f32 1.442695, %v4608_v2  ;;  %v9628_v39 = vpop.eup %6339  ;;  %v9630_v42 = vpack.c.bf16 %v4560_v47, %v4558_v11  ;;  %v4635_v49 = vunpack.c.h.bf16 %v9522_v33  ;;  %6341 = vpow2.f32 %v4669_v46 }
0x121b   : > { %v4677_v34 = vmul.f32 1.442695, %v4609_v4  ;;  %v9633_v56 = vpack.c.bf16 %v4564_v0, %v4562_v18  ;;  %v4629_v15 = vunpack.c.l.bf16 %v9520_v5  ;;  %6343 = vpow2.f32 %v4671_v13 }
0x121c   : > { %v4679_v53 = vmul.f32 1.442695, %v4610_v21  ;;  %v9636_v59 = vpack.c.bf16 %v4568_v29, %v4566_v63  ;;  %v4631_v35 = vunpack.c.h.bf16 %v9520_v5  ;;  %6345 = vpow2.f32 %v4673_v31 }
0x121d   : > { %v4725_v58 = vmul.f32 1.442695, %v4633_v62  ;;  %v4612_v52 = vunpack.c.h.bf16 %v9591_v9  ;;  %v4613_v25 = vunpack.c.l.bf16 %v9512_v51  ;;  %6347 = vpow2.f32 %v4675_v14 }
0x121e   : > { %v4681_v33 = vmul.f32 1.442695, %v4611_v20  ;;  %v4614_v4 = vunpack.c.l.bf16 %v9603_v32  ;;  %v4615_v3 = vunpack.c.h.bf16 %v9512_v51  ;;  %6349 = vpow2.f32 %v4677_v34 }
0x121f   : > { %v4729_v28 = vmul.f32 1.442695, %v4635_v49  ;;  %v4625_v45 = vunpack.c.l.bf16 %v9518_v17  ;;  %6351 = vpow2.f32 %v4679_v53  ;;  %v4717_v10 = vmul.f32 1.442695, %v4629_v15 }
0x1220   : > { %v9646_v5 = vpack.c.bf16 %v9545_v1, %v9539_v23  ;;  %v9648_v50 = vpop.eup %6341  ;;  %v4616_v11 = vunpack.c.h.bf16 %v9603_v32  ;;  %v4627_v9 = vunpack.c.h.bf16 %v9518_v17  ;;  %v4721_v22 = vmul.f32 1.442695, %v4631_v35 }
0x1221   : > { %6353 = vpow2.f32 %v4725_v58  ;;  %v9652_v8 = vpop.eup %6343  ;;  %v4617_v51 = vunpack.c.l.bf16 %v9514_v44  ;;  %v4618_v47 = vunpack.c.l.bf16 %v9605_v30  ;;  %v4685_v38 = vmul.f32 1.442695, %v4613_v25 }
0x1222   : > { %6355 = vpow2.f32 %v4681_v33  ;;  %4981 = vmatpush.bf16.msra.mxu3 %v9646_v5  ;;  %v6346_v23 = vpop.eup %6345  ;;  %v4619_v1 = vunpack.c.h.bf16 %v9514_v44  ;;  %v4620_v18 = vunpack.c.h.bf16 %v9605_v30  ;;  %v4689_v61 = vmul.f32 1.442695, %v4615_v3 }
0x1223   : > { %6357 = vpow2.f32 %v4729_v28  ;;  %v9659_v17 = vpop.eup %6347  ;;  %v4621_v0 = vunpack.c.l.bf16 %v9516_v54  ;;  %v4622_v6 = vunpack.c.l.bf16 %v9607_v12  ;;  %v4709_v63 = vmul.f32 1.442695, %v4625_v45 }
0x1224   : > { %6359 = vpow2.f32 %v4717_v10  ;;  %v6350_v57 = vpop.eup %6349  ;;  %v4623_v29 = vunpack.c.h.bf16 %v9516_v54  ;;  %v4624_v32 = vunpack.c.h.bf16 %v9607_v12  ;;  %v4713_v2 = vmul.f32 1.442695, %v4627_v9 }
0x1225   : > { %6361 = vpow2.f32 %v4721_v22  ;;  %v9665_v44 = vpop.eup %6351  ;;  %v4626_v30 = vunpack.c.l.bf16 %v9609_v27  ;;  %v4628_v46 = vunpack.c.h.bf16 %v9609_v27  ;;  %v4693_v21 = vmul.f32 1.442695, %v4617_v51 }
0x1226   : > { %6363 = vpow2.f32 %v4685_v38  ;;  %v4630_v62 = vunpack.c.l.bf16 %v9611_v16  ;;  %v4632_v31 = vunpack.c.h.bf16 %v9611_v16  ;;  %v4697_v20 = vmul.f32 1.442695, %v4619_v1 }
0x1227   : > { %v6354_v13 = vpop.eup %6353  ;;  %6365 = vpow2.f32 %v4689_v61  ;;  %v4634_v12 = vunpack.c.l.bf16 %v9613_v60  ;;  %v4636_v14 = vunpack.c.h.bf16 %v9613_v60  ;;  %v4701_v49 = vmul.f32 1.442695, %v4621_v0 }
0x1228   : > { %v6356_v54 = vpop.eup %6355  ;;  %6367 = vpow2.f32 %v4709_v63  ;;  %v4637_v15 = vunpack.c.l.bf16 %v9524_v26  ;;  %v4638_v27 = vunpack.c.l.bf16 %v9616_v48  ;;  %v4705_v53 = vmul.f32 1.442695, %v4623_v29 }
0x1229   : > { %v6358_v34 = vpop.eup %6357  ;;  %6369 = vpow2.f32 %v4713_v2  ;;  %v4639_v58 = vunpack.c.h.bf16 %v9524_v26  ;;  %v4683_v25 = vmul.f32 1.442695, %v4612_v52  ;;  %v4640_v28 = vunpack.c.h.bf16 %v9616_v48 }
0x122a   : > { %v6360_v35 = vpop.eup %6359  ;;  %6371 = vpow2.f32 %v4693_v21  ;;  %v9676_v33 = vpack.c.bf16 %v6358_v34, %v6354_v13  ;;  %v4641_v45 = vunpack.c.l.bf16 %v9526_v19  ;;  %v4687_v10 = vmul.f32 1.442695, %v4614_v4 }
0x122b   : > { %v6362_v3 = vpop.eup %6361  ;;  %6373 = vpow2.f32 %v4697_v20  ;;  %v4642_v22 = vunpack.c.l.bf16 %v9618_v55  ;;  %v4643_v51 = vunpack.c.h.bf16 %v9526_v19  ;;  %v4691_v38 = vmul.f32 1.442695, %v4616_v11 }
0x122c   : > { %v6364_v9 = vpop.eup %6363  ;;  %6375 = vpow2.f32 %v4701_v49  ;;  %4967 = vmatpush.bf16.msra.mxu1 %v9676_v33  ;;  %v4695_v1 = vmul.f32 1.442695, %v4618_v47  ;;  %v9683_v61 = vpack.c.bf16 %v6356_v54, %v6350_v57  ;;  %v9686_v0 = vpack.c.bf16 %v6346_v23, %v9648_v50 }
0x122d   : > { %v6366_v52 = vpop.eup %6365  ;;  %6377 = vpow2.f32 %v4705_v53  ;;  %v4644_v4 = vunpack.c.h.bf16 %v9618_v55  ;;  %v4699_v29 = vmul.f32 1.442695, %v4620_v18  ;;  %v9689_v2 = vpack.c.bf16 %v6362_v3, %v6360_v35 }
0x122e   : > { %v6368_v63 = vpop.eup %6367  ;;  %6379 = vpow2.f32 %v4683_v25  ;;  %v4703_v11 = vmul.f32 1.442695, %v4622_v6  ;;  %v4829_v13 = vunpack.c.l.bf16 %v9686_v0  ;;  %v4831_v47 = vunpack.c.h.bf16 %v9686_v0 }
0x122f   : > { %v6370_v21 = vpop.eup %6369  ;;  %6381 = vpow2.f32 %v4687_v10  ;;  %v4645_v57 = vunpack.c.l.bf16 %v9528_v43  ;;  %v4707_v50 = vmul.f32 1.442695, %v4624_v32  ;;  %v4711_v23 = vmul.f32 1.442695, %v4626_v30 }
0x1230   : > { %v6372_v20 = vpop.eup %6371  ;;  %6383 = vpow2.f32 %v4691_v38  ;;  %4968 = vmatpush.bf16.msra.mxu1 %v9689_v2  ;;  %v9695_v18 = vpack.c.bf16 %v6366_v52, %v6364_v9  ;;  %v4833_v49 = vunpack.c.l.bf16 %v9683_v61  ;;  %v4893_v34 = vadd.f32 %v4831_v47, %v4829_v13  ;;  %v10265_v9 = vld [vmem:[#allocation8_spill] sm:$0xff] }
0x1231   : > { %v6374_v54 = vpop.eup %6373  ;;  %6385 = vpow2.f32 %v4695_v1  ;;  %v4646_v53 = vunpack.c.l.bf16 %v9623_v40  ;;  %v4715_v35 = vmul.f32 1.442695, %v4628_v46  ;;  %v9699_v25 = vpack.c.bf16 %v6370_v21, %v6368_v63 }
0x1232   : > { %v6376_v6 = vpop.eup %6375  ;;  %6387 = vpow2.f32 %v4699_v29  ;;  %v4719_v32 = vmul.f32 1.442695, %v4630_v62  ;;  %v4835_v30 = vunpack.c.h.bf16 %v9683_v61  ;;  %v4894_v10 = vadd.f32 %v4893_v34, %v4833_v49 }
0x1233   : > { %v6378_v3 = vpop.eup %6377  ;;  %6389 = vpow2.f32 %v4703_v11  ;;  %v4661_v52 = vunpack.c.l.bf16 %v10265_v9  ;;  %v4723_v1 = vmul.f32 1.442695, %v4632_v31  ;;  %v4727_v29 = vmul.f32 1.442695, %v4634_v12 }
0x1234   : > { %v9702_v38 = vpop.eup %6379  ;;  %6391 = vpow2.f32 %v4707_v50  ;;  %4969 = vmatpush.bf16.msra.mxu1 %v9699_v25  ;;  %v4803_v62 = vpack.c.bf16 %v6374_v54, %v6372_v20  ;;  %v4837_v63 = vunpack.c.l.bf16 %v9695_v18  ;;  %v4895_v21 = vadd.f32 %v4894_v10, %v4835_v30  ;;  %v10266_v54 = vld [vmem:[#allocation32_spill] sm:$0xff] }
0x1235   : > { %v9710_v46 = vpop.eup %6381  ;;  %6393 = vpow2.f32 %v4711_v23  ;;  %v4663_v13 = vunpack.c.h.bf16 %v10265_v9  ;;  %v4731_v16 = vmul.f32 1.442695, %v4636_v14  ;;  %v4805_v31 = vpack.c.bf16 %v6378_v3, %v6376_v6 }
0x1236   : > { %v9713_v11 = vpop.eup %6383  ;;  %6395 = vpow2.f32 %v4715_v35  ;;  %v4733_v12 = vmul.f32 1.442695, %v4637_v15  ;;  %v4839_v20 = vunpack.c.h.bf16 %v9695_v18  ;;  %v4896_v50 = vadd.f32 %v4895_v21, %v4837_v63 }
0x1237   : > { %v9718_v47 = vpop.eup %6385  ;;  %6397 = vpow2.f32 %v4719_v32  ;;  %v4657_v49 = vunpack.c.l.bf16 %v10266_v54  ;;  %v4659_v34 = vunpack.c.h.bf16 %v10266_v54  ;;  %v4737_v60 = vmul.f32 1.442695, %v4639_v58 }
0x1238   : > { %v9723_v23 = vpop.eup %6387  ;;  %6399 = vpow2.f32 %v4723_v1  ;;  %4970 = vmatpush.bf16.msra.mxu1 %v4805_v31  ;;  %v4781_v6 = vmul.f32 1.442695, %v4661_v52  ;;  %v4841_v35 = vunpack.c.l.bf16 %v4803_v62  ;;  %v4897_v15 = vadd.f32 %v4896_v50, %v4839_v20 }
0x1239   : > { %v9729_v14 = vpop.eup %6389  ;;  %6401 = vpow2.f32 %v4727_v29  ;;  %v4647_v32 = vunpack.c.h.bf16 %v9528_v43  ;;  %v4648_v30 = vunpack.c.h.bf16 %v9623_v40  ;;  %v4741_v10 = vmul.f32 1.442695, %v4641_v45 }
0x123a   : > { %v9731_v3 = vpop.eup %6391  ;;  %6403 = vpow2.f32 %v4731_v16  ;;  %v4785_v26 = vmul.f32 1.442695, %v4663_v13  ;;  %v4843_v58 = vunpack.c.h.bf16 %v4803_v62  ;;  %v4898_v1 = vadd.f32 %v4897_v15, %v4841_v35 }
0x123b   : > { %v9737_v9 = vpop.eup %6393  ;;  %6405 = vpow2.f32 %v4733_v12  ;;  %v4653_v52 = vunpack.c.l.bf16 %v9532_v37  ;;  %v4655_v63 = vunpack.c.h.bf16 %v9532_v37  ;;  %v4773_v21 = vmul.f32 1.442695, %v4657_v49 }
0x123c   : > { %v9739_v29 = vpop.eup %6395  ;;  %6407 = vpow2.f32 %v4737_v60  ;;  %4971 = vmatpush.bf16.msra.mxu1 %v4803_v62  ;;  %v4777_v16 = vmul.f32 1.442695, %v4659_v34  ;;  %v4845_v45 = vunpack.c.l.bf16 %v4805_v31  ;;  %v4899_v50 = vadd.f32 %v4898_v1, %v4843_v58 }
0x123d   : > { %v9743_v20 = vpop.eup %6397  ;;  %6409 = vpow2.f32 %v4781_v6  ;;  %v4649_v13 = vunpack.c.l.bf16 %v9530_v36  ;;  %v4651_v12 = vunpack.c.h.bf16 %v9530_v36  ;;  %v4745_v35 = vmul.f32 1.442695, %v4643_v51 }
0x123e   : > { %v9745_v54 = vpop.eup %6399  ;;  %6411 = vpow2.f32 %v4741_v10  ;;  %v4749_v62 = vmul.f32 1.442695, %v4645_v57  ;;  %v4847_v49 = vunpack.c.h.bf16 %v4805_v31  ;;  %v4900_v34 = vadd.f32 %v4899_v50, %v4845_v45 }
0x123f   : > { %v6402_v37 = vpop.eup %6401  ;;  %6413 = vpow2.f32 %v4785_v26  ;;  %v4765_v6 = vmul.f32 1.442695, %v4653_v52  ;;  %v4769_v15 = vmul.f32 1.442695, %v4655_v63  ;;  %v4849_v58 = vunpack.c.l.bf16 %v9699_v25 }
0x1240   : > { %v6404_v60 = vpop.eup %6403  ;;  %6415 = vpow2.f32 %v4773_v21  ;;  %4972 = vmatpush.bf16.msra.mxu1 %v9695_v18  ;;  %v4901_v10 = vadd.f32 %v4900_v34, %v4847_v49  ;;  %v9757_v19 = vpack.c.bf16 %v9702_v38, %v9665_v44  ;;  %v9761_v43 = vpack.c.bf16 %v9659_v17, %v9652_v8 }
0x1241   : > { %v6406_v36 = vpop.eup %6405  ;;  %6417 = vpow2.f32 %v4777_v16  ;;  %v4753_v57 = vmul.f32 1.442695, %v4647_v32  ;;  %v4757_v31 = vmul.f32 1.442695, %v4649_v13  ;;  %v4851_v26 = vunpack.c.h.bf16 %v9699_v25 }
0x1242   : > { %v6408_v51 = vpop.eup %6407  ;;  %6419 = vpow2.f32 %v4745_v35  ;;  %v4902_v18 = vadd.f32 %v4901_v10, %v4849_v58  ;;  %v4830_v52 = vunpack.c.l.bf16 %v9761_v43  ;;  %v4832_v63 = vunpack.c.h.bf16 %v9761_v43 }
0x1243   : > { %v6410_v1 = vpop.eup %6409  ;;  %6421 = vpow2.f32 %v4749_v62  ;;  %v4761_v44 = vmul.f32 1.442695, %v4651_v12  ;;  %v4853_v38 = vunpack.c.l.bf16 %v9689_v2  ;;  %v9770_v8 = vpack.c.bf16 %v9713_v11, %v9710_v46 }
0x1244   : > { %v6412_v21 = vpop.eup %6411  ;;  %6423 = vpow2.f32 %v4765_v6  ;;  %4973 = vmatpush.bf16.msra.mxu1 %v9683_v61  ;;  %v4903_v25 = vadd.f32 %v4902_v18, %v4851_v26  ;;  %v4834_v32 = vunpack.c.l.bf16 %v9757_v19  ;;  %v4930_v16 = vadd.f32 %v4832_v63, %v4830_v52 }
0x1245   : > { %v6414_v17 = vpop.eup %6413  ;;  %6425 = vpow2.f32 %v4769_v15  ;;  %v4855_v50 = vunpack.c.h.bf16 %v9689_v2  ;;  %v9776_v12 = vpack.c.bf16 %v6404_v60, %v6402_v37  ;;  %v4836_v46 = vunpack.c.h.bf16 %v9757_v19 }
0x1246   : > { %v6416_v45 = vpop.eup %6415  ;;  %6427 = vpow2.f32 %v4753_v57  ;;  %v9774_v13 = vpack.c.bf16 %v6414_v17, %v6410_v1  ;;  %v4904_v61 = vadd.f32 %v4903_v25, %v4853_v38  ;;  %v4931_v11 = vadd.f32 %v4930_v16, %v4834_v32 }
0x1247   : > { %v6418_v35 = vpop.eup %6417  ;;  %6429 = vpow2.f32 %v4757_v31  ;;  %v4735_v49 = vmul.f32 1.442695, %v4638_v27  ;;  %v4857_v34 = vunpack.c.l.bf16 %v9676_v33  ;;  %v9784_v2 = vpack.c.bf16 %v6408_v51, %v6406_v36 }
0x1248   : > { %v6420_v62 = vpop.eup %6419  ;;  %6431 = vpow2.f32 %v4761_v44  ;;  %4982 = vmatpush.bf16.msra.mxu3 %v9774_v13  ;;  %4974 = vmatpush.bf16.msra.mxu1 %v9686_v0  ;;  %v4905_v60 = vadd.f32 %v4904_v61, %v4855_v50  ;;  %v9789_v6 = vpack.c.bf16 %v9723_v23, %v9718_v47  ;;  %v4838_v15 = vunpack.c.l.bf16 %v9770_v8 }
0x1249   : > { %v6422_v37 = vpop.eup %6421  ;;  %v4932_v27 = vadd.f32 %v4931_v11, %v4836_v46  ;;  %v4650_v10 = vunpack.c.l.bf16 %v9625_v7  ;;  %v4739_v57 = vmul.f32 1.442695, %v4640_v28  ;;  %v4859_v0 = vunpack.c.h.bf16 %v9676_v33 }
0x124a   : > { %v6424_v58 = vpop.eup %6423  ;;  %v9796_v36 = vpack.c.bf16 %v6418_v35, %v6416_v45  ;;  %v4906_v31 = vadd.f32 %v4905_v60, %v4857_v34  ;;  %v9801_v47 = vpack.c.bf16 %v9745_v54, %v9743_v20  ;;  %v4840_v23 = vunpack.c.h.bf16 %v9770_v8 }
0x124b   : > { %v6426_v51 = vpop.eup %6425  ;;  %4975 = vmatmul.bf16.vlgmr.msra.gmra.mxu1 %v9506_v24  ;;  %v4933_v26 = vadd.f32 %v4932_v27, %v4838_v15  ;;  %6433 = vpow2.f32 %v4735_v49  ;;  %v4743_v48 = vmul.f32 1.442695, %v4642_v22  ;;  %v9807_v33 = vpack.c.bf16 %v6420_v62, %v6412_v21 }
0x124c   : > { %4995 = vmatpush.bf16.msrb.mxu1 %v9776_v12  ;;  %v6428_v1 = vpop.eup %6427  ;;  %4983 = vmatpush.bf16.msra.mxu3 %v9796_v36  ;;  %v4861_v28 = vunpack.c.l.bf16 %v9784_v2  ;;  %v4907_v52 = vadd.f32 %v4906_v31, %v4859_v0  ;;  %v4806_v20 = vpack.c.bf16 %v9731_v3, %v9729_v14  ;;  %v4842_v54 = vunpack.c.l.bf16 %v9789_v6 }
0x124d   : > { %v6430_v18 = vpop.eup %6429  ;;  %v4934_v63 = vadd.f32 %v4933_v26, %v4840_v23  ;;  %6435 = vpow2.f32 %v4739_v57  ;;  %v4747_v22 = vmul.f32 1.442695, %v4644_v4  ;;  %v9816_v38 = vpack.c.bf16 %v6426_v51, %v6424_v58 }
0x124e   : > { %v6432_v44 = vpop.eup %6431  ;;  %v4808_v21 = vpack.c.bf16 %v9739_v29, %v9737_v9  ;;  %v4863_v17 = vunpack.c.h.bf16 %v9784_v2  ;;  %v4908_v25 = vadd.f32 %v4907_v52, %v4861_v28  ;;  %v4844_v32 = vunpack.c.h.bf16 %v9789_v6 }
0x124f   : > { %v4935_v16 = vadd.f32 %v4934_v63, %v4842_v54  ;;  %v4662_v14 = vunpack.c.l.bf16 %v9636_v59  ;;  %6437 = vpow2.f32 %v4743_v48  ;;  %v4751_v3 = vmul.f32 1.442695, %v4646_v53 }
0x1250   : > { %4996 = vmatpush.bf16.msrb.mxu1 %v9801_v47  ;;  %4984 = vmatpush.bf16.msra.mxu3 %v9816_v38  ;;  %v4865_v55 = vunpack.c.l.bf16 %v9807_v33  ;;  %v4817_v4 = vpack.c.bf16 %v6428_v1, %v6422_v37  ;;  %v4909_v45 = vadd.f32 %v4908_v25, %v4863_v17  ;;  %v4846_v9 = vunpack.c.l.bf16 %v4806_v20 }
0x1251   : > { %v4936_v29 = vadd.f32 %v4935_v16, %v4844_v32  ;;  %v6434_v50 = vpop.eup %6433  ;;  %v4664_v35 = vunpack.c.h.bf16 %v9636_v59  ;;  %6439 = vpow2.f32 %v4747_v22  ;;  %v4755_v61 = vmul.f32 1.442695, %v4648_v30  ;;  %v10267_v16 = vld [vmem:[#allocation33_spill] sm:$0xff] }
0x1252   : > { %v4819_v46 = vpack.c.bf16 %v6432_v44, %v6430_v18  ;;  %v4867_v11 = vunpack.c.h.bf16 %v9807_v33  ;;  %v4910_v53 = vadd.f32 %v4909_v45, %v4865_v55  ;;  %v4848_v62 = vunpack.c.h.bf16 %v4806_v20 }
0x1253   : > { %v4937_v49 = vadd.f32 %v4936_v29, %v4846_v9  ;;  %v6436_v34 = vpop.eup %6435  ;;  %v4658_v37 = vunpack.c.l.bf16 %v9633_v56  ;;  %6441 = vpow2.f32 %v4751_v3  ;;  %v4759_v60 = vmul.f32 1.442695, %v4650_v10 }
0x1254   : > { %4997 = vmatpush.bf16.msrb.mxu1 %v4808_v21  ;;  %v4783_v15 = vmul.f32 1.442695, %v4662_v14  ;;  %4985 = vmatpush.bf16.msra.mxu3 %v4819_v46  ;;  %v4869_v27 = vunpack.c.l.bf16 %v4817_v4  ;;  %v4911_v58 = vadd.f32 %v4910_v53, %v4867_v11  ;;  %v4850_v59 = vunpack.c.l.bf16 %v4808_v21  ;;  %v10268_v14 = vld [vmem:[#allocation11_spill] sm:$0xff] }
0x1255   : > { %v4938_v57 = vadd.f32 %v4937_v49, %v4848_v62  ;;  %v6438_v40 = vpop.eup %6437  ;;  %v4652_v30 = vunpack.c.h.bf16 %v9625_v7  ;;  %v4660_v0 = vunpack.c.h.bf16 %v9633_v56  ;;  %6443 = vpow2.f32 %v4755_v61 }
0x1256   : > { %v4787_v51 = vmul.f32 1.442695, %v4664_v35  ;;  %v4871_v31 = vunpack.c.h.bf16 %v4817_v4  ;;  %v4912_v23 = vadd.f32 %v4911_v58, %v4869_v27  ;;  %v4852_v26 = vunpack.c.h.bf16 %v4808_v21 }
0x1257   : > { %v4939_v1 = vadd.f32 %v4938_v57, %v4850_v59  ;;  %v6440_v48 = vpop.eup %6439  ;;  %v4654_v10 = vunpack.c.l.bf16 %v9630_v42  ;;  %6445 = vpow2.f32 %v4759_v60  ;;  %v4775_v28 = vmul.f32 1.442695, %v4658_v37 }
0x1258   : > { %4998 = vmatpush.bf16.msrb.mxu1 %v4806_v20  ;;  %4986 = vmatpush.bf16.msra.mxu3 %v4817_v4  ;;  %v4854_v18 = vunpack.c.l.bf16 %v9801_v47  ;;  %6447 = vpow2.f32 %v4783_v15  ;;  %v4873_v52 = vunpack.c.l.bf16 %v4819_v46  ;;  %v4913_v20 = vadd.f32 %v4912_v23, %v4871_v31 }
0x1259   : > { %v4940_v7 = vadd.f32 %v4939_v1, %v4852_v26  ;;  %v6442_v56 = vpop.eup %6441  ;;  %v4656_v54 = vunpack.c.h.bf16 %v9630_v42  ;;  %v4763_v63 = vmul.f32 1.442695, %v4652_v30  ;;  %v4779_v44 = vmul.f32 1.442695, %v4660_v0 }
0x125a   : > { %6449 = vpow2.f32 %v4787_v51  ;;  %v4875_v22 = vunpack.c.h.bf16 %v4819_v46  ;;  %v4914_v21 = vadd.f32 %v4913_v20, %v4873_v52  ;;  %v4856_v17 = vunpack.c.h.bf16 %v9801_v47 }
0x125b   : > { %v4941_v25 = vadd.f32 %v4940_v7, %v4854_v18  ;;  %v6444_v32 = vpop.eup %6443  ;;  %v4175_v3 = vadd.f32 %v10268_v14, %v10267_v16  ;;  %v4767_v55 = vmul.f32 1.442695, %v4654_v10  ;;  %6451 = vpow2.f32 %v4775_v28 }
0x125c   : > { %4999 = vmatpush.bf16.msrb.mxu1 %v9789_v6  ;;  %4987 = vmatpush.bf16.msra.mxu3 %v9807_v33  ;;  %v4858_v6 = vunpack.c.l.bf16 %v9776_v12  ;;  %v4877_v42 = vunpack.c.l.bf16 %v9816_v38  ;;  %v4915_v4 = vadd.f32 %v4914_v21, %v4875_v22  ;;  %v9845_v45 = vpack.c.bf16 %v6436_v34, %v6434_v50 }
0x125d   : > { %v4942_v9 = vadd.f32 %v4941_v25, %v4856_v17  ;;  %v6446_v47 = vpop.eup %6445  ;;  %v4771_v29 = vmul.f32 1.442695, %v4656_v54  ;;  %6453 = vpow2.f32 %v4779_v44  ;;  %v4860_v35 = vunpack.c.h.bf16 %v9776_v12 }
0x125e   : > { %v9850_v61 = vpack.c.bf16 %v9628_v39, %v9621_v41  ;;  %v6448_v33 = vpop.eup %6447  ;;  %6455 = vpow2.f32 %v4763_v63  ;;  %v4879_v46 = vunpack.c.h.bf16 %v9816_v38  ;;  %v4916_v11 = vadd.f32 %v4915_v4, %v4877_v42 }
0x125f   : > { %v4943_v53 = vadd.f32 %v4942_v9, %v4858_v6  ;;  %6457 = vpow2.f32 %v4767_v55  ;;  %v4816_v49 = vpack.c.bf16 %v6440_v48, %v6438_v40  ;;  %v4881_v12 = vunpack.c.l.bf16 %v9796_v36 }
0x1260   : > { %5000 = vmatpush.bf16.msrb.mxu1 %v9770_v8  ;;  %v6450_v62 = vpop.eup %6449  ;;  %v10269_v8 = vld [vmem:[#allocation19_spill] sm:$0xff]  ;;  %4988 = vmatpush.bf16.msra.mxu3 %v9784_v2  ;;  %v4917_v34 = vadd.f32 %v4916_v11, %v4879_v46  ;;  %v4862_v41 = vunpack.c.l.bf16 %v9845_v45  ;;  %6459 = vpow2.f32 %v4771_v29  ;;  %v4883_v37 = vunpack.c.h.bf16 %v9796_v36 }
0x1261   : > { %v9854_v50 = vpack.c.bf16 %v10269_v8, %v4175_v3  ;;  %v4944_v39 = vadd.f32 %v4943_v53, %v4860_v35  ;;  %v6452_v38 = vpop.eup %6451  ;;  %v4826_v60 = vpack.c.bf16 %v6450_v62, %v6448_v33  ;;  %v4864_v2 = vunpack.c.h.bf16 %v9845_v45 }
0x1262   : > { %v4918_v27 = vadd.f32 %v4917_v34, %v4881_v12  ;;  %v4818_v59 = vpack.c.bf16 %v6444_v32, %v6442_v56  ;;  %v4885_v40 = vunpack.c.l.bf16 %v9774_v13  ;;  %v4868_v36 = vunpack.c.h.bf16 %v4816_v49 }
0x1263   : > { %4989 = vmatmul.bf16.vlgmr.msra.gmra.mxu3 %v9854_v50  ;;  %v4945_v15 = vadd.f32 %v4944_v39, %v4862_v41  ;;  %v6454_v58 = vpop.eup %6453  ;;  %v4887_v31 = vunpack.c.h.bf16 %v9774_v13  ;;  %v4889_v10 = vunpack.c.l.bf16 %v9646_v5  ;;  %v4886_v6 = vunpack.c.l.bf16 %v4826_v60 }
0x1264   : > { %5009 = vmatpush.bf16.msrb.mxu3 %v9850_v61  ;;  %5001 = vmatpush.bf16.msrb.mxu1 %v9757_v19  ;;  %v6456_v57 = vpop.eup %6455  ;;  %v4866_v19 = vunpack.c.l.bf16 %v4816_v49  ;;  %v4919_v0 = vadd.f32 %v4918_v27, %v4883_v37  ;;  %v4824_v23 = vpack.c.bf16 %v6454_v58, %v6452_v38  ;;  %v4870_v18 = vunpack.c.l.bf16 %v4818_v59 }
0x1265   : > { %v4946_v30 = vadd.f32 %v4945_v15, %v4864_v2  ;;  %v6458_v51 = vpop.eup %6457  ;;  %v4820_v28 = vpack.c.bf16 %v6456_v57, %v6446_v47  ;;  %v4872_v56 = vunpack.c.h.bf16 %v4818_v59  ;;  %v4888_v4 = vunpack.c.h.bf16 %v4826_v60 }
0x1266   : > { %v4920_v1 = vadd.f32 %v4919_v0, %v4885_v40  ;;  %v6460_v48 = vpop.eup %6459  ;;  %v4882_v14 = vunpack.c.l.bf16 %v4824_v23  ;;  %v4884_v55 = vunpack.c.h.bf16 %v4824_v23  ;;  %v4890_v47 = vunpack.c.l.bf16 %v9850_v61 }
0x1267   : > { %v4947_v26 = vadd.f32 %v4946_v30, %v4866_v19  ;;  %v4822_v7 = vpack.c.bf16 %v6460_v48, %v6458_v51  ;;  %v4874_v13 = vunpack.c.l.bf16 %v4820_v28  ;;  %v4876_v21 = vunpack.c.h.bf16 %v4820_v28 }
0x1268   : > { %5010 = vmatpush.bf16.msrb.mxu3 %v4826_v60  ;;  %5002 = vmatpush.bf16.msrb.mxu1 %v9761_v43  ;;  %v4921_v20 = vadd.f32 %v4920_v1, %v4887_v31  ;;  %v4891_v43 = vunpack.c.h.bf16 %v9646_v5  ;;  %v4892_v35 = vunpack.c.h.bf16 %v9850_v61 }
0x1269   : > { %v4948_v52 = vadd.f32 %v4947_v26, %v4868_v36  ;;  %v4878_v25 = vunpack.c.l.bf16 %v4822_v7  ;;  %v4880_v32 = vunpack.c.h.bf16 %v4822_v7 }
0x126a   : > { %v4922_v63 = vadd.f32 %v4921_v20, %v4889_v10 }
0x126b   : > { %5003 = vmatmul.bf16.vlgmr.msrb.gmra.mxu1 %v9506_v24  ;;  %v4949_v54 = vadd.f32 %v4948_v52, %v4870_v18 }
0x126c   : > { %5011 = vmatpush.bf16.msrb.mxu3 %v4824_v23  ;;  %v4923_v22 = vadd.f32 %v4922_v63, %v4891_v43  ;;  %v5868_v63 = vld [vmem:[#allocation3 + $0x24] sm:$0xf] }
0x126d   : > { %v4950_v44 = vadd.f32 %v4949_v54, %v4872_v56  ;;  %v5790_v56 = vld [vmem:[#allocation3 + $0x28] sm:$0xf0]  ;;  %v5788_v54 = vld [vmem:[#allocation3 + $0x20] sm:$0xf] }
0x126e   : > { %v4924_v11 = vrot.slane %v4923_v22, 4 }
0x126f   : > { %v4951_v17 = vadd.f32 %v4950_v44, %v4874_v13  ;;  %v5793_v44 = vor.u32 %v5868_v63, %v5790_v56  ;;  %v5239_v56 = vld [vmem:[%s6636_s25 + $0x48] sm:$0xff] }
0x1270   : > { %5012 = vmatpush.bf16.msrb.mxu3 %v4822_v7  ;;  %v4925_v62 = vadd.f32 %v4924_v11, %v4923_v22  ;;  %v5869_v7 = vld [vmem:[#allocation3 + $0x24] sm:$0xf0]  ;;  %v5867_v22 = vld [vmem:[#allocation3 + $0x14] sm:$0xf0] }
0x1271   : > { %v4952_v24 = vadd.f32 %v4951_v17, %v4876_v21  ;;  %v5789_v13 = vor.u32 %v5869_v7, %v5788_v54  ;;  %v5782_v21 = vld [vmem:[#allocation3 + $0x18] sm:$0xf0]  ;;  %v5780_v17 = vld [vmem:[#allocation3 + $0x10] sm:$0xf] }
0x1272   : > { %v4926_v12 = vrot.slane %v4925_v62, 2 }
0x1273   : > { %v4953_v16 = vadd.f32 %v4952_v24, %v4878_v25  ;;  %v5866_v25 = vld [vmem:[#allocation3 + $0x14] sm:$0xf]  ;;  %v5781_v24 = vor.u32 %v5867_v22, %v5780_v17 }
0x1274   : > { %5013 = vmatpush.bf16.msrb.mxu3 %v4820_v28  ;;  %v4927_v39 = vadd.f32 %v4926_v12, %v4925_v62  ;;  %v5231_v12 = vld [vmem:[%s6636_s25 + $0x8] sm:$0xff] }
0x1275   : > { %v4954_v3 = vadd.f32 %v4953_v16, %v4880_v32  ;;  %v5785_v32 = vor.u32 %v5866_v25, %v5782_v21  ;;  %v5865_v16 = vld [vmem:[#allocation3 + $0x4] sm:$0xf0] }
0x1276   : > { %v4928_v37 = vrot.slane %v4927_v39, 1 }
0x1277   : > { %v4955_v5 = vadd.f32 %v4954_v3, %v4882_v14  ;;  %v5774_v14 = vld [vmem:[#allocation3 + $0x8] sm:$0xf0]  ;;  %v5772_v3 = vld [vmem:[#allocation3] sm:$0xf] }
0x1278   : > { %5014 = vmatpush.bf16.msrb.mxu3 %v4818_v59  ;;  %v4929_v2 = vadd.f32 %v4928_v37, %v4927_v39 }
0x1279   : > { %v4956_v42 = vadd.f32 %v4955_v5, %v4884_v55  ;;  %v5864_v55 = vld [vmem:[#allocation3 + $0x4] sm:$0xf]  ;;  %v5773_v5 = vor.u32 %v5865_v16, %v5772_v3 }
0x127a   : > { %6461 = vrcp.f32 %v4929_v2 }
0x127b   : > { %v4957_v9 = vadd.f32 %v4956_v42, %v4886_v6  ;;  %v5777_v6 = vor.u32 %v5864_v55, %v5774_v14  ;;  %v5860_v42 = vld [vmem:[%s9972_s7] sm:$0xff] }
0x127c   : > { %5015 = vmatpush.bf16.msrb.mxu3 %v4816_v49  ;;  %v5242_v14 = vld [vmem:[%s6636_s25 + $0x60] sm:$0xff] }
0x127d   : > { %v4958_v29 = vadd.f32 %v4957_v9, %v4888_v4  ;;  %v5861_v4 = vld [vmem:[%s9972_s7 + $0x8] sm:$0xff]  ;;  %v5862_v9 = vld [vmem:[%s9972_s7 + $0x10] sm:$0xff] }
0x127f   : > { %v4959_v33 = vadd.f32 %v4958_v29, %v4890_v47  ;;  %v5863_v47 = vld [vmem:[%s9972_s7 + $0x18] sm:$0xff]  ;;  %v5063_v29 = vpop.permute.xlu0 %5062 }
0x1280   : > { %5016 = vmatpush.bf16.msrb.mxu3 %v9845_v45  ;;  %v6462_v59 = vpop.eup %6461 }
0x1281   : > { %v4960_v46 = vadd.f32 %v4959_v33, %v4892_v35 }
0x1283   : > { %5017 = vmatmul.bf16.vlgmr.msrb.gmra.mxu3 %v9854_v50  ;;  %v4961_v53 = vrot.slane %v4960_v46, 4 }
0x1285   : > { %v4962_v8 = vadd.f32 %v4961_v53, %v4960_v46  ;;  %v5230_v46 = vld [vmem:[%s6636_s25] sm:$0xff] }
0x1287   : > { %v4963_v34 = vrot.slane %v4962_v8, 2  ;;  %v5068_v35 = vpop.permute.xlu0 %5067 }
0x1289   : > { %v4964_v38 = vadd.f32 %v4963_v34, %v4962_v8 }
0x128b   : > { %v4965_v60 = vrot.slane %v4964_v38, 1 }
0x128d   : > { %v4966_v61 = vadd.f32 %v4965_v60, %v4964_v38 }
0x128f   : > { %6463 = vrcp.f32 %v4966_v61  ;;  %v5073_v62 = vpop.permute.xlu0 %5072 }
0x1295   : > { %v6464_v40 = vpop.eup %6463 }
0x12c8   : > { %v4976_v49 = vpop.f32.mrf.mxu1 }
0x12d0   : > { %v4978_v45 = vpop.f32.mrf.mxu1 }
0x12e6   : > { %v4990_v41 = vpop.f32.mrf.mxu3 }
0x12e7   : > { %v4991_v27 = vadd.f32 %v4990_v41, %v4976_v49  ;;  %v5232_v41 = vld [vmem:[%s6636_s25 + $0x10] sm:$0xff] }
0x12e8   : > { %v5004_v50 = vpop.f32.mrf.mxu1 }
0x12e9   : > { %v5025_v19 = vmul.f32 %v6462_v59, %v4991_v27 }
0x12ee   : > { %v4992_v15 = vpop.f32.mrf.mxu3 }
0x12ef   : > { %v4993_v51 = vadd.f32 %v4992_v15, %v4978_v45  ;;  %v5233_v45 = vld [vmem:[%s6636_s25 + $0x18] sm:$0xff]  ;;  %v5078_v15 = vpop.permute.xlu0 %5077 }
0x12f0   : > { %v5006_v36 = vpop.f32.mrf.mxu1 }
0x12f1   : > { %v5027_v26 = vmul.f32 %v6462_v59, %v4993_v51 }
0x1306   : > { %v5018_v58 = vpop.f32.mrf.mxu3 }
0x1307   : > { %v5019_v57 = vadd.f32 %v5018_v58, %v5004_v50  ;;  %v5234_v50 = vld [vmem:[%s6636_s25 + $0x20] sm:$0xff] }
0x1309   : > { %v5026_v30 = vmul.f32 %v6464_v40, %v5019_v57 }
0x130b   : > { %v5029_v0 = vpack.c.bf16 %v5026_v30, %v5025_v19 }
0x130d   : > { %5034 = vst [vmem:[#allocation3 + $0x30] sm:$0xff] %v5029_v0  ;;  %v5236_v0 = vld [vmem:[%s6636_s25 + $0x30] sm:$0xff] }
0x130e   : > { %v5020_v31 = vpop.f32.mrf.mxu3 }
0x130f   : > { %v5021_v23 = vadd.f32 %v5020_v31, %v5006_v36  ;;  %v5083_v31 = vpop.permute.xlu0 %5082 }
0x1311   : > { %v5028_v1 = vmul.f32 %v6464_v40, %v5021_v23  ;;  %v5235_v40 = vld [vmem:[%s6636_s25 + $0x28] sm:$0xff] }
0x1313   : > { %v5030_v48 = vpack.c.bf16 %v5028_v1, %v5027_v26  ;;  %v5237_v1 = vld [vmem:[%s6636_s25 + $0x38] sm:$0xff] }
0x1314   : > { %v5796_v10 = vld [vmem:[#allocation3 + $0x30] sm:$0xf]  ;;  %v5870_v18 = vld [vmem:[#allocation3 + $0x34] sm:$0xf] }
0x1315   : > { %5035 = vst [vmem:[#allocation3 + $0x38] sm:$0xff] %v5030_v48 }
0x131c   : > { %v5871_v28 = vld [vmem:[#allocation3 + $0x34] sm:$0xf0]  ;;  %v5798_v52 = vld [vmem:[#allocation3 + $0x38] sm:$0xf0] }
0x131d   : > { %v5797_v20 = vor.u32 %v5871_v28, %v5796_v10  ;;  %v5801_v43 = vor.u32 %v5870_v18, %v5798_v52  ;;  %v5238_v28 = vld [vmem:[%s6636_s25 + $0x40] sm:$0xff] }
0x131f   : > { %5176 = vmatpush.bf16.msra.mxu1 %v5797_v20  ;;  %5205 = vmatpush.bf16.msra.mxu3 %v5801_v43  ;;  %v5088_v43 = vpop.permute.xlu0 %5087 }
0x1323   : > { %5177 = vmatpush.bf16.msra.mxu1 %v5789_v13  ;;  %5206 = vmatpush.bf16.msra.mxu3 %v5793_v44  ;;  %v5240_v13 = vld [vmem:[%s6636_s25 + $0x50] sm:$0xff] }
0x1327   : > { %5178 = vmatpush.bf16.msra.mxu1 %v5781_v24  ;;  %5207 = vmatpush.bf16.msra.mxu3 %v5785_v32  ;;  %v5093_v17 = vpop.permute.xlu0 %5092  ;;  %v5241_v24 = vld [vmem:[%s6636_s25 + $0x58] sm:$0xff] }
0x132b   : > { %5179 = vmatpush.bf16.msra.mxu1 %v5773_v5  ;;  %5208 = vmatpush.bf16.msra.mxu3 %v5777_v6 }
0x132e   : > { %5802 = vmatmul.msk.bf16.vlgmr.msra.gmra.mxu1 %vm384_vm0, %v5860_v42  ;;  %5806 = vmatmul.msk.bf16.vlgmr.msra.gmra.mxu3 %vm384_vm0, %v5860_v42  ;;  %v5243_v42 = vld [vmem:[%s6636_s25 + $0x68] sm:$0xff] }
0x133e   : > { %5803 = vmatmul.msk.bf16.gmra.mxu1 %vm384_vm0, %v5861_v4  ;;  %5807 = vmatmul.msk.bf16.gmra.mxu3 %vm384_vm0, %v5861_v4 }
0x134e   : > { %5804 = vmatmul.msk.bf16.gmra.mxu1 %vm384_vm0, %v5862_v9  ;;  %5808 = vmatmul.msk.bf16.gmra.mxu3 %vm384_vm0, %v5862_v9  ;;  %v5098_v9 = vpop.permute.xlu0 %5097 }
0x135e   : > { %5805 = vmatmul.msk.bf16.gmra.mxu1 %vm384_vm0, %v5863_v47  ;;  %5809 = vmatmul.msk.bf16.gmra.mxu3 %vm384_vm0, %v5863_v47 }
0x13ab   : > { %v5181_v33 = vpop.f32.mrf.mxu1 }
0x13ac   : > { %v5182_v11 = vadd.f32 %v5181_v33, %v5063_v29 }
0x13ae   : > { %v5246_v53 = vadd.f32 %v5230_v46, %v5182_v11 }
0x13b0   : > { %5262 = vst [vmem:[%s9898_s26] sm:$0xff] %v5246_v53  ;;  %v5245_v53 = vld [vmem:[%s6636_s25 + $0x78] sm:$0xff] }
0x13b1   : > { %v5210_v8 = vpop.f32.mrf.mxu3 }
0x13b2   : > { %v5211_v49 = vadd.f32 %v5210_v8, %v5063_v29  ;;  %v5244_v29 = vld [vmem:[%s6636_s25 + $0x70] sm:$0xff] }
0x13b3   : > { %v5183_v34 = vpop.f32.mrf.mxu1 }
0x13b4   : > { %v5247_v39 = vadd.f32 %v5231_v12, %v5211_v49  ;;  %v5184_v38 = vadd.f32 %v5183_v34, %v5068_v35 }
0x13b6   : > { %5263 = vst [vmem:[%s9898_s26 + $0x8] sm:$0xff] %v5247_v39  ;;  %v5248_v37 = vadd.f32 %v5232_v41, %v5184_v38 }
0x13b8   : > { %5264 = vst [vmem:[%s9898_s26 + $0x10] sm:$0xff] %v5248_v37 }
0x13b9   : > { %v5212_v60 = vpop.f32.mrf.mxu3 }
0x13ba   : > { %v5213_v2 = vadd.f32 %v5212_v60, %v5068_v35 }
0x13bb   : > { %v5186_v61 = vpop.f32.mrf.mxu1 }
0x13bc   : > { %v5249_v27 = vadd.f32 %v5233_v45, %v5213_v2  ;;  %v5187_v58 = vadd.f32 %v5186_v61, %v5073_v62 }
0x13be   : > { %5265 = vst [vmem:[%s9898_s26 + $0x18] sm:$0xff] %v5249_v27  ;;  %v5250_v59 = vadd.f32 %v5234_v50, %v5187_v58 }
0x13c0   : > { %5266 = vst [vmem:[%s9898_s26 + $0x20] sm:$0xff] %v5250_v59 }
0x13c1   : > { %v5215_v57 = vpop.f32.mrf.mxu3 }
0x13c2   : > { %v5216_v19 = vadd.f32 %v5215_v57, %v5073_v62 }
0x13c3   : > { %v5188_v30 = vpop.f32.mrf.mxu1 }
0x13c4   : > { %v5251_v51 = vadd.f32 %v5235_v40, %v5216_v19  ;;  %v5189_v36 = vadd.f32 %v5188_v30, %v5078_v15 }
0x13c6   : > { %5267 = vst [vmem:[%s9898_s26 + $0x28] sm:$0xff] %v5251_v51  ;;  %v5252_v23 = vadd.f32 %v5236_v0, %v5189_v36 }
0x13c8   : > { %5268 = vst [vmem:[%s9898_s26 + $0x30] sm:$0xff] %v5252_v23 }
0x13c9   : > { %v5217_v26 = vpop.f32.mrf.mxu3 }
0x13ca   : > { %v5218_v48 = vadd.f32 %v5217_v26, %v5078_v15 }
0x13cb   : > { %v5191_v10 = vpop.f32.mrf.mxu1 }
0x13cc   : > { %v5253_v18 = vadd.f32 %v5237_v1, %v5218_v48  ;;  %v5192_v52 = vadd.f32 %v5191_v10, %v5083_v31 }
0x13ce   : > { %5269 = vst [vmem:[%s9898_s26 + $0x38] sm:$0xff] %v5253_v18  ;;  %v5254_v20 = vadd.f32 %v5238_v28, %v5192_v52 }
0x13d0   : > { %5270 = vst [vmem:[%s9898_s26 + $0x40] sm:$0xff] %v5254_v20 }
0x13d1   : > { %v5220_v7 = vpop.f32.mrf.mxu3 }
0x13d2   : > { %v5221_v54 = vadd.f32 %v5220_v7, %v5083_v31 }
0x13d3   : > { %v5193_v63 = vpop.f32.mrf.mxu1 }
0x13d4   : > { %v5255_v44 = vadd.f32 %v5239_v56, %v5221_v54  ;;  %v5194_v22 = vadd.f32 %v5193_v63, %v5088_v43 }
0x13d6   : > { %5271 = vst [vmem:[%s9898_s26 + $0x48] sm:$0xff] %v5255_v44  ;;  %v5256_v21 = vadd.f32 %v5240_v13, %v5194_v22 }
0x13d8   : > { %5272 = vst [vmem:[%s9898_s26 + $0x50] sm:$0xff] %v5256_v21 }
0x13d9   : > { %v5222_v25 = vpop.f32.mrf.mxu3 }
0x13da   : > { %v5223_v32 = vadd.f32 %v5222_v25, %v5088_v43 }
0x13db   : > { %v5196_v16 = vpop.f32.mrf.mxu1 }
0x13dc   : > { %v5257_v3 = vadd.f32 %v5241_v24, %v5223_v32  ;;  %v5197_v55 = vadd.f32 %v5196_v16, %v5093_v17 }
0x13de   : > { %5273 = vst [vmem:[%s9898_s26 + $0x58] sm:$0xff] %v5257_v3  ;;  %v5258_v5 = vadd.f32 %v5242_v14, %v5197_v55 }
0x13e0   : > { %5274 = vst [vmem:[%s9898_s26 + $0x60] sm:$0xff] %v5258_v5 }
0x13e1   : > { %v5225_v6 = vpop.f32.mrf.mxu3 }
0x13e2   : > { %v5226_v4 = vadd.f32 %v5225_v6, %v5093_v17 }
0x13e3   : > { %v5198_v47 = vpop.f32.mrf.mxu1 }
0x13e4   : > { %v5259_v35 = vadd.f32 %v5243_v42, %v5226_v4  ;;  %v5199_v33 = vadd.f32 %v5198_v47, %v5098_v9 }
0x13e6   : > { %5275 = vst [vmem:[%s9898_s26 + $0x68] sm:$0xff] %v5259_v35  ;;  %v5260_v46 = vadd.f32 %v5244_v29, %v5199_v33 }
0x13e8   : > { %5276 = vst [vmem:[%s9898_s26 + $0x70] sm:$0xff] %v5260_v46 }
0x13e9   : > { %v5227_v11 = vpop.f32.mrf.mxu3 }
0x13ea   : > { %v5228_v62 = vadd.f32 %v5227_v11, %v5098_v9 }
0x13ec   : > { %v5261_v8 = vadd.f32 %v5245_v53, %v5228_v62 }
0x13ee   : > { %5277 = vst [vmem:[%s9898_s26 + $0x78] sm:$0xff] %v5261_v8 }
0x13ef   : > { %6492 = shalt.err (!%p6489_p3)
}
0x13f0   : > { %s6531_s23 = smov 256   ;;  %s6532_s26 = smov 16  }
0x13f1   : > { %5873 = dma.vmem_to_hbm [thread:$0]  (%p6621_p5), %s5292_s16, 2048, %s5294_s17, %s5279_s13, %s6531_s23, %s6531_s23, %s6532_s26  }
0x13f2 PF: > { %p5879_p4 = scmp.ge.s32.totalorder %s6527_s12, 2  ;;  %s5308_s14 = sand.u32 1, %s6515_s30  }
0x13f3   : > { %s5309_s24 = scalar_lea.sflag [#allocation5], %s5308_s14 }
0x13f4   : > { %p5876_p7 = pnand %p5879_p4, %p6625_p6 }
0x13f6   : > { %p5877_p8 = pneg %p5876_p7 }
0x13f8   : > { %6510 = dma.done.wait (%p5877_p8), %s5309_s24, 2048  }
0x13f9   : > { %6512 = vsyncadd (%p5877_p8), %s5309_s24, 4294965248  ;;  %p19_p9 = scmp.ge.s32.totalorder %s6608_s15, 4   ;;  %s10270_s30 = smov %s6519_s10 }
0x13fa   : > { %s10271_s10 = smov %s6523_s11  ;;  %s10272_s11 = smov %s6619_s18 }
0x13fb   : > { %s10273_s12 = smov %s6608_s15  ;;  %21 = sbr.rel (!%p19_p9) target bundleno = 3 (0x3), region = 101 }
0x1400   :  { %5315 = vsyncpa [#allocation5], 1 }
0x1401   :  { %5317 = vsyncpa [#allocation5 + $0x1], 1 }

</bundles_post_ra>
